<compile_context>
chip_gen: v6e
topology: v6e:2x2x1
jax: 0.10.0
libtpu: 0.0.40
codegen_flags: <defaults>
</compile_context>

<pallas_src>
import functools

import jax
import jax.numpy as jnp
from jax import lax
from jax.experimental import pallas as pl
from jax.experimental.pallas import tpu as pltpu


_LANE = 128
_MIB = 1024 * 1024


def _round_up(v, m):
    return ((v + m - 1) // m) * m


def _vmem_capacity_bytes():
    # Trace-time hardware query; conservative (v7x-sized) fallback if the API
    # or a TPU device is unavailable.
    try:
        info = pltpu.get_tpu_info()
        cap = getattr(info, "vmem_capacity_bytes", None)
        if cap:
            return int(cap)
    except Exception:
        pass
    return 64 * _MIB


def _min_grid_steps():
    # v7x has 2 TensorCores sharing the "parallel" grid axis: want >= 2 steps
    # per core so DMA can pipeline with compute.  Single-TC generations
    # (v5e / v6e) just take the largest VMEM-fitting tile (no step minimum).
    try:
        kind = jax.devices()[0].device_kind.lower()
    except Exception:
        kind = ""
    return 4 if "v7" in kind else 1


def _vmem_budgets():
    cap = _vmem_capacity_bytes()
    # Resident-block budget used for tile sizing, and the scoped-VMEM limit
    # handed to Mosaic; both derived from physical capacity so a v7x (64 MiB)
    # does not inherit v5e/v6e (128 MiB) tile sizes.
    block_budget = min(cap // 5, 24 * _MIB)
    vmem_limit = min(cap // 2, 64 * _MIB)
    return block_budget, int(vmem_limit)


def _pick_tile(total, bytes_per_unit, budget_bytes, min_steps, cap=4096):
    # Largest divisor of `total` that (a) keeps the block (8,128)-legal
    # (multiple of 8 or the full extent), (b) fits the VMEM budget and
    # (c) still leaves >= min_steps grid steps; fall back to the largest
    # budget-fitting divisor if (c) is impossible.
    cands = sorted(
        {d for d in range(1, total + 1)
         if total % d == 0 and d <= cap and (d % 8 == 0 or d == total)},
        reverse=True)
    if not cands:
        return total
    fitting = [d for d in cands if d * bytes_per_unit <= budget_bytes]
    if not fitting:
        return cands[-1]
    for d in fitting:
        if total // d >= min_steps:
            return d
    return fitting[0]


# ----------------------------------------------------------------------------
# Glue: bilinear grid_sample (align_corners=True, padding_mode='zeros') that
# gathers directly from the shared feature map with a per-sample batch index
# (no Q*Np-fold replication of x in HBM).
# TODO(synk): the data-dependent bilinear gather has no clean Pallas/TPU
# equivalent, so grid sampling stays in plain JAX; the matmul/attention/
# reduction hot path below is in Pallas.
# ----------------------------------------------------------------------------
def grid_sample_bilinear_indexed(img, grid, bidx, out_dtype=jnp.float32):
    # img: (B, C, H, W); grid: (S, P, 2); bidx: (S,). Returns (S, P, C).
    B, C, H, W = img.shape
    gx = grid[..., 0]
    gy = grid[..., 1]
    ix = (gx + 1.0) * 0.5 * (W - 1)
    iy = (gy + 1.0) * 0.5 * (H - 1)
    x0 = jnp.floor(ix)
    y0 = jnp.floor(iy)
    x1 = x0 + 1.0
    y1 = y0 + 1.0
    wx1 = ix - x0
    wx0 = 1.0 - wx1
    wy1 = iy - y0
    wy0 = 1.0 - wy1

    imgc = jnp.transpose(img, (0, 2, 3, 1))      # (B, H, W, C)
    b = bidx[:, None]                            # (S, 1)

    def tap(yc, xc, w):
        mask = (xc >= 0) & (xc <= W - 1) & (yc >= 0) & (yc <= H - 1)
        xi = jnp.clip(xc, 0, W - 1).astype(jnp.int32)
        yi = jnp.clip(yc, 0, H - 1).astype(jnp.int32)
        vals = imgc[b, yi, xi]                   # (S, P, C) gather
        return vals * (w * mask.astype(img.dtype))[..., None]

    out = (tap(y0, x0, wy0 * wx0) + tap(y0, x1, wy0 * wx1) +
           tap(y1, x0, wy1 * wx0) + tap(y1, x1, wy1 * wx1))
    # Taps accumulate in f32; the HBM intermediate is emitted directly in the
    # requested dtype (bf16 for the Pallas path) -> half the HBM traffic.
    return out.astype(out_dtype)


# ----------------------------------------------------------------------------
# Shared glue: polynomial points -> sampling grid -> sampled patches.
# Reproduces the torch reshape/view chain exactly (raw row-major reshapes).
# ----------------------------------------------------------------------------
def build_sampled_patches(x, polys, *, window_size, n_degree,
                          out_dtype=jnp.float32):
    B, C, H, W = x.shape
    Np = n_degree + 1
    Q = polys.shape[1]
    ws = window_size
    ws2 = ws * ws

    alpha = jnp.linspace(0.0, 1.0, Np)
    alphas = jnp.stack([alpha ** i for i in range(n_degree, -1, -1)], axis=1)
    points = jnp.swapaxes(polys @ alphas.T, -1, -2)   # (B, Q, Np, 2)

    points = 2.0 * points - 1.0
    points = points[:, :, None, :, :]                 # (B, Q, 1, Np, 2)

    lo = (-ws) // 2
    hi = ws // 2
    delta_h = 2.0 * jnp.linspace(lo, hi, ws) / H
    delta_w = 2.0 * jnp.linspace(lo, hi, ws) / W
    mesh_x, mesh_y = jnp.meshgrid(delta_w, delta_h, indexing="xy")
    mesh_x = mesh_x.reshape(-1, 1)
    mesh_y = mesh_y.reshape(-1, 1)

    grid_y = points[..., 0] + mesh_y                  # (B, Q, ws2, Np)
    grid_x = points[..., 1] + mesh_x
    grid = jnp.stack((grid_y, grid_x), axis=-1)       # (B, Q, ws2, Np, 2)
    grid = grid.reshape(B * Q * Np, ws2, 2)           # raw reshape, as in torch

    # batch index per sampled window instead of materializing Q*Np copies of x
    bidx = (jnp.arange(B * Q * Np) // (Q * Np)).astype(jnp.int32)
    sampled = grid_sample_bilinear_indexed(x, grid, bidx, out_dtype=out_dtype)
    return sampled.reshape(B, Q * Np, ws2, C)


# ----------------------------------------------------------------------------
# Pallas kernel 1: blocked multi-head window attention.
# grid = (M // TILE_M,): TILE_M sampled windows per grid step.
#  - fused QKV: one (TILE_M*ws2, C) @ (C, 3C) bf16 MXU matmul, f32 accum
#    (scale pre-folded into Wq / bq on the host)
#  - both attention matmuls use bf16 operands with f32 accumulation
#  - softmax in f32, approx reciprocal on the EUP
#  - per-head direct stores; the softmax-invariant positional bias is omitted
# ----------------------------------------------------------------------------
def _attn_kernel(patch_ref, wqkv_ref, bqkv_ref, out_ref, *,
                 num_heads, head_dim, ws2, tile_m):
    c = num_heads * head_dim
    # (TILE_M, ws2, C) -> (TILE_M*ws2, C): merge of leading dims only, so the
    # reshape is layout-free (ws2 is a multiple of the sublane count).
    p2d = patch_ref[...].reshape(tile_m * ws2, c)
    # Fused QKV on the MXU: bf16 x bf16 -> f32.
    qkv = jnp.dot(p2d, wqkv_ref[...],
                  preferred_element_type=jnp.float32) + bqkv_ref[...]

    # NOTE: at C < 128 every per-head slice is sub-lane-width no matter how
    # the fused output is packed; for C >= 128 configs, pack per-head Q/K/V
    # slabs on 128-lane boundaries instead of slicing at head_dim offsets.
    for h in range(num_heads):                        # static unroll; nh small
        q = qkv[:, h * head_dim:(h + 1) * head_dim]
        k = qkv[:, c + h * head_dim:c + (h + 1) * head_dim]
        v = qkv[:, 2 * c + h * head_dim:2 * c + (h + 1) * head_dim]
        q = q.astype(jnp.bfloat16).reshape(tile_m, ws2, head_dim)
        k = k.astype(jnp.bfloat16).reshape(tile_m, ws2, head_dim)
        v = v.astype(jnp.bfloat16).reshape(tile_m, ws2, head_dim)

        # s[m, i, j] = <q_mi, k_mj> (scale already folded into Wq).
        # positional_bias (ws2, 1) broadcasts along the key axis j and is
        # therefore softmax-invariant -> intentionally omitted (dead work).
        s = lax.dot_general(q, k, (((2,), (2,)), ((0,), (0,))),
                            preferred_element_type=jnp.float32)   # (TM, ws2, ws2)
        s = s - jnp.max(s, axis=-1, keepdims=True)
        p = jnp.exp(s)
        inv_l = pl.reciprocal(jnp.sum(p, axis=-1, keepdims=True), approx=True)
        p = (p * inv_l).astype(jnp.bfloat16)
        o = lax.dot_general(p, v, (((2,), (1,)), ((0,), (0,))),
                            preferred_element_type=jnp.float32)   # (TM, ws2, hd)

        # Per-head direct store: no concat, no nh x f32 head outputs kept live.
        out_ref[:, :, h * head_dim:(h + 1) * head_dim] = o.astype(out_ref.dtype)


def _attn_vmem_bytes_per_window(ws2, c):
    # Conservative per-window VMEM estimate (lane padding to 128 included).
    pc = _round_up(c, _LANE)
    p3c = _round_up(3 * c, _LANE)
    pw = _round_up(ws2, _LANE)
    b = 2 * ws2 * pc * 2      # input block, bf16, double-buffered
    b += 2 * ws2 * pc * 2     # output block, bf16, double-buffered
    b += ws2 * p3c * 4        # fused qkv f32 intermediate
    b += 2 * ws2 * pw * 4     # scores + probs f32 (per-head transient)
    b += 4 * ws2 * pc * 4     # q/k/v/o transients (generous headroom)
    return b


def window_attention(patches, w_qkv, b_qkv, *, num_heads, head_dim):
    # patches: (M, ws2, C) bf16 -> (M, ws2, C) bf16 (heads concat on last dim)
    M, ws2, c = patches.shape
    block_budget, vmem_limit = _vmem_budgets()
    tile_m = _pick_tile(M, _attn_vmem_bytes_per_window(ws2, c), block_budget,
                        _min_grid_steps())

    kernel = functools.partial(_attn_kernel, num_heads=num_heads,
                               head_dim=head_dim, ws2=ws2, tile_m=tile_m)
    return pl.pallas_call(
        kernel,
        out_shape=jax.ShapeDtypeStruct((M, ws2, c), jnp.bfloat16),
        grid=(M // tile_m,),
        in_specs=[
            # Block covers the full (ws2, C) trailing extent, so the HBM read
            # is one contiguous DMA per step.
            pl.BlockSpec((tile_m, ws2, c), lambda m: (m, 0, 0)),
            pl.BlockSpec(w_qkv.shape, lambda m: (0, 0)),
            pl.BlockSpec(b_qkv.shape, lambda m: (0, 0)),
        ],
        # Output block also covers the full (ws2, C) trailing extent -> the
        # HBM writeback is a single contiguous DMA.  A lane-dense
        # (TILE_M, ws2*C) out block was evaluated: at C < 128 it only trades
        # the (unavoidable) head-width masked stores for an extra full-block
        # VMEM relayout before the store, so per-head direct stores are kept.
        # (The lane-dense treatment is applied where it pays off: the
        # conv/proj kernel below consumes 512-lane rows.)
        out_specs=pl.BlockSpec((tile_m, ws2, c), lambda m: (m, 0, 0)),
        compiler_params=pltpu.CompilerParams(
            dimension_semantics=("parallel",),
            vmem_limit_bytes=vmem_limit),
    )(patches, w_qkv, b_qkv)


# ----------------------------------------------------------------------------
# Pallas kernel 2: conv1x1 (over ws2) folded into the projection as a single
# lane-dense (rows, ws2*C) @ (ws2*C, C) MXU matmul, tiled over rows.
# ----------------------------------------------------------------------------
def _conv_proj_kernel(z_ref, w_ref, b_ref, out_ref):
    out_ref[...] = (jnp.dot(z_ref[...], w_ref[...],
                            preferred_element_type=jnp.float32) + b_ref[...])


def conv_proj(z, w_comb, bias_eff):
    # z: (R, ws2*C) bf16 (lane-dense, K = ws2*C); returns (R, C) f32.
    R, K = z.shape
    c = w_comb.shape[1]
    block_budget, vmem_limit = _vmem_budgets()
    w_bytes = _round_up(K, 8) * _round_up(c, _LANE) * 2     # resident weight
    per_row = 2 * K * 2 + 3 * _round_up(c, _LANE) * 4
    budget = max(block_budget - w_bytes, per_row * 8)
    tile_r = _pick_tile(R, per_row, budget, _min_grid_steps(), cap=2048)

    return pl.pallas_call(
        _conv_proj_kernel,
        out_shape=jax.ShapeDtypeStruct((R, c), jnp.float32),
        grid=(R // tile_r,),
        in_specs=[
            pl.BlockSpec((tile_r, K), lambda r: (r, 0)),
            pl.BlockSpec(w_comb.shape, lambda r: (0, 0)),
            pl.BlockSpec(bias_eff.shape, lambda r: (0, 0)),
        ],
        out_specs=pl.BlockSpec((tile_r, c), lambda r: (r, 0)),
        compiler_params=pltpu.CompilerParams(
            dimension_semantics=("parallel",),
            vmem_limit_bytes=vmem_limit),
    )(z, w_comb, bias_eff)


# ----------------------------------------------------------------------------
# Parameters (deterministic, synthetic; the mda submodule is unused in the
# original forward and therefore omitted).
# ----------------------------------------------------------------------------
def make_params(key, feature_dim, window_size):
    c = feature_dim
    ws2 = window_size * window_size
    ks = jax.random.split(key, 7)
    s = 0.1
    return dict(
        qkv_w=jax.random.normal(ks[0], (3 * c, c), jnp.float32) * s,
        qkv_b=jax.random.normal(ks[1], (3 * c,), jnp.float32) * s,
        proj_w=jax.random.normal(ks[2], (c, c), jnp.float32) * s,
        proj_b=jax.random.normal(ks[3], (c,), jnp.float32) * s,
        conv_w=jax.random.normal(ks[4], (ws2,), jnp.float32) * s,
        conv_b=jax.random.normal(ks[5], (1,), jnp.float32) * s,
        pos_bias=jax.random.normal(ks[6], (ws2, 1), jnp.float32),
    )


# ----------------------------------------------------------------------------
# Full forward (Pallas path).
# ----------------------------------------------------------------------------
def poly_attention_forward(x, polys, params, *, num_heads, window_size, n_degree):
    B, C, H, W = x.shape
    Np = n_degree + 1
    Q = polys.shape[1]
    ws2 = window_size * window_size
    head_dim = C // num_heads
    scale = float(head_dim) ** (-0.5)
    qnp = Q * Np
    M = B * qnp

    # bf16 patches straight out of the gather (one half-width HBM pass).
    patches = build_sampled_patches(
        x, polys, window_size=window_size, n_degree=n_degree,
        out_dtype=jnp.bfloat16).reshape(M, ws2, C)

    # Pack fused QKV weights (scale folded into the Q block / bias).
    qkv_w, qkv_b = params["qkv_w"], params["qkv_b"]
    w_packed = jnp.concatenate(
        [qkv_w[0 * C:1 * C] * scale, qkv_w[1 * C:2 * C], qkv_w[2 * C:3 * C]],
        axis=0).T.astype(jnp.bfloat16)                           # (C, 3C)
    b_packed = jnp.concatenate(
        [qkv_b[0 * C:1 * C] * scale, qkv_b[1 * C:2 * C], qkv_b[2 * C:3 * C]]
    ).reshape(1, 3 * C).astype(jnp.float32)                      # (1, 3C)

    # pos_bias is softmax-invariant (see kernel comment) -> not passed in.
    o = window_attention(patches, w_packed, b_packed,
                         num_heads=num_heads, head_dim=head_dim)  # (M, ws2, C) bf16

    # PyTorch raw-reshape chain, reduced to ONE XLA transpose: the permutation
    # cross-mixes the head and window axes, so it cannot be expressed as a
    # block index_map; the follow-up reshape to (B*QNp, ws2*C) is free.
    # TODO(synk): folding this last transpose into a kernel would need an
    # element-level scatter on the store path; left to XLA.
    o = o.reshape(B, qnp, ws2, num_heads, head_dim)
    o = jnp.transpose(o, (0, 3, 2, 1, 4))          # (B, nh, ws2, QNp, hd)
    z = o.reshape(M, ws2 * C)                      # raw row-major reshape (free)

    # Fold conv1x1 into the projection:
    #   W_comb[i*C + c_in, c_out] = conv_w[i] * proj_w[c_out, c_in]
    #   bias_eff = proj_b + conv_b * sum_c proj_w[:, c]
    w_comb = (params["conv_w"][:, None, None] *
              params["proj_w"].T[None, :, :]).reshape(ws2 * C, C).astype(jnp.bfloat16)
    bias_eff = (params["proj_b"] +
                params["conv_b"][0] * jnp.sum(params["proj_w"], axis=1)
                ).reshape(1, C).astype(jnp.float32)

    out = conv_proj(z, w_comb, bias_eff)           # (B*QNp, C) f32
    return out.reshape(B, Q, Np, C)


# ----------------------------------------------------------------------------
# Pure-JAX reference (mirrors the PyTorch forward, f32 HIGHEST, including the
# positional bias and the un-folded conv + proj) for validation.
# ----------------------------------------------------------------------------
def reference_forward(x, polys, params, *, num_heads, window_size, n_degree):
    B, C, H, W = x.shape
    Np = n_degree + 1
    Q = polys.shape[1]
    ws2 = window_size * window_size
    head_dim = C // num_heads
    scale = float(head_dim) ** (-0.5)
    hi = jax.lax.Precision.HIGHEST

    sp = build_sampled_patches(x, polys, window_size=window_size,
                               n_degree=n_degree)            # (B, Q*Np, ws2, C) f32

    qkv = jnp.einsum("bnic,oc->bnio", sp, params["qkv_w"], precision=hi) + params["qkv_b"]
    qkv = qkv.reshape(B, Q * Np, ws2, 3, num_heads, head_dim).transpose(3, 0, 4, 1, 2, 5)
    q, k, v = qkv[0], qkv[1], qkv[2]
    attn = jnp.einsum("bhnid,bhnjd->bhnij", q, k, precision=hi) * scale
    attn = attn + params["pos_bias"].reshape(1, 1, 1, ws2, 1)
    attn = jax.nn.softmax(attn, axis=-1)
    o = jnp.einsum("bhnij,bhnjd->bhnid", attn, v, precision=hi)
    o = o.transpose(0, 1, 3, 2, 4)              # (B, nh, ws2, Q*Np, hd)
    o = o.reshape(B, Q * Np, ws2, C)
    y = o.transpose(0, 2, 1, 3)                 # (B, ws2, Q*Np, C)

    z = jnp.einsum("i,binc->bnc", params["conv_w"], y, precision=hi) + params["conv_b"][0]
    out = jnp.einsum("bnc,oc->bno", z, params["proj_w"], precision=hi) + params["proj_b"]
    return out.reshape(B, Q, Np, C)


if __name__ == "__main__":
    B, C, H, W = 2, 32, 16, 16
    Q = 2
    num_heads = 4
    window_size = 4
    n_degree = 3
    Np = n_degree + 1

    key = jax.random.PRNGKey(0)
    kx, kp, kw = jax.random.split(key, 3)
    x = jax.random.normal(kx, (B, C, H, W), jnp.float32)
    polys = jax.random.uniform(kp, (B, Q, 2, Np), jnp.float32)
    params = make_params(kw, C, window_size)

    fwd = jax.jit(functools.partial(poly_attention_forward, num_heads=num_heads,
                                    window_size=window_size, n_degree=n_degree))
    out = jax.block_until_ready(fwd(x, polys, params))
    assert out.shape == (B, Q, Np, C), out.shape

    ref = jax.block_until_ready(
        reference_forward(x, polys, params, num_heads=num_heads,
                          window_size=window_size, n_degree=n_degree))
    max_err = float(jnp.max(jnp.abs(out - ref)))
    if not bool(jnp.allclose(out, ref, atol=1e-2, rtol=1e-2)):
        raise AssertionError(f"Pallas output mismatch vs reference, max abs err={max_err}")

    print("KERNEL_OK")
</pallas_src>

<mosaic_0001>
module attributes {stable_mosaic.version = 11 : i64} {
  func.func @_attn_kernel(%arg0: i32, %arg1: memref<16x16x32xbf16, #tpu.memory_space<vmem>>, %arg2: memref<32x96xbf16, #tpu.memory_space<vmem>>, %arg3: memref<1x96xf32, #tpu.memory_space<vmem>>, %arg4: memref<16x16x32xbf16, #tpu.memory_space<vmem>>) attributes {dimension_semantics = [#tpu.dimension_semantics<parallel>], iteration_bounds = array<i64: 1>, scalar_prefetch = 0 : i64, scratch_operands = 0 : i64, tpu.core_type = #tpu.core_type<tc>, window_params = [{transform_indices = @transform_0, window_bounds = array<i64: 16, 16, 32>}, {pipeline_mode = #tpu.pipeline_mode<synchronous>, transform_indices = @transform_1, window_bounds = array<i64: 32, 96>}, {pipeline_mode = #tpu.pipeline_mode<synchronous>, transform_indices = @transform_2, window_bounds = array<i64: 1, 96>}, {transform_indices = @transform_3, window_bounds = array<i64: 16, 16, 32>}]} {
    %c0 = arith.constant 0 : index
    %c0_0 = arith.constant 0 : index
    %c0_1 = arith.constant 0 : index
    %0 = vector.load %arg1[%c0, %c0_0, %c0_1] : memref<16x16x32xbf16, #tpu.memory_space<vmem>>, vector<16x16x32xbf16>
    %1 = vector.shape_cast %0 : vector<16x16x32xbf16> to vector<256x32xbf16>
    %c0_2 = arith.constant 0 : index
    %c0_3 = arith.constant 0 : index
    %2 = vector.load %arg2[%c0_2, %c0_3] : memref<32x96xbf16, #tpu.memory_space<vmem>>, vector<32x96xbf16>
    %cst = arith.constant dense<0.000000e+00> : vector<256x96xf32>
    %3 = tpu.matmul %1, %2, %cst {dimension_numbers = #tpu.dot_dimension_numbers<[1], [0], [0], [1], [0, 0, 1, 1], [], []>} : vector<256x32xbf16>, vector<32x96xbf16>, vector<256x96xf32> -> vector<256x96xf32>
    %c0_4 = arith.constant 0 : index
    %c0_5 = arith.constant 0 : index
    %4 = vector.load %arg3[%c0_4, %c0_5] : memref<1x96xf32, #tpu.memory_space<vmem>>, vector<1x96xf32>
    %5 = vector.broadcast %4 : vector<1x96xf32> to vector<256x96xf32>
    %6 = arith.addf %3, %5 : vector<256x96xf32>
    %7 = vector.extract_strided_slice %6 {offsets = [0, 0], sizes = [256, 8], strides = [1, 1]} : vector<256x96xf32> to vector<256x8xf32>
    %8 = vector.extract_strided_slice %6 {offsets = [0, 32], sizes = [256, 8], strides = [1, 1]} : vector<256x96xf32> to vector<256x8xf32>
    %9 = vector.extract_strided_slice %6 {offsets = [0, 64], sizes = [256, 8], strides = [1, 1]} : vector<256x96xf32> to vector<256x8xf32>
    %10 = arith.truncf %7 : vector<256x8xf32> to vector<256x8xbf16>
    %11 = vector.shape_cast %10 : vector<256x8xbf16> to vector<16x16x8xbf16>
    %12 = arith.truncf %8 : vector<256x8xf32> to vector<256x8xbf16>
    %13 = vector.shape_cast %12 : vector<256x8xbf16> to vector<16x16x8xbf16>
    %14 = arith.truncf %9 : vector<256x8xf32> to vector<256x8xbf16>
    %15 = vector.shape_cast %14 : vector<256x8xbf16> to vector<16x16x8xbf16>
    %cst_6 = arith.constant dense<0.000000e+00> : vector<16x16x16xf32>
    %16 = tpu.matmul %11, %13, %cst_6 {dimension_numbers = #tpu.dot_dimension_numbers<[2], [2], [1], [1], [0, 0, 0, 1, 1, 1], [0], [0]>} : vector<16x16x8xbf16>, vector<16x16x8xbf16>, vector<16x16x16xf32> -> vector<16x16x16xf32>
    %cst_7 = arith.constant dense<0xFF800000> : vector<16x16xf32>
    %17 = vector.multi_reduction <maximumf>, %16, %cst_7 [2] : vector<16x16x16xf32> to vector<16x16xf32>
    %18 = vector.shape_cast %17 : vector<16x16xf32> to vector<16x16x1xf32>
    %19 = vector.broadcast %18 : vector<16x16x1xf32> to vector<16x16x16xf32>
    %20 = arith.subf %16, %19 : vector<16x16x16xf32>
    %21 = math.exp %20 : vector<16x16x16xf32>
    %cst_8 = arith.constant dense<0.000000e+00> : vector<16x16xf32>
    %22 = vector.multi_reduction <add>, %21, %cst_8 [2] : vector<16x16x16xf32> to vector<16x16xf32>
    %23 = vector.shape_cast %22 : vector<16x16xf32> to vector<16x16x1xf32>
    %24 = tpu.reciprocal %23 {approx = true} : vector<16x16x1xf32> -> vector<16x16x1xf32>
    %25 = vector.broadcast %24 : vector<16x16x1xf32> to vector<16x16x16xf32>
    %26 = arith.mulf %21, %25 : vector<16x16x16xf32>
    %27 = arith.truncf %26 : vector<16x16x16xf32> to vector<16x16x16xbf16>
    %cst_9 = arith.constant dense<0.000000e+00> : vector<16x16x8xf32>
    %28 = tpu.matmul %27, %15, %cst_9 {dimension_numbers = #tpu.dot_dimension_numbers<[2], [1], [1], [2], [0, 0, 0, 1, 1, 2], [0], [0]>} : vector<16x16x16xbf16>, vector<16x16x8xbf16>, vector<16x16x8xf32> -> vector<16x16x8xf32>
    %29 = arith.truncf %28 : vector<16x16x8xf32> to vector<16x16x8xbf16>
    %c0_10 = arith.constant 0 : index
    %c0_11 = arith.constant 0 : index
    %c0_12 = arith.constant 0 : index
    %30 = vector.load %arg4[%c0_10, %c0_11, %c0_12] : memref<16x16x32xbf16, #tpu.memory_space<vmem>>, vector<16x16x8xbf16>
    tpu.vector_store %arg4[%c0_10, %c0_11, %c0_12], %29 {strides = array<i32>} : memref<16x16x32xbf16, #tpu.memory_space<vmem>>, vector<16x16x8xbf16>,
    %31 = vector.extract_strided_slice %6 {offsets = [0, 8], sizes = [256, 8], strides = [1, 1]} : vector<256x96xf32> to vector<256x8xf32>
    %32 = vector.extract_strided_slice %6 {offsets = [0, 40], sizes = [256, 8], strides = [1, 1]} : vector<256x96xf32> to vector<256x8xf32>
    %33 = vector.extract_strided_slice %6 {offsets = [0, 72], sizes = [256, 8], strides = [1, 1]} : vector<256x96xf32> to vector<256x8xf32>
    %34 = arith.truncf %31 : vector<256x8xf32> to vector<256x8xbf16>
    %35 = vector.shape_cast %34 : vector<256x8xbf16> to vector<16x16x8xbf16>
    %36 = arith.truncf %32 : vector<256x8xf32> to vector<256x8xbf16>
    %37 = vector.shape_cast %36 : vector<256x8xbf16> to vector<16x16x8xbf16>
    %38 = arith.truncf %33 : vector<256x8xf32> to vector<256x8xbf16>
    %39 = vector.shape_cast %38 : vector<256x8xbf16> to vector<16x16x8xbf16>
    %cst_13 = arith.constant dense<0.000000e+00> : vector<16x16x16xf32>
    %40 = tpu.matmul %35, %37, %cst_13 {dimension_numbers = #tpu.dot_dimension_numbers<[2], [2], [1], [1], [0, 0, 0, 1, 1, 1], [0], [0]>} : vector<16x16x8xbf16>, vector<16x16x8xbf16>, vector<16x16x16xf32> -> vector<16x16x16xf32>
    %cst_14 = arith.constant dense<0xFF800000> : vector<16x16xf32>
    %41 = vector.multi_reduction <maximumf>, %40, %cst_14 [2] : vector<16x16x16xf32> to vector<16x16xf32>
    %42 = vector.shape_cast %41 : vector<16x16xf32> to vector<16x16x1xf32>
    %43 = vector.broadcast %42 : vector<16x16x1xf32> to vector<16x16x16xf32>
    %44 = arith.subf %40, %43 : vector<16x16x16xf32>
    %45 = math.exp %44 : vector<16x16x16xf32>
    %cst_15 = arith.constant dense<0.000000e+00> : vector<16x16xf32>
    %46 = vector.multi_reduction <add>, %45, %cst_15 [2] : vector<16x16x16xf32> to vector<16x16xf32>
    %47 = vector.shape_cast %46 : vector<16x16xf32> to vector<16x16x1xf32>
    %48 = tpu.reciprocal %47 {approx = true} : vector<16x16x1xf32> -> vector<16x16x1xf32>
    %49 = vector.broadcast %48 : vector<16x16x1xf32> to vector<16x16x16xf32>
    %50 = arith.mulf %45, %49 : vector<16x16x16xf32>
    %51 = arith.truncf %50 : vector<16x16x16xf32> to vector<16x16x16xbf16>
    %cst_16 = arith.constant dense<0.000000e+00> : vector<16x16x8xf32>
    %52 = tpu.matmul %51, %39, %cst_16 {dimension_numbers = #tpu.dot_dimension_numbers<[2], [1], [1], [2], [0, 0, 0, 1, 1, 2], [0], [0]>} : vector<16x16x16xbf16>, vector<16x16x8xbf16>, vector<16x16x8xf32> -> vector<16x16x8xf32>
    %53 = arith.truncf %52 : vector<16x16x8xf32> to vector<16x16x8xbf16>
    %c0_17 = arith.constant 0 : index
    %c0_18 = arith.constant 0 : index
    %c8 = arith.constant 8 : index
    %54 = vector.load %arg4[%c0_17, %c0_18, %c8] : memref<16x16x32xbf16, #tpu.memory_space<vmem>>, vector<16x16x8xbf16>
    tpu.vector_store %arg4[%c0_17, %c0_18, %c8], %53 {strides = array<i32>} : memref<16x16x32xbf16, #tpu.memory_space<vmem>>, vector<16x16x8xbf16>,
    %55 = vector.extract_strided_slice %6 {offsets = [0, 16], sizes = [256, 8], strides = [1, 1]} : vector<256x96xf32> to vector<256x8xf32>
    %56 = vector.extract_strided_slice %6 {offsets = [0, 48], sizes = [256, 8], strides = [1, 1]} : vector<256x96xf32> to vector<256x8xf32>
    %57 = vector.extract_strided_slice %6 {offsets = [0, 80], sizes = [256, 8], strides = [1, 1]} : vector<256x96xf32> to vector<256x8xf32>
    %58 = arith.truncf %55 : vector<256x8xf32> to vector<256x8xbf16>
    %59 = vector.shape_cast %58 : vector<256x8xbf16> to vector<16x16x8xbf16>
    %60 = arith.truncf %56 : vector<256x8xf32> to vector<256x8xbf16>
    %61 = vector.shape_cast %60 : vector<256x8xbf16> to vector<16x16x8xbf16>
    %62 = arith.truncf %57 : vector<256x8xf32> to vector<256x8xbf16>
    %63 = vector.shape_cast %62 : vector<256x8xbf16> to vector<16x16x8xbf16>
    %cst_19 = arith.constant dense<0.000000e+00> : vector<16x16x16xf32>
    %64 = tpu.matmul %59, %61, %cst_19 {dimension_numbers = #tpu.dot_dimension_numbers<[2], [2], [1], [1], [0, 0, 0, 1, 1, 1], [0], [0]>} : vector<16x16x8xbf16>, vector<16x16x8xbf16>, vector<16x16x16xf32> -> vector<16x16x16xf32>
    %cst_20 = arith.constant dense<0xFF800000> : vector<16x16xf32>
    %65 = vector.multi_reduction <maximumf>, %64, %cst_20 [2] : vector<16x16x16xf32> to vector<16x16xf32>
    %66 = vector.shape_cast %65 : vector<16x16xf32> to vector<16x16x1xf32>
    %67 = vector.broadcast %66 : vector<16x16x1xf32> to vector<16x16x16xf32>
    %68 = arith.subf %64, %67 : vector<16x16x16xf32>
    %69 = math.exp %68 : vector<16x16x16xf32>
    %cst_21 = arith.constant dense<0.000000e+00> : vector<16x16xf32>
    %70 = vector.multi_reduction <add>, %69, %cst_21 [2] : vector<16x16x16xf32> to vector<16x16xf32>
    %71 = vector.shape_cast %70 : vector<16x16xf32> to vector<16x16x1xf32>
    %72 = tpu.reciprocal %71 {approx = true} : vector<16x16x1xf32> -> vector<16x16x1xf32>
    %73 = vector.broadcast %72 : vector<16x16x1xf32> to vector<16x16x16xf32>
    %74 = arith.mulf %69, %73 : vector<16x16x16xf32>
    %75 = arith.truncf %74 : vector<16x16x16xf32> to vector<16x16x16xbf16>
    %cst_22 = arith.constant dense<0.000000e+00> : vector<16x16x8xf32>
    %76 = tpu.matmul %75, %63, %cst_22 {dimension_numbers = #tpu.dot_dimension_numbers<[2], [1], [1], [2], [0, 0, 0, 1, 1, 2], [0], [0]>} : vector<16x16x16xbf16>, vector<16x16x8xbf16>, vector<16x16x8xf32> -> vector<16x16x8xf32>
    %77 = arith.truncf %76 : vector<16x16x8xf32> to vector<16x16x8xbf16>
    %c0_23 = arith.constant 0 : index
    %c0_24 = arith.constant 0 : index
    %c16 = arith.constant 16 : index
    %78 = vector.load %arg4[%c0_23, %c0_24, %c16] : memref<16x16x32xbf16, #tpu.memory_space<vmem>>, vector<16x16x8xbf16>
    tpu.vector_store %arg4[%c0_23, %c0_24, %c16], %77 {strides = array<i32>} : memref<16x16x32xbf16, #tpu.memory_space<vmem>>, vector<16x16x8xbf16>,
    %79 = vector.extract_strided_slice %6 {offsets = [0, 24], sizes = [256, 8], strides = [1, 1]} : vector<256x96xf32> to vector<256x8xf32>
    %80 = vector.extract_strided_slice %6 {offsets = [0, 56], sizes = [256, 8], strides = [1, 1]} : vector<256x96xf32> to vector<256x8xf32>
    %81 = vector.extract_strided_slice %6 {offsets = [0, 88], sizes = [256, 8], strides = [1, 1]} : vector<256x96xf32> to vector<256x8xf32>
    %82 = arith.truncf %79 : vector<256x8xf32> to vector<256x8xbf16>
    %83 = vector.shape_cast %82 : vector<256x8xbf16> to vector<16x16x8xbf16>
    %84 = arith.truncf %80 : vector<256x8xf32> to vector<256x8xbf16>
    %85 = vector.shape_cast %84 : vector<256x8xbf16> to vector<16x16x8xbf16>
    %86 = arith.truncf %81 : vector<256x8xf32> to vector<256x8xbf16>
    %87 = vector.shape_cast %86 : vector<256x8xbf16> to vector<16x16x8xbf16>
    %cst_25 = arith.constant dense<0.000000e+00> : vector<16x16x16xf32>
    %88 = tpu.matmul %83, %85, %cst_25 {dimension_numbers = #tpu.dot_dimension_numbers<[2], [2], [1], [1], [0, 0, 0, 1, 1, 1], [0], [0]>} : vector<16x16x8xbf16>, vector<16x16x8xbf16>, vector<16x16x16xf32> -> vector<16x16x16xf32>
    %cst_26 = arith.constant dense<0xFF800000> : vector<16x16xf32>
    %89 = vector.multi_reduction <maximumf>, %88, %cst_26 [2] : vector<16x16x16xf32> to vector<16x16xf32>
    %90 = vector.shape_cast %89 : vector<16x16xf32> to vector<16x16x1xf32>
    %91 = vector.broadcast %90 : vector<16x16x1xf32> to vector<16x16x16xf32>
    %92 = arith.subf %88, %91 : vector<16x16x16xf32>
    %93 = math.exp %92 : vector<16x16x16xf32>
    %cst_27 = arith.constant dense<0.000000e+00> : vector<16x16xf32>
    %94 = vector.multi_reduction <add>, %93, %cst_27 [2] : vector<16x16x16xf32> to vector<16x16xf32>
    %95 = vector.shape_cast %94 : vector<16x16xf32> to vector<16x16x1xf32>
    %96 = tpu.reciprocal %95 {approx = true} : vector<16x16x1xf32> -> vector<16x16x1xf32>
    %97 = vector.broadcast %96 : vector<16x16x1xf32> to vector<16x16x16xf32>
    %98 = arith.mulf %93, %97 : vector<16x16x16xf32>
    %99 = arith.truncf %98 : vector<16x16x16xf32> to vector<16x16x16xbf16>
    %cst_28 = arith.constant dense<0.000000e+00> : vector<16x16x8xf32>
    %100 = tpu.matmul %99, %87, %cst_28 {dimension_numbers = #tpu.dot_dimension_numbers<[2], [1], [1], [2], [0, 0, 0, 1, 1, 2], [0], [0]>} : vector<16x16x16xbf16>, vector<16x16x8xbf16>, vector<16x16x8xf32> -> vector<16x16x8xf32>
    %101 = arith.truncf %100 : vector<16x16x8xf32> to vector<16x16x8xbf16>
    %c0_29 = arith.constant 0 : index
    %c0_30 = arith.constant 0 : index
    %c24 = arith.constant 24 : index
    %102 = vector.load %arg4[%c0_29, %c0_30, %c24] : memref<16x16x32xbf16, #tpu.memory_space<vmem>>, vector<16x16x8xbf16>
    tpu.vector_store %arg4[%c0_29, %c0_30, %c24], %101 {strides = array<i32>} : memref<16x16x32xbf16, #tpu.memory_space<vmem>>, vector<16x16x8xbf16>,
    return
  }
  func.func @transform_0(%arg0: i32) -> (i32, i32, i32) {
    %c0_i32 = arith.constant 0 : i32
    %c0_i32_0 = arith.constant 0 : i32
    %c0_i32_1 = arith.constant 0 : i32
    return %arg0, %c0_i32, %c0_i32_0 : i32, i32, i32
  }
  func.func @transform_1(%arg0: i32) -> (i32, i32) {
    %c0_i32 = arith.constant 0 : i32
    %c0_i32_0 = arith.constant 0 : i32
    %c0_i32_1 = arith.constant 0 : i32
    return %c0_i32, %c0_i32_0 : i32, i32
  }
  func.func @transform_2(%arg0: i32) -> (i32, i32) {
    %c0_i32 = arith.constant 0 : i32
    %c0_i32_0 = arith.constant 0 : i32
    %c0_i32_1 = arith.constant 0 : i32
    return %c0_i32, %c0_i32_0 : i32, i32
  }
  func.func @transform_3(%arg0: i32) -> (i32, i32, i32) {
    %c0_i32 = arith.constant 0 : i32
    %c0_i32_0 = arith.constant 0 : i32
    %c0_i32_1 = arith.constant 0 : i32
    return %arg0, %c0_i32, %c0_i32_0 : i32, i32, i32
  }
}

module attributes {stable_mosaic.version = 11 : i64} {
  func.func @_conv_proj_kernel(%arg0: i32, %arg1: memref<16x512xbf16, #tpu.memory_space<vmem>>, %arg2: memref<512x32xbf16, #tpu.memory_space<vmem>>, %arg3: memref<1x32xf32, #tpu.memory_space<vmem>>, %arg4: memref<16x32xf32, #tpu.memory_space<vmem>>) attributes {dimension_semantics = [#tpu.dimension_semantics<parallel>], iteration_bounds = array<i64: 1>, scalar_prefetch = 0 : i64, scratch_operands = 0 : i64, tpu.core_type = #tpu.core_type<tc>, window_params = [{transform_indices = @transform_0, window_bounds = array<i64: 16, 512>}, {pipeline_mode = #tpu.pipeline_mode<synchronous>, transform_indices = @transform_1, window_bounds = array<i64: 512, 32>}, {pipeline_mode = #tpu.pipeline_mode<synchronous>, transform_indices = @transform_2, window_bounds = array<i64: 1, 32>}, {transform_indices = @transform_3, window_bounds = array<i64: 16, 32>}]} {
    %c0 = arith.constant 0 : index
    %c0_0 = arith.constant 0 : index
    %0 = vector.load %arg1[%c0, %c0_0] : memref<16x512xbf16, #tpu.memory_space<vmem>>, vector<16x512xbf16>
    %c0_1 = arith.constant 0 : index
    %c0_2 = arith.constant 0 : index
    %1 = vector.load %arg2[%c0_1, %c0_2] : memref<512x32xbf16, #tpu.memory_space<vmem>>, vector<512x32xbf16>
    %cst = arith.constant dense<0.000000e+00> : vector<16x32xf32>
    %2 = tpu.matmul %0, %1, %cst {dimension_numbers = #tpu.dot_dimension_numbers<[1], [0], [0], [1], [0, 0, 1, 1], [], []>} : vector<16x512xbf16>, vector<512x32xbf16>, vector<16x32xf32> -> vector<16x32xf32>
    %c0_3 = arith.constant 0 : index
    %c0_4 = arith.constant 0 : index
    %3 = vector.load %arg3[%c0_3, %c0_4] : memref<1x32xf32, #tpu.memory_space<vmem>>, vector<1x32xf32>
    %4 = vector.broadcast %3 : vector<1x32xf32> to vector<16x32xf32>
    %5 = arith.addf %2, %4 : vector<16x32xf32>
    %c0_5 = arith.constant 0 : index
    %c0_6 = arith.constant 0 : index
    %6 = vector.load %arg4[%c0_5, %c0_6] : memref<16x32xf32, #tpu.memory_space<vmem>>, vector<16x32xf32>
    tpu.vector_store %arg4[%c0_5, %c0_6], %5 {strides = array<i32>} : memref<16x32xf32, #tpu.memory_space<vmem>>, vector<16x32xf32>,
    return
  }
  func.func @transform_0(%arg0: i32) -> (i32, i32) {
    %c0_i32 = arith.constant 0 : i32
    %c0_i32_0 = arith.constant 0 : i32
    return %arg0, %c0_i32 : i32, i32
  }
  func.func @transform_1(%arg0: i32) -> (i32, i32) {
    %c0_i32 = arith.constant 0 : i32
    %c0_i32_0 = arith.constant 0 : i32
    %c0_i32_1 = arith.constant 0 : i32
    return %c0_i32, %c0_i32_0 : i32, i32
  }
  func.func @transform_2(%arg0: i32) -> (i32, i32) {
    %c0_i32 = arith.constant 0 : i32
    %c0_i32_0 = arith.constant 0 : i32
    %c0_i32_1 = arith.constant 0 : i32
    return %c0_i32, %c0_i32_0 : i32, i32
  }
  func.func @transform_3(%arg0: i32) -> (i32, i32) {
    %c0_i32 = arith.constant 0 : i32
    %c0_i32_0 = arith.constant 0 : i32
    return %arg0, %c0_i32 : i32, i32
  }
}

</mosaic_0001>

<bundles_post_ra>
// kernel: poly_attention_forward.3
= control target key start
LH: loop header
LB: loop body
LE: loop exit
PB: predicated region body
PF: predicated region fallthrough
CT: control target
= control target key end

     0   :  { %s685_s0 = inlined_call_operand.vmem [shape: bf16[16,512], index: 0, kind: input, shape index: {}]   ;;  %s686_s1 = inlined_call_operand.vmem [shape: bf16[512,32], index: 1, kind: input, shape index: {}]   ;;  %s687_s2 = inlined_call_operand.vmem [shape: f32[1,32], index: 2, kind: input, shape index: {}]   ;;  %s688_s3 = inlined_call_operand.hbm [shape: f32[16,32], index: 3, kind: output, shape index: {}]  }
   0x1   :  { %v488_v0 = vld [vmem:[%s686_s1 + $0x78] sm:$0xff]   ;;  %v492_v4 = vld [vmem:[%s686_s1 + $0x70] sm:$0xff]   ;;  %v496_v8 = vld [vmem:[%s686_s1 + $0x68] sm:$0xff]  }
   0x2   :  { %v489_v1 = vld [vmem:[%s686_s1 + $0xf8] sm:$0xff]   ;;  %441 = vmatprep.subr.bf16.mxu0 %v488_v0  ;;  %v493_v5 = vld [vmem:[%s686_s1 + $0xf0] sm:$0xff]   ;;  %v497_v9 = vld [vmem:[%s686_s1 + $0xe8] sm:$0xff]  }
   0x3   :  { %v490_v2 = vld [vmem:[%s686_s1 + $0x38] sm:$0xff]   ;;  %463 = vmatprep.subr.bf16.mxu1 %v489_v1  ;;  %v494_v6 = vld [vmem:[%s686_s1 + $0x30] sm:$0xff]   ;;  %v498_v10 = vld [vmem:[%s686_s1 + $0x28] sm:$0xff]  }
   0x4   :  { %v491_v3 = vld [vmem:[%s686_s1 + $0xb8] sm:$0xff]   ;;  %442 = vmatpush3.bf16.msra.mxu0 %v490_v2  ;;  %v495_v7 = vld [vmem:[%s686_s1 + $0xb0] sm:$0xff]   ;;  %v499_v11 = vld [vmem:[%s686_s1 + $0xa8] sm:$0xff]  }
   0x5   :  { %464 = vmatpush3.bf16.msra.mxu1 %v491_v3  ;;  %443 = vmatprep.subr.bf16.mxu0 %v492_v4  ;;  %v500_v12 = vld [vmem:[%s686_s1 + $0x60] sm:$0xff]   ;;  %v504_v16 = vld [vmem:[%s686_s1 + $0x58] sm:$0xff]   ;;  %v508_v20 = vld [vmem:[%s686_s1 + $0x50] sm:$0xff]  }
   0x6   :  { %465 = vmatprep.subr.bf16.mxu1 %v493_v5  ;;  %v501_v13 = vld [vmem:[%s686_s1 + $0xe0] sm:$0xff]   ;;  %v505_v17 = vld [vmem:[%s686_s1 + $0xd8] sm:$0xff]   ;;  %v509_v21 = vld [vmem:[%s686_s1 + $0xd0] sm:$0xff]  }
   0x7   :  { %v502_v14 = vld [vmem:[%s686_s1 + $0x20] sm:$0xff]   ;;  %v506_v18 = vld [vmem:[%s686_s1 + $0x18] sm:$0xff]   ;;  %v510_v22 = vld [vmem:[%s686_s1 + $0x10] sm:$0xff]  }
   0x8   :  { %444 = vmatpush3.bf16.msra.mxu0 %v494_v6  ;;  %v503_v15 = vld [vmem:[%s686_s1 + $0xa0] sm:$0xff]   ;;  %v507_v19 = vld [vmem:[%s686_s1 + $0x98] sm:$0xff]   ;;  %v511_v23 = vld [vmem:[%s686_s1 + $0x90] sm:$0xff]  }
   0x9   :  { %466 = vmatpush3.bf16.msra.mxu1 %v495_v7  ;;  %445 = vmatprep.subr.bf16.mxu0 %v496_v8  ;;  %v512_v24 = vld [vmem:[%s686_s1 + $0x48] sm:$0xff]   ;;  %v516_v28 = vld [vmem:[%s686_s1 + $0x40] sm:$0xff]  }
   0xa   :  { %467 = vmatprep.subr.bf16.mxu1 %v497_v9  ;;  %v513_v25 = vld [vmem:[%s686_s1 + $0xc8] sm:$0xff]   ;;  %v517_v29 = vld [vmem:[%s686_s1 + $0xc0] sm:$0xff]  }
   0xb   :  { %v514_v26 = vld [vmem:[%s686_s1 + $0x8] sm:$0xff]   ;;  %v518_v30 = vld [vmem:[%s686_s1] sm:$0xff]  }
   0xc   :  { %446 = vmatpush3.bf16.msra.mxu0 %v498_v10  ;;  %v515_v27 = vld [vmem:[%s686_s1 + $0x88] sm:$0xff]   ;;  %v519_v31 = vld [vmem:[%s686_s1 + $0x80] sm:$0xff]  }
   0xd   :  { %468 = vmatpush3.bf16.msra.mxu1 %v499_v11  ;;  %447 = vmatprep.subr.bf16.mxu0 %v500_v12  ;;  %v520_v32 = vld [vmem:[%s685_s0] ss:$16 sps:$4 sm:$0xff]   ;;  %v522_v33 = vld [vmem:[%s685_s0 + $0x4] ss:$16 sps:$4 sm:$0xff]   ;;  %v523_v34 = vld [vmem:[%s685_s0 + $0x8] ss:$16 sps:$4 sm:$0xff]  }
   0xe   :  { %469 = vmatprep.subr.bf16.mxu1 %v501_v13  ;;  %v525_v35 = vld [vmem:[%s685_s0 + $0xc] ss:$16 sps:$4 sm:$0xff]  }
  0x10   :  { %448 = vmatpush3.bf16.msra.mxu0 %v502_v14 }
  0x11   :  { %470 = vmatpush3.bf16.msra.mxu1 %v503_v15  ;;  %449 = vmatprep.subr.bf16.mxu0 %v504_v16 }
  0x12   :  { %471 = vmatprep.subr.bf16.mxu1 %v505_v17 }
  0x14   :  { %450 = vmatpush3.bf16.msra.mxu0 %v506_v18 }
  0x15   :  { %472 = vmatpush3.bf16.msra.mxu1 %v507_v19  ;;  %451 = vmatprep.subr.bf16.mxu0 %v508_v20 }
  0x16   :  { %473 = vmatprep.subr.bf16.mxu1 %v509_v21 }
  0x18   :  { %452 = vmatpush3.bf16.msra.mxu0 %v510_v22 }
  0x19   :  { %474 = vmatpush3.bf16.msra.mxu1 %v511_v23  ;;  %453 = vmatprep.subr.bf16.mxu0 %v512_v24 }
  0x1a   :  { %475 = vmatprep.subr.bf16.mxu1 %v513_v25 }
  0x1c   :  { %454 = vmatpush3.bf16.msra.mxu0 %v514_v26 }
  0x1d   :  { %476 = vmatpush3.bf16.msra.mxu1 %v515_v27  ;;  %455 = vmatprep.subr.bf16.mxu0 %v516_v28 }
  0x1e   :  { %477 = vmatprep.subr.bf16.mxu1 %v517_v29 }
  0x20   :  { %456 = vmatpush3.bf16.msra.mxu0 %v518_v30 }
  0x21   :  { %478 = vmatpush3.bf16.msra.mxu1 %v519_v31 }
  0x22   :  { %8 = vsyncpa [#allocation3], 0  ;;  %335 = vmatprep.mubr.bf16.mxu0 %v522_v33  ;;  %376 = vmatprep.mubr.bf16.mxu1 %v525_v35  ;;  %v404_v38 = vld [vmem:[%s687_s2] ss:$0 sm:$0xff]  ;;  %vm385_vm0 = vcmask 261120   ;;  %s548_s0 = smov [#allocation2]  }
  0x23   :  { %336 = vmatmul.mubr.bf16.vlgmr.msra.gmra.mxu0 %v520_v32  ;;  %s393_s4 = sshll.u32 %s548_s0, 4  ;;  %s394_s4 = int_to_ptr.vmem [resolvable:$true] %s393_s4 }
  0x24   :  { %377 = vmatmul.mubr.bf16.vlgmr.msra.gmra.mxu1 %v523_v34  ;;  %s526_s2 = scalar_lea.vmem %s394_s4, 256  ;;  %p531_p1 = scmp.lt.s32.totalorder %s394_s4, %s394_s4 }
  0x25   :  { %p527_p0 = scmp.ne.s32.totalorder %s394_s4, %s526_s2  ;;  %p532_p2 = scmp.lt.s32.totalorder %s526_s2, %s526_s2 }
  0x27   :  { %p533_p3 = por %p532_p2, %p531_p1 }
  0x29   :  { %p534_p4 = pnand %p533_p3, %p527_p0 }
  0xe3   :  { %v457_v36 = vpop.f32.mrf.mxu0 }
  0xe4   :  { %v479_v37 = vpop.f32.mrf.mxu1 }
  0xe5   :  { %v458_v39 = vpop.f32.mrf.mxu0 }
  0xe6   :  { %v459_v40 = vadd.f32 %v458_v39, %v457_v36  ;;  %v480_v41 = vpop.f32.mrf.mxu1 }
  0xe7   :  { %v460_v42 = vpop.f32.mrf.mxu0  ;;  %v481_v44 = vadd.f32 %v480_v41, %v479_v37 }
  0xe8   :  { %v338_v43 = vadd.f32 %v459_v40, %v404_v38  ;;  %v482_v45 = vpop.f32.mrf.mxu1 }
  0xe9   :  { %v461_v46 = vpop.f32.mrf.mxu0 }
  0xea   :  { %v379_v47 = vadd.f32 %v481_v44, %v338_v43  ;;  %v462_v48 = vadd.f32 %v461_v46, %v460_v42  ;;  %v483_v49 = vpop.f32.mrf.mxu1 }
  0xeb   :  { %v484_v51 = vadd.f32 %v483_v49, %v482_v45 }
  0xec   :  { %386 = vst.msk [vmem:[#allocation2] sm:$0xff] %vm385_vm0, %v379_v47  ;;  %v341_v50 = vadd.f32 %v462_v48, %v404_v38 }
  0xee   :  { %v382_v52 = vadd.f32 %v484_v51, %v341_v50 }
  0xf0   :  { %387 = vst.msk [vmem:[#allocation2 + $0x8] sm:$0xff] %vm385_vm0, %v382_v52 }
  0xf1   :  { %537 = shalt.err (!%p534_p4)
}
  0xf2   :  { %s549_s5 = smov 128   ;;  %s550_s6 = smov 8  }
  0xf3   :  { %399 = dma.vmem_to_hbm [thread:$0]  %s394_s4, 256, %s688_s3, [#allocation3], %s549_s5, %s549_s5, %s550_s6  }
  0xf4   :  { %546 = dma.done.wait [#allocation3], 256  }
  0xf5   :  { %547 = vsyncadd [#allocation3], 4294967040 }
  0xf6   :  { %403 = vsyncpa [#allocation3], 1 }

// kernel: poly_attention_forward.2
= control target key start
LH: loop header
LB: loop body
LE: loop exit
PB: predicated region body
PF: predicated region fallthrough
CT: control target
= control target key end

     0   :  { %vm150_vm0 = vcmask 261120   ;;  %v14415_v18 = vmov 0.0   ;;  %vm10990_vm1 = vmmov 0   ;;  %vm379_vm2 = vcmask 64512   ;;  %s10994_s22 = smov 120   ;;  %s10995_s23 = smov 56   ;;  %s14411_s1 = inlined_call_operand.vmem [shape: bf16[32,96], index: 1, kind: input, shape index: {}]   ;;  %s14412_s0 = inlined_call_operand.vmem [shape: bf16[16,16,32], index: 0, kind: input, shape index: {}]   ;;  %s14413_s2 = inlined_call_operand.vmem [shape: f32[1,96], index: 2, kind: input, shape index: {}]   ;;  %s14414_s3 = inlined_call_operand.vmem [shape: bf16[16,16,32], index: 3, kind: output, shape index: {}]  }
   0x1   :  { %v10459_v0 = vld [vmem:[%s14411_s1 + $0x8] sm:$0xff]   ;;  %v10460_v1 = vld [vmem:[%s14411_s1] sm:$0xff]   ;;  %v10463_v4 = vld [vmem:[%s14412_s0 + $0x10] sm:$0xff]   ;;  %9675 = vmatprep.subr.bf16.mxu1 %v14415_v18  ;;  %9677 = vmatprep.mubr.msk.bf16.mxu1 %vm10990_vm1, %v14415_v18  ;;  %vm1177_vm3 = vcmask 130048   ;;  %s10993_s1 = smov 88   ;;  %vm2426_vm4 = vcmask 60416  }
   0x2   :  { %9639 = vmatprep.subr.bf16.mxu0 %v10459_v0  ;;  %v10461_v2 = vld [vmem:[%s14412_s0] sm:$0xff]   ;;  %v10462_v3 = vld [vmem:[%s14412_s0 + $0x8] sm:$0xff]   ;;  %v10464_v5 = vld [vmem:[%s14412_s0 + $0x18] sm:$0xff]   ;;  %s10997_s30 = smov 112   ;;  %s10998_s4 = smov 48   ;;  %vm4587_vm5 = vcmask 126016  }
   0x3   :  { %9640 = vmatpush3.bf16.msra.mxu0 %v10459_v0  ;;  %9643 = vmatprep.mubr.msk.bf16.mxu0 %vm150_vm0, %v10461_v2  ;;  %v10465_v6 = vld [vmem:[%s14412_s0 + $0x20] sm:$0xff]   ;;  %v10466_v7 = vld [vmem:[%s14412_s0 + $0x28] sm:$0xff]   ;;  %v10467_v8 = vld [vmem:[%s14412_s0 + $0x30] sm:$0xff]   ;;  %s10999_s5 = smov 72   ;;  %s11000_s6 = smov 104   ;;  %vm6748_vm6 = vcmask 191616  }
   0x4   :  { %9641 = vmatprep.subr.bf16.mxu0 %v10460_v1  ;;  %v10468_v9 = vld [vmem:[%s14412_s0 + $0x38] sm:$0xff]   ;;  %v10469_v10 = vld [vmem:[%s14412_s0 + $0x40] sm:$0xff]   ;;  %v10470_v11 = vld [vmem:[%s14412_s0 + $0x48] sm:$0xff]   ;;  %s11001_s7 = smov 40   ;;  %s11002_s8 = smov 8   ;;  %vm8909_vm7 = vcmask 257216  }
   0x5   :  { %v10471_v12 = vld [vmem:[%s14412_s0 + $0x50] sm:$0xff]   ;;  %v10472_v13 = vld [vmem:[%s14412_s0 + $0x58] sm:$0xff]   ;;  %v10473_v14 = vld [vmem:[%s14412_s0 + $0x60] sm:$0xff]   ;;  %s11003_s9 = smov 16   ;;  %s11004_s18 = smov 24  }
   0x6   :  { %v10474_v15 = vld [vmem:[%s14412_s0 + $0x68] sm:$0xff]   ;;  %v10475_v16 = vld [vmem:[%s14412_s0 + $0x70] sm:$0xff]   ;;  %v10476_v17 = vld [vmem:[%s14412_s0 + $0x78] sm:$0xff]   ;;  %s10991_s0 = smov 96  }
   0x7   :  { %9642 = vmatpush3.bf16.msra.mxu0 %v10460_v1  ;;  %v11104_v22 = vld [vmem:[%s14413_s2] ss:$0 sm:$0xff]  ;;  %s10992_s2 = smov 64  }
   0x8   :  { %9723 = vmatprep.subr.bf16.mxu0 %v14415_v18 }
   0xa   :  { %9644 = vmatmul.mubr.msk.bf16.vlgmr.msra.gmra.mxu0 %vm150_vm0, %v10462_v3 }
   0xb   :  { %9647 = vmatprep.mubr.msk.bf16.mxu0 %vm150_vm0, %v10463_v4 }
  0x12   :  { %9648 = vmatmul.mubr.msk.bf16.gmra.mxu0 %vm150_vm0, %v10464_v5 }
  0x13   :  { %9651 = vmatprep.mubr.msk.bf16.mxu0 %vm150_vm0, %v10465_v6 }
  0x1a   :  { %9652 = vmatmul.mubr.msk.bf16.gmra.mxu0 %vm150_vm0, %v10466_v7 }
  0x1b   :  { %9655 = vmatprep.mubr.msk.bf16.mxu0 %vm150_vm0, %v10467_v8 }
  0x22   :  { %9656 = vmatmul.mubr.msk.bf16.gmra.mxu0 %vm150_vm0, %v10468_v9 }
  0x23   :  { %9659 = vmatprep.mubr.msk.bf16.mxu0 %vm150_vm0, %v10469_v10 }
  0x2a   :  { %9660 = vmatmul.mubr.msk.bf16.gmra.mxu0 %vm150_vm0, %v10470_v11 }
  0x2b   :  { %9663 = vmatprep.mubr.msk.bf16.mxu0 %vm150_vm0, %v10471_v12 }
  0x32   :  { %9664 = vmatmul.mubr.msk.bf16.gmra.mxu0 %vm150_vm0, %v10472_v13 }
  0x33   :  { %9667 = vmatprep.mubr.msk.bf16.mxu0 %vm150_vm0, %v10473_v14 }
  0x3a   :  { %9668 = vmatmul.mubr.msk.bf16.gmra.mxu0 %vm150_vm0, %v10474_v15 }
  0x3b   :  { %9671 = vmatprep.mubr.msk.bf16.mxu0 %vm150_vm0, %v10475_v16 }
  0x42   :  { %9672 = vmatmul.mubr.msk.bf16.gmra.mxu0 %vm150_vm0, %v10476_v17 }
  0x43   :  { %9725 = vmatprep.mubr.msk.bf16.mxu0 %vm10990_vm1, %v14415_v18 }
  0xca   :  { %v9645_v19 = vpop.f32.mrf.mxu0 }
  0xcb   :  { %v242_v30 = vadd.f32 %v9645_v19, %v11104_v22 }
  0xcc   :  { %v233_v20 = vpop.f32.mrf.mxu0 }
  0xcd   :  { %v234_v24 = vadd.f32 %v11104_v22, %v233_v20 }
  0xce   :  { %v9646_v21 = vpop.f32.mrf.mxu0 }
  0xcf   :  { %v245_v27 = vadd.f32 %v9646_v21, %v11104_v22 }
  0xd0   :  { %v236_v23 = vpop.f32.mrf.mxu0 }
  0xd1   :  { %v237_v25 = vadd.f32 %v11104_v22, %v236_v23  ;;  %v11114_v32 = vpack.c.bf16 %v245_v27, %v242_v30 }
  0xd2   :  { %v9649_v26 = vpop.f32.mrf.mxu0 }
  0xd3   :  { %v11109_v28 = vpack.c.bf16 %v237_v25, %v234_v24  ;;  %v258_v37 = vadd.f32 %v9649_v26, %v11104_v22 }
  0xd4   :  { %v249_v29 = vpop.f32.mrf.mxu0 }
  0xd5   :  { %377 = vrot.lane.b32.xlu0 %v11109_v28, %s10991_s0  ;;  %v250_v33 = vadd.f32 %v11104_v22, %v249_v29 }
  0xd6   :  { %v9650_v31 = vpop.f32.mrf.mxu0 }
  0xd7   :  { %v261_v38 = vadd.f32 %v9650_v31, %v11104_v22 }
  0xd8   :  { %v252_v34 = vpop.f32.mrf.mxu0 }
  0xd9   :  { %v253_v35 = vadd.f32 %v11104_v22, %v252_v34  ;;  %428 = vrot.lane.b32.xlu0 %v11114_v32, %s10991_s0  ;;  %v11127_v43 = vpack.c.bf16 %v261_v38, %v258_v37 }
  0xda   :  { %v9653_v36 = vpop.f32.mrf.mxu0 }
  0xdb   :  { %v11122_v39 = vpack.c.bf16 %v253_v35, %v250_v33  ;;  %v274_v41 = vadd.f32 %v9653_v36, %v11104_v22 }
  0xdc   :  { %v265_v40 = vpop.f32.mrf.mxu0 }
  0xdd   :  { %478 = vrot.lane.b32.xlu1 %v11122_v39, %s10991_s0  ;;  %v266_v44 = vadd.f32 %v11104_v22, %v265_v40 }
  0xde   :  { %v9654_v42 = vpop.f32.mrf.mxu0 }
  0xdf   :  { %v277_v45 = vadd.f32 %v9654_v42, %v11104_v22 }
  0xe0   :  { %v268_v46 = vpop.f32.mrf.mxu0 }
  0xe1   :  { %v11131_v47 = vpack.c.bf16 %v277_v45, %v274_v41  ;;  %v269_v48 = vadd.f32 %v11104_v22, %v268_v46  ;;  %528 = vrot.lane.b32.xlu1 %v11127_v43, %s10991_s0 }
  0xe2   :  { %v9657_v49 = vpop.f32.mrf.mxu0 }
  0xe3   :  { %v11136_v50 = vpack.c.bf16 %v269_v48, %v266_v44  ;;  %v290_v52 = vadd.f32 %v9657_v49, %v11104_v22 }
  0xe4   :  { %v281_v51 = vpop.f32.mrf.mxu0 }
  0xe5   :  { %628 = vrot.lane.b32.xlu1 %v11131_v47, %s10991_s0  ;;  %578 = vrot.lane.b32.xlu0 %v11136_v50, %s10991_s0  ;;  %v282_v54 = vadd.f32 %v11104_v22, %v281_v51 }
  0xe6   :  { %v9658_v53 = vpop.f32.mrf.mxu0 }
  0xe7   :  { %v293_v55 = vadd.f32 %v9658_v53, %v11104_v22 }
  0xe8   :  { %v284_v56 = vpop.f32.mrf.mxu0 }
  0xe9   :  { %v11145_v57 = vpack.c.bf16 %v293_v55, %v290_v52  ;;  %v285_v58 = vadd.f32 %v11104_v22, %v284_v56 }
  0xea   :  { %v9661_v59 = vpop.f32.mrf.mxu0 }
  0xeb   :  { %v11148_v60 = vpack.c.bf16 %v285_v58, %v282_v54  ;;  %728 = vrot.lane.b32.xlu1 %v11145_v57, %s10991_s0  ;;  %v306_v62 = vadd.f32 %v9661_v59, %v11104_v22 }
  0xec   :  { %v297_v61 = vpop.f32.mrf.mxu0 }
  0xed   :  { %678 = vrot.lane.b32.xlu0 %v11148_v60, %s10991_s0  ;;  %v298_v0 = vadd.f32 %v11104_v22, %v297_v61 }
  0xee   :  { %v9662_v63 = vpop.f32.mrf.mxu0 }
  0xef   :  { %v309_v1 = vadd.f32 %v9662_v63, %v11104_v22 }
  0xf0   :  { %v300_v2 = vpop.f32.mrf.mxu0 }
  0xf1   :  { %v11157_v3 = vpack.c.bf16 %v309_v1, %v306_v62  ;;  %v301_v4 = vadd.f32 %v11104_v22, %v300_v2 }
  0xf2   :  { %v9665_v5 = vpop.f32.mrf.mxu0 }
  0xf3   :  { %v11160_v6 = vpack.c.bf16 %v301_v4, %v298_v0  ;;  %828 = vrot.lane.b32.xlu1 %v11157_v3, %s10991_s0  ;;  %v322_v8 = vadd.f32 %v9665_v5, %v11104_v22 }
  0xf4   :  { %v313_v7 = vpop.f32.mrf.mxu0 }
  0xf5   :  { %778 = vrot.lane.b32.xlu0 %v11160_v6, %s10991_s0  ;;  %v314_v10 = vadd.f32 %v11104_v22, %v313_v7 }
  0xf6   :  { %v9666_v9 = vpop.f32.mrf.mxu0 }
  0xf7   :  { %v325_v11 = vadd.f32 %v9666_v9, %v11104_v22 }
  0xf8   :  { %v316_v12 = vpop.f32.mrf.mxu0 }
  0xf9   :  { %v11169_v13 = vpack.c.bf16 %v325_v11, %v322_v8  ;;  %v317_v14 = vadd.f32 %v11104_v22, %v316_v12 }
  0xfa   :  { %v9669_v15 = vpop.f32.mrf.mxu0 }
  0xfb   :  { %v11172_v16 = vpack.c.bf16 %v317_v14, %v314_v10  ;;  %928 = vrot.lane.b32.xlu1 %v11169_v13, %s10991_s0  ;;  %v338_v19 = vadd.f32 %v9669_v15, %v11104_v22 }
  0xfc   :  { %v329_v17 = vpop.f32.mrf.mxu0 }
  0xfd   :  { %14421 = vst [vmem:[#allocation2_spill] sm:$0xff] %v11172_v16  ;;  %878 = vrot.lane.b32.xlu0 %v11172_v16, %s10991_s0  ;;  %v330_v21 = vadd.f32 %v11104_v22, %v329_v17 }
  0xfe   :  { %v9670_v20 = vpop.f32.mrf.mxu0 }
  0xff   :  { %v341_v23 = vadd.f32 %v9670_v20, %v11104_v22 }
 0x100   :  { %v332_v24 = vpop.f32.mrf.mxu0 }
 0x101   :  { %v11181_v25 = vpack.c.bf16 %v341_v23, %v338_v19  ;;  %v333_v26 = vadd.f32 %v11104_v22, %v332_v24 }
 0x102   :  { %v9673_v27 = vpop.f32.mrf.mxu0 }
 0x103   :  { %v11184_v29 = vpack.c.bf16 %v333_v26, %v330_v21  ;;  %1028 = vrot.lane.b32.xlu1 %v11181_v25, %s10991_s0  ;;  %v354_v31 = vadd.f32 %v9673_v27, %v11104_v22 }
 0x104   :  { %v345_v30 = vpop.f32.mrf.mxu0 }
 0x105   :  { %14422 = vst [vmem:[#allocation3_spill] sm:$0xff] %v11184_v29  ;;  %978 = vrot.lane.b32.xlu0 %v11184_v29, %s10991_s0  ;;  %v346_v34 = vadd.f32 %v11104_v22, %v345_v30 }
 0x106   :  { %v9674_v33 = vpop.f32.mrf.mxu0 }
 0x107   :  { %v357_v35 = vadd.f32 %v9674_v33, %v11104_v22 }
 0x108   :  { %v348_v36 = vpop.f32.mrf.mxu0 }
 0x109   :  { %v11193_v37 = vpack.c.bf16 %v357_v35, %v354_v31  ;;  %v349_v38 = vadd.f32 %v11104_v22, %v348_v36 }
 0x10b   :  { %v11196_v40 = vpack.c.bf16 %v349_v38, %v346_v34  ;;  %1128 = vrot.lane.b32.xlu1 %v11193_v37, %s10991_s0 }
 0x10d   :  { %1078 = vrot.lane.b32.xlu0 %v11196_v40, %s10991_s0 }
 0x10f   :  { %1546 = vrot.lane.b32.xlu1 %v11109_v28, %s10992_s2 }
 0x111   :  { %1593 = vrot.lane.b32.xlu0 %v11114_v32, %s10992_s2 }
 0x113   :  { %1640 = vrot.lane.b32.xlu1 %v11122_v39, %s10992_s2 }
 0x115   :  { %1687 = vrot.lane.b32.xlu0 %v11127_v43, %s10992_s2 }
 0x117   :  { %1734 = vrot.lane.b32.xlu1 %v11136_v50, %s10992_s2 }
 0x119   :  { %1781 = vrot.lane.b32.xlu0 %v11131_v47, %s10992_s2 }
 0x11b   :  { %1828 = vrot.lane.b32.xlu1 %v11148_v60, %s10992_s2 }
 0x11d   :  { %1875 = vrot.lane.b32.xlu0 %v11145_v57, %s10992_s2 }
 0x11f   :  { %1922 = vrot.lane.b32.xlu1 %v11160_v6, %s10992_s2 }
 0x121   :  { %1969 = vrot.lane.b32.xlu0 %v11157_v3, %s10992_s2 }
 0x123   :  { %2016 = vrot.lane.b32.xlu1 %v11172_v16, %s10992_s2 }
 0x125   :  { %2110 = vrot.lane.b32.xlu0 %v11184_v29, %s10992_s2 }
 0x127   :  { %2063 = vrot.lane.b32.xlu1 %v11169_v13, %s10992_s2 }
 0x12b   :  { %2157 = vrot.lane.b32.xlu1 %v11181_v25, %s10992_s2 }
 0x147   :  { %v378_v22 = vpop.permute.xlu0 %377 }
 0x148   :  { %v384_v41 = vsel %vm379_vm2, %v378_v22, 0 }
 0x149   :  { %9676 = vmatpush3.bf16.xpose.msra.mxu1 %v384_v41 }
 0x14a   :  { %9681 = vmatprep.subr.bf16.mxu1 %v14415_v18 }
 0x14b   :  { %v429_v42 = vpop.permute.xlu0 %428 }
 0x14c   :  { %v434_v44 = vsel %vm379_vm2, %v429_v42, 0 }
 0x14f   :  { %v479_v45 = vpop.permute.xlu1 %478 }
 0x150   :  { %9678 = vmatmul.mubr.msk.bf16.vlgmr.msra.gmra.mxu1 %vm379_vm2, %v11109_v28  ;;  %v484_v46 = vsel %vm379_vm2, %v479_v45, 0 }
 0x151   :  { %9682 = vmatpush3.bf16.xpose.msra.mxu1 %v434_v44  ;;  %9683 = vmatprep.mubr.msk.bf16.mxu1 %vm10990_vm1, %v14415_v18 }
 0x152   :  { %9687 = vmatprep.subr.bf16.mxu1 %v14415_v18 }
 0x153   :  { %v529_v48 = vpop.permute.xlu1 %528 }
 0x154   :  { %v534_v51 = vsel %vm379_vm2, %v529_v48, 0 }
 0x157   :  { %v579_v49 = vpop.permute.xlu0 %578  ;;  %v629_v56 = vpop.permute.xlu1 %628 }
 0x158   :  { %9684 = vmatmul.mubr.msk.bf16.vlgmr.msra.gmra.mxu1 %vm379_vm2, %v11114_v32  ;;  %v584_v54 = vsel %vm379_vm2, %v579_v49, 0  ;;  %v634_v61 = vsel %vm379_vm2, %v629_v56, 0 }
 0x159   :  { %9688 = vmatpush3.bf16.xpose.msra.mxu1 %v484_v46  ;;  %9689 = vmatprep.mubr.msk.bf16.mxu1 %vm10990_vm1, %v14415_v18 }
 0x15a   :  { %9693 = vmatprep.subr.bf16.mxu1 %v14415_v18 }
 0x15d   :  { %v729_v58 = vpop.permute.xlu1 %728 }
 0x15e   :  { %v734_v8 = vsel %vm379_vm2, %v729_v58, 0 }
 0x15f   :  { %v679_v52 = vpop.permute.xlu0 %678 }
 0x160   :  { %9690 = vmatmul.mubr.msk.bf16.vlgmr.msra.gmra.mxu1 %vm379_vm2, %v11122_v39  ;;  %v684_v2 = vsel %vm379_vm2, %v679_v52, 0 }
 0x161   :  { %9694 = vmatpush3.bf16.xpose.msra.mxu1 %v534_v51  ;;  %9695 = vmatprep.mubr.msk.bf16.mxu1 %vm10990_vm1, %v14415_v18 }
 0x162   :  { %9699 = vmatprep.subr.bf16.mxu1 %v14415_v18 }
 0x165   :  { %v829_v63 = vpop.permute.xlu1 %828 }
 0x166   :  { %v834_v11 = vsel %vm379_vm2, %v829_v63, 0 }
 0x167   :  { %v779_v53 = vpop.permute.xlu0 %778 }
 0x168   :  { %v784_v55 = vsel %vm379_vm2, %v779_v53, 0  ;;  %9696 = vmatmul.mubr.msk.bf16.vlgmr.msra.gmra.mxu1 %vm379_vm2, %v11127_v43 }
 0x169   :  { %9700 = vmatpush3.bf16.xpose.msra.mxu1 %v584_v54  ;;  %9724 = vmatpush3.bf16.xpose.msra.mxu0 %v784_v55 }
 0x16a   :  { %9701 = vmatprep.mubr.msk.bf16.mxu1 %vm10990_vm1, %v14415_v18  ;;  %9705 = vmatprep.subr.bf16.mxu1 %v14415_v18 }
 0x16b   :  { %9735 = vmatprep.subr.bf16.mxu0 %v14415_v18 }
 0x16d   :  { %v929_v0 = vpop.permute.xlu1 %928 }
 0x16e   :  { %v934_v14 = vsel %vm379_vm2, %v929_v0, 0 }
 0x16f   :  { %v879_v59 = vpop.permute.xlu0 %878 }
 0x170   :  { %v884_v62 = vsel %vm379_vm2, %v879_v59, 0  ;;  %9702 = vmatmul.mubr.msk.bf16.vlgmr.msra.gmra.mxu1 %vm379_vm2, %v11136_v50  ;;  %9726 = vmatmul.mubr.msk.bf16.vlgmr.msra.gmra.mxu0 %vm379_vm2, %v11160_v6 }
 0x171   :  { %9706 = vmatpush3.bf16.xpose.msra.mxu1 %v634_v61  ;;  %9736 = vmatpush3.bf16.xpose.msra.mxu0 %v884_v62 }
 0x172   :  { %9707 = vmatprep.mubr.msk.bf16.mxu1 %vm10990_vm1, %v14415_v18  ;;  %9737 = vmatprep.mubr.msk.bf16.mxu0 %vm10990_vm1, %v14415_v18 }
 0x173   :  { %9711 = vmatprep.subr.bf16.mxu1 %v14415_v18  ;;  %9747 = vmatprep.subr.bf16.mxu0 %v14415_v18 }
 0x175   :  { %v1029_v5 = vpop.permute.xlu1 %1028 }
 0x176   :  { %v1034_v15 = vsel %vm379_vm2, %v1029_v5, 0 }
 0x177   :  { %v979_v1 = vpop.permute.xlu0 %978 }
 0x178   :  { %v984_v4 = vsel %vm379_vm2, %v979_v1, 0  ;;  %9708 = vmatmul.mubr.msk.bf16.vlgmr.msra.gmra.mxu1 %vm379_vm2, %v11131_v47  ;;  %9738 = vmatmul.mubr.msk.bf16.vlgmr.msra.gmra.mxu0 %vm379_vm2, %v11172_v16 }
 0x179   :  { %9712 = vmatpush3.bf16.xpose.msra.mxu1 %v684_v2  ;;  %9748 = vmatpush3.bf16.xpose.msra.mxu0 %v984_v4 }
 0x17a   :  { %9713 = vmatprep.mubr.msk.bf16.mxu1 %vm10990_vm1, %v14415_v18  ;;  %9749 = vmatprep.mubr.msk.bf16.mxu0 %vm10990_vm1, %v14415_v18 }
 0x17b   :  { %9717 = vmatprep.subr.bf16.mxu1 %v14415_v18  ;;  %9759 = vmatprep.subr.bf16.mxu0 %v14415_v18 }
 0x17d   :  { %v1129_v10 = vpop.permute.xlu1 %1128 }
 0x17e   :  { %v1134_v17 = vsel %vm379_vm2, %v1129_v10, 0 }
 0x17f   :  { %v1079_v7 = vpop.permute.xlu0 %1078 }
 0x180   :  { %v1084_v9 = vsel %vm379_vm2, %v1079_v7, 0  ;;  %9714 = vmatmul.mubr.msk.bf16.vlgmr.msra.gmra.mxu1 %vm379_vm2, %v11148_v60  ;;  %9750 = vmatmul.mubr.msk.bf16.vlgmr.msra.gmra.mxu0 %vm379_vm2, %v11184_v29 }
 0x181   :  { %9718 = vmatpush3.bf16.xpose.msra.mxu1 %v734_v8  ;;  %9760 = vmatpush3.bf16.xpose.msra.mxu0 %v1084_v9  ;;  %v1547_v12 = vpop.permute.xlu1 %1546 }
 0x182   :  { %9719 = vmatprep.mubr.msk.bf16.mxu1 %vm10990_vm1, %v14415_v18  ;;  %9761 = vmatprep.mubr.msk.bf16.mxu0 %vm10990_vm1, %v14415_v18 }
 0x183   :  { %9729 = vmatprep.subr.bf16.mxu1 %v14415_v18  ;;  %9771 = vmatprep.subr.bf16.mxu0 %v14415_v18  ;;  %v1594_v19 = vpop.permute.xlu0 %1593 }
 0x188   :  { %9720 = vmatmul.mubr.msk.bf16.vlgmr.msra.gmra.mxu1 %vm379_vm2, %v11145_v57  ;;  %9762 = vmatmul.mubr.msk.bf16.vlgmr.msra.gmra.mxu0 %vm379_vm2, %v11196_v40 }
 0x189   :  { %9730 = vmatpush3.bf16.xpose.msra.mxu1 %v834_v11  ;;  %9772 = vmatpush3.bf16.msra.mxu0 %v1547_v12 }
 0x18a   :  { %9731 = vmatprep.mubr.msk.bf16.mxu1 %vm10990_vm1, %v14415_v18  ;;  %9741 = vmatprep.subr.bf16.mxu1 %v14415_v18 }
 0x18b   :  { %9773 = vmatprep.mubr.msk.bf16.mxu0 %vm10990_vm1, %v14415_v18  ;;  %9783 = vmatprep.subr.bf16.mxu0 %v14415_v18 }
 0x190   :  { %9732 = vmatmul.mubr.msk.bf16.vlgmr.msra.gmra.mxu1 %vm379_vm2, %v11157_v3 }
 0x191   :  { %9742 = vmatpush3.bf16.xpose.msra.mxu1 %v934_v14  ;;  %9743 = vmatprep.mubr.msk.bf16.mxu1 %vm10990_vm1, %v14415_v18 }
 0x192   :  { %9753 = vmatprep.subr.bf16.mxu1 %v14415_v18 }
 0x198   :  { %9744 = vmatmul.mubr.msk.bf16.vlgmr.msra.gmra.mxu1 %vm379_vm2, %v11169_v13 }
 0x199   :  { %9754 = vmatpush3.bf16.xpose.msra.mxu1 %v1034_v15  ;;  %9755 = vmatprep.mubr.msk.bf16.mxu1 %vm10990_vm1, %v14415_v18 }
 0x19a   :  { %9765 = vmatprep.subr.bf16.mxu1 %v14415_v18 }
 0x1a0   :  { %9756 = vmatmul.mubr.msk.bf16.vlgmr.msra.gmra.mxu1 %vm379_vm2, %v11181_v25 }
 0x1a1   :  { %9766 = vmatpush3.bf16.xpose.msra.mxu1 %v1134_v17  ;;  %9767 = vmatprep.mubr.msk.bf16.mxu1 %vm10990_vm1, %v14415_v18 }
 0x1a2   :  { %9777 = vmatprep.subr.bf16.mxu1 %v14415_v18 }
 0x1a8   :  { %9768 = vmatmul.mubr.msk.bf16.vlgmr.msra.gmra.mxu1 %vm379_vm2, %v11193_v37 }
 0x1a9   :  { %9778 = vmatpush3.bf16.msra.mxu1 %v1594_v19  ;;  %9779 = vmatprep.mubr.msk.bf16.mxu1 %vm10990_vm1, %v14415_v18 }
 0x1aa   :  { %9789 = vmatprep.subr.bf16.mxu1 %v14415_v18 }
 0x210   :  { %v11328_v20 = vpop.f32.mrf.mxu1 }
 0x211   :  { %v1178_v21 = vsel %vm1177_vm3, %v11328_v20, -inf }
 0x212   :  { %1179 = vmax.xlane.f32.xlu0 %v1178_v21  ;;  %v9679_v23 = vpop.f32.mrf.mxu1 }
 0x214   :  { %v11332_v24 = vpop.f32.mrf.mxu1 }
 0x215   :  { %v1181_v26 = vsel %vm1177_vm3, %v11332_v24, -inf }
 0x216   :  { %1182 = vmax.xlane.f32.xlu1 %v1181_v26  ;;  %v9680_v27 = vpop.f32.mrf.mxu1 }
 0x218   :  { %v11336_v30 = vpop.f32.mrf.mxu1 }
 0x219   :  { %v1184_v31 = vsel %vm1177_vm3, %v11336_v30, -inf }
 0x21a   :  { %1185 = vmax.xlane.f32.xlu0 %v1184_v31  ;;  %v9685_v33 = vpop.f32.mrf.mxu1 }
 0x21c   :  { %v11340_v34 = vpop.f32.mrf.mxu1 }
 0x21d   :  { %v1187_v35 = vsel %vm1177_vm3, %v11340_v34, -inf }
 0x21e   :  { %1188 = vmax.xlane.f32.xlu0 %v1187_v35  ;;  %v9686_v36 = vpop.f32.mrf.mxu1 }
 0x220   :  { %v11344_v38 = vpop.f32.mrf.mxu1 }
 0x221   :  { %v1190_v22 = vsel %vm1177_vm3, %v11344_v38, -inf }
 0x222   :  { %1191 = vmax.xlane.f32.xlu1 %v1190_v22  ;;  %v9691_v41 = vpop.f32.mrf.mxu1 }
 0x224   :  { %v11348_v42 = vpop.f32.mrf.mxu1 }
 0x225   :  { %v1193_v44 = vsel %vm1177_vm3, %v11348_v42, -inf }
 0x226   :  { %1194 = vmax.xlane.f32.xlu0 %v1193_v44  ;;  %v9692_v45 = vpop.f32.mrf.mxu1 }
 0x228   :  { %v11352_v46 = vpop.f32.mrf.mxu1 }
 0x229   :  { %v1196_v48 = vsel %vm1177_vm3, %v11352_v46, -inf }
 0x22a   :  { %1197 = vmax.xlane.f32.xlu1 %v1196_v48  ;;  %v9697_v49 = vpop.f32.mrf.mxu1 }
 0x22c   :  { %v11356_v51 = vpop.f32.mrf.mxu1 }
 0x22d   :  { %v1199_v52 = vsel %vm1177_vm3, %v11356_v51, -inf }
 0x22e   :  { %1200 = vmax.xlane.f32.xlu0 %v1199_v52  ;;  %v9698_v53 = vpop.f32.mrf.mxu1 }
 0x230   :  { %v11360_v54 = vpop.f32.mrf.mxu1  ;;  %v11362_v55 = vpop.f32.mrf.mxu0 }
 0x231   :  { %v1202_v56 = vsel %vm1177_vm3, %v11360_v54, -inf  ;;  %v1226_v0 = vsel %vm1177_vm3, %v11362_v55, -inf }
 0x232   :  { %1203 = vmax.xlane.f32.xlu1 %v1202_v56  ;;  %v9703_v58 = vpop.f32.mrf.mxu1  ;;  %v9727_v59 = vpop.f32.mrf.mxu0 }
 0x234   :  { %v11366_v61 = vpop.f32.mrf.mxu1  ;;  %v11368_v62 = vpop.f32.mrf.mxu0 }
 0x235   :  { %v1205_v63 = vsel %vm1177_vm3, %v11366_v61, -inf  ;;  %v1229_v8 = vsel %vm1177_vm3, %v11368_v62, -inf }
 0x236   :  { %1206 = vmax.xlane.f32.xlu0 %v1205_v63  ;;  %v9704_v1 = vpop.f32.mrf.mxu1  ;;  %1227 = vmax.xlane.f32.xlu1 %v1226_v0  ;;  %v9728_v2 = vpop.f32.mrf.mxu0 }
 0x238   :  { %v11374_v4 = vpop.f32.mrf.mxu1  ;;  %v11376_v5 = vpop.f32.mrf.mxu0 }
 0x239   :  { %v1208_v7 = vsel %vm1177_vm3, %v11374_v4, -inf  ;;  %v1238_v15 = vsel %vm1177_vm3, %v11376_v5, -inf }
 0x23a   :  { %v9709_v9 = vpop.f32.mrf.mxu1  ;;  %1209 = vmax.xlane.f32.xlu1 %v1208_v7  ;;  %1230 = vmax.xlane.f32.xlu0 %v1229_v8  ;;  %v9739_v10 = vpop.f32.mrf.mxu0 }
 0x23c   :  { %v11382_v11 = vpop.f32.mrf.mxu1  ;;  %v11384_v12 = vpop.f32.mrf.mxu0 }
 0x23d   :  { %v1211_v14 = vsel %vm1177_vm3, %v11382_v11, -inf  ;;  %v1241_v27 = vsel %vm1177_vm3, %v11384_v12, -inf }
 0x23e   :  { %v9710_v17 = vpop.f32.mrf.mxu1  ;;  %1212 = vmax.xlane.f32.xlu0 %v1211_v14  ;;  %1239 = vmax.xlane.f32.xlu1 %v1238_v15  ;;  %v9740_v19 = vpop.f32.mrf.mxu0 }
 0x240   :  { %v11390_v21 = vpop.f32.mrf.mxu1  ;;  %v11392_v23 = vpop.f32.mrf.mxu0 }
 0x241   :  { %v1214_v26 = vsel %vm1177_vm3, %v11390_v21, -inf  ;;  %v1250_v41 = vsel %vm1177_vm3, %v11392_v23, -inf }
 0x242   :  { %v9715_v31 = vpop.f32.mrf.mxu1  ;;  %1215 = vmax.xlane.f32.xlu1 %v1214_v26  ;;  %1242 = vmax.xlane.f32.xlu0 %v1241_v27  ;;  %v9751_v33 = vpop.f32.mrf.mxu0 }
 0x244   :  { %v11398_v35 = vpop.f32.mrf.mxu1  ;;  %v11400_v36 = vpop.f32.mrf.mxu0 }
 0x245   :  { %v1217_v22 = vsel %vm1177_vm3, %v11398_v35, -inf  ;;  %v1253_v53 = vsel %vm1177_vm3, %v11400_v36, -inf }
 0x246   :  { %v9716_v44 = vpop.f32.mrf.mxu1  ;;  %1218 = vmax.xlane.f32.xlu0 %v1217_v22  ;;  %1251 = vmax.xlane.f32.xlu1 %v1250_v41  ;;  %v9752_v45 = vpop.f32.mrf.mxu0 }
 0x248   :  { %v11406_v48 = vpop.f32.mrf.mxu1  ;;  %v11408_v49 = vpop.f32.mrf.mxu0 }
 0x249   :  { %v1220_v52 = vsel %vm1177_vm3, %v11406_v48, -inf  ;;  %v1262_v1 = vsel %vm1177_vm3, %v11408_v49, -inf }
 0x24a   :  { %v9721_v56 = vpop.f32.mrf.mxu1  ;;  %1221 = vmax.xlane.f32.xlu1 %v1220_v52  ;;  %1254 = vmax.xlane.f32.xlu0 %v1253_v53  ;;  %v9763_v58 = vpop.f32.mrf.mxu0 }
 0x24c   :  { %v11414_v59 = vpop.f32.mrf.mxu1  ;;  %v11416_v63 = vpop.f32.mrf.mxu0 }
 0x24d   :  { %v1223_v0 = vsel %vm1177_vm3, %v11414_v59, -inf  ;;  %v1265_v10 = vsel %vm1177_vm3, %v11416_v63, -inf }
 0x24e   :  { %v9722_v2 = vpop.f32.mrf.mxu1  ;;  %1224 = vmax.xlane.f32.xlu0 %v1223_v0  ;;  %1263 = vmax.xlane.f32.xlu1 %v1262_v1  ;;  %v9764_v7 = vpop.f32.mrf.mxu0 }
 0x250   :  { %v11422_v8 = vpop.f32.mrf.mxu1 }
 0x251   :  { %v1232_v9 = vsel %vm1177_vm3, %v11422_v8, -inf }
 0x252   :  { %v9733_v14 = vpop.f32.mrf.mxu1  ;;  %1233 = vmax.xlane.f32.xlu1 %v1232_v9  ;;  %1266 = vmax.xlane.f32.xlu0 %v1265_v10 }
 0x253   :  { %v11456_v14 = vpop.permute.xlu1 %1640 }
 0x254   :  { %v11428_v15 = vpop.f32.mrf.mxu1 }
 0x255   :  { %v1235_v17 = vsel %vm1177_vm3, %v11428_v15, -inf }
 0x256   :  { %v9734_v19 = vpop.f32.mrf.mxu1  ;;  %1236 = vmax.xlane.f32.xlu0 %v1235_v17 }
 0x257   :  { %v11458_v17 = vpop.permute.xlu1 %1734  ;;  %v11460_v19 = vpop.permute.xlu0 %1687 }
 0x258   :  { %v11432_v26 = vpop.f32.mrf.mxu1 }
 0x259   :  { %v1244_v27 = vsel %vm1177_vm3, %v11432_v26, -inf }
 0x25a   :  { %v9745_v31 = vpop.f32.mrf.mxu1  ;;  %1245 = vmax.xlane.f32.xlu1 %v1244_v27 }
 0x25b   :  { %v11462_v27 = vpop.permute.xlu1 %1828  ;;  %v11464_v31 = vpop.permute.xlu0 %1781 }
 0x25c   :  { %v11436_v33 = vpop.f32.mrf.mxu1 }
 0x25d   :  { %v1247_v22 = vsel %vm1177_vm3, %v11436_v33, -inf }
 0x25e   :  { %v9746_v41 = vpop.f32.mrf.mxu1  ;;  %1248 = vmax.xlane.f32.xlu0 %v1247_v22 }
 0x25f   :  { %v11466_v22 = vpop.permute.xlu1 %1922  ;;  %v11468_v41 = vpop.permute.xlu0 %1875 }
 0x260   :  { %v11440_v44 = vpop.f32.mrf.mxu1  ;;  %14423 = vst [vmem:[#allocation4_spill] sm:$0xff] %v11466_v22  ;;  %14424 = vst [vmem:[#allocation5_spill] sm:$0xff] %v11468_v41 }
 0x261   :  { %v1256_v45 = vsel %vm1177_vm3, %v11440_v44, -inf }
 0x262   :  { %v9757_v52 = vpop.f32.mrf.mxu1  ;;  %1257 = vmax.xlane.f32.xlu1 %v1256_v45 }
 0x263   :  { %v11470_v45 = vpop.permute.xlu1 %2016  ;;  %v11472_v52 = vpop.permute.xlu0 %1969 }
 0x264   :  { %v11444_v53 = vpop.f32.mrf.mxu1  ;;  %14425 = vst [vmem:[#allocation6_spill] sm:$0xff] %v11470_v45  ;;  %14426 = vst [vmem:[#allocation7_spill] sm:$0xff] %v11472_v52 }
 0x265   :  { %v1259_v56 = vsel %vm1177_vm3, %v11444_v53, -inf }
 0x266   :  { %v9758_v58 = vpop.f32.mrf.mxu1  ;;  %1260 = vmax.xlane.f32.xlu0 %v1259_v56 }
 0x267   :  { %v11474_v56 = vpop.permute.xlu1 %2063  ;;  %v11476_v58 = vpop.permute.xlu0 %2110 }
 0x268   :  { %v11448_v0 = vpop.f32.mrf.mxu1  ;;  %14427 = vst [vmem:[#allocation8_spill] sm:$0xff] %v11474_v56  ;;  %14428 = vst [vmem:[#allocation9_spill] sm:$0xff] %v11476_v58 }
 0x269   :  { %v1268_v1 = vsel %vm1177_vm3, %v11448_v0, -inf }
 0x26a   :  { %v9769_v2 = vpop.f32.mrf.mxu1  ;;  %1269 = vmax.xlane.f32.xlu1 %v1268_v1 }
 0x26b   :  { %v11478_v1 = vpop.permute.xlu1 %2157 }
 0x26c   :  { %v11452_v7 = vpop.f32.mrf.mxu1  ;;  %14429 = vst [vmem:[#allocation10_spill] sm:$0xff] %v11478_v1 }
 0x26d   :  { %v1271_v9 = vsel %vm1177_vm3, %v11452_v7, -inf }
 0x26e   :  { %v9770_v10 = vpop.f32.mrf.mxu1  ;;  %1272 = vmax.xlane.f32.xlu0 %v1271_v9 }
 0x29b   :  { %v1180_v2 = vpop.xlane.xlu0 %1179 }
 0x29c   :  { %v1274_v9 = vsub.f32 %v11328_v20, %v1180_v2 }
 0x29e   :  { %v1306_v10 = vmul.f32 1.442695, %v1274_v9 }
 0x29f   :  { %v1183_v18 = vpop.xlane.xlu1 %1182 }
 0x2a0   :  { %10477 = vpow2.f32 %v1306_v10  ;;  %v1275_v22 = vsub.f32 %v11332_v24, %v1183_v18 }
 0x2a2   :  { %v1308_v29 = vmul.f32 1.442695, %v1275_v22 }
 0x2a3   :  { %v1186_v41 = vpop.xlane.xlu0 %1185 }
 0x2a4   :  { %10479 = vpow2.f32 %v1308_v29  ;;  %v1276_v45 = vsub.f32 %v11336_v30, %v1186_v41 }
 0x2a6   :  { %v1310_v52 = vmul.f32 1.442695, %v1276_v45 }
 0x2a7   :  { %v1189_v16 = vpop.xlane.xlu0 %1188 }
 0x2a8   :  { %10481 = vpow2.f32 %v1310_v52  ;;  %v1277_v58 = vsub.f32 %v11340_v34, %v1189_v16 }
 0x2aa   :  { %v1312_v56 = vmul.f32 1.442695, %v1277_v58 }
 0x2ab   :  { %v1192_v1 = vpop.xlane.xlu1 %1191 }
 0x2ac   :  { %10483 = vpow2.f32 %v1312_v56  ;;  %v1278_v20 = vsub.f32 %v11344_v38, %v1192_v1 }
 0x2ad   :  { %v11485_v2 = vpop.eup %10477 }
 0x2ae   :  { %v1314_v9 = vmul.f32 1.442695, %v1278_v20  ;;  %v1370_v18 = vsel %vm1177_vm3, %v11485_v2, 0.0 }
 0x2af   :  { %1371 = vadd.xlane.f32.xlu1 %v1370_v18  ;;  %v1195_v29 = vpop.xlane.xlu0 %1194 }
 0x2b0   :  { %10485 = vpow2.f32 %v1314_v9  ;;  %v1279_v24 = vsub.f32 %v11348_v42, %v1195_v29 }
 0x2b1   :  { %v11490_v30 = vpop.eup %10479 }
 0x2b2   :  { %v1316_v22 = vmul.f32 1.442695, %v1279_v24  ;;  %v1373_v16 = vsel %vm1177_vm3, %v11490_v30, 0.0 }
 0x2b3   :  { %v1198_v34 = vpop.xlane.xlu1 %1197  ;;  %1374 = vadd.xlane.f32.xlu0 %v1373_v16 }
 0x2b4   :  { %10487 = vpow2.f32 %v1316_v22  ;;  %v1280_v38 = vsub.f32 %v11352_v46, %v1198_v34 }
 0x2b5   :  { %v11495_v41 = vpop.eup %10481 }
 0x2b6   :  { %v1318_v45 = vmul.f32 1.442695, %v1280_v38  ;;  %v1376_v52 = vsel %vm1177_vm3, %v11495_v41, 0.0 }
 0x2b7   :  { %1377 = vadd.xlane.f32.xlu1 %v1376_v52  ;;  %v1201_v56 = vpop.xlane.xlu0 %1200 }
 0x2b8   :  { %10489 = vpow2.f32 %v1318_v45  ;;  %v1281_v42 = vsub.f32 %v11356_v51, %v1201_v56 }
 0x2b9   :  { %v11500_v58 = vpop.eup %10483 }
 0x2ba   :  { %v1320_v1 = vmul.f32 1.442695, %v1281_v42  ;;  %v1379_v10 = vsel %vm1177_vm3, %v11500_v58, 0.0 }
 0x2bb   :  { %v1204_v20 = vpop.xlane.xlu1 %1203  ;;  %1380 = vadd.xlane.f32.xlu0 %v1379_v10 }
 0x2bc   :  { %10491 = vpow2.f32 %v1320_v1  ;;  %v1282_v46 = vsub.f32 %v11360_v54, %v1204_v20 }
 0x2bd   :  { %v11505_v9 = vpop.eup %10485 }
 0x2be   :  { %v1322_v18 = vmul.f32 1.442695, %v1282_v46  ;;  %v1382_v29 = vsel %vm1177_vm3, %v11505_v9, 0.0 }
 0x2bf   :  { %v1228_v24 = vpop.xlane.xlu1 %1227  ;;  %1383 = vadd.xlane.f32.xlu1 %v1382_v29  ;;  %v1207_v51 = vpop.xlane.xlu0 %1206 }
 0x2c0   :  { %10493 = vpow2.f32 %v1322_v18  ;;  %v1290_v22 = vsub.f32 %v11362_v55, %v1228_v24  ;;  %v1283_v16 = vsub.f32 %v11366_v61, %v1207_v51 }
 0x2c1   :  { %v11511_v34 = vpop.eup %10487 }
 0x2c2   :  { %v1338_v38 = vmul.f32 1.442695, %v1290_v22  ;;  %v1324_v45 = vmul.f32 1.442695, %v1283_v16  ;;  %v1385_v54 = vsel %vm1177_vm3, %v11511_v34, 0.0 }
 0x2c3   :  { %v1210_v52 = vpop.xlane.xlu1 %1209  ;;  %1386 = vadd.xlane.f32.xlu0 %v1385_v54  ;;  %v1231_v56 = vpop.xlane.xlu0 %1230 }
 0x2c4   :  { %10495 = vpow2.f32 %v1338_v38  ;;  %v1284_v42 = vsub.f32 %v11374_v4, %v1210_v52  ;;  %v1291_v1 = vsub.f32 %v11368_v62, %v1231_v56 }
 0x2c5   :  { %v11517_v10 = vpop.eup %10489  ;;  %10497 = vpow2.f32 %v1324_v45 }
 0x2c6   :  { %v1326_v55 = vmul.f32 1.442695, %v1284_v42  ;;  %v1340_v61 = vmul.f32 1.442695, %v1291_v1  ;;  %v1388_v20 = vsel %vm1177_vm3, %v11517_v10, 0.0 }
 0x2c7   :  { %v1240_v46 = vpop.xlane.xlu1 %1239  ;;  %1389 = vadd.xlane.f32.xlu1 %v1388_v20  ;;  %v1213_v18 = vpop.xlane.xlu0 %1212 }
 0x2c8   :  { %10499 = vpow2.f32 %v1326_v55  ;;  %v1294_v29 = vsub.f32 %v11376_v5, %v1240_v46  ;;  %v1285_v24 = vsub.f32 %v11382_v11, %v1213_v18 }
 0x2c9   :  { %v11523_v51 = vpop.eup %10491  ;;  %10501 = vpow2.f32 %v1340_v61 }
 0x2ca   :  { %v1346_v62 = vmul.f32 1.442695, %v1294_v29  ;;  %v1328_v4 = vmul.f32 1.442695, %v1285_v24  ;;  %v1391_v22 = vsel %vm1177_vm3, %v11523_v51, 0.0 }
 0x2cb   :  { %v1216_v16 = vpop.xlane.xlu1 %1215  ;;  %1392 = vadd.xlane.f32.xlu0 %v1391_v22  ;;  %v1243_v38 = vpop.xlane.xlu0 %1242 }
 0x2cc   :  { %10503 = vpow2.f32 %v1346_v62  ;;  %v1286_v45 = vsub.f32 %v11390_v21, %v1216_v16  ;;  %v1295_v54 = vsub.f32 %v11384_v12, %v1243_v38 }
 0x2cd   :  { %v11529_v52 = vpop.eup %10493  ;;  %10505 = vpow2.f32 %v1328_v4 }
 0x2ce   :  { %v1330_v5 = vmul.f32 1.442695, %v1286_v45  ;;  %v1348_v11 = vmul.f32 1.442695, %v1295_v54  ;;  %v1394_v56 = vsel %vm1177_vm3, %v11529_v52, 0.0 }
 0x2cf   :  { %v1252_v42 = vpop.xlane.xlu1 %1251  ;;  %1395 = vadd.xlane.f32.xlu1 %v1394_v56  ;;  %v1219_v1 = vpop.xlane.xlu0 %1218 }
 0x2d0   :  { %10507 = vpow2.f32 %v1330_v5  ;;  %v1298_v55 = vsub.f32 %v11392_v23, %v1252_v42  ;;  %v1287_v61 = vsub.f32 %v11398_v35, %v1219_v1 }
 0x2d1   :  { %v11535_v20 = vpop.eup %10495  ;;  %10509 = vpow2.f32 %v1348_v11 }
 0x2d2   :  { %v11537_v12 = vpop.eup %10497  ;;  %v1354_v21 = vmul.f32 1.442695, %v1298_v55  ;;  %v1332_v46 = vmul.f32 1.442695, %v1287_v61  ;;  %v1418_v18 = vsel %vm1177_vm3, %v11535_v20, 0.0 }
 0x2d3   :  { %v1222_v29 = vpop.xlane.xlu1 %1221  ;;  %1419 = vadd.xlane.f32.xlu1 %v1418_v18  ;;  %v1397_v24 = vsel %vm1177_vm3, %v11537_v12, 0.0  ;;  %v1255_v62 = vpop.xlane.xlu0 %1254 }
 0x2d4   :  { %10511 = vpow2.f32 %v1354_v21  ;;  %v1288_v23 = vsub.f32 %v11406_v48, %v1222_v29  ;;  %1398 = vadd.xlane.f32.xlu0 %v1397_v24  ;;  %v1299_v35 = vsub.f32 %v11400_v36, %v1255_v62 }
 0x2d5   :  { %v11545_v4 = vpop.eup %10499  ;;  %10513 = vpow2.f32 %v1332_v46 }
 0x2d6   :  { %v11547_v22 = vpop.eup %10501  ;;  %v1334_v16 = vmul.f32 1.442695, %v1288_v23  ;;  %v1356_v38 = vmul.f32 1.442695, %v1299_v35  ;;  %v1400_v45 = vsel %vm1177_vm3, %v11545_v4, 0.0 }
 0x2d7   :  { %v1264_v54 = vpop.xlane.xlu1 %1263  ;;  %1401 = vadd.xlane.f32.xlu1 %v1400_v45  ;;  %v1421_v5 = vsel %vm1177_vm3, %v11547_v22, 0.0  ;;  %v1225_v11 = vpop.xlane.xlu0 %1224 }
 0x2d8   :  { %10515 = vpow2.f32 %v1334_v16  ;;  %v1302_v48 = vsub.f32 %v11408_v49, %v1264_v54  ;;  %1422 = vadd.xlane.f32.xlu0 %v1421_v5  ;;  %v1289_v36 = vsub.f32 %v11414_v59, %v1225_v11 }
 0x2d9   :  { %v11555_v56 = vpop.eup %10503  ;;  %10517 = vpow2.f32 %v1356_v38 }
 0x2da   :  { %v11557_v42 = vpop.eup %10505  ;;  %v1362_v1 = vmul.f32 1.442695, %v1302_v48  ;;  %v1336_v55 = vmul.f32 1.442695, %v1289_v36  ;;  %v1430_v61 = vsel %vm1177_vm3, %v11555_v56, 0.0 }
 0x2db   :  { %v1234_v21 = vpop.xlane.xlu1 %1233  ;;  %1431 = vadd.xlane.f32.xlu1 %v1430_v61  ;;  %v1403_v46 = vsel %vm1177_vm3, %v11557_v42, 0.0  ;;  %v1267_v18 = vpop.xlane.xlu0 %1266 }
 0x2dc   :  { %10519 = vpow2.f32 %v1362_v1  ;;  %v1292_v49 = vsub.f32 %v11422_v8, %v1234_v21  ;;  %1404 = vadd.xlane.f32.xlu0 %v1403_v46  ;;  %v1303_v59 = vsub.f32 %v11416_v63, %v1267_v18 }
 0x2dd   :  { %v11565_v29 = vpop.eup %10507  ;;  %10521 = vpow2.f32 %v1336_v55 }
 0x2de   :  { %v11567_v24 = vpop.eup %10509  ;;  %v1342_v62 = vmul.f32 1.442695, %v1292_v49  ;;  %v1364_v23 = vmul.f32 1.442695, %v1303_v59  ;;  %v1406_v35 = vsel %vm1177_vm3, %v11565_v29, 0.0 }
 0x2df   :  { %1407 = vadd.xlane.f32.xlu1 %v1406_v35  ;;  %v1433_v16 = vsel %vm1177_vm3, %v11567_v24, 0.0  ;;  %v1237_v38 = vpop.xlane.xlu0 %1236 }
 0x2e0   :  { %10523 = vpow2.f32 %v1342_v62  ;;  %1434 = vadd.xlane.f32.xlu0 %v1433_v16  ;;  %v1293_v8 = vsub.f32 %v11428_v15, %v1237_v38 }
 0x2e1   :  { %v11574_v63 = vpop.eup %10511  ;;  %10525 = vpow2.f32 %v1364_v23 }
 0x2e2   :  { %v11576_v45 = vpop.eup %10513  ;;  %v1344_v54 = vmul.f32 1.442695, %v1293_v8  ;;  %v1442_v5 = vsel %vm1177_vm3, %v11574_v63, 0.0 }
 0x2e3   :  { %v1246_v11 = vpop.xlane.xlu1 %1245  ;;  %1443 = vadd.xlane.f32.xlu1 %v1442_v5  ;;  %v1409_v48 = vsel %vm1177_vm3, %v11576_v45, 0.0 }
 0x2e4   :  { %10527 = vpow2.f32 %v1344_v54  ;;  %v1296_v36 = vsub.f32 %v11432_v26, %v1246_v11  ;;  %1410 = vadd.xlane.f32.xlu0 %v1409_v48 }
 0x2e5   :  { %v11583_v1 = vpop.eup %10515 }
 0x2e6   :  { %v11585_v15 = vpop.eup %10517  ;;  %v1350_v55 = vmul.f32 1.442695, %v1296_v36  ;;  %v1412_v61 = vsel %vm1177_vm3, %v11583_v1, 0.0 }
 0x2e7   :  { %1413 = vadd.xlane.f32.xlu1 %v1412_v61  ;;  %v1445_v21 = vsel %vm1177_vm3, %v11585_v15, 0.0  ;;  %v1249_v46 = vpop.xlane.xlu0 %1248 }
 0x2e8   :  { %10529 = vpow2.f32 %v1350_v55  ;;  %1446 = vadd.xlane.f32.xlu0 %v1445_v21  ;;  %v1297_v18 = vsub.f32 %v11436_v33, %v1249_v46 }
 0x2e9   :  { %v11592_v49 = vpop.eup %10519 }
 0x2ea   :  { %v11594_v26 = vpop.eup %10521  ;;  %v1352_v59 = vmul.f32 1.442695, %v1297_v18  ;;  %v1454_v62 = vsel %vm1177_vm3, %v11592_v49, 0.0 }
 0x2eb   :  { %v1258_v23 = vpop.xlane.xlu1 %1257  ;;  %1455 = vadd.xlane.f32.xlu1 %v1454_v62  ;;  %v1415_v35 = vsel %vm1177_vm3, %v11594_v26, 0.0 }
 0x2ec   :  { %10531 = vpow2.f32 %v1352_v59  ;;  %v1300_v16 = vsub.f32 %v11440_v44, %v1258_v23  ;;  %1416 = vadd.xlane.f32.xlu0 %v1415_v35 }
 0x2ed   :  { %v11601_v38 = vpop.eup %10523 }
 0x2ee   :  { %v11603_v33 = vpop.eup %10525  ;;  %v1358_v8 = vmul.f32 1.442695, %v1300_v16  ;;  %v1424_v54 = vsel %vm1177_vm3, %v11601_v38, 0.0 }
 0x2ef   :  { %1425 = vadd.xlane.f32.xlu1 %v1424_v54  ;;  %v1457_v5 = vsel %vm1177_vm3, %v11603_v33, 0.0  ;;  %v1261_v11 = vpop.xlane.xlu0 %1260 }
 0x2f0   :  { %10533 = vpow2.f32 %v1358_v8  ;;  %1458 = vadd.xlane.f32.xlu0 %v1457_v5  ;;  %v1301_v48 = vsub.f32 %v11444_v53, %v1261_v11 }
 0x2f1   :  { %v11610_v36 = vpop.eup %10527 }
 0x2f2   :  { %v1360_v44 = vmul.f32 1.442695, %v1301_v48  ;;  %v1427_v55 = vsel %vm1177_vm3, %v11610_v36, 0.0 }
 0x2f3   :  { %v1270_v35 = vpop.xlane.xlu1 %1269 }
 0x2f4   :  { %10535 = vpow2.f32 %v1360_v44  ;;  %1428 = vadd.xlane.f32.xlu0 %v1427_v55  ;;  %v1304_v16 = vsub.f32 %v11448_v0, %v1270_v35 }
 0x2f5   :  { %v11614_v61 = vpop.eup %10529 }
 0x2f6   :  { %v1436_v21 = vsel %vm1177_vm3, %v11614_v61, 0.0  ;;  %v1366_v54 = vmul.f32 1.442695, %v1304_v16 }
 0x2f7   :  { %1437 = vadd.xlane.f32.xlu1 %v1436_v21  ;;  %v1273_v8 = vpop.xlane.xlu0 %1272 }
 0x2f8   :  { %v1305_v5 = vsub.f32 %v11452_v7, %v1273_v8  ;;  %10537 = vpow2.f32 %v1366_v54 }
 0x2f9   :  { %v11618_v46 = vpop.eup %10531 }
 0x2fa   :  { %v1439_v18 = vsel %vm1177_vm3, %v11618_v46, 0.0  ;;  %v1368_v11 = vmul.f32 1.442695, %v1305_v5 }
 0x2fb   :  { %1440 = vadd.xlane.f32.xlu0 %v1439_v18 }
 0x2fc   :  { %10539 = vpow2.f32 %v1368_v11 }
 0x2fd   :  { %v11622_v53 = vpop.eup %10533 }
 0x2fe   :  { %v1448_v59 = vsel %vm1177_vm3, %v11622_v53, 0.0 }
 0x2ff   :  { %1449 = vadd.xlane.f32.xlu1 %v1448_v59 }
 0x301   :  { %v11626_v62 = vpop.eup %10535 }
 0x302   :  { %v1451_v23 = vsel %vm1177_vm3, %v11626_v62, 0.0 }
 0x303   :  { %1452 = vadd.xlane.f32.xlu0 %v1451_v23 }
 0x305   :  { %v11636_v48 = vpop.eup %10537 }
 0x306   :  { %v1460_v44 = vsel %vm1177_vm3, %v11636_v48, 0.0 }
 0x309   :  { %v11640_v55 = vpop.eup %10539 }
 0x30a   :  { %v1463_v21 = vsel %vm1177_vm3, %v11640_v55, 0.0 }
 0x310   :  { %2251 = vrot.lane.b32.xlu1 %v11193_v37, %s10992_s2 }
 0x319   :  { %2204 = vrot.lane.b32.xlu0 %v11196_v40, %s10992_s2 }
 0x334   :  { %1461 = vadd.xlane.f32.xlu1 %v1460_v44 }
 0x338   :  { %v1372_v18 = vpop.xlane.xlu1 %1371  ;;  %1464 = vadd.xlane.f32.xlu0 %v1463_v21 }
 0x339   :  { %10541 = vrcp.f32 %v1372_v18  ;;  %v14430_v18 = vmov 0.0  }
 0x33c   :  { %v1375_v0 = vpop.xlane.xlu0 %1374 }
 0x33d   :  { %10543 = vrcp.f32 %v1375_v0 }
 0x340   :  { %v1378_v7 = vpop.xlane.xlu1 %1377 }
 0x341   :  { %10545 = vrcp.f32 %v1378_v7 }
 0x344   :  { %v1381_v59 = vpop.xlane.xlu0 %1380 }
 0x345   :  { %10547 = vrcp.f32 %v1381_v59  ;;  %2512 = vrot.lane.b32.xlu1 %v11114_v32, %s10993_s1 }
 0x346   :  { %v10542_v23 = vpop.eup %10541 }
 0x347   :  { %v1498_v8 = vmul.f32 %v10542_v23, %v11485_v2 }
 0x348   :  { %v1384_v35 = vpop.xlane.xlu1 %1383 }
 0x349   :  { %2510 = vrot.lane.b32.xlu1 %v11114_v32, %s10994_s22  ;;  %10549 = vrcp.f32 %v1384_v35 }
 0x34a   :  { %v10544_v16 = vpop.eup %10543 }
 0x34b   :  { %v1499_v54 = vmul.f32 %v10544_v16, %v11490_v30 }
 0x34c   :  { %v1387_v5 = vpop.xlane.xlu0 %1386 }
 0x34d   :  { %10551 = vrcp.f32 %v1387_v5  ;;  %2614 = vrot.lane.b32.xlu1 %v11127_v43, %s10993_s1  ;;  %v1530_v11 = vpack.c.bf16 %v1499_v54, %v1498_v8 }
 0x34e   :  { %2461 = vrot.lane.b32.xlu0 %v11109_v28, %s10993_s1  ;;  %v10546_v44 = vpop.eup %10545 }
 0x34f   :  { %9774 = vmatmul.mubr.msk.bf16.vlgmr.msra.gmra.mxu0 %vm1177_vm3, %v1530_v11  ;;  %v1500_v30 = vmul.f32 %v10546_v44, %v11495_v41 }
 0x350   :  { %9784 = vmatpush3.bf16.msra.mxu0 %v11456_v14  ;;  %v1390_v21 = vpop.xlane.xlu1 %1389  ;;  %9785 = vmatprep.mubr.msk.bf16.mxu0 %vm10990_vm1, %v14430_v18 }
 0x351   :  { %2612 = vrot.lane.b32.xlu1 %v11127_v43, %s10994_s22  ;;  %9795 = vmatprep.subr.bf16.mxu0 %v14430_v18  ;;  %10553 = vrcp.f32 %v1390_v21 }
 0x352   :  { %v10548_v2 = vpop.eup %10547  ;;  %2459 = vrot.lane.b32.xlu0 %v11109_v28, %s10994_s22 }
 0x353   :  { %v1501_v0 = vmul.f32 %v10548_v2, %v11500_v58 }
 0x354   :  { %v1393_v7 = vpop.xlane.xlu0 %1392 }
 0x355   :  { %10555 = vrcp.f32 %v1393_v7  ;;  %2716 = vrot.lane.b32.xlu1 %v11131_v47, %s10993_s1  ;;  %v1531_v14 = vpack.c.bf16 %v1501_v0, %v1500_v30 }
 0x356   :  { %2563 = vrot.lane.b32.xlu0 %v11122_v39, %s10993_s1  ;;  %v10550_v59 = vpop.eup %10549 }
 0x357   :  { %9780 = vmatmul.mubr.msk.bf16.vlgmr.msra.gmra.mxu1 %vm1177_vm3, %v1531_v14  ;;  %v1502_v58 = vmul.f32 %v10550_v59, %v11505_v9 }
 0x358   :  { %9790 = vmatpush3.bf16.msra.mxu1 %v11460_v19  ;;  %v1396_v23 = vpop.xlane.xlu1 %1395  ;;  %9791 = vmatprep.mubr.msk.bf16.mxu1 %vm10990_vm1, %v14430_v18 }
 0x359   :  { %2714 = vrot.lane.b32.xlu1 %v11131_v47, %s10994_s22  ;;  %9801 = vmatprep.subr.bf16.mxu1 %v14430_v18  ;;  %10557 = vrcp.f32 %v1396_v23 }
 0x35a   :  { %v10552_v41 = vpop.eup %10551  ;;  %2561 = vrot.lane.b32.xlu0 %v11122_v39, %s10994_s22 }
 0x35b   :  { %v1503_v35 = vmul.f32 %v10552_v41, %v11511_v34 }
 0x35c   :  { %v1420_v16 = vpop.xlane.xlu1 %1419 }
 0x35d   :  { %v1399_v19 = vpop.xlane.xlu0 %1398  ;;  %2818 = vrot.lane.b32.xlu1 %v11145_v57, %s10993_s1  ;;  %v1532_v8 = vpack.c.bf16 %v1503_v35, %v1502_v58 }
 0x35e   :  { %10559 = vrcp.f32 %v1399_v19  ;;  %2665 = vrot.lane.b32.xlu0 %v11136_v50, %s10993_s1  ;;  %v10554_v54 = vpop.eup %10553 }
 0x35f   :  { %9786 = vmatmul.mubr.msk.bf16.vlgmr.msra.gmra.mxu0 %vm1177_vm3, %v1532_v8  ;;  %v1504_v11 = vmul.f32 %v10554_v54, %v11517_v10  ;;  %v14431_v54 = vld [vmem:[#allocation2_spill] sm:$0xff] }
 0x360   :  { %9796 = vmatpush3.bf16.msra.mxu0 %v11458_v17  ;;  %v1402_v5 = vpop.xlane.xlu1 %1401  ;;  %9797 = vmatprep.mubr.msk.bf16.mxu0 %vm10990_vm1, %v14430_v18 }
 0x361   :  { %v1423_v9 = vpop.xlane.xlu0 %1422  ;;  %2816 = vrot.lane.b32.xlu1 %v11145_v57, %s10994_s22  ;;  %9807 = vmatprep.subr.bf16.mxu0 %v14430_v18  ;;  %10561 = vrcp.f32 %v1402_v5 }
 0x362   :  { %v10556_v34 = vpop.eup %10555  ;;  %2663 = vrot.lane.b32.xlu0 %v11136_v50, %s10994_s22 }
 0x363   :  { %v1505_v44 = vmul.f32 %v10556_v34, %v11523_v51 }
 0x364   :  { %v1432_v17 = vpop.xlane.xlu1 %1431 }
 0x365   :  { %v1405_v21 = vpop.xlane.xlu0 %1404  ;;  %2920 = vrot.lane.b32.xlu1 %v11157_v3, %s10993_s1  ;;  %v1533_v2 = vpack.c.bf16 %v1505_v44, %v1504_v11 }
 0x366   :  { %10563 = vrcp.f32 %v1405_v21  ;;  %2767 = vrot.lane.b32.xlu0 %v11148_v60, %s10993_s1  ;;  %v10558_v10 = vpop.eup %10557 }
 0x367   :  { %9792 = vmatmul.mubr.msk.bf16.vlgmr.msra.gmra.mxu1 %vm1177_vm3, %v1533_v2  ;;  %v1506_v14 = vmul.f32 %v10558_v10, %v11529_v52  ;;  %v14433_v2 = vld [vmem:[#allocation3_spill] sm:$0xff] }
 0x368   :  { %9802 = vmatpush3.bf16.msra.mxu1 %v11464_v31  ;;  %v1408_v30 = vpop.xlane.xlu1 %1407  ;;  %9803 = vmatprep.mubr.msk.bf16.mxu1 %vm10990_vm1, %v14430_v18 }
 0x369   :  { %v1435_v51 = vpop.xlane.xlu0 %1434  ;;  %2918 = vrot.lane.b32.xlu1 %v11157_v3, %s10994_s22  ;;  %9813 = vmatprep.subr.bf16.mxu1 %v14430_v18  ;;  %10565 = vrcp.f32 %v1408_v30 }
 0x36a   :  { %2765 = vrot.lane.b32.xlu0 %v11148_v60, %s10994_s22 }
 0x36b   :  { %v10560_v0 = vpop.eup %10559 }
 0x36c   :  { %v1444_v7 = vpop.xlane.xlu1 %1443  ;;  %v1507_v31 = vmul.f32 %v10560_v0, %v11537_v12 }
 0x36d   :  { %v1411_v59 = vpop.xlane.xlu0 %1410  ;;  %3022 = vrot.lane.b32.xlu1 %v11169_v13, %s10993_s1 }
 0x36e   :  { %10567 = vrcp.f32 %v1411_v59  ;;  %2869 = vrot.lane.b32.xlu0 %v11160_v6, %s10993_s1  ;;  %v1534_v23 = vpack.c.bf16 %v1507_v31, %v1506_v14  ;;  %v10562_v58 = vpop.eup %10561  ;;  %v14434_v14 = vld [vmem:[#allocation4_spill] sm:$0xff] }
 0x36f   :  { %10569 = vrcp.f32 %v1423_v9  ;;  %v14432_v9 = vld [vmem:[#allocation5_spill] sm:$0xff] }
 0x370   :  { %9798 = vmatmul.mubr.msk.bf16.vlgmr.msra.gmra.mxu0 %vm1177_vm3, %v1534_v23  ;;  %v1414_v41 = vpop.xlane.xlu1 %1413  ;;  %10571 = vrcp.f32 %v1420_v16 }
 0x371   :  { %9808 = vmatpush3.bf16.msra.mxu0 %v11462_v27  ;;  %v1447_v35 = vpop.xlane.xlu0 %1446  ;;  %3020 = vrot.lane.b32.xlu1 %v11169_v13, %s10994_s22  ;;  %10573 = vrcp.f32 %v1414_v41  ;;  %v1508_v27 = vmul.f32 %v10562_v58, %v11545_v4 }
 0x372   :  { %2867 = vrot.lane.b32.xlu0 %v11160_v6, %s10994_s22  ;;  %9809 = vmatprep.mubr.msk.bf16.mxu0 %vm10990_vm1, %v14430_v18 }
 0x373   :  { %v10564_v52 = vpop.eup %10563  ;;  %9819 = vmatprep.subr.bf16.mxu0 %v14430_v18 }
 0x374   :  { %v11723_v12 = vpop.xlane.xlu1 %1455  ;;  %v1509_v19 = vmul.f32 %v10564_v52, %v11557_v42 }
 0x375   :  { %v1417_v8 = vpop.xlane.xlu0 %1416  ;;  %3124 = vrot.lane.b32.xlu1 %v11181_v25, %s10993_s1 }
 0x376   :  { %10575 = vrcp.f32 %v1417_v8  ;;  %2971 = vrot.lane.b32.xlu0 %v14431_v54, %s10993_s1  ;;  %v1535_v5 = vpack.c.bf16 %v1509_v19, %v1508_v27  ;;  %v10566_v16 = vpop.eup %10565 }
 0x377   :  { %10577 = vrcp.f32 %v1435_v51  ;;  %v1510_v42 = vmul.f32 %v10566_v16, %v11565_v29 }
 0x378   :  { %9804 = vmatmul.mubr.msk.bf16.vlgmr.msra.gmra.mxu1 %vm1177_vm3, %v1535_v5  ;;  %v1426_v34 = vpop.xlane.xlu1 %1425  ;;  %10579 = vrcp.f32 %v1432_v17 }
 0x379   :  { %9814 = vmatpush3.bf16.msra.mxu1 %v14432_v9  ;;  %v1459_v11 = vpop.xlane.xlu0 %1458  ;;  %3122 = vrot.lane.b32.xlu1 %v11181_v25, %s10994_s22  ;;  %10581 = vrcp.f32 %v1426_v34 }
 0x37a   :  { %2969 = vrot.lane.b32.xlu0 %v14431_v54, %s10994_s22  ;;  %9815 = vmatprep.mubr.msk.bf16.mxu1 %vm10990_vm1, %v14430_v18 }
 0x37b   :  { %v10568_v4 = vpop.eup %10567  ;;  %9825 = vmatprep.subr.bf16.mxu1 %v14430_v18 }
 0x37c   :  { %v1511_v44 = vmul.f32 %v10568_v4, %v11576_v45  ;;  %v10570_v10 = vpop.eup %10569  ;;  %v14437_v4 = vld [vmem:[#allocation8_spill] sm:$0xff] }
 0x37d   :  { %v1429_v21 = vpop.xlane.xlu0 %1428  ;;  %3226 = vrot.lane.b32.xlu1 %v11193_v37, %s10993_s1  ;;  %v10572_v51 = vpop.eup %10571  ;;  %v1515_v29 = vmul.f32 %v10570_v10, %v11547_v22 }
 0x37e   :  { %10583 = vrcp.f32 %v1429_v21  ;;  %3073 = vrot.lane.b32.xlu0 %v14433_v2, %s10993_s1  ;;  %v1536_v30 = vpack.c.bf16 %v1511_v44, %v1510_v42  ;;  %v10574_v0 = vpop.eup %10573  ;;  %v1514_v41 = vmul.f32 %v10572_v51, %v11535_v20  ;;  %v14436_v20 = vld [vmem:[#allocation6_spill] sm:$0xff] }
 0x37f   :  { %10585 = vrcp.f32 %v1447_v35  ;;  %v1512_v59 = vmul.f32 %v10574_v0, %v11583_v1 }
 0x380   :  { %9810 = vmatmul.mubr.msk.bf16.vlgmr.msra.gmra.mxu0 %vm1177_vm3, %v1536_v30  ;;  %v1438_v17 = vpop.xlane.xlu1 %1437  ;;  %v1538_v58 = vpack.c.bf16 %v1515_v29, %v1514_v41 }
 0x381   :  { %9820 = vmatpush3.bf16.msra.mxu0 %v14434_v14  ;;  %3224 = vrot.lane.b32.xlu1 %v11193_v37, %s10994_s22  ;;  %10587 = vrcp.f32 %v1438_v17 }
 0x382   :  { %3071 = vrot.lane.b32.xlu0 %v14433_v2, %s10994_s22  ;;  %9821 = vmatprep.mubr.msk.bf16.mxu0 %vm10990_vm1, %v14430_v18  ;;  %10589 = vrcp.f32 %v1444_v7  ;;  %v14435_v7 = vld [vmem:[#allocation7_spill] sm:$0xff] }
 0x383   :  { %v10576_v45 = vpop.eup %10575  ;;  %9831 = vmatprep.subr.bf16.mxu0 %v14430_v18 }
 0x384   :  { %v1441_v31 = vpop.xlane.xlu0 %1440  ;;  %v1513_v23 = vmul.f32 %v10576_v45, %v11594_v26  ;;  %v10578_v35 = vpop.eup %10577 }
 0x385   :  { %10591 = vrcp.f32 %v1441_v31  ;;  %3643 = vrot.lane.b32.xlu1 %v11109_v28, %s10995_s23  ;;  %v10580_v52 = vpop.eup %10579  ;;  %v1519_v27 = vmul.f32 %v10578_v35, %v11567_v24 }
 0x386   :  { %3175 = vrot.lane.b32.xlu0 %v11196_v40, %s10993_s1  ;;  %v1537_v22 = vpack.c.bf16 %v1513_v23, %v1512_v59  ;;  %v10582_v26 = vpop.eup %10581  ;;  %10593 = vrcp.f32 %v1459_v11  ;;  %v1518_v24 = vmul.f32 %v10580_v52, %v11555_v56 }
 0x387   :  { %v1516_v5 = vmul.f32 %v10582_v26, %v11601_v38 }
 0x388   :  { %9816 = vmatmul.mubr.msk.bf16.vlgmr.msra.gmra.mxu1 %vm1177_vm3, %v1537_v22  ;;  %9822 = vmatmul.mubr.msk.bf16.vlgmr.msra.gmra.mxu0 %vm1177_vm3, %v1538_v58  ;;  %v1450_v1 = vpop.xlane.xlu1 %1449 }
 0x389   :  { %9826 = vmatpush3.bf16.msra.mxu1 %v14435_v7  ;;  %9832 = vmatpush3.bf16.msra.mxu0 %v14436_v20  ;;  %10595 = vrcp.f32 %v1450_v1 }
 0x38a   :  { %3737 = vrot.lane.b32.xlu1 %v11122_v39, %s10995_s23  ;;  %3173 = vrot.lane.b32.xlu0 %v11196_v40, %s10994_s22  ;;  %10597 = vrcp.f32 %v11723_v12  ;;  %v1540_v12 = vpack.c.bf16 %v1519_v27, %v1518_v24 }
 0x38b   :  { %v10584_v19 = vpop.eup %10583  ;;  %9827 = vmatprep.mubr.msk.bf16.mxu1 %vm10990_vm1, %v14430_v18  ;;  %9833 = vmatprep.mubr.msk.bf16.mxu0 %vm10990_vm1, %v14430_v18 }
 0x38c   :  { %v1453_v8 = vpop.xlane.xlu0 %1452  ;;  %9837 = vmatprep.subr.bf16.mxu1 %v14430_v18  ;;  %9843 = vmatprep.subr.bf16.mxu0 %v14430_v18  ;;  %v1517_v16 = vmul.f32 %v10584_v19, %v11610_v36  ;;  %v10586_v34 = vpop.eup %10585  ;;  %v14438_v36 = vld [vmem:[#allocation9_spill] sm:$0xff] }
 0x38d   :  { %10599 = vrcp.f32 %v1453_v8  ;;  %v1523_v42 = vmul.f32 %v10586_v34, %v11585_v15  ;;  %v2252_v23 = vpop.permute.xlu1 %2251 }
 0x38e   :  { %3831 = vrot.lane.b32.xlu1 %v11136_v50, %s10995_s23  ;;  %3690 = vrot.lane.b32.xlu0 %v11114_v32, %s10995_s23  ;;  %v1539_v9 = vpack.c.bf16 %v1517_v16, %v1516_v5  ;;  %v10588_v11 = vpop.eup %10587 }
 0x38f   :  { %v10590_v38 = vpop.eup %10589  ;;  %v1520_v44 = vmul.f32 %v10588_v11, %v11614_v61 }
 0x390   :  { %9828 = vmatmul.mubr.msk.bf16.vlgmr.msra.gmra.mxu1 %vm1177_vm3, %v1539_v9  ;;  %9834 = vmatmul.mubr.msk.bf16.vlgmr.msra.gmra.mxu0 %vm1177_vm3, %v1540_v12  ;;  %v1522_v30 = vmul.f32 %v10590_v38, %v11574_v63  ;;  %v2205_v0 = vpop.permute.xlu0 %2204 }
 0x391   :  { %9838 = vmatpush3.bf16.msra.mxu1 %v14437_v4  ;;  %9844 = vmatpush3.bf16.msra.mxu0 %v14438_v36 }
 0x392   :  { %v10592_v56 = vpop.eup %10591  ;;  %3925 = vrot.lane.b32.xlu1 %v11148_v60, %s10995_s23  ;;  %3784 = vrot.lane.b32.xlu0 %v11127_v43, %s10995_s23  ;;  %v1542_v15 = vpack.c.bf16 %v1523_v42, %v1522_v30 }
 0x393   :  { %9839 = vmatprep.mubr.msk.bf16.mxu1 %vm10990_vm1, %v14430_v18  ;;  %9845 = vmatprep.mubr.msk.bf16.mxu0 %vm10990_vm1, %v14430_v18  ;;  %v1521_v21 = vmul.f32 %v10592_v56, %v11618_v46  ;;  %v10594_v51 = vpop.eup %10593  ;;  %v14439_v46 = vld [vmem:[#allocation10_spill] sm:$0xff] }
 0x394   :  { %9849 = vmatprep.subr.bf16.mxu1 %v14430_v18  ;;  %9855 = vmatprep.subr.bf16.mxu0 %v14430_v18  ;;  %v1527_v14 = vmul.f32 %v10594_v51, %v11603_v33 }
 0x395   :  { %v1541_v10 = vpack.c.bf16 %v1521_v21, %v1520_v44 }
 0x396   :  { %4019 = vrot.lane.b32.xlu1 %v11160_v6, %s10995_s23  ;;  %3878 = vrot.lane.b32.xlu0 %v11131_v47, %s10995_s23  ;;  %v10596_v17 = vpop.eup %10595 }
 0x397   :  { %v10598_v61 = vpop.eup %10597  ;;  %v1524_v29 = vmul.f32 %v10596_v17, %v11622_v53 }
 0x398   :  { %9840 = vmatmul.mubr.msk.bf16.vlgmr.msra.gmra.mxu1 %vm1177_vm3, %v1541_v10  ;;  %9846 = vmatmul.mubr.msk.bf16.vlgmr.msra.gmra.mxu0 %vm1177_vm3, %v1542_v15  ;;  %v1526_v31 = vmul.f32 %v10598_v61, %v11592_v49 }
 0x399   :  { %9850 = vmatpush3.bf16.msra.mxu1 %v14439_v46  ;;  %9856 = vmatpush3.bf16.msra.mxu0 %v2205_v0 }
 0x39a   :  { %v10600_v63 = vpop.eup %10599  ;;  %4113 = vrot.lane.b32.xlu1 %v14431_v54, %s10995_s23  ;;  %3972 = vrot.lane.b32.xlu0 %v11145_v57, %s10995_s23  ;;  %v1544_v33 = vpack.c.bf16 %v1527_v14, %v1526_v31 }
 0x39b   :  { %9851 = vmatprep.mubr.msk.bf16.mxu1 %vm10990_vm1, %v14430_v18  ;;  %9857 = vmatprep.mubr.msk.bf16.mxu0 %vm10990_vm1, %v14430_v18  ;;  %v1525_v45 = vmul.f32 %v10600_v63, %v11626_v62 }
 0x39c   :  { %9861 = vmatprep.subr.bf16.mxu1 %v14430_v18  ;;  %9867 = vmatprep.subr.bf16.mxu0 %v14430_v18 }
 0x39d   :  { %v1543_v59 = vpack.c.bf16 %v1525_v45, %v1524_v29 }
 0x39e   :  { %4160 = vrot.lane.b32.xlu1 %v11169_v13, %s10995_s23  ;;  %4066 = vrot.lane.b32.xlu0 %v11157_v3, %s10995_s23 }
 0x3a0   :  { %9852 = vmatmul.mubr.msk.bf16.vlgmr.msra.gmra.mxu1 %vm1177_vm3, %v1543_v59  ;;  %9858 = vmatmul.mubr.msk.bf16.vlgmr.msra.gmra.mxu0 %vm1177_vm3, %v1544_v33 }
 0x3a1   :  { %9862 = vmatpush3.bf16.msra.mxu1 %v2252_v23  ;;  %9869 = vmatprep.mubr.msk.bf16.mxu0 %vm10990_vm1, %v14430_v18 }
 0x3a2   :  { %4254 = vrot.lane.b32.xlu1 %v11181_v25, %s10995_s23  ;;  %4207 = vrot.lane.b32.xlu0 %v14433_v2, %s10995_s23 }
 0x3a3   :  { %9863 = vmatprep.mubr.msk.bf16.mxu1 %vm10990_vm1, %v14430_v18  ;;  %9873 = vmatprep.subr.bf16.mxu1 %v14430_v18 }
 0x3bd   :  { %v1462_v49 = vpop.xlane.xlu1 %1461 }
 0x3be   :  { %10601 = vrcp.f32 %v1462_v49 }
 0x3c1   :  { %v2513_v53 = vpop.permute.xlu1 %2512  ;;  %v1465_v62 = vpop.xlane.xlu0 %1464 }
 0x3c2   :  { %10603 = vrcp.f32 %v1465_v62  ;;  %v2518_v9 = vsel %vm379_vm2, %v2513_v53, 0 }
 0x3c5   :  { %v2511_v41 = vpop.permute.xlu1 %2510  ;;  %v2462_v22 = vpop.permute.xlu0 %2461 }
 0x3c6   :  { %v2467_v58 = vsel %vm379_vm2, %v2462_v22, 0 }
 0x3c7   :  { %9868 = vmatpush3.bf16.xpose.msra.mxu0 %v2467_v58 }
 0x3c8   :  { %9879 = vmatprep.subr.bf16.mxu0 %v14430_v18 }
 0x3c9   :  { %v2615_v35 = vpop.permute.xlu1 %2614  ;;  %v2460_v52 = vpop.permute.xlu0 %2459 }
 0x3ca   :  { %v2620_v38 = vsel %vm379_vm2, %v2615_v35, 0 }
 0x3cb   :  { %v10602_v1 = vpop.eup %10601 }
 0x3cc   :  { %v1528_v19 = vmul.f32 %v10602_v1, %v11636_v48 }
 0x3cd   :  { %v2613_v26 = vpop.permute.xlu1 %2612  ;;  %v2564_v7 = vpop.permute.xlu0 %2563 }
 0x3ce   :  { %v2569_v20 = vsel %vm379_vm2, %v2564_v7, 0  ;;  %9870 = vmatmul.mubr.msk.bf16.vlgmr.msra.gmra.mxu0 %vm379_vm2, %v2460_v52 }
 0x3cf   :  { %v10604_v27 = vpop.eup %10603  ;;  %9880 = vmatpush3.bf16.xpose.msra.mxu0 %v2569_v20  ;;  %9881 = vmatprep.mubr.msk.bf16.mxu0 %vm10990_vm1, %v14430_v18 }
 0x3d0   :  { %v1529_v8 = vmul.f32 %v10604_v27, %v11640_v55  ;;  %9891 = vmatprep.subr.bf16.mxu0 %v14430_v18 }
 0x3d1   :  { %v2717_v5 = vpop.permute.xlu1 %2716  ;;  %v2562_v16 = vpop.permute.xlu0 %2561 }
 0x3d2   :  { %v1545_v24 = vpack.c.bf16 %v1529_v8, %v1528_v19  ;;  %v2722_v21 = vsel %vm379_vm2, %v2717_v5, 0 }
 0x3d4   :  { %9864 = vmatmul.mubr.msk.bf16.vlgmr.msra.gmra.mxu1 %vm1177_vm3, %v1545_v24 }
 0x3d5   :  { %9874 = vmatpush3.bf16.xpose.msra.mxu1 %v2518_v9  ;;  %v2715_v12 = vpop.permute.xlu1 %2714  ;;  %v2666_v34 = vpop.permute.xlu0 %2665  ;;  %9875 = vmatprep.mubr.msk.bf16.mxu1 %vm10990_vm1, %v14430_v18 }
 0x3d6   :  { %v2671_v11 = vsel %vm379_vm2, %v2666_v34, 0  ;;  %9882 = vmatmul.mubr.msk.bf16.vlgmr.msra.gmra.mxu0 %vm379_vm2, %v2562_v16  ;;  %9885 = vmatprep.subr.bf16.mxu1 %v14430_v18 }
 0x3d7   :  { %9892 = vmatpush3.bf16.xpose.msra.mxu0 %v2671_v11  ;;  %9893 = vmatprep.mubr.msk.bf16.mxu0 %vm10990_vm1, %v14430_v18 }
 0x3d8   :  { %9903 = vmatprep.subr.bf16.mxu0 %v14430_v18 }
 0x3d9   :  { %v2819_v48 = vpop.permute.xlu1 %2818  ;;  %v2664_v55 = vpop.permute.xlu0 %2663 }
 0x3da   :  { %v2824_v0 = vsel %vm379_vm2, %v2819_v48, 0 }
 0x3dc   :  { %9876 = vmatmul.mubr.msk.bf16.vlgmr.msra.gmra.mxu1 %vm379_vm2, %v2511_v41 }
 0x3dd   :  { %9886 = vmatpush3.bf16.xpose.msra.mxu1 %v2620_v38  ;;  %v2817_v4 = vpop.permute.xlu1 %2816  ;;  %v2768_v36 = vpop.permute.xlu0 %2767  ;;  %9887 = vmatprep.mubr.msk.bf16.mxu1 %vm10990_vm1, %v14430_v18 }
 0x3de   :  { %v2773_v56 = vsel %vm379_vm2, %v2768_v36, 0  ;;  %9894 = vmatmul.mubr.msk.bf16.vlgmr.msra.gmra.mxu0 %vm379_vm2, %v2664_v55  ;;  %9897 = vmatprep.subr.bf16.mxu1 %v14430_v18 }
 0x3df   :  { %9904 = vmatpush3.bf16.xpose.msra.mxu0 %v2773_v56  ;;  %9905 = vmatprep.mubr.msk.bf16.mxu0 %vm10990_vm1, %v14430_v18 }
 0x3e0   :  { %9915 = vmatprep.subr.bf16.mxu0 %v14430_v18 }
 0x3e1   :  { %v2921_v42 = vpop.permute.xlu1 %2920  ;;  %v2766_v44 = vpop.permute.xlu0 %2765 }
 0x3e2   :  { %v2926_v45 = vsel %vm379_vm2, %v2921_v42, 0 }
 0x3e4   :  { %9888 = vmatmul.mubr.msk.bf16.vlgmr.msra.gmra.mxu1 %vm379_vm2, %v2613_v26 }
 0x3e5   :  { %9898 = vmatpush3.bf16.xpose.msra.mxu1 %v2722_v21  ;;  %v2919_v30 = vpop.permute.xlu1 %2918  ;;  %v2870_v10 = vpop.permute.xlu0 %2869  ;;  %9899 = vmatprep.mubr.msk.bf16.mxu1 %vm10990_vm1, %v14430_v18 }
 0x3e6   :  { %v2875_v15 = vsel %vm379_vm2, %v2870_v10, 0  ;;  %9906 = vmatmul.mubr.msk.bf16.vlgmr.msra.gmra.mxu0 %vm379_vm2, %v2766_v44  ;;  %9909 = vmatprep.subr.bf16.mxu1 %v14430_v18 }
 0x3e7   :  { %9916 = vmatpush3.bf16.xpose.msra.mxu0 %v2875_v15  ;;  %9917 = vmatprep.mubr.msk.bf16.mxu0 %vm10990_vm1, %v14430_v18 }
 0x3e8   :  { %9927 = vmatprep.subr.bf16.mxu0 %v14430_v18 }
 0x3e9   :  { %v3023_v51 = vpop.permute.xlu1 %3022  ;;  %v2868_v17 = vpop.permute.xlu0 %2867 }
 0x3ea   :  { %v3028_v53 = vsel %vm379_vm2, %v3023_v51, 0 }
 0x3ec   :  { %9900 = vmatmul.mubr.msk.bf16.vlgmr.msra.gmra.mxu1 %vm379_vm2, %v2715_v12 }
 0x3ed   :  { %9910 = vmatpush3.bf16.xpose.msra.mxu1 %v2824_v0  ;;  %v3021_v61 = vpop.permute.xlu1 %3020  ;;  %v2972_v46 = vpop.permute.xlu0 %2971  ;;  %9911 = vmatprep.mubr.msk.bf16.mxu1 %vm10990_vm1, %v14430_v18 }
 0x3ee   :  { %v2977_v63 = vsel %vm379_vm2, %v2972_v46, 0  ;;  %9918 = vmatmul.mubr.msk.bf16.vlgmr.msra.gmra.mxu0 %vm379_vm2, %v2868_v17  ;;  %9921 = vmatprep.subr.bf16.mxu1 %v14430_v18 }
 0x3ef   :  { %9928 = vmatpush3.bf16.xpose.msra.mxu0 %v2977_v63  ;;  %9929 = vmatprep.mubr.msk.bf16.mxu0 %vm10990_vm1, %v14430_v18 }
 0x3f0   :  { %9939 = vmatprep.subr.bf16.mxu0 %v14430_v18 }
 0x3f1   :  { %v3125_v14 = vpop.permute.xlu1 %3124  ;;  %v2970_v29 = vpop.permute.xlu0 %2969 }
 0x3f2   :  { %v3130_v58 = vsel %vm379_vm2, %v3125_v14, 0 }
 0x3f4   :  { %9912 = vmatmul.mubr.msk.bf16.vlgmr.msra.gmra.mxu1 %vm379_vm2, %v2817_v4 }
 0x3f5   :  { %9922 = vmatpush3.bf16.xpose.msra.mxu1 %v2926_v45  ;;  %v3123_v31 = vpop.permute.xlu1 %3122  ;;  %v3074_v59 = vpop.permute.xlu0 %3073  ;;  %9923 = vmatprep.mubr.msk.bf16.mxu1 %vm10990_vm1, %v14430_v18 }
 0x3f6   :  { %v3079_v33 = vsel %vm379_vm2, %v3074_v59, 0  ;;  %9930 = vmatmul.mubr.msk.bf16.vlgmr.msra.gmra.mxu0 %vm379_vm2, %v2970_v29  ;;  %9933 = vmatprep.subr.bf16.mxu1 %v14430_v18 }
 0x3f7   :  { %9940 = vmatpush3.bf16.xpose.msra.mxu0 %v3079_v33  ;;  %9941 = vmatprep.mubr.msk.bf16.mxu0 %vm10990_vm1, %v14430_v18 }
 0x3f8   :  { %9951 = vmatprep.subr.bf16.mxu0 %v14430_v18 }
 0x3f9   :  { %v3072_v23 = vpop.permute.xlu0 %3071  ;;  %v3227_v49 = vpop.permute.xlu1 %3226 }
 0x3fa   :  { %v3232_v1 = vsel %vm379_vm2, %v3227_v49, 0 }
 0x3fc   :  { %9924 = vmatmul.mubr.msk.bf16.vlgmr.msra.gmra.mxu1 %vm379_vm2, %v2919_v30 }
 0x3fd   :  { %9934 = vmatpush3.bf16.xpose.msra.mxu1 %v3028_v53  ;;  %v3176_v62 = vpop.permute.xlu0 %3175  ;;  %9935 = vmatprep.mubr.msk.bf16.mxu1 %vm10990_vm1, %v14430_v18  ;;  %v3225_v22 = vpop.permute.xlu1 %3224 }
 0x3fe   :  { %v3181_v41 = vsel %vm379_vm2, %v3176_v62, 0  ;;  %9942 = vmatmul.mubr.msk.bf16.vlgmr.msra.gmra.mxu0 %vm379_vm2, %v3072_v23  ;;  %9945 = vmatprep.subr.bf16.mxu1 %v14430_v18 }
 0x3ff   :  { %9952 = vmatpush3.bf16.xpose.msra.mxu0 %v3181_v41  ;;  %9953 = vmatprep.mubr.msk.bf16.mxu0 %vm10990_vm1, %v14430_v18 }
 0x400   :  { %9963 = vmatprep.subr.bf16.mxu0 %v14430_v18 }
 0x401   :  { %v3174_v35 = vpop.permute.xlu0 %3173  ;;  %v3644_v52 = vpop.permute.xlu1 %3643 }
 0x404   :  { %9936 = vmatmul.mubr.msk.bf16.vlgmr.msra.gmra.mxu1 %vm379_vm2, %v3021_v61 }
 0x405   :  { %9946 = vmatpush3.bf16.xpose.msra.mxu1 %v3130_v58  ;;  %9947 = vmatprep.mubr.msk.bf16.mxu1 %vm10990_vm1, %v14430_v18  ;;  %v3691_v19 = vpop.permute.xlu0 %3690 }
 0x406   :  { %9954 = vmatmul.mubr.msk.bf16.vlgmr.msra.gmra.mxu0 %vm379_vm2, %v3174_v35  ;;  %9957 = vmatprep.subr.bf16.mxu1 %v14430_v18 }
 0x407   :  { %9964 = vmatpush3.bf16.msra.mxu0 %v3644_v52  ;;  %9965 = vmatprep.mubr.msk.bf16.mxu0 %vm10990_vm1, %v14430_v18 }
 0x408   :  { %9975 = vmatprep.subr.bf16.mxu0 %v14430_v18 }
 0x40c   :  { %9948 = vmatmul.mubr.msk.bf16.vlgmr.msra.gmra.mxu1 %vm379_vm2, %v3123_v31 }
 0x40d   :  { %9958 = vmatpush3.bf16.xpose.msra.mxu1 %v3232_v1  ;;  %9959 = vmatprep.mubr.msk.bf16.mxu1 %vm10990_vm1, %v14430_v18 }
 0x40e   :  { %9969 = vmatprep.subr.bf16.mxu1 %v14430_v18 }
 0x40f   :  { %v1586_v26 = vpop.f32.mrf.mxu0 }
 0x410   :  { %v9237_v7 = vpack.c.bf16 %v1586_v26, %v1586_v26 }
 0x411   :  { %v9775_v20 = vpop.f32.mrf.mxu0 }
 0x412   :  { %2427 = vst.msk [vmem:[%s14414_s3] sm:$0xf] %vm2426_vm4, %v9237_v7 }
 0x413   :  { %v1589_v27 = vpop.f32.mrf.mxu0 }
 0x414   :  { %v9238_v8 = vpack.c.bf16 %v1589_v27, %v1589_v27  ;;  %9960 = vmatmul.mubr.msk.bf16.vlgmr.msra.gmra.mxu1 %vm379_vm2, %v3225_v22 }
 0x415   :  { %9970 = vmatpush3.bf16.msra.mxu1 %v3691_v19  ;;  %v9776_v5 = vpop.f32.mrf.mxu0  ;;  %9971 = vmatprep.mubr.msk.bf16.mxu1 %vm10990_vm1, %v14430_v18 }
 0x416   :  { %2428 = vst.msk [vmem:[%s14414_s3 + $0x4] sm:$0xf] %vm2426_vm4, %v9238_v8  ;;  %9981 = vmatprep.subr.bf16.mxu1 %v14430_v18 }
 0x417   :  { %v1633_v16 = vpop.f32.mrf.mxu1 }
 0x418   :  { %v9239_v24 = vpack.c.bf16 %v1633_v16, %v1633_v16 }
 0x419   :  { %v9781_v9 = vpop.f32.mrf.mxu1 }
 0x41a   :  { %2429 = vst.msk [vmem:[%s14414_s3 + $0x8] sm:$0xf] %vm2426_vm4, %v9239_v24 }
 0x41b   :  { %v1636_v12 = vpop.f32.mrf.mxu1 }
 0x41c   :  { %v9240_v34 = vpack.c.bf16 %v1636_v12, %v1636_v12 }
 0x41d   :  { %v9782_v11 = vpop.f32.mrf.mxu1 }
 0x41e   :  { %2430 = vst.msk [vmem:[%s14414_s3 + $0xc] sm:$0xf] %vm2426_vm4, %v9240_v34 }
 0x41f   :  { %v1680_v48 = vpop.f32.mrf.mxu0 }
 0x420   :  { %v9241_v55 = vpack.c.bf16 %v1680_v48, %v1680_v48 }
 0x421   :  { %v9787_v38 = vpop.f32.mrf.mxu0 }
 0x422   :  { %2431 = vst.msk [vmem:[%s14414_s3 + $0x10] sm:$0xf] %vm2426_vm4, %v9241_v55 }
 0x423   :  { %v1683_v4 = vpop.f32.mrf.mxu0 }
 0x424   :  { %v9242_v36 = vpack.c.bf16 %v1683_v4, %v1683_v4 }
 0x425   :  { %v9788_v56 = vpop.f32.mrf.mxu0 }
 0x426   :  { %2432 = vst.msk [vmem:[%s14414_s3 + $0x14] sm:$0xf] %vm2426_vm4, %v9242_v36 }
 0x427   :  { %v1727_v42 = vpop.f32.mrf.mxu1 }
 0x428   :  { %v9243_v44 = vpack.c.bf16 %v1727_v42, %v1727_v42 }
 0x429   :  { %v9793_v21 = vpop.f32.mrf.mxu1 }
 0x42a   :  { %2433 = vst.msk [vmem:[%s14414_s3 + $0x18] sm:$0xf] %vm2426_vm4, %v9243_v44 }
 0x42b   :  { %v1730_v30 = vpop.f32.mrf.mxu1 }
 0x42c   :  { %v9244_v10 = vpack.c.bf16 %v1730_v30, %v1730_v30 }
 0x42d   :  { %v9794_v15 = vpop.f32.mrf.mxu1 }
 0x42e   :  { %2434 = vst.msk [vmem:[%s14414_s3 + $0x1c] sm:$0xf] %vm2426_vm4, %v9244_v10 }
 0x430   :  { %v1774_v51 = vpop.f32.mrf.mxu0 }
 0x431   :  { %v9245_v17 = vpack.c.bf16 %v1774_v51, %v1774_v51 }
 0x432   :  { %v9799_v0 = vpop.f32.mrf.mxu0 }
 0x433   :  { %2435 = vst.msk [vmem:[%s14414_s3 + $0x20] sm:$0xf] %vm2426_vm4, %v9245_v17 }
 0x434   :  { %v1777_v61 = vpop.f32.mrf.mxu0 }
 0x435   :  { %v9246_v46 = vpack.c.bf16 %v1777_v61, %v1777_v61 }
 0x436   :  { %v9800_v63 = vpop.f32.mrf.mxu0 }
 0x437   :  { %2436 = vst.msk [vmem:[%s14414_s3 + $0x24] sm:$0xf] %vm2426_vm4, %v9246_v46 }
 0x438   :  { %v1821_v14 = vpop.f32.mrf.mxu1 }
 0x439   :  { %v9247_v29 = vpack.c.bf16 %v1821_v14, %v1821_v14 }
 0x43a   :  { %v9805_v45 = vpop.f32.mrf.mxu1 }
 0x43b   :  { %2437 = vst.msk [vmem:[%s14414_s3 + $0x28] sm:$0xf] %vm2426_vm4, %v9247_v29 }
 0x43c   :  { %v1824_v31 = vpop.f32.mrf.mxu1 }
 0x43d   :  { %v9248_v59 = vpack.c.bf16 %v1824_v31, %v1824_v31 }
 0x43e   :  { %v9806_v33 = vpop.f32.mrf.mxu1 }
 0x43f   :  { %2438 = vst.msk [vmem:[%s14414_s3 + $0x2c] sm:$0xf] %vm2426_vm4, %v9248_v59 }
 0x440   :  { %v1868_v23 = vpop.f32.mrf.mxu0 }
 0x441   :  { %v9249_v49 = vpack.c.bf16 %v1868_v23, %v1868_v23 }
 0x442   :  { %v9811_v53 = vpop.f32.mrf.mxu0 }
 0x443   :  { %2439 = vst.msk [vmem:[%s14414_s3 + $0x30] sm:$0xf] %vm2426_vm4, %v9249_v49 }
 0x444   :  { %v1871_v62 = vpop.f32.mrf.mxu0 }
 0x445   :  { %v9250_v41 = vpack.c.bf16 %v1871_v62, %v1871_v62 }
 0x446   :  { %v9812_v22 = vpop.f32.mrf.mxu0 }
 0x447   :  { %2440 = vst.msk [vmem:[%s14414_s3 + $0x34] sm:$0xf] %vm2426_vm4, %v9250_v41 }
 0x448   :  { %v1915_v58 = vpop.f32.mrf.mxu1  ;;  %v1962_v35 = vpop.f32.mrf.mxu0 }
 0x449   :  { %v9251_v52 = vpack.c.bf16 %v1915_v58, %v1915_v58  ;;  %v9253_v1 = vpack.c.bf16 %v1962_v35, %v1962_v35 }
 0x44a   :  { %v9817_v26 = vpop.f32.mrf.mxu1  ;;  %v9823_v7 = vpop.f32.mrf.mxu0 }
 0x44b   :  { %2441 = vst.msk [vmem:[%s14414_s3 + $0x38] sm:$0xf] %vm2426_vm4, %v9251_v52  ;;  %2443 = vst.msk [vmem:[%s14414_s3 + $0x40] sm:$0xf] %vm2426_vm4, %v9253_v1 }
 0x44c   :  { %v1918_v20 = vpop.f32.mrf.mxu1  ;;  %v1965_v27 = vpop.f32.mrf.mxu0 }
 0x44d   :  { %v9252_v19 = vpack.c.bf16 %v1918_v20, %v1918_v20  ;;  %v9254_v8 = vpack.c.bf16 %v1965_v27, %v1965_v27 }
 0x44e   :  { %v9818_v5 = vpop.f32.mrf.mxu1  ;;  %v9824_v16 = vpop.f32.mrf.mxu0 }
 0x44f   :  { %2442 = vst.msk [vmem:[%s14414_s3 + $0x3c] sm:$0xf] %vm2426_vm4, %v9252_v19  ;;  %2444 = vst.msk [vmem:[%s14414_s3 + $0x44] sm:$0xf] %vm2426_vm4, %v9254_v8 }
 0x450   :  { %v2009_v24 = vpop.f32.mrf.mxu1  ;;  %v2056_v9 = vpop.f32.mrf.mxu0 }
 0x451   :  { %v9255_v12 = vpack.c.bf16 %v2009_v24, %v2009_v24  ;;  %v9257_v34 = vpack.c.bf16 %v2056_v9, %v2056_v9 }
 0x452   :  { %v9829_v11 = vpop.f32.mrf.mxu1  ;;  %v9835_v48 = vpop.f32.mrf.mxu0 }
 0x453   :  { %2445 = vst.msk [vmem:[%s14414_s3 + $0x48] sm:$0xf] %vm2426_vm4, %v9255_v12  ;;  %2447 = vst.msk [vmem:[%s14414_s3 + $0x50] sm:$0xf] %vm2426_vm4, %v9257_v34 }
 0x454   :  { %v2012_v55 = vpop.f32.mrf.mxu1  ;;  %v2059_v38 = vpop.f32.mrf.mxu0 }
 0x455   :  { %v9256_v4 = vpack.c.bf16 %v2012_v55, %v2012_v55  ;;  %v9258_v36 = vpack.c.bf16 %v2059_v38, %v2059_v38 }
 0x456   :  { %v9830_v56 = vpop.f32.mrf.mxu1  ;;  %v9836_v42 = vpop.f32.mrf.mxu0 }
 0x457   :  { %2446 = vst.msk [vmem:[%s14414_s3 + $0x4c] sm:$0xf] %vm2426_vm4, %v9256_v4  ;;  %2448 = vst.msk [vmem:[%s14414_s3 + $0x54] sm:$0xf] %vm2426_vm4, %v9258_v36 }
 0x458   :  { %v2103_v44 = vpop.f32.mrf.mxu1  ;;  %v2150_v21 = vpop.f32.mrf.mxu0 }
 0x459   :  { %v9259_v30 = vpack.c.bf16 %v2103_v44, %v2103_v44  ;;  %v9261_v10 = vpack.c.bf16 %v2150_v21, %v2150_v21 }
 0x45a   :  { %v9841_v15 = vpop.f32.mrf.mxu1  ;;  %v9847_v51 = vpop.f32.mrf.mxu0 }
 0x45b   :  { %2449 = vst.msk [vmem:[%s14414_s3 + $0x58] sm:$0xf] %vm2426_vm4, %v9259_v30  ;;  %2451 = vst.msk [vmem:[%s14414_s3 + $0x60] sm:$0xf] %vm2426_vm4, %v9261_v10 }
 0x45c   :  { %v2106_v17 = vpop.f32.mrf.mxu1  ;;  %v2153_v0 = vpop.f32.mrf.mxu0 }
 0x45d   :  { %v9260_v61 = vpack.c.bf16 %v2106_v17, %v2106_v17  ;;  %v9262_v46 = vpack.c.bf16 %v2153_v0, %v2153_v0 }
 0x45e   :  { %v9842_v63 = vpop.f32.mrf.mxu1  ;;  %v9848_v14 = vpop.f32.mrf.mxu0 }
 0x45f   :  { %2450 = vst.msk [vmem:[%s14414_s3 + $0x5c] sm:$0xf] %vm2426_vm4, %v9260_v61  ;;  %2452 = vst.msk [vmem:[%s14414_s3 + $0x64] sm:$0xf] %vm2426_vm4, %v9262_v46 }
 0x460   :  { %v2197_v29 = vpop.f32.mrf.mxu1  ;;  %v2244_v45 = vpop.f32.mrf.mxu0 }
 0x461   :  { %v9263_v31 = vpack.c.bf16 %v2197_v29, %v2197_v29  ;;  %v9265_v59 = vpack.c.bf16 %v2244_v45, %v2244_v45 }
 0x462   :  { %v9853_v33 = vpop.f32.mrf.mxu1  ;;  %v9859_v23 = vpop.f32.mrf.mxu0 }
 0x463   :  { %2453 = vst.msk [vmem:[%s14414_s3 + $0x68] sm:$0xf] %vm2426_vm4, %v9263_v31  ;;  %2455 = vst.msk [vmem:[%s14414_s3 + $0x70] sm:$0xf] %vm2426_vm4, %v9265_v59 }
 0x464   :  { %v2200_v49 = vpop.f32.mrf.mxu1  ;;  %v2247_v53 = vpop.f32.mrf.mxu0 }
 0x465   :  { %v9264_v62 = vpack.c.bf16 %v2200_v49, %v2200_v49  ;;  %v9266_v41 = vpack.c.bf16 %v2247_v53, %v2247_v53 }
 0x466   :  { %v9854_v22 = vpop.f32.mrf.mxu1  ;;  %v9860_v58 = vpop.f32.mrf.mxu0 }
 0x467   :  { %2454 = vst.msk [vmem:[%s14414_s3 + $0x6c] sm:$0xf] %vm2426_vm4, %v9264_v62  ;;  %2456 = vst.msk [vmem:[%s14414_s3 + $0x74] sm:$0xf] %vm2426_vm4, %v9266_v41 }
 0x48e   :  { %v12047_v35 = vpop.f32.mrf.mxu0 }
 0x48f   :  { %v3275_v52 = vsel %vm1177_vm3, %v12047_v35, -inf }
 0x490   :  { %3276 = vmax.xlane.f32.xlu0 %v3275_v52  ;;  %v9871_v1 = vpop.f32.mrf.mxu0 }
 0x492   :  { %v12051_v26 = vpop.f32.mrf.mxu0 }
 0x493   :  { %v3278_v7 = vsel %vm1177_vm3, %v12051_v26, -inf }
 0x494   :  { %v2291_v20 = vpop.f32.mrf.mxu1  ;;  %3279 = vmax.xlane.f32.xlu1 %v3278_v7  ;;  %v9872_v27 = vpop.f32.mrf.mxu0 }
 0x495   :  { %v9267_v19 = vpack.c.bf16 %v2291_v20, %v2291_v20 }
 0x496   :  { %v9865_v8 = vpop.f32.mrf.mxu1  ;;  %v12055_v5 = vpop.f32.mrf.mxu0 }
 0x497   :  { %2457 = vst.msk [vmem:[%s14414_s3 + $0x78] sm:$0xf] %vm2426_vm4, %v9267_v19  ;;  %v3287_v16 = vsel %vm1177_vm3, %v12055_v5, -inf }
 0x498   :  { %v2294_v24 = vpop.f32.mrf.mxu1  ;;  %3288 = vmax.xlane.f32.xlu1 %v3287_v16  ;;  %v9883_v9 = vpop.f32.mrf.mxu0 }
 0x499   :  { %v9268_v12 = vpack.c.bf16 %v2294_v24, %v2294_v24 }
 0x49a   :  { %v9866_v34 = vpop.f32.mrf.mxu1  ;;  %v12063_v11 = vpop.f32.mrf.mxu0 }
 0x49b   :  { %2458 = vst.msk [vmem:[%s14414_s3 + $0x7c] sm:$0xf] %vm2426_vm4, %v9268_v12  ;;  %v3290_v17 = vsel %vm1177_vm3, %v12063_v11, -inf }
 0x49c   :  { %v12069_v48 = vpop.f32.mrf.mxu1  ;;  %v9884_v55 = vpop.f32.mrf.mxu0 }
 0x49d   :  { %v3281_v38 = vsel %vm1177_vm3, %v12069_v48, -inf }
 0x49e   :  { %v9877_v4 = vpop.f32.mrf.mxu1  ;;  %3282 = vmax.xlane.f32.xlu0 %v3281_v38  ;;  %v12073_v36 = vpop.f32.mrf.mxu0 }
 0x49f   :  { %v3299_v29 = vsel %vm1177_vm3, %v12073_v36, -inf }
 0x4a0   :  { %v12075_v56 = vpop.f32.mrf.mxu1  ;;  %v9895_v42 = vpop.f32.mrf.mxu0 }
 0x4a1   :  { %v3284_v44 = vsel %vm1177_vm3, %v12075_v56, -inf }
 0x4a2   :  { %v9878_v21 = vpop.f32.mrf.mxu1  ;;  %3285 = vmax.xlane.f32.xlu0 %v3284_v44  ;;  %v12079_v30 = vpop.f32.mrf.mxu0 }
 0x4a3   :  { %v3302_v49 = vsel %vm1177_vm3, %v12079_v30, -inf }
 0x4a4   :  { %v12081_v10 = vpop.f32.mrf.mxu1  ;;  %v9896_v15 = vpop.f32.mrf.mxu0 }
 0x4a5   :  { %v3293_v51 = vsel %vm1177_vm3, %v12081_v10, -inf }
 0x4a6   :  { %v9889_v0 = vpop.f32.mrf.mxu1  ;;  %3294 = vmax.xlane.f32.xlu1 %v3293_v51  ;;  %3291 = vmax.xlane.f32.xlu0 %v3290_v17  ;;  %v12087_v61 = vpop.f32.mrf.mxu0 }
 0x4a7   :  { %v3311_v52 = vsel %vm1177_vm3, %v12087_v61, -inf }
 0x4a8   :  { %v12089_v46 = vpop.f32.mrf.mxu1  ;;  %v9907_v63 = vpop.f32.mrf.mxu0 }
 0x4a9   :  { %v3296_v14 = vsel %vm1177_vm3, %v12089_v46, -inf }
 0x4aa   :  { %v9890_v45 = vpop.f32.mrf.mxu1  ;;  %3297 = vmax.xlane.f32.xlu0 %v3296_v14  ;;  %3300 = vmax.xlane.f32.xlu1 %v3299_v29  ;;  %v12095_v31 = vpop.f32.mrf.mxu0 }
 0x4ab   :  { %v3314_v8 = vsel %vm1177_vm3, %v12095_v31, -inf }
 0x4ac   :  { %v12097_v59 = vpop.f32.mrf.mxu1  ;;  %v9908_v33 = vpop.f32.mrf.mxu0 }
 0x4ad   :  { %v3305_v23 = vsel %vm1177_vm3, %v12097_v59, -inf }
 0x4ae   :  { %v9901_v53 = vpop.f32.mrf.mxu1  ;;  %3306 = vmax.xlane.f32.xlu1 %v3305_v23  ;;  %3303 = vmax.xlane.f32.xlu0 %v3302_v49  ;;  %v12103_v62 = vpop.f32.mrf.mxu0 }
 0x4af   :  { %v3323_v55 = vsel %vm1177_vm3, %v12103_v62, -inf }
 0x4b0   :  { %v12105_v41 = vpop.f32.mrf.mxu1  ;;  %v9919_v22 = vpop.f32.mrf.mxu0 }
 0x4b1   :  { %v3308_v58 = vsel %vm1177_vm3, %v12105_v41, -inf }
 0x4b2   :  { %v9902_v1 = vpop.f32.mrf.mxu1  ;;  %3309 = vmax.xlane.f32.xlu0 %v3308_v58  ;;  %3312 = vmax.xlane.f32.xlu1 %v3311_v52  ;;  %v12111_v7 = vpop.f32.mrf.mxu0 }
 0x4b3   :  { %v3326_v15 = vsel %vm1177_vm3, %v12111_v7, -inf }
 0x4b4   :  { %v12113_v20 = vpop.f32.mrf.mxu1  ;;  %v9920_v27 = vpop.f32.mrf.mxu0 }
 0x4b5   :  { %v3317_v19 = vsel %vm1177_vm3, %v12113_v20, -inf }
 0x4b6   :  { %v9913_v16 = vpop.f32.mrf.mxu1  ;;  %3318 = vmax.xlane.f32.xlu1 %v3317_v19  ;;  %3315 = vmax.xlane.f32.xlu0 %v3314_v8  ;;  %v12119_v24 = vpop.f32.mrf.mxu0 }
 0x4b7   :  { %v3335_v29 = vsel %vm1177_vm3, %v12119_v24, -inf }
 0x4b8   :  { %v12121_v9 = vpop.f32.mrf.mxu1  ;;  %v9931_v12 = vpop.f32.mrf.mxu0 }
 0x4b9   :  { %v3320_v34 = vsel %vm1177_vm3, %v12121_v9, -inf }
 0x4ba   :  { %v9914_v38 = vpop.f32.mrf.mxu1  ;;  %3321 = vmax.xlane.f32.xlu0 %v3320_v34  ;;  %3324 = vmax.xlane.f32.xlu1 %v3323_v55  ;;  %v12127_v4 = vpop.f32.mrf.mxu0 }
 0x4bb   :  { %v3338_v22 = vsel %vm1177_vm3, %v12127_v4, -inf }
 0x4bc   :  { %v12129_v42 = vpop.f32.mrf.mxu1  ;;  %v9932_v44 = vpop.f32.mrf.mxu0 }
 0x4bd   :  { %v3329_v21 = vsel %vm1177_vm3, %v12129_v42, -inf }
 0x4be   :  { %v9925_v51 = vpop.f32.mrf.mxu1  ;;  %3330 = vmax.xlane.f32.xlu1 %v3329_v21  ;;  %3327 = vmax.xlane.f32.xlu0 %v3326_v15  ;;  %v12135_v17 = vpop.f32.mrf.mxu0 }
 0x4bf   :  { %v3347_v8 = vsel %vm1177_vm3, %v12135_v17, -inf }
 0x4c0   :  { %v12137_v0 = vpop.f32.mrf.mxu1  ;;  %v9943_v63 = vpop.f32.mrf.mxu0 }
 0x4c1   :  { %v3332_v14 = vsel %vm1177_vm3, %v12137_v0, -inf }
 0x4c2   :  { %v9926_v45 = vpop.f32.mrf.mxu1  ;;  %3333 = vmax.xlane.f32.xlu0 %v3332_v14  ;;  %3336 = vmax.xlane.f32.xlu1 %v3335_v29  ;;  %v12143_v33 = vpop.f32.mrf.mxu0 }
 0x4c3   :  { %v3350_v44 = vsel %vm1177_vm3, %v12143_v33, -inf }
 0x4c4   :  { %v12145_v23 = vpop.f32.mrf.mxu1  ;;  %v9944_v49 = vpop.f32.mrf.mxu0 }
 0x4c5   :  { %v3341_v53 = vsel %vm1177_vm3, %v12145_v23, -inf }
 0x4c6   :  { %v9937_v58 = vpop.f32.mrf.mxu1  ;;  %3342 = vmax.xlane.f32.xlu1 %v3341_v53  ;;  %3339 = vmax.xlane.f32.xlu0 %v3338_v22  ;;  %v12151_v52 = vpop.f32.mrf.mxu0 }
 0x4c7   :  { %v3359_v63 = vsel %vm1177_vm3, %v12151_v52, -inf }
 0x4c8   :  { %v12153_v1 = vpop.f32.mrf.mxu1  ;;  %v9955_v27 = vpop.f32.mrf.mxu0 }
 0x4c9   :  { %v3344_v19 = vsel %vm1177_vm3, %v12153_v1, -inf }
 0x4ca   :  { %v9938_v16 = vpop.f32.mrf.mxu1  ;;  %3345 = vmax.xlane.f32.xlu0 %v3344_v19  ;;  %3348 = vmax.xlane.f32.xlu1 %v3347_v8  ;;  %v12159_v12 = vpop.f32.mrf.mxu0 }
 0x4cb   :  { %v3362_v49 = vsel %vm1177_vm3, %v12159_v12, -inf  ;;  %v12187_v19 = vpop.permute.xlu1 %3737  ;;  %v12191_v16 = vpop.permute.xlu0 %3784 }
 0x4cc   :  { %v12161_v34 = vpop.f32.mrf.mxu1  ;;  %v9956_v55 = vpop.f32.mrf.mxu0  ;;  %14441 = vst [vmem:[#allocation5_spill] sm:$0xff] %v12191_v16 }
 0x4cd   :  { %v3353_v38 = vsel %vm1177_vm3, %v12161_v34, -inf }
 0x4ce   :  { %v9949_v21 = vpop.f32.mrf.mxu1  ;;  %3354 = vmax.xlane.f32.xlu1 %v3353_v38  ;;  %3351 = vmax.xlane.f32.xlu0 %v3350_v44 }
 0x4cf   :  { %v12189_v8 = vpop.permute.xlu1 %3831  ;;  %v12195_v38 = vpop.permute.xlu0 %3878 }
 0x4d0   :  { %v12167_v15 = vpop.f32.mrf.mxu1  ;;  %14440 = vst [vmem:[#allocation2_spill] sm:$0xff] %v12189_v8  ;;  %14443 = vst [vmem:[#allocation4_spill] sm:$0xff] %v12195_v38 }
 0x4d1   :  { %v3356_v51 = vsel %vm1177_vm3, %v12167_v15, -inf }
 0x4d2   :  { %v9950_v14 = vpop.f32.mrf.mxu1  ;;  %3357 = vmax.xlane.f32.xlu0 %v3356_v51  ;;  %3360 = vmax.xlane.f32.xlu1 %v3359_v63 }
 0x4d3   :  { %v12193_v55 = vpop.permute.xlu1 %3925  ;;  %v12199_v21 = vpop.permute.xlu0 %3972 }
 0x4d4   :  { %v12173_v29 = vpop.f32.mrf.mxu1  ;;  %14442 = vst [vmem:[#allocation3_spill] sm:$0xff] %v12193_v55  ;;  %14445 = vst [vmem:[#allocation6_spill] sm:$0xff] %v12199_v21 }
 0x4d5   :  { %v3365_v45 = vsel %vm1177_vm3, %v12173_v29, -inf }
 0x4d6   :  { %v9961_v53 = vpop.f32.mrf.mxu1  ;;  %3366 = vmax.xlane.f32.xlu1 %v3365_v45  ;;  %3363 = vmax.xlane.f32.xlu0 %v3362_v49 }
 0x4d7   :  { %v12197_v44 = vpop.permute.xlu1 %4019  ;;  %v12203_v63 = vpop.permute.xlu0 %4066 }
 0x4d8   :  { %v12179_v22 = vpop.f32.mrf.mxu1  ;;  %14444 = vst [vmem:[#allocation7_spill] sm:$0xff] %v12197_v44  ;;  %14447 = vst [vmem:[#allocation9_spill] sm:$0xff] %v12203_v63 }
 0x4d9   :  { %v3368_v58 = vsel %vm1177_vm3, %v12179_v22, -inf }
 0x4da   :  { %v9962_v27 = vpop.f32.mrf.mxu1  ;;  %3369 = vmax.xlane.f32.xlu0 %v3368_v58 }
 0x4db   :  { %v12201_v51 = vpop.permute.xlu1 %4113  ;;  %v12207_v45 = vpop.permute.xlu0 %4207 }
 0x4dc   :  { %14446 = vst [vmem:[#allocation8_spill] sm:$0xff] %v12201_v51  ;;  %14449 = vst [vmem:[#allocation11_spill] sm:$0xff] %v12207_v45 }
 0x4df   :  { %v12205_v14 = vpop.permute.xlu1 %4160 }
 0x4e0   :  { %14448 = vst [vmem:[#allocation10_spill] sm:$0xff] %v12205_v14 }
 0x4e3   :  { %v12209_v49 = vpop.permute.xlu1 %4254 }
 0x4e4   :  { %14450 = vst [vmem:[#allocation12_spill] sm:$0xff] %v12209_v49 }
 0x4e7   :  { %4348 = vrot.lane.b32.xlu1 %v11193_v37, %s10995_s23 }
 0x4f0   :  { %4301 = vrot.lane.b32.xlu0 %v11196_v40, %s10995_s23  ;;  %s10996_s23 = smov 80  }
 0x519   :  { %v3277_v53 = vpop.xlane.xlu0 %3276 }
 0x51a   :  { %v3371_v58 = vsub.f32 %v12047_v35, %v3277_v53 }
 0x51c   :  { %v3403_v27 = vmul.f32 1.442695, %v3371_v58 }
 0x51d   :  { %v3280_v55 = vpop.xlane.xlu1 %3279 }
 0x51e   :  { %10605 = vpow2.f32 %v3403_v27  ;;  %v3372_v44 = vsub.f32 %v12051_v26, %v3280_v55 }
 0x520   :  { %v3405_v38 = vmul.f32 1.442695, %v3372_v44 }
 0x521   :  { %v3289_v21 = vpop.xlane.xlu1 %3288 }
 0x522   :  { %10607 = vpow2.f32 %v3405_v38  ;;  %v3375_v51 = vsub.f32 %v12055_v5, %v3289_v21 }
 0x524   :  { %v3411_v8 = vmul.f32 1.442695, %v3375_v51 }
 0x527   :  { %v3283_v63 = vpop.xlane.xlu0 %3282 }
 0x528   :  { %v3373_v14 = vsub.f32 %v12069_v48, %v3283_v63 }
 0x52a   :  { %v3407_v45 = vmul.f32 1.442695, %v3373_v14 }
 0x52b   :  { %v12215_v16 = vpop.eup %10605  ;;  %v3286_v49 = vpop.xlane.xlu0 %3285 }
 0x52c   :  { %10609 = vpow2.f32 %v3407_v45  ;;  %v3374_v35 = vsub.f32 %v12075_v56, %v3286_v49  ;;  %v3467_v53 = vsel %vm1177_vm3, %v12215_v16, 0.0 }
 0x52d   :  { %3468 = vadd.xlane.f32.xlu1 %v3467_v53  ;;  %10611 = vpow2.f32 %v3411_v8 }
 0x52e   :  { %v3409_v26 = vmul.f32 1.442695, %v3374_v35 }
 0x52f   :  { %v12220_v55 = vpop.eup %10607  ;;  %v3295_v5 = vpop.xlane.xlu1 %3294 }
 0x530   :  { %v3292_v38 = vpop.xlane.xlu0 %3291  ;;  %10613 = vpow2.f32 %v3409_v26  ;;  %v3377_v48 = vsub.f32 %v12081_v10, %v3295_v5  ;;  %v3470_v21 = vsel %vm1177_vm3, %v12220_v55, 0.0 }
 0x531   :  { %v3376_v44 = vsub.f32 %v12063_v11, %v3292_v38  ;;  %3471 = vadd.xlane.f32.xlu0 %v3470_v21 }
 0x532   :  { %v3415_v56 = vmul.f32 1.442695, %v3377_v48 }
 0x533   :  { %v3413_v51 = vmul.f32 1.442695, %v3376_v44  ;;  %v3301_v63 = vpop.xlane.xlu1 %3300 }
 0x534   :  { %v3298_v14 = vpop.xlane.xlu0 %3297  ;;  %10615 = vpow2.f32 %v3415_v56  ;;  %v3379_v8 = vsub.f32 %v12073_v36, %v3301_v63 }
 0x535   :  { %v3378_v45 = vsub.f32 %v12089_v46, %v3298_v14  ;;  %10617 = vpow2.f32 %v3413_v51 }
 0x536   :  { %v3419_v49 = vmul.f32 1.442695, %v3379_v8 }
 0x537   :  { %v3417_v58 = vmul.f32 1.442695, %v3378_v45  ;;  %v3307_v27 = vpop.xlane.xlu1 %3306 }
 0x538   :  { %v3304_v10 = vpop.xlane.xlu0 %3303  ;;  %10619 = vpow2.f32 %v3419_v49  ;;  %v3381_v11 = vsub.f32 %v12097_v59, %v3307_v27 }
 0x539   :  { %v3380_v35 = vsub.f32 %v12079_v30, %v3304_v10  ;;  %v12230_v53 = vpop.eup %10609  ;;  %10621 = vpow2.f32 %v3417_v58 }
 0x53a   :  { %v3423_v26 = vmul.f32 1.442695, %v3381_v11  ;;  %v3473_v36 = vsel %vm1177_vm3, %v12230_v53, 0.0  ;;  %v12234_v38 = vpop.eup %10611 }
 0x53b   :  { %v3421_v5 = vmul.f32 1.442695, %v3380_v35  ;;  %v3313_v46 = vpop.xlane.xlu1 %3312  ;;  %3474 = vadd.xlane.f32.xlu1 %v3473_v36  ;;  %v3479_v51 = vsel %vm1177_vm3, %v12234_v38, 0.0 }
 0x53c   :  { %v3310_v48 = vpop.xlane.xlu0 %3309  ;;  %10623 = vpow2.f32 %v3423_v26  ;;  %v3383_v44 = vsub.f32 %v12087_v61, %v3313_v46 }
 0x53d   :  { %v3382_v59 = vsub.f32 %v12105_v41, %v3310_v48  ;;  %v12238_v21 = vpop.eup %10613  ;;  %10625 = vpow2.f32 %v3421_v5 }
 0x53e   :  { %v3427_v30 = vmul.f32 1.442695, %v3383_v44  ;;  %v3476_v63 = vsel %vm1177_vm3, %v12238_v21, 0.0 }
 0x53f   :  { %v3425_v56 = vmul.f32 1.442695, %v3382_v59  ;;  %v3319_v14 = vpop.xlane.xlu1 %3318  ;;  %3480 = vadd.xlane.f32.xlu1 %v3479_v51  ;;  %3477 = vadd.xlane.f32.xlu0 %v3476_v63 }
 0x540   :  { %v3316_v8 = vpop.xlane.xlu0 %3315  ;;  %10627 = vpow2.f32 %v3427_v30  ;;  %v3385_v61 = vsub.f32 %v12113_v20, %v3319_v14 }
 0x541   :  { %v3384_v41 = vsub.f32 %v12095_v31, %v3316_v8  ;;  %v12246_v45 = vpop.eup %10615  ;;  %10629 = vpow2.f32 %v3425_v56 }
 0x542   :  { %v12248_v49 = vpop.eup %10617  ;;  %v3431_v58 = vmul.f32 1.442695, %v3385_v61  ;;  %v3485_v10 = vsel %vm1177_vm3, %v12246_v45, 0.0 }
 0x543   :  { %v3429_v27 = vmul.f32 1.442695, %v3384_v41  ;;  %v3325_v11 = vpop.xlane.xlu1 %3324  ;;  %3486 = vadd.xlane.f32.xlu1 %v3485_v10  ;;  %v3482_v35 = vsel %vm1177_vm3, %v12248_v49, 0.0 }
 0x544   :  { %v3322_v26 = vpop.xlane.xlu0 %3321  ;;  %10631 = vpow2.f32 %v3431_v58  ;;  %v3387_v20 = vsub.f32 %v12103_v62, %v3325_v11  ;;  %3483 = vadd.xlane.f32.xlu0 %v3482_v35 }
 0x545   :  { %v3386_v31 = vsub.f32 %v12121_v9, %v3322_v26  ;;  %v12256_v5 = vpop.eup %10619  ;;  %10633 = vpow2.f32 %v3429_v27 }
 0x546   :  { %v12258_v36 = vpop.eup %10621  ;;  %v3435_v46 = vmul.f32 1.442695, %v3387_v20  ;;  %v3491_v44 = vsel %vm1177_vm3, %v12256_v5, 0.0 }
 0x547   :  { %v3433_v48 = vmul.f32 1.442695, %v3386_v31  ;;  %v3331_v59 = vpop.xlane.xlu1 %3330  ;;  %3492 = vadd.xlane.f32.xlu1 %v3491_v44  ;;  %v3488_v30 = vsel %vm1177_vm3, %v12258_v36, 0.0 }
 0x548   :  { %v3328_v56 = vpop.xlane.xlu0 %3327  ;;  %10635 = vpow2.f32 %v3435_v46  ;;  %v3389_v62 = vsub.f32 %v12129_v42, %v3331_v59  ;;  %3489 = vadd.xlane.f32.xlu0 %v3488_v30 }
 0x549   :  { %v3388_v9 = vsub.f32 %v12111_v7, %v3328_v56  ;;  %v12266_v51 = vpop.eup %10623  ;;  %10637 = vpow2.f32 %v3433_v48 }
 0x54a   :  { %v12268_v63 = vpop.eup %10625  ;;  %v3439_v14 = vmul.f32 1.442695, %v3389_v62  ;;  %v3497_v61 = vsel %vm1177_vm3, %v12266_v51, 0.0 }
 0x54b   :  { %v3437_v8 = vmul.f32 1.442695, %v3388_v9  ;;  %v3337_v41 = vpop.xlane.xlu1 %3336  ;;  %3498 = vadd.xlane.f32.xlu1 %v3497_v61  ;;  %v3494_v58 = vsel %vm1177_vm3, %v12268_v63, 0.0 }
 0x54c   :  { %v3334_v27 = vpop.xlane.xlu0 %3333  ;;  %10639 = vpow2.f32 %v3439_v14  ;;  %v3391_v42 = vsub.f32 %v12119_v24, %v3337_v41  ;;  %3495 = vadd.xlane.f32.xlu0 %v3494_v58 }
 0x54d   :  { %v3390_v7 = vsub.f32 %v12137_v0, %v3334_v27  ;;  %v12276_v10 = vpop.eup %10627  ;;  %10641 = vpow2.f32 %v3437_v8 }
 0x54e   :  { %v12278_v11 = vpop.eup %10629  ;;  %v3443_v35 = vmul.f32 1.442695, %v3391_v42  ;;  %v3503_v20 = vsel %vm1177_vm3, %v12276_v10, 0.0 }
 0x54f   :  { %v3441_v26 = vmul.f32 1.442695, %v3390_v7  ;;  %v3343_v31 = vpop.xlane.xlu1 %3342  ;;  %3504 = vadd.xlane.f32.xlu1 %v3503_v20  ;;  %v3500_v46 = vsel %vm1177_vm3, %v12278_v11, 0.0 }
 0x550   :  { %v3340_v48 = vpop.xlane.xlu0 %3339  ;;  %10643 = vpow2.f32 %v3443_v35  ;;  %v3393_v24 = vsub.f32 %v12145_v23, %v3343_v31  ;;  %3501 = vadd.xlane.f32.xlu0 %v3500_v46 }
 0x551   :  { %v3392_v0 = vsub.f32 %v12127_v4, %v3340_v48  ;;  %v12286_v44 = vpop.eup %10631  ;;  %10645 = vpow2.f32 %v3441_v26 }
 0x552   :  { %v12288_v59 = vpop.eup %10633  ;;  %v3447_v30 = vmul.f32 1.442695, %v3393_v24  ;;  %v3509_v62 = vsel %vm1177_vm3, %v12286_v44, 0.0 }
 0x553   :  { %v3445_v56 = vmul.f32 1.442695, %v3392_v0  ;;  %v3349_v9 = vpop.xlane.xlu1 %3348  ;;  %3510 = vadd.xlane.f32.xlu1 %v3509_v62  ;;  %v3506_v14 = vsel %vm1177_vm3, %v12288_v59, 0.0 }
 0x554   :  { %v3346_v8 = vpop.xlane.xlu0 %3345  ;;  %10647 = vpow2.f32 %v3447_v30  ;;  %v3395_v23 = vsub.f32 %v12135_v17, %v3349_v9  ;;  %3507 = vadd.xlane.f32.xlu0 %v3506_v14 }
 0x555   :  { %v3394_v4 = vsub.f32 %v12153_v1, %v3346_v8  ;;  %v12296_v61 = vpop.eup %10635  ;;  %10649 = vpow2.f32 %v3445_v56 }
 0x556   :  { %v12298_v41 = vpop.eup %10637  ;;  %v3451_v58 = vmul.f32 1.442695, %v3395_v23  ;;  %v3515_v42 = vsel %vm1177_vm3, %v12296_v61, 0.0 }
 0x557   :  { %v3449_v27 = vmul.f32 1.442695, %v3394_v4  ;;  %v3355_v7 = vpop.xlane.xlu1 %3354  ;;  %3516 = vadd.xlane.f32.xlu1 %v3515_v42  ;;  %v3512_v35 = vsel %vm1177_vm3, %v12298_v41, 0.0 }
 0x558   :  { %v3352_v26 = vpop.xlane.xlu0 %3351  ;;  %10651 = vpow2.f32 %v3451_v58  ;;  %v3397_v17 = vsub.f32 %v12161_v34, %v3355_v7  ;;  %3513 = vadd.xlane.f32.xlu0 %v3512_v35 }
 0x559   :  { %v3396_v1 = vsub.f32 %v12143_v33, %v3352_v26  ;;  %v12306_v20 = vpop.eup %10639  ;;  %10653 = vpow2.f32 %v3449_v27 }
 0x55a   :  { %v12308_v31 = vpop.eup %10641  ;;  %v3455_v46 = vmul.f32 1.442695, %v3397_v17  ;;  %v3521_v24 = vsel %vm1177_vm3, %v12306_v20, 0.0 }
 0x55b   :  { %v3453_v48 = vmul.f32 1.442695, %v3396_v1  ;;  %v3361_v0 = vpop.xlane.xlu1 %3360  ;;  %3522 = vadd.xlane.f32.xlu1 %v3521_v24  ;;  %v3518_v30 = vsel %vm1177_vm3, %v12308_v31, 0.0 }
 0x55c   :  { %v3358_v56 = vpop.xlane.xlu0 %3357  ;;  %10655 = vpow2.f32 %v3455_v46  ;;  %v3399_v34 = vsub.f32 %v12151_v52, %v3361_v0  ;;  %3519 = vadd.xlane.f32.xlu0 %v3518_v30 }
 0x55d   :  { %v3398_v33 = vsub.f32 %v12167_v15, %v3358_v56  ;;  %v12316_v62 = vpop.eup %10643  ;;  %10657 = vpow2.f32 %v3453_v48 }
 0x55e   :  { %v12318_v9 = vpop.eup %10645  ;;  %v3459_v14 = vmul.f32 1.442695, %v3399_v34  ;;  %v3527_v23 = vsel %vm1177_vm3, %v12316_v62, 0.0 }
 0x55f   :  { %v3457_v8 = vmul.f32 1.442695, %v3398_v33  ;;  %v3367_v4 = vpop.xlane.xlu1 %3366  ;;  %3528 = vadd.xlane.f32.xlu1 %v3527_v23  ;;  %v3524_v58 = vsel %vm1177_vm3, %v12318_v9, 0.0 }
 0x560   :  { %v3364_v27 = vpop.xlane.xlu0 %3363  ;;  %10659 = vpow2.f32 %v3459_v14  ;;  %v3401_v52 = vsub.f32 %v12173_v29, %v3367_v4  ;;  %3525 = vadd.xlane.f32.xlu0 %v3524_v58 }
 0x561   :  { %v3400_v15 = vsub.f32 %v12159_v12, %v3364_v27  ;;  %v12326_v42 = vpop.eup %10647  ;;  %10661 = vpow2.f32 %v3457_v8 }
 0x562   :  { %v12328_v7 = vpop.eup %10649  ;;  %v3463_v35 = vmul.f32 1.442695, %v3401_v52  ;;  %v3533_v17 = vsel %vm1177_vm3, %v12326_v42, 0.0 }
 0x563   :  { %v3461_v26 = vmul.f32 1.442695, %v3400_v15  ;;  %3534 = vadd.xlane.f32.xlu1 %v3533_v17  ;;  %v3530_v1 = vsel %vm1177_vm3, %v12328_v7, 0.0  ;;  %v12413_v17 = vpop.permute.xlu1 %4348 }
 0x564   :  { %v3370_v46 = vpop.xlane.xlu0 %3369  ;;  %10663 = vpow2.f32 %v3463_v35  ;;  %3531 = vadd.xlane.f32.xlu0 %v3530_v1 }
 0x565   :  { %v3402_v29 = vsub.f32 %v12179_v22, %v3370_v46  ;;  %v12335_v12 = vpop.eup %10651  ;;  %10665 = vpow2.f32 %v3461_v26 }
 0x566   :  { %v12337_v48 = vpop.eup %10653  ;;  %v3539_v0 = vsel %vm1177_vm3, %v12335_v12, 0.0 }
 0x567   :  { %v3465_v24 = vmul.f32 1.442695, %v3402_v29  ;;  %3540 = vadd.xlane.f32.xlu1 %v3539_v0  ;;  %v3536_v30 = vsel %vm1177_vm3, %v12337_v48, 0.0 }
 0x568   :  { %3537 = vadd.xlane.f32.xlu0 %v3536_v30  ;;  %v12419_v1 = vpop.permute.xlu0 %4301 }
 0x569   :  { %10667 = vpow2.f32 %v3465_v24  ;;  %v12343_v56 = vpop.eup %10655 }
 0x56a   :  { %v12345_v34 = vpop.eup %10657  ;;  %v3545_v22 = vsel %vm1177_vm3, %v12343_v56, 0.0 }
 0x56b   :  { %3546 = vadd.xlane.f32.xlu1 %v3545_v22  ;;  %v3542_v33 = vsel %vm1177_vm3, %v12345_v34, 0.0 }
 0x56c   :  { %3543 = vadd.xlane.f32.xlu0 %v3542_v33 }
 0x56d   :  { %v12351_v14 = vpop.eup %10659 }
 0x56e   :  { %v12353_v8 = vpop.eup %10661  ;;  %v3551_v23 = vsel %vm1177_vm3, %v12351_v14, 0.0 }
 0x56f   :  { %3552 = vadd.xlane.f32.xlu1 %v3551_v23  ;;  %v3548_v4 = vsel %vm1177_vm3, %v12353_v8, 0.0 }
 0x570   :  { %3549 = vadd.xlane.f32.xlu0 %v3548_v4 }
 0x571   :  { %v12359_v58 = vpop.eup %10663 }
 0x572   :  { %v12361_v27 = vpop.eup %10665  ;;  %v3557_v52 = vsel %vm1177_vm3, %v12359_v58, 0.0 }
 0x573   :  { %3558 = vadd.xlane.f32.xlu1 %v3557_v52  ;;  %v3554_v15 = vsel %vm1177_vm3, %v12361_v27, 0.0 }
 0x574   :  { %3555 = vadd.xlane.f32.xlu0 %v3554_v15 }
 0x576   :  { %v12367_v35 = vpop.eup %10667 }
 0x577   :  { %v3560_v26 = vsel %vm1177_vm3, %v12367_v35, 0.0 }
 0x578   :  { %3561 = vadd.xlane.f32.xlu0 %v3560_v26 }
 0x584   :  { %4673 = vrot.lane.b32.xlu1 %v11114_v32, %s10996_s23 }
 0x588   :  { %4671 = vrot.lane.b32.xlu1 %v11114_v32, %s10997_s30 }
 0x58c   :  { %4775 = vrot.lane.b32.xlu1 %v11127_v43, %s10996_s23 }
 0x58e   :  { %4622 = vrot.lane.b32.xlu0 %v11109_v28, %s10996_s23 }
 0x590   :  { %4773 = vrot.lane.b32.xlu1 %v11127_v43, %s10997_s30 }
 0x592   :  { %4620 = vrot.lane.b32.xlu0 %v11109_v28, %s10997_s30 }
 0x594   :  { %4877 = vrot.lane.b32.xlu1 %v11131_v47, %s10996_s23 }
 0x596   :  { %4724 = vrot.lane.b32.xlu0 %v11122_v39, %s10996_s23 }
 0x598   :  { %4875 = vrot.lane.b32.xlu1 %v11131_v47, %s10997_s30 }
 0x59a   :  { %4722 = vrot.lane.b32.xlu0 %v11122_v39, %s10997_s30 }
 0x59c   :  { %4979 = vrot.lane.b32.xlu1 %v11145_v57, %s10996_s23 }
 0x59e   :  { %4826 = vrot.lane.b32.xlu0 %v11136_v50, %s10996_s23 }
 0x5a0   :  { %4977 = vrot.lane.b32.xlu1 %v11145_v57, %s10997_s30 }
 0x5a2   :  { %4824 = vrot.lane.b32.xlu0 %v11136_v50, %s10997_s30 }
 0x5a4   :  { %5081 = vrot.lane.b32.xlu1 %v11157_v3, %s10996_s23 }
 0x5a6   :  { %4928 = vrot.lane.b32.xlu0 %v11148_v60, %s10996_s23 }
 0x5a8   :  { %5079 = vrot.lane.b32.xlu1 %v11157_v3, %s10997_s30 }
 0x5aa   :  { %4926 = vrot.lane.b32.xlu0 %v11148_v60, %s10997_s30 }
 0x5ac   :  { %5183 = vrot.lane.b32.xlu1 %v11169_v13, %s10996_s23 }
 0x5ae   :  { %5030 = vrot.lane.b32.xlu0 %v11160_v6, %s10996_s23 }
 0x5b0   :  { %5181 = vrot.lane.b32.xlu1 %v11169_v13, %s10997_s30 }
 0x5b2   :  { %5028 = vrot.lane.b32.xlu0 %v11160_v6, %s10997_s30 }
 0x5b4   :  { %5285 = vrot.lane.b32.xlu1 %v11181_v25, %s10996_s23 }
 0x5b6   :  { %5132 = vrot.lane.b32.xlu0 %v14431_v54, %s10996_s23  ;;  %v3469_v46 = vpop.xlane.xlu1 %3468 }
 0x5b7   :  { %10669 = vrcp.f32 %v3469_v46 }
 0x5b8   :  { %5283 = vrot.lane.b32.xlu1 %v11181_v25, %s10997_s30 }
 0x5ba   :  { %5130 = vrot.lane.b32.xlu0 %v14431_v54, %s10997_s30  ;;  %v3472_v29 = vpop.xlane.xlu0 %3471 }
 0x5bb   :  { %10671 = vrcp.f32 %v3472_v29 }
 0x5bc   :  { %5387 = vrot.lane.b32.xlu1 %v11193_v37, %s10996_s23 }
 0x5be   :  { %5234 = vrot.lane.b32.xlu0 %v14433_v2, %s10996_s23 }
 0x5c0   :  { %5385 = vrot.lane.b32.xlu1 %v11193_v37, %s10997_s30 }
 0x5c2   :  { %5232 = vrot.lane.b32.xlu0 %v14433_v2, %s10997_s30 }
 0x5c4   :  { %5804 = vrot.lane.b32.xlu1 %v11109_v28, %s10998_s4  ;;  %v3475_v24 = vpop.xlane.xlu1 %3474  ;;  %v10670_v0 = vpop.eup %10669 }
 0x5c5   :  { %10673 = vrcp.f32 %v3475_v24  ;;  %v3595_v23 = vmul.f32 %v10670_v0, %v12215_v16 }
 0x5c6   :  { %5336 = vrot.lane.b32.xlu0 %v11196_v40, %s10996_s23 }
 0x5c8   :  { %v10672_v30 = vpop.eup %10671  ;;  %5898 = vrot.lane.b32.xlu1 %v11122_v39, %s10998_s4  ;;  %v3481_v22 = vpop.xlane.xlu1 %3480 }
 0x5c9   :  { %v3478_v33 = vpop.xlane.xlu0 %3477  ;;  %v3596_v4 = vmul.f32 %v10672_v30, %v12220_v55 }
 0x5ca   :  { %10675 = vrcp.f32 %v3478_v33  ;;  %5334 = vrot.lane.b32.xlu0 %v11196_v40, %s10997_s30 }
 0x5cb   :  { %v3627_v52 = vpack.c.bf16 %v3596_v4, %v3595_v23  ;;  %10677 = vrcp.f32 %v3481_v22 }
 0x5cc   :  { %5992 = vrot.lane.b32.xlu1 %v11136_v50, %s10998_s4  ;;  %v3487_v15 = vpop.xlane.xlu1 %3486 }
 0x5cd   :  { %v3484_v26 = vpop.xlane.xlu0 %3483  ;;  %9966 = vmatmul.mubr.msk.bf16.vlgmr.msra.gmra.mxu0 %vm1177_vm3, %v3627_v52 }
 0x5ce   :  { %10679 = vrcp.f32 %v3484_v26  ;;  %5851 = vrot.lane.b32.xlu0 %v11114_v32, %s10998_s4  ;;  %9976 = vmatpush3.bf16.msra.mxu0 %v12187_v19 }
 0x5cf   :  { %9977 = vmatprep.mubr.msk.bf16.mxu0 %vm10990_vm1, %v14430_v18  ;;  %9987 = vmatprep.subr.bf16.mxu0 %v14430_v18  ;;  %10681 = vrcp.f32 %v3487_v15 }
 0x5d0   :  { %6086 = vrot.lane.b32.xlu1 %v11148_v60, %s10998_s4  ;;  %v3493_v16 = vpop.xlane.xlu1 %3492 }
 0x5d1   :  { %v3490_v55 = vpop.xlane.xlu0 %3489 }
 0x5d2   :  { %10683 = vrcp.f32 %v3490_v55  ;;  %5945 = vrot.lane.b32.xlu0 %v11127_v43, %s10998_s4  ;;  %v10674_v46 = vpop.eup %10673 }
 0x5d3   :  { %10685 = vrcp.f32 %v3493_v16  ;;  %v3597_v0 = vmul.f32 %v10674_v46, %v12230_v53  ;;  %v14451_v16 = vld [vmem:[#allocation5_spill] sm:$0xff] }
 0x5d4   :  { %6180 = vrot.lane.b32.xlu1 %v11160_v6, %s10998_s4  ;;  %v3499_v19 = vpop.xlane.xlu1 %3498 }
 0x5d5   :  { %v3496_v29 = vpop.xlane.xlu0 %3495 }
 0x5d6   :  { %10687 = vrcp.f32 %v3496_v29  ;;  %6039 = vrot.lane.b32.xlu0 %v11131_v47, %s10998_s4 }
 0x5d7   :  { %v10676_v24 = vpop.eup %10675  ;;  %10689 = vrcp.f32 %v3499_v19 }
 0x5d8   :  { %v3598_v30 = vmul.f32 %v10676_v24, %v12238_v21  ;;  %6274 = vrot.lane.b32.xlu1 %v14431_v54, %s10998_s4  ;;  %v3505_v22 = vpop.xlane.xlu1 %3504  ;;  %v10678_v33 = vpop.eup %10677 }
 0x5d9   :  { %v3502_v23 = vpop.xlane.xlu0 %3501  ;;  %v3599_v15 = vmul.f32 %v10678_v33, %v12234_v38 }
 0x5da   :  { %10691 = vrcp.f32 %v3502_v23  ;;  %6133 = vrot.lane.b32.xlu0 %v11145_v57, %s10998_s4  ;;  %v3628_v4 = vpack.c.bf16 %v3598_v30, %v3597_v0  ;;  %v14452_v0 = vld [vmem:[#allocation2_spill] sm:$0xff] }
 0x5db   :  { %v10680_v52 = vpop.eup %10679  ;;  %10693 = vrcp.f32 %v3505_v22 }
 0x5dc   :  { %v3600_v26 = vmul.f32 %v10680_v52, %v12248_v49  ;;  %9972 = vmatmul.mubr.msk.bf16.vlgmr.msra.gmra.mxu1 %vm1177_vm3, %v3628_v4  ;;  %6321 = vrot.lane.b32.xlu1 %v11169_v13, %s10998_s4  ;;  %v3511_v53 = vpop.xlane.xlu1 %3510  ;;  %v10682_v21 = vpop.eup %10681  ;;  %v14453_v52 = vld [vmem:[#allocation4_spill] sm:$0xff] }
 0x5dd   :  { %9982 = vmatpush3.bf16.msra.mxu1 %v14451_v16  ;;  %v3508_v55 = vpop.xlane.xlu0 %3507  ;;  %9983 = vmatprep.mubr.msk.bf16.mxu1 %vm10990_vm1, %v14430_v18  ;;  %v3601_v19 = vmul.f32 %v10682_v21, %v12246_v45 }
 0x5de   :  { %10695 = vrcp.f32 %v3508_v55  ;;  %6227 = vrot.lane.b32.xlu0 %v11157_v3, %s10998_s4  ;;  %v3629_v38 = vpack.c.bf16 %v3600_v26, %v3599_v15  ;;  %9993 = vmatprep.subr.bf16.mxu1 %v14430_v18  ;;  %v14454_v55 = vld [vmem:[#allocation3_spill] sm:$0xff] }
 0x5df   :  { %v10684_v49 = vpop.eup %10683  ;;  %10697 = vrcp.f32 %v3511_v53 }
 0x5e0   :  { %v3602_v46 = vmul.f32 %v10684_v49, %v12258_v36  ;;  %9978 = vmatmul.mubr.msk.bf16.vlgmr.msra.gmra.mxu0 %vm1177_vm3, %v3629_v38  ;;  %6415 = vrot.lane.b32.xlu1 %v11181_v25, %s10998_s4  ;;  %v3517_v29 = vpop.xlane.xlu1 %3516  ;;  %v10686_v24 = vpop.eup %10685 }
 0x5e1   :  { %9988 = vmatpush3.bf16.msra.mxu0 %v14452_v0  ;;  %v3514_v30 = vpop.xlane.xlu0 %3513  ;;  %9989 = vmatprep.mubr.msk.bf16.mxu0 %vm10990_vm1, %v14430_v18  ;;  %v3603_v22 = vmul.f32 %v10686_v24, %v12256_v5  ;;  %v14455_v24 = vld [vmem:[#allocation6_spill] sm:$0xff] }
 0x5e2   :  { %10699 = vrcp.f32 %v3514_v30  ;;  %6368 = vrot.lane.b32.xlu0 %v14433_v2, %s10998_s4  ;;  %v3630_v45 = vpack.c.bf16 %v3602_v46, %v3601_v19  ;;  %9999 = vmatprep.subr.bf16.mxu0 %v14430_v18 }
 0x5e3   :  { %v10688_v36 = vpop.eup %10687  ;;  %10701 = vrcp.f32 %v3517_v29 }
 0x5e4   :  { %v3604_v33 = vmul.f32 %v10688_v36, %v12268_v63  ;;  %9984 = vmatmul.mubr.msk.bf16.vlgmr.msra.gmra.mxu1 %vm1177_vm3, %v3630_v45  ;;  %v3523_v23 = vpop.xlane.xlu1 %3522  ;;  %v10690_v4 = vpop.eup %10689 }
 0x5e5   :  { %9994 = vmatpush3.bf16.msra.mxu1 %v14453_v52  ;;  %v3520_v15 = vpop.xlane.xlu0 %3519  ;;  %9995 = vmatprep.mubr.msk.bf16.mxu1 %vm10990_vm1, %v14430_v18  ;;  %v3605_v5 = vmul.f32 %v10690_v4, %v12266_v51 }
 0x5e6   :  { %10703 = vrcp.f32 %v3520_v15  ;;  %v3631_v26 = vpack.c.bf16 %v3604_v33, %v3603_v22  ;;  %10005 = vmatprep.subr.bf16.mxu1 %v14430_v18  ;;  %v14456_v33 = vld [vmem:[#allocation7_spill] sm:$0xff] }
 0x5e7   :  { %v10692_v53 = vpop.eup %10691  ;;  %10705 = vrcp.f32 %v3523_v23 }
 0x5e8   :  { %v3606_v63 = vmul.f32 %v10692_v53, %v12278_v11  ;;  %9990 = vmatmul.mubr.msk.bf16.vlgmr.msra.gmra.mxu0 %vm1177_vm3, %v3631_v26  ;;  %v3529_v21 = vpop.xlane.xlu1 %3528  ;;  %v10694_v16 = vpop.eup %10693  ;;  %v14457_v53 = vld [vmem:[#allocation9_spill] sm:$0xff] }
 0x5e9   :  { %10000 = vmatpush3.bf16.msra.mxu0 %v14454_v55  ;;  %v3526_v38 = vpop.xlane.xlu0 %3525  ;;  %10001 = vmatprep.mubr.msk.bf16.mxu0 %vm10990_vm1, %v14430_v18  ;;  %v3607_v51 = vmul.f32 %v10694_v16, %v12276_v10 }
 0x5ea   :  { %10707 = vrcp.f32 %v3526_v38  ;;  %v3632_v49 = vpack.c.bf16 %v3606_v63, %v3605_v5  ;;  %10011 = vmatprep.subr.bf16.mxu0 %v14430_v18  ;;  %v14458_v38 = vld [vmem:[#allocation8_spill] sm:$0xff] }
 0x5eb   :  { %v10696_v19 = vpop.eup %10695  ;;  %10709 = vrcp.f32 %v3529_v21 }
 0x5ec   :  { %v3608_v11 = vmul.f32 %v10696_v19, %v12288_v59  ;;  %9996 = vmatmul.mubr.msk.bf16.vlgmr.msra.gmra.mxu1 %vm1177_vm3, %v3632_v49  ;;  %v3535_v46 = vpop.xlane.xlu1 %3534  ;;  %v10698_v29 = vpop.eup %10697 }
 0x5ed   :  { %10006 = vmatpush3.bf16.msra.mxu1 %v14455_v24  ;;  %v3532_v0 = vpop.xlane.xlu0 %3531  ;;  %10007 = vmatprep.mubr.msk.bf16.mxu1 %vm10990_vm1, %v14430_v18  ;;  %v3609_v10 = vmul.f32 %v10698_v29, %v12286_v44  ;;  %v14459_v29 = vld [vmem:[#allocation10_spill] sm:$0xff] }
 0x5ee   :  { %10711 = vrcp.f32 %v3532_v0  ;;  %v3633_v30 = vpack.c.bf16 %v3608_v11, %v3607_v51  ;;  %10017 = vmatprep.subr.bf16.mxu1 %v14430_v18 }
 0x5ef   :  { %v10700_v45 = vpop.eup %10699  ;;  %10713 = vrcp.f32 %v3535_v46 }
 0x5f0   :  { %v3610_v59 = vmul.f32 %v10700_v45, %v12298_v41  ;;  %10002 = vmatmul.mubr.msk.bf16.vlgmr.msra.gmra.mxu0 %vm1177_vm3, %v3633_v30  ;;  %v3541_v36 = vpop.xlane.xlu1 %3540  ;;  %v10702_v22 = vpop.eup %10701 }
 0x5f1   :  { %10012 = vmatpush3.bf16.msra.mxu0 %v14456_v33  ;;  %v3538_v23 = vpop.xlane.xlu0 %3537  ;;  %10013 = vmatprep.mubr.msk.bf16.mxu0 %vm10990_vm1, %v14430_v18  ;;  %v3611_v44 = vmul.f32 %v10702_v22, %v12296_v61 }
 0x5f2   :  { %10715 = vrcp.f32 %v3538_v23  ;;  %v3634_v4 = vpack.c.bf16 %v3610_v59, %v3609_v10  ;;  %10023 = vmatprep.subr.bf16.mxu0 %v14430_v18  ;;  %v14460_v59 = vld [vmem:[#allocation11_spill] sm:$0xff] }
 0x5f3   :  { %v10704_v52 = vpop.eup %10703  ;;  %10717 = vrcp.f32 %v3541_v36 }
 0x5f4   :  { %v3612_v41 = vmul.f32 %v10704_v52, %v12308_v31  ;;  %10008 = vmatmul.mubr.msk.bf16.vlgmr.msra.gmra.mxu1 %vm1177_vm3, %v3634_v4  ;;  %v3547_v15 = vpop.xlane.xlu1 %3546  ;;  %v10706_v26 = vpop.eup %10705  ;;  %v14461_v52 = vld [vmem:[#allocation12_spill] sm:$0xff] }
 0x5f5   :  { %10018 = vmatpush3.bf16.msra.mxu1 %v14457_v53  ;;  %v3544_v5 = vpop.xlane.xlu0 %3543  ;;  %10019 = vmatprep.mubr.msk.bf16.mxu1 %vm10990_vm1, %v14430_v18  ;;  %v3613_v61 = vmul.f32 %v10706_v26, %v12306_v20 }
 0x5f6   :  { %10719 = vrcp.f32 %v3544_v5  ;;  %v3635_v63 = vpack.c.bf16 %v3612_v41, %v3611_v44  ;;  %10029 = vmatprep.subr.bf16.mxu1 %v14430_v18 }
 0x5f7   :  { %v10708_v21 = vpop.eup %10707  ;;  %10721 = vrcp.f32 %v3547_v15 }
 0x5f8   :  { %v3614_v31 = vmul.f32 %v10708_v21, %v12318_v9  ;;  %10014 = vmatmul.mubr.msk.bf16.vlgmr.msra.gmra.mxu0 %vm1177_vm3, %v3635_v63  ;;  %v3553_v16 = vpop.xlane.xlu1 %3552  ;;  %v10710_v55 = vpop.eup %10709 }
 0x5f9   :  { %10024 = vmatpush3.bf16.msra.mxu0 %v14458_v38  ;;  %v3550_v49 = vpop.xlane.xlu0 %3549  ;;  %10025 = vmatprep.mubr.msk.bf16.mxu0 %vm10990_vm1, %v14430_v18  ;;  %v3615_v20 = vmul.f32 %v10710_v55, %v12316_v62 }
 0x5fa   :  { %10723 = vrcp.f32 %v3550_v49  ;;  %v3636_v19 = vpack.c.bf16 %v3614_v31, %v3613_v61  ;;  %10035 = vmatprep.subr.bf16.mxu0 %v14430_v18 }
 0x5fb   :  { %v10712_v51 = vpop.eup %10711  ;;  %10725 = vrcp.f32 %v3553_v16 }
 0x5fc   :  { %v3616_v9 = vmul.f32 %v10712_v51, %v12328_v7  ;;  %10020 = vmatmul.mubr.msk.bf16.vlgmr.msra.gmra.mxu1 %vm1177_vm3, %v3636_v19  ;;  %v3559_v11 = vpop.xlane.xlu1 %3558  ;;  %v10714_v46 = vpop.eup %10713 }
 0x5fd   :  { %10030 = vmatpush3.bf16.msra.mxu1 %v14459_v29  ;;  %v3556_v24 = vpop.xlane.xlu0 %3555  ;;  %10031 = vmatprep.mubr.msk.bf16.mxu1 %vm10990_vm1, %v14430_v18  ;;  %v3617_v62 = vmul.f32 %v10714_v46, %v12326_v42 }
 0x5fe   :  { %10727 = vrcp.f32 %v3556_v24  ;;  %v3637_v0 = vpack.c.bf16 %v3616_v9, %v3615_v20  ;;  %10041 = vmatprep.subr.bf16.mxu1 %v14430_v18 }
 0x5ff   :  { %v10716_v30 = vpop.eup %10715  ;;  %10729 = vrcp.f32 %v3559_v11 }
 0x600   :  { %v3618_v7 = vmul.f32 %v10716_v30, %v12337_v48  ;;  %10026 = vmatmul.mubr.msk.bf16.vlgmr.msra.gmra.mxu0 %vm1177_vm3, %v3637_v0  ;;  %v4674_v45 = vpop.permute.xlu1 %4673  ;;  %v10718_v10 = vpop.eup %10717 }
 0x601   :  { %10036 = vmatpush3.bf16.msra.mxu0 %v14460_v59  ;;  %v3562_v36 = vpop.xlane.xlu0 %3561  ;;  %10037 = vmatprep.mubr.msk.bf16.mxu0 %vm10990_vm1, %v14430_v18  ;;  %v3619_v42 = vmul.f32 %v10718_v10, %v12335_v12  ;;  %v4679_v51 = vsel %vm379_vm2, %v4674_v45, 0 }
 0x602   :  { %10731 = vrcp.f32 %v3562_v36  ;;  %v3638_v22 = vpack.c.bf16 %v3618_v7, %v3617_v62  ;;  %10047 = vmatprep.subr.bf16.mxu0 %v14430_v18 }
 0x603   :  { %v10720_v33 = vpop.eup %10719 }
 0x604   :  { %v3620_v48 = vmul.f32 %v10720_v33, %v12345_v34  ;;  %10032 = vmatmul.mubr.msk.bf16.vlgmr.msra.gmra.mxu1 %vm1177_vm3, %v3638_v22  ;;  %v4672_v23 = vpop.permute.xlu1 %4671  ;;  %v10722_v4 = vpop.eup %10721 }
 0x605   :  { %10042 = vmatpush3.bf16.msra.mxu1 %v14461_v52  ;;  %v4623_v44 = vpop.permute.xlu0 %4622  ;;  %10043 = vmatprep.mubr.msk.bf16.mxu1 %vm10990_vm1, %v14430_v18  ;;  %v3621_v26 = vmul.f32 %v10722_v4, %v12343_v56 }
 0x606   :  { %v3639_v41 = vpack.c.bf16 %v3620_v48, %v3619_v42  ;;  %10053 = vmatprep.subr.bf16.mxu1 %v14430_v18 }
 0x607   :  { %v10724_v15 = vpop.eup %10723 }
 0x608   :  { %v3622_v12 = vmul.f32 %v10724_v15, %v12353_v8  ;;  %10038 = vmatmul.mubr.msk.bf16.vlgmr.msra.gmra.mxu0 %vm1177_vm3, %v3639_v41  ;;  %v4776_v34 = vpop.permute.xlu1 %4775  ;;  %v10726_v53 = vpop.eup %10725 }
 0x609   :  { %10048 = vmatpush3.bf16.msra.mxu0 %v12419_v1  ;;  %v4621_v5 = vpop.permute.xlu0 %4620  ;;  %10049 = vmatprep.mubr.msk.bf16.mxu0 %vm10990_vm1, %v14430_v18  ;;  %v3623_v61 = vmul.f32 %v10726_v53, %v12351_v14  ;;  %v4781_v46 = vsel %vm379_vm2, %v4776_v34, 0 }
 0x60a   :  { %v3640_v63 = vpack.c.bf16 %v3622_v12, %v3621_v26  ;;  %10059 = vmatprep.subr.bf16.mxu0 %v14430_v18 }
 0x60b   :  { %v10728_v21 = vpop.eup %10727 }
 0x60c   :  { %v3624_v56 = vmul.f32 %v10728_v21, %v12361_v27  ;;  %10044 = vmatmul.mubr.msk.bf16.vlgmr.msra.gmra.mxu1 %vm1177_vm3, %v3640_v63  ;;  %v4774_v8 = vpop.permute.xlu1 %4773  ;;  %v10730_v31 = vpop.eup %10729  ;;  %v4628_v27 = vsel %vm379_vm2, %v4623_v44, 0 }
 0x60d   :  { %10054 = vmatpush3.bf16.msra.mxu1 %v12413_v17  ;;  %v4725_v16 = vpop.permute.xlu0 %4724  ;;  %10055 = vmatprep.mubr.msk.bf16.mxu1 %vm10990_vm1, %v14430_v18  ;;  %v3625_v38 = vmul.f32 %v10730_v31, %v12359_v58 }
 0x60e   :  { %v3641_v1 = vpack.c.bf16 %v3624_v56, %v3623_v61  ;;  %10065 = vmatprep.subr.bf16.mxu1 %v14430_v18  ;;  %v4730_v20 = vsel %vm379_vm2, %v4725_v16, 0 }
 0x60f   :  { %v10732_v55 = vpop.eup %10731 }
 0x610   :  { %v3626_v14 = vmul.f32 %v10732_v55, %v12367_v35  ;;  %10050 = vmatmul.mubr.msk.bf16.vlgmr.msra.gmra.mxu0 %vm1177_vm3, %v3641_v1  ;;  %v4878_v49 = vpop.permute.xlu1 %4877 }
 0x611   :  { %10060 = vmatpush3.bf16.xpose.msra.mxu0 %v4628_v27  ;;  %v4723_v19 = vpop.permute.xlu0 %4722  ;;  %10061 = vmatprep.mubr.msk.bf16.mxu0 %vm10990_vm1, %v14430_v18  ;;  %v4883_v7 = vsel %vm379_vm2, %v4878_v49, 0 }
 0x612   :  { %v3642_v17 = vpack.c.bf16 %v3626_v14, %v3625_v38  ;;  %10071 = vmatprep.subr.bf16.mxu0 %v14430_v18 }
 0x614   :  { %10056 = vmatmul.mubr.msk.bf16.vlgmr.msra.gmra.mxu1 %vm1177_vm3, %v3642_v17  ;;  %v4876_v58 = vpop.permute.xlu1 %4875 }
 0x615   :  { %10066 = vmatpush3.bf16.xpose.msra.mxu1 %v4679_v51  ;;  %v4827_v35 = vpop.permute.xlu0 %4826  ;;  %10067 = vmatprep.mubr.msk.bf16.mxu1 %vm10990_vm1, %v14430_v18 }
 0x616   :  { %10077 = vmatprep.subr.bf16.mxu1 %v14430_v18  ;;  %v4832_v0 = vsel %vm379_vm2, %v4827_v35, 0 }
 0x618   :  { %10062 = vmatmul.mubr.msk.bf16.vlgmr.msra.gmra.mxu0 %vm379_vm2, %v4621_v5  ;;  %v4980_v9 = vpop.permute.xlu1 %4979 }
 0x619   :  { %10072 = vmatpush3.bf16.xpose.msra.mxu0 %v4730_v20  ;;  %v4825_v11 = vpop.permute.xlu0 %4824  ;;  %10073 = vmatprep.mubr.msk.bf16.mxu0 %vm10990_vm1, %v14430_v18  ;;  %v4985_v22 = vsel %vm379_vm2, %v4980_v9, 0 }
 0x61a   :  { %10083 = vmatprep.subr.bf16.mxu0 %v14430_v18 }
 0x61c   :  { %10068 = vmatmul.mubr.msk.bf16.vlgmr.msra.gmra.mxu1 %vm379_vm2, %v4672_v23  ;;  %v4978_v29 = vpop.permute.xlu1 %4977 }
 0x61d   :  { %10078 = vmatpush3.bf16.xpose.msra.mxu1 %v4781_v46  ;;  %v4929_v24 = vpop.permute.xlu0 %4928  ;;  %10079 = vmatprep.mubr.msk.bf16.mxu1 %vm10990_vm1, %v14430_v18 }
 0x61e   :  { %10089 = vmatprep.subr.bf16.mxu1 %v14430_v18  ;;  %v4934_v59 = vsel %vm379_vm2, %v4929_v24, 0 }
 0x620   :  { %10074 = vmatmul.mubr.msk.bf16.vlgmr.msra.gmra.mxu0 %vm379_vm2, %v4723_v19  ;;  %v5082_v30 = vpop.permute.xlu1 %5081 }
 0x621   :  { %10084 = vmatpush3.bf16.xpose.msra.mxu0 %v4832_v0  ;;  %v4927_v62 = vpop.permute.xlu0 %4926  ;;  %10085 = vmatprep.mubr.msk.bf16.mxu0 %vm10990_vm1, %v14430_v18  ;;  %v5087_v52 = vsel %vm379_vm2, %v5082_v30, 0 }
 0x622   :  { %10095 = vmatprep.subr.bf16.mxu0 %v14430_v18 }
 0x624   :  { %10080 = vmatmul.mubr.msk.bf16.vlgmr.msra.gmra.mxu1 %vm379_vm2, %v4774_v8  ;;  %v5080_v10 = vpop.permute.xlu1 %5079 }
 0x625   :  { %10090 = vmatpush3.bf16.xpose.msra.mxu1 %v4883_v7  ;;  %v5031_v45 = vpop.permute.xlu0 %5030  ;;  %10091 = vmatprep.mubr.msk.bf16.mxu1 %vm10990_vm1, %v14430_v18 }
 0x626   :  { %10101 = vmatprep.subr.bf16.mxu1 %v14430_v18  ;;  %v5036_v48 = vsel %vm379_vm2, %v5031_v45, 0 }
 0x628   :  { %10086 = vmatmul.mubr.msk.bf16.vlgmr.msra.gmra.mxu0 %vm379_vm2, %v4825_v11  ;;  %v5184_v33 = vpop.permute.xlu1 %5183 }
 0x629   :  { %10096 = vmatpush3.bf16.xpose.msra.mxu0 %v4934_v59  ;;  %v5029_v36 = vpop.permute.xlu0 %5028  ;;  %10097 = vmatprep.mubr.msk.bf16.mxu0 %vm10990_vm1, %v14430_v18  ;;  %v5189_v26 = vsel %vm379_vm2, %v5184_v33, 0 }
 0x62a   :  { %10107 = vmatprep.subr.bf16.mxu0 %v14430_v18 }
 0x62c   :  { %10092 = vmatmul.mubr.msk.bf16.vlgmr.msra.gmra.mxu1 %vm379_vm2, %v4876_v58  ;;  %v5182_v23 = vpop.permute.xlu1 %5181 }
 0x62d   :  { %10102 = vmatpush3.bf16.xpose.msra.mxu1 %v4985_v22  ;;  %v5133_v42 = vpop.permute.xlu0 %5132  ;;  %10103 = vmatprep.mubr.msk.bf16.mxu1 %vm10990_vm1, %v14430_v18 }
 0x62e   :  { %10113 = vmatprep.subr.bf16.mxu1 %v14430_v18  ;;  %v5138_v44 = vsel %vm379_vm2, %v5133_v42, 0 }
 0x630   :  { %10098 = vmatmul.mubr.msk.bf16.vlgmr.msra.gmra.mxu0 %vm379_vm2, %v4927_v62  ;;  %v5286_v41 = vpop.permute.xlu1 %5285 }
 0x631   :  { %10108 = vmatpush3.bf16.xpose.msra.mxu0 %v5036_v48  ;;  %10109 = vmatprep.mubr.msk.bf16.mxu0 %vm10990_vm1, %v14430_v18  ;;  %v5131_v4 = vpop.permute.xlu0 %5130  ;;  %v5291_v5 = vsel %vm379_vm2, %v5286_v41, 0 }
 0x632   :  { %10119 = vmatprep.subr.bf16.mxu0 %v14430_v18 }
 0x634   :  { %10104 = vmatmul.mubr.msk.bf16.vlgmr.msra.gmra.mxu1 %vm379_vm2, %v4978_v29  ;;  %v5284_v12 = vpop.permute.xlu1 %5283 }
 0x635   :  { %10114 = vmatpush3.bf16.xpose.msra.mxu1 %v5087_v52  ;;  %10115 = vmatprep.mubr.msk.bf16.mxu1 %vm10990_vm1, %v14430_v18  ;;  %v5235_v15 = vpop.permute.xlu0 %5234 }
 0x636   :  { %10125 = vmatprep.subr.bf16.mxu1 %v14430_v18  ;;  %v5240_v53 = vsel %vm379_vm2, %v5235_v15, 0 }
 0x638   :  { %10110 = vmatmul.mubr.msk.bf16.vlgmr.msra.gmra.mxu0 %vm379_vm2, %v5029_v36  ;;  %v5388_v63 = vpop.permute.xlu1 %5387 }
 0x639   :  { %10120 = vmatpush3.bf16.xpose.msra.mxu0 %v5138_v44  ;;  %10121 = vmatprep.mubr.msk.bf16.mxu0 %vm10990_vm1, %v14430_v18  ;;  %v5233_v34 = vpop.permute.xlu0 %5232  ;;  %v5393_v8 = vsel %vm379_vm2, %v5388_v63, 0 }
 0x63a   :  { %10131 = vmatprep.subr.bf16.mxu0 %v14430_v18 }
 0x63c   :  { %10116 = vmatmul.mubr.msk.bf16.vlgmr.msra.gmra.mxu1 %vm379_vm2, %v5080_v10  ;;  %v5386_v56 = vpop.permute.xlu1 %5385 }
 0x63d   :  { %10126 = vmatpush3.bf16.xpose.msra.mxu1 %v5189_v26  ;;  %10127 = vmatprep.mubr.msk.bf16.mxu1 %vm10990_vm1, %v14430_v18  ;;  %v5337_v21 = vpop.permute.xlu0 %5336 }
 0x63e   :  { %10137 = vmatprep.subr.bf16.mxu1 %v14430_v18  ;;  %v5342_v61 = vsel %vm379_vm2, %v5337_v21, 0 }
 0x640   :  { %10122 = vmatmul.mubr.msk.bf16.vlgmr.msra.gmra.mxu0 %vm379_vm2, %v5131_v4  ;;  %v5805_v16 = vpop.permute.xlu1 %5804 }
 0x641   :  { %10132 = vmatpush3.bf16.xpose.msra.mxu0 %v5240_v53  ;;  %10133 = vmatprep.mubr.msk.bf16.mxu0 %vm10990_vm1, %v14430_v18  ;;  %v5335_v31 = vpop.permute.xlu0 %5334 }
 0x642   :  { %10143 = vmatprep.subr.bf16.mxu0 %v14430_v18 }
 0x644   :  { %10128 = vmatmul.mubr.msk.bf16.vlgmr.msra.gmra.mxu1 %vm379_vm2, %v5182_v23 }
 0x645   :  { %10138 = vmatpush3.bf16.xpose.msra.mxu1 %v5291_v5  ;;  %10139 = vmatprep.mubr.msk.bf16.mxu1 %vm10990_vm1, %v14430_v18  ;;  %v5852_v1 = vpop.permute.xlu0 %5851 }
 0x646   :  { %10149 = vmatprep.subr.bf16.mxu1 %v14430_v18 }
 0x648   :  { %10134 = vmatmul.mubr.msk.bf16.vlgmr.msra.gmra.mxu0 %vm379_vm2, %v5233_v34 }
 0x649   :  { %10144 = vmatpush3.bf16.xpose.msra.mxu0 %v5342_v61  ;;  %10145 = vmatprep.mubr.msk.bf16.mxu0 %vm10990_vm1, %v14430_v18 }
 0x64a   :  { %10155 = vmatprep.subr.bf16.mxu0 %v14430_v18 }
 0x64c   :  { %10140 = vmatmul.mubr.msk.bf16.vlgmr.msra.gmra.mxu1 %vm379_vm2, %v5284_v12 }
 0x64d   :  { %10150 = vmatpush3.bf16.xpose.msra.mxu1 %v5393_v8  ;;  %10151 = vmatprep.mubr.msk.bf16.mxu1 %vm10990_vm1, %v14430_v18 }
 0x64e   :  { %10161 = vmatprep.subr.bf16.mxu1 %v14430_v18 }
 0x650   :  { %10146 = vmatmul.mubr.msk.bf16.vlgmr.msra.gmra.mxu0 %vm379_vm2, %v5335_v31 }
 0x651   :  { %10156 = vmatpush3.bf16.msra.mxu0 %v5805_v16  ;;  %10157 = vmatprep.mubr.msk.bf16.mxu0 %vm10990_vm1, %v14430_v18 }
 0x652   :  { %10167 = vmatprep.subr.bf16.mxu0 %v14430_v18 }
 0x654   :  { %10152 = vmatmul.mubr.msk.bf16.vlgmr.msra.gmra.mxu1 %vm379_vm2, %v5386_v56 }
 0x655   :  { %10162 = vmatpush3.bf16.msra.mxu1 %v5852_v1  ;;  %10163 = vmatprep.mubr.msk.bf16.mxu1 %vm10990_vm1, %v14430_v18 }
 0x656   :  { %10173 = vmatprep.subr.bf16.mxu1 %v14430_v18 }
 0x68d   :  { %v12657_v55 = vpop.f32.mrf.mxu0 }
 0x68e   :  { %14462 = vst [vmem:[#allocation5_spill] sm:$0xff] %v12657_v55 }
 0x68f   :  { %v9967_v38 = vpop.f32.mrf.mxu0 }
 0x691   :  { %v12659_v14 = vpop.f32.mrf.mxu0 }
 0x692   :  { %14463 = vst [vmem:[#allocation2_spill] sm:$0xff] %v12659_v14 }
 0x693   :  { %v9968_v27 = vpop.f32.mrf.mxu0 }
 0x69c   :  { %v12661_v49 = vpop.f32.mrf.mxu1 }
 0x69d   :  { %14464 = vst [vmem:[#allocation4_spill] sm:$0xff] %v12661_v49 }
 0x69e   :  { %v9973_v19 = vpop.f32.mrf.mxu1 }
 0x6a0   :  { %v12663_v17 = vpop.f32.mrf.mxu1  ;;  %v12665_v51 = vpop.f32.mrf.mxu0 }
 0x6a1   :  { %14465 = vst [vmem:[#allocation3_spill] sm:$0xff] %v12663_v17  ;;  %14466 = vst [vmem:[#allocation6_spill] sm:$0xff] %v12665_v51 }
 0x6a2   :  { %v9974_v58 = vpop.f32.mrf.mxu1  ;;  %v9979_v35 = vpop.f32.mrf.mxu0 }
 0x6a4   :  { %v12667_v20 = vpop.f32.mrf.mxu0  ;;  %v12669_v9 = vpop.f32.mrf.mxu1 }
 0x6a5   :  { %14467 = vst [vmem:[#allocation7_spill] sm:$0xff] %v12667_v20  ;;  %14468 = vst [vmem:[#allocation9_spill] sm:$0xff] %v12669_v9 }
 0x6a6   :  { %v9980_v11 = vpop.f32.mrf.mxu0  ;;  %v9985_v46 = vpop.f32.mrf.mxu1 }
 0x6a8   :  { %v12671_v29 = vpop.f32.mrf.mxu1  ;;  %v12673_v24 = vpop.f32.mrf.mxu0 }
 0x6a9   :  { %14469 = vst [vmem:[#allocation8_spill] sm:$0xff] %v12671_v29  ;;  %14470 = vst [vmem:[#allocation10_spill] sm:$0xff] %v12673_v24 }
 0x6aa   :  { %v9986_v0 = vpop.f32.mrf.mxu1  ;;  %v9991_v30 = vpop.f32.mrf.mxu0 }
 0x6ac   :  { %v12675_v62 = vpop.f32.mrf.mxu0  ;;  %v12677_v7 = vpop.f32.mrf.mxu1 }
 0x6ad   :  { %14471 = vst [vmem:[#allocation11_spill] sm:$0xff] %v12675_v62  ;;  %14472 = vst [vmem:[#allocation12_spill] sm:$0xff] %v12677_v7 }
 0x6ae   :  { %v9992_v45 = vpop.f32.mrf.mxu0  ;;  %v9997_v10 = vpop.f32.mrf.mxu1 }
 0x6b0   :  { %v12679_v59 = vpop.f32.mrf.mxu1  ;;  %v12681_v36 = vpop.f32.mrf.mxu0 }
 0x6b1   :  { %14473 = vst [vmem:[#allocation13_spill] sm:$0xff] %v12679_v59  ;;  %14474 = vst [vmem:[#allocation14_spill] sm:$0xff] %v12681_v36 }
 0x6b2   :  { %v9998_v22 = vpop.f32.mrf.mxu1  ;;  %v10003_v33 = vpop.f32.mrf.mxu0 }
 0x6b4   :  { %v12683_v42 = vpop.f32.mrf.mxu0  ;;  %v12685_v48 = vpop.f32.mrf.mxu1 }
 0x6b5   :  { %14475 = vst [vmem:[#allocation15_spill] sm:$0xff] %v12683_v42  ;;  %14476 = vst [vmem:[#allocation16_spill] sm:$0xff] %v12685_v48 }
 0x6b6   :  { %v10004_v23 = vpop.f32.mrf.mxu0  ;;  %v10009_v4 = vpop.f32.mrf.mxu1 }
 0x6b8   :  { %v12687_v52 = vpop.f32.mrf.mxu1  ;;  %v12689_v44 = vpop.f32.mrf.mxu0 }
 0x6b9   :  { %14477 = vst [vmem:[#allocation17_spill] sm:$0xff] %v12687_v52  ;;  %14478 = vst [vmem:[#allocation18_spill] sm:$0xff] %v12689_v44 }
 0x6ba   :  { %v10010_v41 = vpop.f32.mrf.mxu1  ;;  %v10015_v15 = vpop.f32.mrf.mxu0 }
 0x6bc   :  { %v12691_v26 = vpop.f32.mrf.mxu0  ;;  %v12693_v12 = vpop.f32.mrf.mxu1 }
 0x6bd   :  { %14479 = vst [vmem:[#allocation19_spill] sm:$0xff] %v12691_v26  ;;  %14480 = vst [vmem:[#allocation20_spill] sm:$0xff] %v12693_v12 }
 0x6be   :  { %v10016_v34 = vpop.f32.mrf.mxu0  ;;  %v10021_v53 = vpop.f32.mrf.mxu1 }
 0x6c0   :  { %v12695_v5 = vpop.f32.mrf.mxu1  ;;  %v12697_v63 = vpop.f32.mrf.mxu0 }
 0x6c1   :  { %14481 = vst [vmem:[#allocation21_spill] sm:$0xff] %v12695_v5  ;;  %14482 = vst [vmem:[#allocation22_spill] sm:$0xff] %v12697_v63 }
 0x6c2   :  { %v10022_v21 = vpop.f32.mrf.mxu1  ;;  %v10027_v61 = vpop.f32.mrf.mxu0 }
 0x6c4   :  { %v12699_v56 = vpop.f32.mrf.mxu0  ;;  %v12701_v8 = vpop.f32.mrf.mxu1 }
 0x6c5   :  { %14483 = vst [vmem:[#allocation23_spill] sm:$0xff] %v12699_v56  ;;  %14484 = vst [vmem:[#allocation24_spill] sm:$0xff] %v12701_v8 }
 0x6c6   :  { %v10028_v31 = vpop.f32.mrf.mxu0  ;;  %v10033_v16 = vpop.f32.mrf.mxu1 }
 0x6c8   :  { %v12703_v1 = vpop.f32.mrf.mxu1  ;;  %v12705_v38 = vpop.f32.mrf.mxu0 }
 0x6c9   :  { %14485 = vst [vmem:[#allocation25_spill] sm:$0xff] %v12703_v1  ;;  %14486 = vst [vmem:[#allocation26_spill] sm:$0xff] %v12705_v38 }
 0x6ca   :  { %v10034_v27 = vpop.f32.mrf.mxu1  ;;  %v10039_v19 = vpop.f32.mrf.mxu0 }
 0x6cc   :  { %v12707_v58 = vpop.f32.mrf.mxu0  ;;  %v12709_v35 = vpop.f32.mrf.mxu1 }
 0x6cd   :  { %14487 = vst [vmem:[#allocation27_spill] sm:$0xff] %v12707_v58  ;;  %14488 = vst [vmem:[#allocation28_spill] sm:$0xff] %v12709_v35 }
 0x6ce   :  { %v10040_v11 = vpop.f32.mrf.mxu0  ;;  %v10045_v46 = vpop.f32.mrf.mxu1 }
 0x6d0   :  { %v12711_v0 = vpop.f32.mrf.mxu1  ;;  %v12713_v30 = vpop.f32.mrf.mxu0 }
 0x6d1   :  { %14489 = vst [vmem:[#allocation29_spill] sm:$0xff] %v12711_v0  ;;  %14490 = vst [vmem:[#allocation30_spill] sm:$0xff] %v12713_v30 }
 0x6d2   :  { %v10046_v45 = vpop.f32.mrf.mxu1  ;;  %v10051_v10 = vpop.f32.mrf.mxu0 }
 0x6d4   :  { %v12715_v22 = vpop.f32.mrf.mxu0  ;;  %v12717_v33 = vpop.f32.mrf.mxu1 }
 0x6d5   :  { %14491 = vst [vmem:[#allocation31_spill] sm:$0xff] %v12715_v22  ;;  %14492 = vst [vmem:[#allocation32_spill] sm:$0xff] %v12717_v33 }
 0x6d6   :  { %v10052_v23 = vpop.f32.mrf.mxu0  ;;  %v10057_v4 = vpop.f32.mrf.mxu1 }
 0x6d8   :  { %v12719_v41 = vpop.f32.mrf.mxu1  ;;  %v12721_v15 = vpop.f32.mrf.mxu0 }
 0x6d9   :  { %14493 = vst [vmem:[#allocation33_spill] sm:$0xff] %v12719_v41  ;;  %v5436_v34 = vsel %vm1177_vm3, %v12721_v15, -inf }
 0x6da   :  { %v10058_v53 = vpop.f32.mrf.mxu1  ;;  %5437 = vmax.xlane.f32.xlu0 %v5436_v34  ;;  %v10063_v21 = vpop.f32.mrf.mxu0 }
 0x6dc   :  { %v12725_v61 = vpop.f32.mrf.mxu0  ;;  %v12727_v31 = vpop.f32.mrf.mxu1 }
 0x6dd   :  { %v5442_v16 = vsel %vm1177_vm3, %v12727_v31, -inf  ;;  %v5439_v27 = vsel %vm1177_vm3, %v12725_v61, -inf }
 0x6de   :  { %v10069_v19 = vpop.f32.mrf.mxu1  ;;  %5443 = vmax.xlane.f32.xlu0 %v5442_v16  ;;  %5440 = vmax.xlane.f32.xlu1 %v5439_v27  ;;  %v10064_v11 = vpop.f32.mrf.mxu0 }
 0x6e0   :  { %v12733_v46 = vpop.f32.mrf.mxu1  ;;  %v12735_v45 = vpop.f32.mrf.mxu0 }
 0x6e1   :  { %v5445_v10 = vsel %vm1177_vm3, %v12733_v46, -inf  ;;  %v5448_v23 = vsel %vm1177_vm3, %v12735_v45, -inf }
 0x6e2   :  { %v10070_v4 = vpop.f32.mrf.mxu1  ;;  %5446 = vmax.xlane.f32.xlu0 %v5445_v10  ;;  %5449 = vmax.xlane.f32.xlu1 %v5448_v23  ;;  %v10075_v34 = vpop.f32.mrf.mxu0 }
 0x6e4   :  { %v12741_v53 = vpop.f32.mrf.mxu0  ;;  %v12743_v21 = vpop.f32.mrf.mxu1 }
 0x6e5   :  { %v5454_v16 = vsel %vm1177_vm3, %v12743_v21, -inf  ;;  %v5451_v27 = vsel %vm1177_vm3, %v12741_v53, -inf }
 0x6e6   :  { %v10081_v19 = vpop.f32.mrf.mxu1  ;;  %5455 = vmax.xlane.f32.xlu1 %v5454_v16  ;;  %5452 = vmax.xlane.f32.xlu0 %v5451_v27  ;;  %v10076_v11 = vpop.f32.mrf.mxu0 }
 0x6e8   :  { %v12749_v33 = vpop.f32.mrf.mxu1  ;;  %v12751_v4 = vpop.f32.mrf.mxu0 }
 0x6e9   :  { %v5457_v10 = vsel %vm1177_vm3, %v12749_v33, -inf  ;;  %v5460_v23 = vsel %vm1177_vm3, %v12751_v4, -inf }
 0x6ea   :  { %v10082_v34 = vpop.f32.mrf.mxu1  ;;  %5458 = vmax.xlane.f32.xlu0 %v5457_v10  ;;  %5461 = vmax.xlane.f32.xlu1 %v5460_v23  ;;  %v10087_v30 = vpop.f32.mrf.mxu0 }
 0x6ec   :  { %v12757_v35 = vpop.f32.mrf.mxu0  ;;  %v12759_v19 = vpop.f32.mrf.mxu1 }
 0x6ed   :  { %v5466_v16 = vsel %vm1177_vm3, %v12759_v19, -inf  ;;  %v5463_v27 = vsel %vm1177_vm3, %v12757_v35, -inf }
 0x6ee   :  { %v10093_v11 = vpop.f32.mrf.mxu1  ;;  %5467 = vmax.xlane.f32.xlu1 %v5466_v16  ;;  %5464 = vmax.xlane.f32.xlu0 %v5463_v27  ;;  %v10088_v41 = vpop.f32.mrf.mxu0 }
 0x6f0   :  { %v12765_v38 = vpop.f32.mrf.mxu1  ;;  %v12767_v34 = vpop.f32.mrf.mxu0 }
 0x6f1   :  { %v5469_v30 = vsel %vm1177_vm3, %v12765_v38, -inf  ;;  %v5472_v10 = vsel %vm1177_vm3, %v12767_v34, -inf }
 0x6f2   :  { %v10094_v23 = vpop.f32.mrf.mxu1  ;;  %5470 = vmax.xlane.f32.xlu0 %v5469_v30  ;;  %5473 = vmax.xlane.f32.xlu1 %v5472_v10  ;;  %v10099_v22 = vpop.f32.mrf.mxu0 }
 0x6f4   :  { %v12773_v8 = vpop.f32.mrf.mxu0  ;;  %v12775_v11 = vpop.f32.mrf.mxu1 }
 0x6f5   :  { %v5478_v41 = vsel %vm1177_vm3, %v12775_v11, -inf  ;;  %v5475_v16 = vsel %vm1177_vm3, %v12773_v8, -inf }
 0x6f6   :  { %v10105_v27 = vpop.f32.mrf.mxu1  ;;  %5479 = vmax.xlane.f32.xlu1 %v5478_v41  ;;  %5476 = vmax.xlane.f32.xlu0 %v5475_v16  ;;  %v10100_v0 = vpop.f32.mrf.mxu0 }
 0x6f8   :  { %v12781_v63 = vpop.f32.mrf.mxu1  ;;  %v12783_v23 = vpop.f32.mrf.mxu0 }
 0x6f9   :  { %v5481_v22 = vsel %vm1177_vm3, %v12781_v63, -inf  ;;  %v5484_v30 = vsel %vm1177_vm3, %v12783_v23, -inf }
 0x6fa   :  { %v10106_v10 = vpop.f32.mrf.mxu1  ;;  %5482 = vmax.xlane.f32.xlu0 %v5481_v22  ;;  %5485 = vmax.xlane.f32.xlu1 %v5484_v30  ;;  %v10111_v58 = vpop.f32.mrf.mxu0 }
 0x6fc   :  { %v12789_v12 = vpop.f32.mrf.mxu0  ;;  %v12791_v27 = vpop.f32.mrf.mxu1 }
 0x6fd   :  { %v5490_v0 = vsel %vm1177_vm3, %v12791_v27, -inf  ;;  %v5487_v41 = vsel %vm1177_vm3, %v12789_v12, -inf }
 0x6fe   :  { %v10117_v16 = vpop.f32.mrf.mxu1  ;;  %5491 = vmax.xlane.f32.xlu1 %v5490_v0  ;;  %5488 = vmax.xlane.f32.xlu0 %v5487_v41  ;;  %v10112_v1 = vpop.f32.mrf.mxu0 }
 0x700   :  { %v12797_v44 = vpop.f32.mrf.mxu1  ;;  %v12799_v10 = vpop.f32.mrf.mxu0 }
 0x701   :  { %v5493_v58 = vsel %vm1177_vm3, %v12797_v44, -inf  ;;  %v5496_v22 = vsel %vm1177_vm3, %v12799_v10, -inf }
 0x702   :  { %v10118_v30 = vpop.f32.mrf.mxu1  ;;  %5494 = vmax.xlane.f32.xlu0 %v5493_v58  ;;  %5497 = vmax.xlane.f32.xlu1 %v5496_v22  ;;  %v10123_v56 = vpop.f32.mrf.mxu0 }
 0x704   :  { %v12805_v48 = vpop.f32.mrf.mxu0  ;;  %v12807_v16 = vpop.f32.mrf.mxu1 }
 0x705   :  { %v5502_v1 = vsel %vm1177_vm3, %v12807_v16, -inf  ;;  %v5499_v0 = vsel %vm1177_vm3, %v12805_v48, -inf }
 0x706   :  { %v10129_v41 = vpop.f32.mrf.mxu1  ;;  %5503 = vmax.xlane.f32.xlu1 %v5502_v1  ;;  %5500 = vmax.xlane.f32.xlu0 %v5499_v0  ;;  %v10124_v5 = vpop.f32.mrf.mxu0 }
 0x708   :  { %v12813_v36 = vpop.f32.mrf.mxu1  ;;  %v12815_v30 = vpop.f32.mrf.mxu0 }
 0x709   :  { %v5505_v56 = vsel %vm1177_vm3, %v12813_v36, -inf  ;;  %v5508_v58 = vsel %vm1177_vm3, %v12815_v30, -inf }
 0x70a   :  { %v10130_v22 = vpop.f32.mrf.mxu1  ;;  %5506 = vmax.xlane.f32.xlu0 %v5505_v56  ;;  %5509 = vmax.xlane.f32.xlu1 %v5508_v58  ;;  %v10135_v26 = vpop.f32.mrf.mxu0 }
 0x70c   :  { %v12821_v7 = vpop.f32.mrf.mxu0  ;;  %v12823_v41 = vpop.f32.mrf.mxu1 }
 0x70d   :  { %v5514_v5 = vsel %vm1177_vm3, %v12823_v41, -inf  ;;  %v5511_v1 = vsel %vm1177_vm3, %v12821_v7, -inf }
 0x70e   :  { %v10141_v0 = vpop.f32.mrf.mxu1  ;;  %5515 = vmax.xlane.f32.xlu1 %v5514_v5  ;;  %5512 = vmax.xlane.f32.xlu0 %v5511_v1  ;;  %v10136_v52 = vpop.f32.mrf.mxu0 }
 0x710   :  { %v12829_v24 = vpop.f32.mrf.mxu1  ;;  %v12831_v22 = vpop.f32.mrf.mxu0 }
 0x711   :  { %v5517_v26 = vsel %vm1177_vm3, %v12829_v24, -inf  ;;  %v5520_v56 = vsel %vm1177_vm3, %v12831_v22, -inf }
 0x712   :  { %v10142_v58 = vpop.f32.mrf.mxu1  ;;  %5518 = vmax.xlane.f32.xlu0 %v5517_v26  ;;  %5521 = vmax.xlane.f32.xlu1 %v5520_v56  ;;  %v10147_v42 = vpop.f32.mrf.mxu0 }
 0x713   :  { %v12853_v56 = vpop.permute.xlu1 %5898 }
 0x714   :  { %v12837_v9 = vpop.f32.mrf.mxu0  ;;  %v12839_v0 = vpop.f32.mrf.mxu1 }
 0x715   :  { %v5526_v52 = vsel %vm1177_vm3, %v12839_v0, -inf  ;;  %v5523_v5 = vsel %vm1177_vm3, %v12837_v9, -inf }
 0x716   :  { %v10153_v1 = vpop.f32.mrf.mxu1  ;;  %5527 = vmax.xlane.f32.xlu1 %v5526_v52  ;;  %5524 = vmax.xlane.f32.xlu0 %v5523_v5  ;;  %v10148_v59 = vpop.f32.mrf.mxu0 }
 0x717   :  { %v12855_v58 = vpop.permute.xlu1 %5992  ;;  %v12857_v52 = vpop.permute.xlu0 %5945 }
 0x718   :  { %v12845_v51 = vpop.f32.mrf.mxu1  ;;  %14494 = vst [vmem:[#allocation34_spill] sm:$0xff] %v12855_v58  ;;  %14495 = vst [vmem:[#allocation35_spill] sm:$0xff] %v12857_v52 }
 0x719   :  { %v5529_v26 = vsel %vm1177_vm3, %v12845_v51, -inf }
 0x71a   :  { %v10154_v42 = vpop.f32.mrf.mxu1  ;;  %5530 = vmax.xlane.f32.xlu0 %v5529_v26 }
 0x71b   :  { %v12859_v59 = vpop.permute.xlu1 %6086  ;;  %v12861_v5 = vpop.permute.xlu0 %6039 }
 0x71c   :  { %14496 = vst [vmem:[#allocation36_spill] sm:$0xff] %v12859_v59  ;;  %14497 = vst [vmem:[#allocation37_spill] sm:$0xff] %v12861_v5 }
 0x71f   :  { %v12863_v1 = vpop.permute.xlu1 %6180  ;;  %v12865_v42 = vpop.permute.xlu0 %6133 }
 0x720   :  { %14498 = vst [vmem:[#allocation38_spill] sm:$0xff] %v12863_v1  ;;  %14499 = vst [vmem:[#allocation39_spill] sm:$0xff] %v12865_v42 }
 0x723   :  { %v12867_v26 = vpop.permute.xlu1 %6274  ;;  %v12869_v62 = vpop.permute.xlu0 %6227 }
 0x724   :  { %14500 = vst [vmem:[#allocation40_spill] sm:$0xff] %v12867_v26  ;;  %14501 = vst [vmem:[#allocation41_spill] sm:$0xff] %v12869_v62 }
 0x727   :  { %6509 = vrot.lane.b32.xlu1 %v11193_v37, %s10998_s4  ;;  %v12871_v49 = vpop.permute.xlu1 %6321  ;;  %v12873_v29 = vpop.permute.xlu0 %6368 }
 0x728   :  { %14502 = vst [vmem:[#allocation42_spill] sm:$0xff] %v12871_v49  ;;  %14503 = vst [vmem:[#allocation43_spill] sm:$0xff] %v12873_v29 }
 0x72b   :  { %v12875_v55 = vpop.permute.xlu1 %6415 }
 0x72c   :  { %14504 = vst [vmem:[#allocation44_spill] sm:$0xff] %v12875_v55 }
 0x730   :  { %6462 = vrot.lane.b32.xlu0 %v11196_v40, %s10998_s4 }
 0x763   :  { %v5438_v20 = vpop.xlane.xlu0 %5437 }
 0x764   :  { %v5532_v17 = vsub.f32 %v12721_v15, %v5438_v20 }
 0x766   :  { %v5564_v14 = vmul.f32 1.442695, %v5532_v17 }
 0x767   :  { %v5441_v59 = vpop.xlane.xlu1 %5440  ;;  %v5444_v5 = vpop.xlane.xlu0 %5443 }
 0x768   :  { %10733 = vpow2.f32 %v5564_v14  ;;  %v5533_v1 = vsub.f32 %v12725_v61, %v5441_v59  ;;  %v5534_v42 = vsub.f32 %v12727_v31, %v5444_v5 }
 0x76a   :  { %v5566_v26 = vmul.f32 1.442695, %v5533_v1  ;;  %v5568_v58 = vmul.f32 1.442695, %v5534_v42 }
 0x76b   :  { %v5450_v62 = vpop.xlane.xlu1 %5449  ;;  %v5447_v52 = vpop.xlane.xlu0 %5446 }
 0x76c   :  { %10735 = vpow2.f32 %v5566_v26  ;;  %v5536_v29 = vsub.f32 %v12735_v45, %v5450_v62  ;;  %v5535_v55 = vsub.f32 %v12733_v46, %v5447_v52 }
 0x76d   :  { %10737 = vpow2.f32 %v5568_v58 }
 0x76e   :  { %v5572_v49 = vmul.f32 1.442695, %v5536_v29  ;;  %v5570_v20 = vmul.f32 1.442695, %v5535_v55 }
 0x76f   :  { %v5456_v17 = vpop.xlane.xlu1 %5455  ;;  %v5453_v15 = vpop.xlane.xlu0 %5452 }
 0x770   :  { %10739 = vpow2.f32 %v5572_v49  ;;  %v5538_v14 = vsub.f32 %v12743_v21, %v5456_v17  ;;  %v5537_v61 = vsub.f32 %v12741_v53, %v5453_v15 }
 0x771   :  { %10741 = vpow2.f32 %v5570_v20 }
 0x772   :  { %v5576_v31 = vmul.f32 1.442695, %v5538_v14  ;;  %v5574_v59 = vmul.f32 1.442695, %v5537_v61 }
 0x773   :  { %v5462_v5 = vpop.xlane.xlu1 %5461  ;;  %v5459_v1 = vpop.xlane.xlu0 %5458 }
 0x774   :  { %10743 = vpow2.f32 %v5576_v31  ;;  %v5540_v62 = vsub.f32 %v12751_v4, %v5462_v5  ;;  %v5539_v46 = vsub.f32 %v12749_v33, %v5459_v1 }
 0x775   :  { %v12886_v45 = vpop.eup %10733  ;;  %10745 = vpow2.f32 %v5574_v59 }
 0x776   :  { %v5580_v55 = vmul.f32 1.442695, %v5540_v62  ;;  %v5578_v29 = vmul.f32 1.442695, %v5539_v46  ;;  %v5628_v49 = vsel %vm1177_vm3, %v12886_v45, 0.0 }
 0x777   :  { %v5468_v21 = vpop.xlane.xlu1 %5467  ;;  %5629 = vadd.xlane.f32.xlu1 %v5628_v49  ;;  %v5465_v53 = vpop.xlane.xlu0 %5464 }
 0x778   :  { %10747 = vpow2.f32 %v5580_v55  ;;  %v5542_v58 = vsub.f32 %v12759_v19, %v5468_v21  ;;  %v5541_v52 = vsub.f32 %v12757_v35, %v5465_v53 }
 0x779   :  { %v12892_v42 = vpop.eup %10735  ;;  %10749 = vpow2.f32 %v5578_v29 }
 0x77a   :  { %v12894_v33 = vpop.eup %10737  ;;  %v5584_v4 = vmul.f32 1.442695, %v5542_v58  ;;  %v5582_v26 = vmul.f32 1.442695, %v5541_v52  ;;  %v5631_v20 = vsel %vm1177_vm3, %v12892_v42, 0.0 }
 0x77b   :  { %v5474_v17 = vpop.xlane.xlu1 %5473  ;;  %5632 = vadd.xlane.f32.xlu0 %v5631_v20  ;;  %v5634_v15 = vsel %vm1177_vm3, %v12894_v33, 0.0  ;;  %v5471_v14 = vpop.xlane.xlu0 %5470 }
 0x77c   :  { %10751 = vpow2.f32 %v5584_v4  ;;  %v5544_v19 = vsub.f32 %v12767_v34, %v5474_v17  ;;  %5635 = vadd.xlane.f32.xlu1 %v5634_v15  ;;  %v5543_v35 = vsub.f32 %v12765_v38, %v5471_v14 }
 0x77d   :  { %v12902_v61 = vpop.eup %10739  ;;  %10753 = vpow2.f32 %v5582_v26 }
 0x77e   :  { %v12904_v31 = vpop.eup %10741  ;;  %v5588_v59 = vmul.f32 1.442695, %v5544_v19  ;;  %v5586_v5 = vmul.f32 1.442695, %v5543_v35  ;;  %v5640_v1 = vsel %vm1177_vm3, %v12902_v61, 0.0 }
 0x77f   :  { %v5480_v62 = vpop.xlane.xlu1 %5479  ;;  %v5637_v46 = vsel %vm1177_vm3, %v12904_v31, 0.0  ;;  %v5477_v55 = vpop.xlane.xlu0 %5476 }
 0x780   :  { %10755 = vpow2.f32 %v5588_v59  ;;  %v5546_v34 = vsub.f32 %v12775_v11, %v5480_v62  ;;  %5641 = vadd.xlane.f32.xlu1 %v5640_v1  ;;  %5638 = vadd.xlane.f32.xlu0 %v5637_v46  ;;  %v5545_v38 = vsub.f32 %v12773_v8, %v5477_v55 }
 0x781   :  { %v12912_v29 = vpop.eup %10743  ;;  %10757 = vpow2.f32 %v5586_v5 }
 0x782   :  { %v12914_v49 = vpop.eup %10745  ;;  %v5592_v21 = vmul.f32 1.442695, %v5546_v34  ;;  %v5590_v53 = vmul.f32 1.442695, %v5545_v38  ;;  %v5646_v58 = vsel %vm1177_vm3, %v12912_v29, 0.0 }
 0x783   :  { %v5486_v52 = vpop.xlane.xlu1 %5485  ;;  %v5643_v4 = vsel %vm1177_vm3, %v12914_v49, 0.0  ;;  %v5483_v26 = vpop.xlane.xlu0 %5482 }
 0x784   :  { %10759 = vpow2.f32 %v5592_v21  ;;  %v5548_v11 = vsub.f32 %v12783_v23, %v5486_v52  ;;  %5647 = vadd.xlane.f32.xlu1 %v5646_v58  ;;  %5644 = vadd.xlane.f32.xlu0 %v5643_v4  ;;  %v5547_v8 = vsub.f32 %v12781_v63, %v5483_v26 }
 0x785   :  { %v12922_v20 = vpop.eup %10747  ;;  %10761 = vpow2.f32 %v5590_v53 }
 0x786   :  { %v12924_v17 = vpop.eup %10749  ;;  %v5596_v15 = vmul.f32 1.442695, %v5548_v11  ;;  %v5594_v14 = vmul.f32 1.442695, %v5547_v8  ;;  %v5652_v19 = vsel %vm1177_vm3, %v12922_v20, 0.0 }
 0x787   :  { %v5492_v35 = vpop.xlane.xlu1 %5491  ;;  %v5649_v59 = vsel %vm1177_vm3, %v12924_v17, 0.0  ;;  %v5489_v5 = vpop.xlane.xlu0 %5488 }
 0x788   :  { %10763 = vpow2.f32 %v5596_v15  ;;  %v5550_v23 = vsub.f32 %v12791_v27, %v5492_v35  ;;  %5653 = vadd.xlane.f32.xlu1 %v5652_v19  ;;  %5650 = vadd.xlane.f32.xlu0 %v5649_v59  ;;  %v5549_v63 = vsub.f32 %v12789_v12, %v5489_v5 }
 0x789   :  { %v12932_v1 = vpop.eup %10751  ;;  %10765 = vpow2.f32 %v5594_v14 }
 0x78a   :  { %v12934_v62 = vpop.eup %10753  ;;  %v5600_v46 = vmul.f32 1.442695, %v5550_v23  ;;  %v5598_v55 = vmul.f32 1.442695, %v5549_v63  ;;  %v5658_v34 = vsel %vm1177_vm3, %v12932_v1, 0.0 }
 0x78b   :  { %v5498_v38 = vpop.xlane.xlu1 %5497  ;;  %v5655_v21 = vsel %vm1177_vm3, %v12934_v62, 0.0  ;;  %v5495_v53 = vpop.xlane.xlu0 %5494 }
 0x78c   :  { %10767 = vpow2.f32 %v5600_v46  ;;  %v5552_v27 = vsub.f32 %v12799_v10, %v5498_v38  ;;  %5659 = vadd.xlane.f32.xlu1 %v5658_v34  ;;  %5656 = vadd.xlane.f32.xlu0 %v5655_v21  ;;  %v5551_v12 = vsub.f32 %v12797_v44, %v5495_v53 }
 0x78d   :  { %v12942_v58 = vpop.eup %10755  ;;  %10769 = vpow2.f32 %v5598_v55 }
 0x78e   :  { %v12944_v52 = vpop.eup %10757  ;;  %v5604_v4 = vmul.f32 1.442695, %v5552_v27  ;;  %v5602_v26 = vmul.f32 1.442695, %v5551_v12  ;;  %v5664_v11 = vsel %vm1177_vm3, %v12942_v58, 0.0 }
 0x78f   :  { %v5504_v8 = vpop.xlane.xlu1 %5503  ;;  %v5661_v15 = vsel %vm1177_vm3, %v12944_v52, 0.0  ;;  %v5501_v14 = vpop.xlane.xlu0 %5500 }
 0x790   :  { %10771 = vpow2.f32 %v5604_v4  ;;  %v5554_v10 = vsub.f32 %v12807_v16, %v5504_v8  ;;  %5665 = vadd.xlane.f32.xlu1 %v5664_v11  ;;  %5662 = vadd.xlane.f32.xlu0 %v5661_v15  ;;  %v5553_v44 = vsub.f32 %v12805_v48, %v5501_v14 }
 0x791   :  { %v12952_v19 = vpop.eup %10759  ;;  %10773 = vpow2.f32 %v5602_v26 }
 0x792   :  { %v12954_v35 = vpop.eup %10761  ;;  %v5608_v59 = vmul.f32 1.442695, %v5554_v10  ;;  %v5606_v5 = vmul.f32 1.442695, %v5553_v44  ;;  %v5670_v23 = vsel %vm1177_vm3, %v12952_v19, 0.0 }
 0x793   :  { %v5510_v63 = vpop.xlane.xlu1 %5509  ;;  %v5667_v46 = vsel %vm1177_vm3, %v12954_v35, 0.0  ;;  %v5507_v55 = vpop.xlane.xlu0 %5506 }
 0x794   :  { %10775 = vpow2.f32 %v5608_v59  ;;  %v5556_v16 = vsub.f32 %v12815_v30, %v5510_v63  ;;  %5671 = vadd.xlane.f32.xlu1 %v5670_v23  ;;  %5668 = vadd.xlane.f32.xlu0 %v5667_v46  ;;  %v5555_v48 = vsub.f32 %v12813_v36, %v5507_v55 }
 0x795   :  { %v12962_v34 = vpop.eup %10763  ;;  %10777 = vpow2.f32 %v5606_v5 }
 0x796   :  { %v12964_v38 = vpop.eup %10765  ;;  %v5612_v21 = vmul.f32 1.442695, %v5556_v16  ;;  %v5610_v53 = vmul.f32 1.442695, %v5555_v48  ;;  %v5676_v27 = vsel %vm1177_vm3, %v12962_v34, 0.0 }
 0x797   :  { %v5516_v12 = vpop.xlane.xlu1 %5515  ;;  %v5673_v4 = vsel %vm1177_vm3, %v12964_v38, 0.0  ;;  %v5513_v26 = vpop.xlane.xlu0 %5512 }
 0x798   :  { %10779 = vpow2.f32 %v5612_v21  ;;  %v5558_v30 = vsub.f32 %v12823_v41, %v5516_v12  ;;  %5677 = vadd.xlane.f32.xlu1 %v5676_v27  ;;  %5674 = vadd.xlane.f32.xlu0 %v5673_v4  ;;  %v5557_v36 = vsub.f32 %v12821_v7, %v5513_v26 }
 0x799   :  { %v12972_v11 = vpop.eup %10767  ;;  %10781 = vpow2.f32 %v5610_v53 }
 0x79a   :  { %v12974_v8 = vpop.eup %10769  ;;  %v5616_v15 = vmul.f32 1.442695, %v5558_v30  ;;  %v5614_v14 = vmul.f32 1.442695, %v5557_v36  ;;  %v5682_v10 = vsel %vm1177_vm3, %v12972_v11, 0.0 }
 0x79b   :  { %v5522_v44 = vpop.xlane.xlu1 %5521  ;;  %v5679_v59 = vsel %vm1177_vm3, %v12974_v8, 0.0  ;;  %v5519_v5 = vpop.xlane.xlu0 %5518 }
 0x79c   :  { %10783 = vpow2.f32 %v5616_v15  ;;  %v5560_v41 = vsub.f32 %v12831_v22, %v5522_v44  ;;  %5683 = vadd.xlane.f32.xlu1 %v5682_v10  ;;  %5680 = vadd.xlane.f32.xlu0 %v5679_v59  ;;  %v5559_v7 = vsub.f32 %v12829_v24, %v5519_v5 }
 0x79d   :  { %v12982_v23 = vpop.eup %10771  ;;  %10785 = vpow2.f32 %v5614_v14 }
 0x79e   :  { %v12984_v63 = vpop.eup %10773  ;;  %v5620_v46 = vmul.f32 1.442695, %v5560_v41  ;;  %v5618_v55 = vmul.f32 1.442695, %v5559_v7  ;;  %v5688_v16 = vsel %vm1177_vm3, %v12982_v23, 0.0 }
 0x79f   :  { %v5528_v48 = vpop.xlane.xlu1 %5527  ;;  %v5685_v21 = vsel %vm1177_vm3, %v12984_v63, 0.0  ;;  %v5525_v53 = vpop.xlane.xlu0 %5524 }
 0x7a0   :  { %10787 = vpow2.f32 %v5620_v46  ;;  %v5562_v22 = vsub.f32 %v12839_v0, %v5528_v48  ;;  %5689 = vadd.xlane.f32.xlu1 %v5688_v16  ;;  %5686 = vadd.xlane.f32.xlu0 %v5685_v21  ;;  %v5561_v24 = vsub.f32 %v12837_v9, %v5525_v53 }
 0x7a1   :  { %v12992_v27 = vpop.eup %10775  ;;  %10789 = vpow2.f32 %v5618_v55 }
 0x7a2   :  { %v12994_v12 = vpop.eup %10777  ;;  %v5624_v4 = vmul.f32 1.442695, %v5562_v22  ;;  %v5622_v26 = vmul.f32 1.442695, %v5561_v24  ;;  %v5694_v30 = vsel %vm1177_vm3, %v12992_v27, 0.0 }
 0x7a3   :  { %v5691_v36 = vsel %vm1177_vm3, %v12994_v12, 0.0  ;;  %v5531_v15 = vpop.xlane.xlu0 %5530 }
 0x7a4   :  { %10791 = vpow2.f32 %v5624_v4  ;;  %5695 = vadd.xlane.f32.xlu1 %v5694_v30  ;;  %5692 = vadd.xlane.f32.xlu0 %v5691_v36  ;;  %v5563_v0 = vsub.f32 %v12845_v51, %v5531_v15  ;;  %v13089_v30 = vpop.permute.xlu1 %6509 }
 0x7a5   :  { %v13001_v9 = vpop.eup %10779  ;;  %10793 = vpow2.f32 %v5622_v26 }
 0x7a6   :  { %v13003_v14 = vpop.eup %10781  ;;  %v5626_v10 = vmul.f32 1.442695, %v5563_v0  ;;  %v5700_v44 = vsel %vm1177_vm3, %v13001_v9, 0.0 }
 0x7a7   :  { %v5697_v59 = vsel %vm1177_vm3, %v13003_v14, 0.0  ;;  %v13095_v36 = vpop.permute.xlu0 %6462 }
 0x7a8   :  { %10795 = vpow2.f32 %v5626_v10  ;;  %5701 = vadd.xlane.f32.xlu1 %v5700_v44  ;;  %5698 = vadd.xlane.f32.xlu0 %v5697_v59 }
 0x7a9   :  { %v13009_v5 = vpop.eup %10783 }
 0x7aa   :  { %v13011_v41 = vpop.eup %10785  ;;  %v5706_v51 = vsel %vm1177_vm3, %v13009_v5, 0.0 }
 0x7ab   :  { %v5703_v7 = vsel %vm1177_vm3, %v13011_v41, 0.0 }
 0x7ac   :  { %5707 = vadd.xlane.f32.xlu1 %v5706_v51  ;;  %5704 = vadd.xlane.f32.xlu0 %v5703_v7 }
 0x7ad   :  { %v13017_v46 = vpop.eup %10787 }
 0x7ae   :  { %v13019_v55 = vpop.eup %10789  ;;  %v5712_v16 = vsel %vm1177_vm3, %v13017_v46, 0.0 }
 0x7af   :  { %v5709_v48 = vsel %vm1177_vm3, %v13019_v55, 0.0 }
 0x7b0   :  { %5713 = vadd.xlane.f32.xlu1 %v5712_v16  ;;  %5710 = vadd.xlane.f32.xlu0 %v5709_v48 }
 0x7b1   :  { %v13025_v21 = vpop.eup %10791 }
 0x7b2   :  { %v13027_v53 = vpop.eup %10793  ;;  %v5718_v22 = vsel %vm1177_vm3, %v13025_v21, 0.0 }
 0x7b3   :  { %v5715_v24 = vsel %vm1177_vm3, %v13027_v53, 0.0 }
 0x7b4   :  { %5719 = vadd.xlane.f32.xlu1 %v5718_v22  ;;  %5716 = vadd.xlane.f32.xlu0 %v5715_v24 }
 0x7b5   :  { %v13033_v4 = vpop.eup %10795 }
 0x7b6   :  { %v5721_v26 = vsel %vm1177_vm3, %v13033_v4, 0.0 }
 0x7b8   :  { %5722 = vadd.xlane.f32.xlu0 %v5721_v26 }
 0x7c5   :  { %6834 = vrot.lane.b32.xlu1 %v11114_v32, %s10999_s5 }
 0x7c9   :  { %6832 = vrot.lane.b32.xlu1 %v11114_v32, %s11000_s6 }
 0x7cd   :  { %6936 = vrot.lane.b32.xlu1 %v11127_v43, %s10999_s5 }
 0x7ce   :  { %6783 = vrot.lane.b32.xlu0 %v11109_v28, %s10999_s5 }
 0x7d1   :  { %6934 = vrot.lane.b32.xlu1 %v11127_v43, %s11000_s6 }
 0x7d2   :  { %6781 = vrot.lane.b32.xlu0 %v11109_v28, %s11000_s6 }
 0x7d5   :  { %7038 = vrot.lane.b32.xlu1 %v11131_v47, %s10999_s5 }
 0x7d6   :  { %6885 = vrot.lane.b32.xlu0 %v11122_v39, %s10999_s5 }
 0x7d9   :  { %7036 = vrot.lane.b32.xlu1 %v11131_v47, %s11000_s6 }
 0x7da   :  { %6883 = vrot.lane.b32.xlu0 %v11122_v39, %s11000_s6 }
 0x7dd   :  { %7140 = vrot.lane.b32.xlu1 %v11145_v57, %s10999_s5 }
 0x7de   :  { %6987 = vrot.lane.b32.xlu0 %v11136_v50, %s10999_s5 }
 0x7e1   :  { %7138 = vrot.lane.b32.xlu1 %v11145_v57, %s11000_s6 }
 0x7e2   :  { %6985 = vrot.lane.b32.xlu0 %v11136_v50, %s11000_s6 }
 0x7e5   :  { %7242 = vrot.lane.b32.xlu1 %v11157_v3, %s10999_s5 }
 0x7e6   :  { %7089 = vrot.lane.b32.xlu0 %v11148_v60, %s10999_s5 }
 0x7e9   :  { %7240 = vrot.lane.b32.xlu1 %v11157_v3, %s11000_s6 }
 0x7ea   :  { %7087 = vrot.lane.b32.xlu0 %v11148_v60, %s11000_s6 }
 0x7ed   :  { %7344 = vrot.lane.b32.xlu1 %v11169_v13, %s10999_s5 }
 0x7ee   :  { %7191 = vrot.lane.b32.xlu0 %v11160_v6, %s10999_s5 }
 0x7f1   :  { %7342 = vrot.lane.b32.xlu1 %v11169_v13, %s11000_s6 }
 0x7f2   :  { %7189 = vrot.lane.b32.xlu0 %v11160_v6, %s11000_s6 }
 0x7f5   :  { %7446 = vrot.lane.b32.xlu1 %v11181_v25, %s10999_s5 }
 0x7f6   :  { %7293 = vrot.lane.b32.xlu0 %v14431_v54, %s10999_s5 }
 0x7f9   :  { %7444 = vrot.lane.b32.xlu1 %v11181_v25, %s11000_s6 }
 0x7fa   :  { %7291 = vrot.lane.b32.xlu0 %v14431_v54, %s11000_s6 }
 0x7fd   :  { %7548 = vrot.lane.b32.xlu1 %v11193_v37, %s10999_s5 }
 0x7fe   :  { %7395 = vrot.lane.b32.xlu0 %v14433_v2, %s10999_s5 }
 0x800   :  { %v5630_v15 = vpop.xlane.xlu1 %5629 }
 0x801   :  { %7546 = vrot.lane.b32.xlu1 %v11193_v37, %s11000_s6  ;;  %10797 = vrcp.f32 %v5630_v15 }
 0x802   :  { %7393 = vrot.lane.b32.xlu0 %v14433_v2, %s11000_s6 }
 0x804   :  { %v5633_v0 = vpop.xlane.xlu0 %5632 }
 0x805   :  { %7965 = vrot.lane.b32.xlu1 %v11109_v28, %s11001_s7  ;;  %v5636_v10 = vpop.xlane.xlu1 %5635  ;;  %10799 = vrcp.f32 %v5633_v0 }
 0x806   :  { %7497 = vrot.lane.b32.xlu0 %v11196_v40, %s10999_s5  ;;  %10801 = vrcp.f32 %v5636_v10 }
 0x809   :  { %8059 = vrot.lane.b32.xlu1 %v11122_v39, %s11001_s7  ;;  %v5642_v44 = vpop.xlane.xlu1 %5641  ;;  %v5639_v59 = vpop.xlane.xlu0 %5638 }
 0x80a   :  { %7495 = vrot.lane.b32.xlu0 %v11196_v40, %s11000_s6  ;;  %10803 = vrcp.f32 %v5639_v59  ;;  %v14505_v59 = vld [vmem:[#allocation35_spill] sm:$0xff] }
 0x80b   :  { %10805 = vrcp.f32 %v5642_v44 }
 0x80d   :  { %8153 = vrot.lane.b32.xlu1 %v11136_v50, %s11001_s7  ;;  %v5648_v28 = vpop.xlane.xlu1 %5647  ;;  %v5645_v51 = vpop.xlane.xlu0 %5644 }
 0x80e   :  { %8012 = vrot.lane.b32.xlu0 %v11114_v32, %s11001_s7  ;;  %10807 = vrcp.f32 %v5645_v51  ;;  %v10798_v7 = vpop.eup %10797 }
 0x80f   :  { %10809 = vrcp.f32 %v5648_v28  ;;  %v5756_v22 = vmul.f32 %v10798_v7, %v12886_v45 }
 0x811   :  { %8247 = vrot.lane.b32.xlu1 %v11148_v60, %s11001_s7  ;;  %v5654_v39 = vpop.xlane.xlu1 %5653  ;;  %v5651_v16 = vpop.xlane.xlu0 %5650 }
 0x812   :  { %v10800_v48 = vpop.eup %10799  ;;  %8106 = vrot.lane.b32.xlu0 %v11127_v43, %s11001_s7  ;;  %10811 = vrcp.f32 %v5651_v16 }
 0x813   :  { %v5757_v50 = vmul.f32 %v10800_v48, %v12892_v42  ;;  %10813 = vrcp.f32 %v5654_v39  ;;  %v10802_v15 = vpop.eup %10801  ;;  %v14506_v39 = vld [vmem:[#allocation34_spill] sm:$0xff] }
 0x814   :  { %v5758_v60 = vmul.f32 %v10802_v15, %v12894_v33 }
 0x815   :  { %8341 = vrot.lane.b32.xlu1 %v11160_v6, %s11001_s7  ;;  %v5660_v32 = vpop.xlane.xlu1 %5659  ;;  %v5657_v24 = vpop.xlane.xlu0 %5656  ;;  %v5788_v26 = vpack.c.bf16 %v5757_v50, %v5756_v22 }
 0x816   :  { %8200 = vrot.lane.b32.xlu0 %v11131_v47, %s11001_s7  ;;  %10815 = vrcp.f32 %v5657_v24 }
 0x817   :  { %10158 = vmatmul.mubr.msk.bf16.vlgmr.msra.gmra.mxu0 %vm1177_vm3, %v5788_v26  ;;  %v10804_v43 = vpop.eup %10803  ;;  %10817 = vrcp.f32 %v5660_v32  ;;  %v14507_v32 = vld [vmem:[#allocation37_spill] sm:$0xff] }
 0x818   :  { %10168 = vmatpush3.bf16.msra.mxu0 %v12853_v56  ;;  %10169 = vmatprep.mubr.msk.bf16.mxu0 %vm10990_vm1, %v14430_v18  ;;  %v5759_v6 = vmul.f32 %v10804_v43, %v12904_v31  ;;  %v10806_v47 = vpop.eup %10805 }
 0x819   :  { %8435 = vrot.lane.b32.xlu1 %v14431_v54, %s11001_s7  ;;  %v5666_v45 = vpop.xlane.xlu1 %5665  ;;  %v5663_v42 = vpop.xlane.xlu0 %5662  ;;  %10179 = vmatprep.subr.bf16.mxu0 %v14430_v18  ;;  %v5760_v10 = vmul.f32 %v10806_v47, %v12902_v61 }
 0x81a   :  { %8294 = vrot.lane.b32.xlu0 %v11145_v57, %s11001_s7  ;;  %10819 = vrcp.f32 %v5663_v42  ;;  %v5789_v56 = vpack.c.bf16 %v5759_v6, %v5758_v60  ;;  %v14508_v6 = vld [vmem:[#allocation36_spill] sm:$0xff] }
 0x81b   :  { %v10808_v0 = vpop.eup %10807  ;;  %10821 = vrcp.f32 %v5666_v45 }
 0x81c   :  { %v5761_v33 = vmul.f32 %v10808_v0, %v12914_v49  ;;  %10164 = vmatmul.mubr.msk.bf16.vlgmr.msra.gmra.mxu1 %vm1177_vm3, %v5789_v56  ;;  %v10810_v44 = vpop.eup %10809 }
 0x81d   :  { %8482 = vrot.lane.b32.xlu1 %v11169_v13, %s11001_s7  ;;  %v5672_v54 = vpop.xlane.xlu1 %5671  ;;  %v5669_v31 = vpop.xlane.xlu0 %5668  ;;  %10174 = vmatpush3.bf16.msra.mxu1 %v14505_v59  ;;  %v5762_v49 = vmul.f32 %v10810_v44, %v12912_v29 }
 0x81e   :  { %8388 = vrot.lane.b32.xlu0 %v11157_v3, %s11001_s7  ;;  %10823 = vrcp.f32 %v5669_v31  ;;  %v5790_v57 = vpack.c.bf16 %v5761_v33, %v5760_v10  ;;  %10175 = vmatprep.mubr.msk.bf16.mxu1 %vm10990_vm1, %v14430_v18  ;;  %v14509_v10 = vld [vmem:[#allocation39_spill] sm:$0xff] }
 0x81f   :  { %10185 = vmatprep.subr.bf16.mxu1 %v14430_v18  ;;  %v10812_v61 = vpop.eup %10811  ;;  %10825 = vrcp.f32 %v5672_v54 }
 0x820   :  { %v5763_v13 = vmul.f32 %v10812_v61, %v12924_v17  ;;  %10170 = vmatmul.mubr.msk.bf16.vlgmr.msra.gmra.mxu0 %vm1177_vm3, %v5790_v57  ;;  %v10814_v7 = vpop.eup %10813  ;;  %v14510_v57 = vld [vmem:[#allocation38_spill] sm:$0xff] }
 0x821   :  { %v5678_v28 = vpop.xlane.xlu1 %5677  ;;  %v5675_v51 = vpop.xlane.xlu0 %5674  ;;  %10180 = vmatpush3.bf16.msra.mxu0 %v14506_v39  ;;  %10181 = vmatprep.mubr.msk.bf16.mxu0 %vm10990_vm1, %v14430_v18  ;;  %v5764_v29 = vmul.f32 %v10814_v7, %v12922_v20  ;;  %v14511_v7 = vld [vmem:[#allocation41_spill] sm:$0xff] }
 0x822   :  { %10827 = vrcp.f32 %v5675_v51  ;;  %v5791_v3 = vpack.c.bf16 %v5763_v13, %v5762_v49  ;;  %10191 = vmatprep.subr.bf16.mxu0 %v14430_v18 }
 0x823   :  { %v10816_v16 = vpop.eup %10815  ;;  %10829 = vrcp.f32 %v5678_v28 }
 0x824   :  { %v5765_v17 = vmul.f32 %v10816_v16, %v12934_v62  ;;  %10176 = vmatmul.mubr.msk.bf16.vlgmr.msra.gmra.mxu1 %vm1177_vm3, %v5791_v3  ;;  %v10818_v50 = vpop.eup %10817 }
 0x825   :  { %v5684_v48 = vpop.xlane.xlu1 %5683  ;;  %v5681_v22 = vpop.xlane.xlu0 %5680  ;;  %10186 = vmatpush3.bf16.msra.mxu1 %v14507_v32  ;;  %10187 = vmatprep.mubr.msk.bf16.mxu1 %vm10990_vm1, %v14430_v18  ;;  %v5766_v20 = vmul.f32 %v10818_v50, %v12932_v1 }
 0x826   :  { %10831 = vrcp.f32 %v5681_v22  ;;  %v5792_v24 = vpack.c.bf16 %v5765_v17, %v5764_v29  ;;  %10197 = vmatprep.subr.bf16.mxu1 %v14430_v18 }
 0x827   :  { %v10820_v26 = vpop.eup %10819  ;;  %10833 = vrcp.f32 %v5684_v48  ;;  %v14512_v48 = vld [vmem:[#allocation40_spill] sm:$0xff] }
 0x828   :  { %v5767_v62 = vmul.f32 %v10820_v26, %v12944_v52  ;;  %10182 = vmatmul.mubr.msk.bf16.vlgmr.msra.gmra.mxu0 %vm1177_vm3, %v5792_v24  ;;  %v10822_v60 = vpop.eup %10821 }
 0x829   :  { %v5690_v15 = vpop.xlane.xlu1 %5689  ;;  %v5687_v43 = vpop.xlane.xlu0 %5686  ;;  %10192 = vmatpush3.bf16.msra.mxu0 %v14508_v6  ;;  %10193 = vmatprep.mubr.msk.bf16.mxu0 %vm10990_vm1, %v14430_v18  ;;  %v5768_v1 = vmul.f32 %v10822_v60, %v12942_v58 }
 0x82a   :  { %10835 = vrcp.f32 %v5687_v43  ;;  %v5793_v45 = vpack.c.bf16 %v5767_v62, %v5766_v20  ;;  %10203 = vmatprep.subr.bf16.mxu0 %v14430_v18  ;;  %v14513_v20 = vld [vmem:[#allocation42_spill] sm:$0xff] }
 0x82b   :  { %v10824_v42 = vpop.eup %10823  ;;  %10837 = vrcp.f32 %v5690_v15 }
 0x82c   :  { %v5769_v52 = vmul.f32 %v10824_v42, %v12954_v35  ;;  %10188 = vmatmul.mubr.msk.bf16.vlgmr.msra.gmra.mxu1 %vm1177_vm3, %v5793_v45  ;;  %v10826_v0 = vpop.eup %10825  ;;  %v14514_v45 = vld [vmem:[#allocation43_spill] sm:$0xff] }
 0x82d   :  { %v5696_v47 = vpop.xlane.xlu1 %5695  ;;  %v5693_v56 = vpop.xlane.xlu0 %5692  ;;  %10198 = vmatpush3.bf16.msra.mxu1 %v14509_v10  ;;  %10199 = vmatprep.mubr.msk.bf16.mxu1 %vm10990_vm1, %v14430_v18  ;;  %v5770_v58 = vmul.f32 %v10826_v0, %v12952_v19  ;;  %v14515_v0 = vld [vmem:[#allocation44_spill] sm:$0xff] }
 0x82e   :  { %10839 = vrcp.f32 %v5693_v56  ;;  %v5794_v33 = vpack.c.bf16 %v5769_v52, %v5768_v1  ;;  %10209 = vmatprep.subr.bf16.mxu1 %v14430_v18 }
 0x82f   :  { %v10828_v54 = vpop.eup %10827  ;;  %10841 = vrcp.f32 %v5696_v47 }
 0x830   :  { %v5771_v35 = vmul.f32 %v10828_v54, %v12964_v38  ;;  %10194 = vmatmul.mubr.msk.bf16.vlgmr.msra.gmra.mxu0 %vm1177_vm3, %v5794_v33  ;;  %v10830_v59 = vpop.eup %10829 }
 0x831   :  { %v5702_v31 = vpop.xlane.xlu1 %5701  ;;  %v5699_v44 = vpop.xlane.xlu0 %5698  ;;  %10204 = vmatpush3.bf16.msra.mxu0 %v14510_v57  ;;  %10205 = vmatprep.mubr.msk.bf16.mxu0 %vm10990_vm1, %v14430_v18  ;;  %v5772_v19 = vmul.f32 %v10830_v59, %v12962_v34 }
 0x832   :  { %10843 = vrcp.f32 %v5699_v44  ;;  %v5795_v61 = vpack.c.bf16 %v5771_v35, %v5770_v58  ;;  %10215 = vmatprep.subr.bf16.mxu0 %v14430_v18 }
 0x833   :  { %v10832_v49 = vpop.eup %10831  ;;  %10845 = vrcp.f32 %v5702_v31 }
 0x834   :  { %v5773_v38 = vmul.f32 %v10832_v49, %v12974_v8  ;;  %10200 = vmatmul.mubr.msk.bf16.vlgmr.msra.gmra.mxu1 %vm1177_vm3, %v5795_v61  ;;  %v10834_v51 = vpop.eup %10833 }
 0x835   :  { %v5708_v13 = vpop.xlane.xlu1 %5707  ;;  %v5705_v28 = vpop.xlane.xlu0 %5704  ;;  %10210 = vmatpush3.bf16.msra.mxu1 %v14511_v7  ;;  %10211 = vmatprep.mubr.msk.bf16.mxu1 %vm10990_vm1, %v14430_v18  ;;  %v5774_v34 = vmul.f32 %v10834_v51, %v12972_v11 }
 0x836   :  { %10847 = vrcp.f32 %v5705_v28  ;;  %v5796_v39 = vpack.c.bf16 %v5773_v38, %v5772_v19  ;;  %10221 = vmatprep.subr.bf16.mxu1 %v14430_v18 }
 0x837   :  { %v10836_v3 = vpop.eup %10835  ;;  %10849 = vrcp.f32 %v5708_v13 }
 0x838   :  { %v5775_v8 = vmul.f32 %v10836_v3, %v12984_v63  ;;  %10206 = vmatmul.mubr.msk.bf16.vlgmr.msra.gmra.mxu0 %vm1177_vm3, %v5796_v39  ;;  %v10838_v17 = vpop.eup %10837 }
 0x839   :  { %v5714_v16 = vpop.xlane.xlu1 %5713  ;;  %v5711_v29 = vpop.xlane.xlu0 %5710  ;;  %10216 = vmatpush3.bf16.msra.mxu0 %v14512_v48  ;;  %10217 = vmatprep.mubr.msk.bf16.mxu0 %vm10990_vm1, %v14430_v18  ;;  %v5776_v11 = vmul.f32 %v10838_v17, %v12982_v23 }
 0x83a   :  { %10851 = vrcp.f32 %v5711_v29  ;;  %v5797_v22 = vpack.c.bf16 %v5775_v8, %v5774_v34  ;;  %10227 = vmatprep.subr.bf16.mxu0 %v14430_v18 }
 0x83b   :  { %v10840_v50 = vpop.eup %10839  ;;  %10853 = vrcp.f32 %v5714_v16 }
 0x83c   :  { %v5777_v63 = vmul.f32 %v10840_v50, %v12994_v12  ;;  %10212 = vmatmul.mubr.msk.bf16.vlgmr.msra.gmra.mxu1 %vm1177_vm3, %v5797_v22  ;;  %v10842_v26 = vpop.eup %10841 }
 0x83d   :  { %v5720_v32 = vpop.xlane.xlu1 %5719  ;;  %v5717_v24 = vpop.xlane.xlu0 %5716  ;;  %10222 = vmatpush3.bf16.msra.mxu1 %v14513_v20  ;;  %10223 = vmatprep.mubr.msk.bf16.mxu1 %vm10990_vm1, %v14430_v18  ;;  %v5778_v23 = vmul.f32 %v10842_v26, %v12992_v27 }
 0x83e   :  { %10855 = vrcp.f32 %v5717_v24  ;;  %v5798_v62 = vpack.c.bf16 %v5777_v63, %v5776_v11  ;;  %10233 = vmatprep.subr.bf16.mxu1 %v14430_v18 }
 0x83f   :  { %v10844_v15 = vpop.eup %10843  ;;  %10857 = vrcp.f32 %v5720_v32 }
 0x840   :  { %v5779_v12 = vmul.f32 %v10844_v15, %v13003_v14  ;;  %10218 = vmatmul.mubr.msk.bf16.vlgmr.msra.gmra.mxu0 %vm1177_vm3, %v5798_v62  ;;  %v10846_v6 = vpop.eup %10845 }
 0x841   :  { %v6835_v43 = vpop.permute.xlu1 %6834  ;;  %v5723_v60 = vpop.xlane.xlu0 %5722  ;;  %10228 = vmatpush3.bf16.msra.mxu0 %v14514_v45  ;;  %10229 = vmatprep.mubr.msk.bf16.mxu0 %vm10990_vm1, %v14430_v18  ;;  %v5780_v52 = vmul.f32 %v10846_v6, %v13001_v9 }
 0x842   :  { %10859 = vrcp.f32 %v5723_v60  ;;  %v5799_v42 = vpack.c.bf16 %v5779_v12, %v5778_v23  ;;  %10239 = vmatprep.subr.bf16.mxu0 %v14430_v18 }
 0x843   :  { %v10848_v1 = vpop.eup %10847 }
 0x844   :  { %v5781_v27 = vmul.f32 %v10848_v1, %v13011_v41  ;;  %10224 = vmatmul.mubr.msk.bf16.vlgmr.msra.gmra.mxu1 %vm1177_vm3, %v5799_v42  ;;  %v10850_v56 = vpop.eup %10849 }
 0x845   :  { %v6833_v14 = vpop.permute.xlu1 %6832  ;;  %v6784_v47 = vpop.permute.xlu0 %6783  ;;  %10234 = vmatpush3.bf16.msra.mxu1 %v14515_v0  ;;  %10235 = vmatprep.mubr.msk.bf16.mxu1 %vm10990_vm1, %v14430_v18  ;;  %v5782_v54 = vmul.f32 %v10850_v56, %v13009_v5 }
 0x846   :  { %v5800_v10 = vpack.c.bf16 %v5781_v27, %v5780_v52  ;;  %10245 = vmatprep.subr.bf16.mxu1 %v14430_v18 }
 0x847   :  { %v10852_v33 = vpop.eup %10851 }
 0x848   :  { %v5783_v9 = vmul.f32 %v10852_v33, %v13019_v55  ;;  %10230 = vmatmul.mubr.msk.bf16.vlgmr.msra.gmra.mxu0 %vm1177_vm3, %v5800_v10  ;;  %v10854_v35 = vpop.eup %10853 }
 0x849   :  { %v6937_v41 = vpop.permute.xlu1 %6936  ;;  %v6782_v58 = vpop.permute.xlu0 %6781  ;;  %10240 = vmatpush3.bf16.msra.mxu0 %v13095_v36  ;;  %10241 = vmatprep.mubr.msk.bf16.mxu0 %vm10990_vm1, %v14430_v18  ;;  %v5784_v57 = vmul.f32 %v10854_v35, %v13017_v46  ;;  %v6789_v46 = vsel %vm379_vm2, %v6784_v47, 0 }
 0x84a   :  { %v5801_v31 = vpack.c.bf16 %v5783_v9, %v5782_v54  ;;  %10251 = vmatprep.subr.bf16.mxu0 %v14430_v18  ;;  %v6942_v3 = vsel %vm379_vm2, %v6937_v41, 0 }
 0x84b   :  { %v10856_v44 = vpop.eup %10855 }
 0x84c   :  { %v10858_v59 = vpop.eup %10857  ;;  %v5785_v5 = vmul.f32 %v10856_v44, %v13027_v53  ;;  %10236 = vmatmul.mubr.msk.bf16.vlgmr.msra.gmra.mxu1 %vm1177_vm3, %v5801_v31 }
 0x84d   :  { %v6935_v55 = vpop.permute.xlu1 %6934  ;;  %v6886_v61 = vpop.permute.xlu0 %6885  ;;  %10246 = vmatpush3.bf16.msra.mxu1 %v13089_v30  ;;  %10247 = vmatprep.mubr.msk.bf16.mxu1 %vm10990_vm1, %v14430_v18  ;;  %v5786_v19 = vmul.f32 %v10858_v59, %v13025_v21  ;;  %v6840_v30 = vsel %vm379_vm2, %v6835_v43, 0 }
 0x84e   :  { %v5802_v49 = vpack.c.bf16 %v5785_v5, %v5784_v57  ;;  %10257 = vmatprep.subr.bf16.mxu1 %v14430_v18 }
 0x84f   :  { %v10860_v36 = vpop.eup %10859 }
 0x850   :  { %v5787_v38 = vmul.f32 %v10860_v36, %v13033_v4  ;;  %10242 = vmatmul.mubr.msk.bf16.vlgmr.msra.gmra.mxu0 %vm1177_vm3, %v5802_v49  ;;  %v6891_v4 = vsel %vm379_vm2, %v6886_v61, 0 }
 0x851   :  { %v7039_v53 = vpop.permute.xlu1 %7038  ;;  %v6884_v13 = vpop.permute.xlu0 %6883  ;;  %10252 = vmatpush3.bf16.xpose.msra.mxu0 %v6789_v46  ;;  %10253 = vmatprep.mubr.msk.bf16.mxu0 %vm10990_vm1, %v14430_v18 }
 0x852   :  { %v5803_v28 = vpack.c.bf16 %v5787_v38, %v5786_v19  ;;  %10263 = vmatprep.subr.bf16.mxu0 %v14430_v18  ;;  %v7044_v48 = vsel %vm379_vm2, %v7039_v53, 0 }
 0x854   :  { %10248 = vmatmul.mubr.msk.bf16.vlgmr.msra.gmra.mxu1 %vm1177_vm3, %v5803_v28 }
 0x855   :  { %v7037_v21 = vpop.permute.xlu1 %7036  ;;  %v6988_v51 = vpop.permute.xlu0 %6987  ;;  %10258 = vmatpush3.bf16.xpose.msra.mxu1 %v6840_v30  ;;  %10259 = vmatprep.mubr.msk.bf16.mxu1 %vm10990_vm1, %v14430_v18 }
 0x856   :  { %10269 = vmatprep.subr.bf16.mxu1 %v14430_v18  ;;  %v6993_v16 = vsel %vm379_vm2, %v6988_v51, 0 }
 0x858   :  { %10254 = vmatmul.mubr.msk.bf16.vlgmr.msra.gmra.mxu0 %vm379_vm2, %v6782_v58 }
 0x859   :  { %v7141_v7 = vpop.permute.xlu1 %7140  ;;  %v6986_v39 = vpop.permute.xlu0 %6985  ;;  %10264 = vmatpush3.bf16.xpose.msra.mxu0 %v6891_v4  ;;  %10265 = vmatprep.mubr.msk.bf16.mxu0 %vm10990_vm1, %v14430_v18 }
 0x85a   :  { %10275 = vmatprep.subr.bf16.mxu0 %v14430_v18  ;;  %v7146_v32 = vsel %vm379_vm2, %v7141_v7, 0 }
 0x85c   :  { %10260 = vmatmul.mubr.msk.bf16.vlgmr.msra.gmra.mxu1 %vm379_vm2, %v6833_v14 }
 0x85d   :  { %v7139_v34 = vpop.permute.xlu1 %7138  ;;  %v7090_v8 = vpop.permute.xlu0 %7089  ;;  %10270 = vmatpush3.bf16.xpose.msra.mxu1 %v6942_v3  ;;  %10271 = vmatprep.mubr.msk.bf16.mxu1 %vm10990_vm1, %v14430_v18 }
 0x85e   :  { %10281 = vmatprep.subr.bf16.mxu1 %v14430_v18  ;;  %v7095_v11 = vsel %vm379_vm2, %v7090_v8, 0 }
 0x860   :  { %10266 = vmatmul.mubr.msk.bf16.vlgmr.msra.gmra.mxu0 %vm379_vm2, %v6884_v13 }
 0x861   :  { %v7243_v29 = vpop.permute.xlu1 %7242  ;;  %v7088_v17 = vpop.permute.xlu0 %7087  ;;  %10276 = vmatpush3.bf16.xpose.msra.mxu0 %v6993_v16  ;;  %10277 = vmatprep.mubr.msk.bf16.mxu0 %vm10990_vm1, %v14430_v18 }
 0x862   :  { %10287 = vmatprep.subr.bf16.mxu0 %v14430_v18  ;;  %v7248_v23 = vsel %vm379_vm2, %v7243_v29, 0 }
 0x864   :  { %10272 = vmatmul.mubr.msk.bf16.vlgmr.msra.gmra.mxu1 %vm379_vm2, %v6935_v55 }
 0x865   :  { %v7192_v22 = vpop.permute.xlu0 %7191  ;;  %10282 = vmatpush3.bf16.xpose.msra.mxu1 %v7044_v48  ;;  %10283 = vmatprep.mubr.msk.bf16.mxu1 %vm10990_vm1, %v14430_v18  ;;  %v7241_v50 = vpop.permute.xlu1 %7240 }
 0x866   :  { %10293 = vmatprep.subr.bf16.mxu1 %v14430_v18  ;;  %v7197_v20 = vsel %vm379_vm2, %v7192_v22, 0 }
 0x868   :  { %10278 = vmatmul.mubr.msk.bf16.vlgmr.msra.gmra.mxu0 %vm379_vm2, %v6986_v39 }
 0x869   :  { %v7190_v63 = vpop.permute.xlu0 %7189  ;;  %10288 = vmatpush3.bf16.xpose.msra.mxu0 %v7095_v11  ;;  %10289 = vmatprep.mubr.msk.bf16.mxu0 %vm10990_vm1, %v14430_v18  ;;  %v7345_v24 = vpop.permute.xlu1 %7344 }
 0x86a   :  { %10299 = vmatprep.subr.bf16.mxu0 %v14430_v18  ;;  %v7350_v6 = vsel %vm379_vm2, %v7345_v24, 0 }
 0x86c   :  { %10284 = vmatmul.mubr.msk.bf16.vlgmr.msra.gmra.mxu1 %vm379_vm2, %v7037_v21 }
 0x86d   :  { %10294 = vmatpush3.bf16.xpose.msra.mxu1 %v7146_v32  ;;  %v7294_v26 = vpop.permute.xlu0 %7293  ;;  %10295 = vmatprep.mubr.msk.bf16.mxu1 %vm10990_vm1, %v14430_v18  ;;  %v7343_v62 = vpop.permute.xlu1 %7342 }
 0x86e   :  { %10305 = vmatprep.subr.bf16.mxu1 %v14430_v18  ;;  %v7299_v12 = vsel %vm379_vm2, %v7294_v26, 0 }
 0x870   :  { %10290 = vmatmul.mubr.msk.bf16.vlgmr.msra.gmra.mxu0 %vm379_vm2, %v7088_v17 }
 0x871   :  { %10300 = vmatpush3.bf16.xpose.msra.mxu0 %v7197_v20  ;;  %10301 = vmatprep.mubr.msk.bf16.mxu0 %vm10990_vm1, %v14430_v18  ;;  %v7292_v15 = vpop.permute.xlu0 %7291  ;;  %v7447_v43 = vpop.permute.xlu1 %7446 }
 0x872   :  { %10311 = vmatprep.subr.bf16.mxu0 %v14430_v18  ;;  %v7452_v52 = vsel %vm379_vm2, %v7447_v43, 0 }
 0x874   :  { %10296 = vmatmul.mubr.msk.bf16.vlgmr.msra.gmra.mxu1 %vm379_vm2, %v7139_v34 }
 0x875   :  { %10306 = vmatpush3.bf16.xpose.msra.mxu1 %v7248_v23  ;;  %10307 = vmatprep.mubr.msk.bf16.mxu1 %vm10990_vm1, %v14430_v18  ;;  %v7396_v60 = vpop.permute.xlu0 %7395  ;;  %v7445_v45 = vpop.permute.xlu1 %7444 }
 0x876   :  { %10317 = vmatprep.subr.bf16.mxu1 %v14430_v18  ;;  %v7401_v1 = vsel %vm379_vm2, %v7396_v60, 0 }
 0x878   :  { %10302 = vmatmul.mubr.msk.bf16.vlgmr.msra.gmra.mxu0 %vm379_vm2, %v7190_v63 }
 0x879   :  { %10312 = vmatpush3.bf16.xpose.msra.mxu0 %v7299_v12  ;;  %10313 = vmatprep.mubr.msk.bf16.mxu0 %vm10990_vm1, %v14430_v18  ;;  %v7394_v42 = vpop.permute.xlu0 %7393  ;;  %v7549_v27 = vpop.permute.xlu1 %7548 }
 0x87a   :  { %10323 = vmatprep.subr.bf16.mxu0 %v14430_v18  ;;  %v7554_v0 = vsel %vm379_vm2, %v7549_v27, 0 }
 0x87c   :  { %10308 = vmatmul.mubr.msk.bf16.vlgmr.msra.gmra.mxu1 %vm379_vm2, %v7241_v50 }
 0x87d   :  { %10318 = vmatpush3.bf16.xpose.msra.mxu1 %v7350_v6  ;;  %10319 = vmatprep.mubr.msk.bf16.mxu1 %vm10990_vm1, %v14430_v18  ;;  %v7498_v14 = vpop.permute.xlu0 %7497  ;;  %v7547_v56 = vpop.permute.xlu1 %7546 }
 0x87e   :  { %10329 = vmatprep.subr.bf16.mxu1 %v14430_v18  ;;  %v7503_v47 = vsel %vm379_vm2, %v7498_v14, 0 }
 0x880   :  { %10314 = vmatmul.mubr.msk.bf16.vlgmr.msra.gmra.mxu0 %vm379_vm2, %v7292_v15 }
 0x881   :  { %10324 = vmatpush3.bf16.xpose.msra.mxu0 %v7401_v1  ;;  %10325 = vmatprep.mubr.msk.bf16.mxu0 %vm10990_vm1, %v14430_v18  ;;  %v7496_v10 = vpop.permute.xlu0 %7495  ;;  %v7966_v33 = vpop.permute.xlu1 %7965 }
 0x882   :  { %10335 = vmatprep.subr.bf16.mxu0 %v14430_v18 }
 0x884   :  { %10320 = vmatmul.mubr.msk.bf16.vlgmr.msra.gmra.mxu1 %vm379_vm2, %v7343_v62 }
 0x885   :  { %10330 = vmatpush3.bf16.xpose.msra.mxu1 %v7452_v52  ;;  %10331 = vmatprep.mubr.msk.bf16.mxu1 %vm10990_vm1, %v14430_v18  ;;  %v8013_v54 = vpop.permute.xlu0 %8012 }
 0x886   :  { %10341 = vmatprep.subr.bf16.mxu1 %v14430_v18 }
 0x888   :  { %10326 = vmatmul.mubr.msk.bf16.vlgmr.msra.gmra.mxu0 %vm379_vm2, %v7394_v42 }
 0x889   :  { %10336 = vmatpush3.bf16.xpose.msra.mxu0 %v7503_v47  ;;  %10337 = vmatprep.mubr.msk.bf16.mxu0 %vm10990_vm1, %v14430_v18 }
 0x88a   :  { %10347 = vmatprep.subr.bf16.mxu0 %v14430_v18 }
 0x88c   :  { %10332 = vmatmul.mubr.msk.bf16.vlgmr.msra.gmra.mxu1 %vm379_vm2, %v7445_v45 }
 0x88d   :  { %10342 = vmatpush3.bf16.xpose.msra.mxu1 %v7554_v0  ;;  %10343 = vmatprep.mubr.msk.bf16.mxu1 %vm10990_vm1, %v14430_v18 }
 0x88e   :  { %10353 = vmatprep.subr.bf16.mxu1 %v14430_v18 }
 0x890   :  { %10338 = vmatmul.mubr.msk.bf16.vlgmr.msra.gmra.mxu0 %vm379_vm2, %v7496_v10 }
 0x891   :  { %10348 = vmatpush3.bf16.msra.mxu0 %v7966_v33  ;;  %10349 = vmatprep.mubr.msk.bf16.mxu0 %vm10990_vm1, %v14430_v18 }
 0x892   :  { %10359 = vmatprep.subr.bf16.mxu0 %v14430_v18 }
 0x894   :  { %10344 = vmatmul.mubr.msk.bf16.vlgmr.msra.gmra.mxu1 %vm379_vm2, %v7547_v56 }
 0x895   :  { %10354 = vmatpush3.bf16.msra.mxu1 %v8013_v54  ;;  %10355 = vmatprep.mubr.msk.bf16.mxu1 %vm10990_vm1, %v14430_v18 }
 0x896   :  { %10365 = vmatprep.subr.bf16.mxu1 %v14430_v18 }
 0x8d7   :  { %v13319_v9 = vpop.f32.mrf.mxu0 }
 0x8d9   :  { %v10159_v41 = vpop.f32.mrf.mxu0 }
 0x8db   :  { %v13321_v58 = vpop.f32.mrf.mxu0 }
 0x8dc   :  { %v13323_v35 = vpop.f32.mrf.mxu1 }
 0x8dd   :  { %v10160_v31 = vpop.f32.mrf.mxu0 }
 0x8de   :  { %v10165_v44 = vpop.f32.mrf.mxu1 }
 0x8e0   :  { %v13325_v59 = vpop.f32.mrf.mxu1  ;;  %v13327_v57 = vpop.f32.mrf.mxu0 }
 0x8e2   :  { %v10166_v5 = vpop.f32.mrf.mxu1  ;;  %v10171_v55 = vpop.f32.mrf.mxu0 }
 0x8e4   :  { %v13329_v61 = vpop.f32.mrf.mxu0  ;;  %v13331_v36 = vpop.f32.mrf.mxu1 }
 0x8e6   :  { %v10172_v49 = vpop.f32.mrf.mxu0  ;;  %v10177_v19 = vpop.f32.mrf.mxu1 }
 0x8e8   :  { %v13333_v38 = vpop.f32.mrf.mxu1  ;;  %v13335_v46 = vpop.f32.mrf.mxu0 }
 0x8ea   :  { %v10178_v53 = vpop.f32.mrf.mxu1  ;;  %v10183_v13 = vpop.f32.mrf.mxu0 }
 0x8ec   :  { %v13337_v28 = vpop.f32.mrf.mxu0  ;;  %v13339_v30 = vpop.f32.mrf.mxu1 }
 0x8ed   :  { %14516 = vst [vmem:[#allocation35_spill] sm:$0xff] %v13339_v30 }
 0x8ee   :  { %v10184_v21 = vpop.f32.mrf.mxu0  ;;  %v10189_v51 = vpop.f32.mrf.mxu1 }
 0x8f0   :  { %v13341_v4 = vpop.f32.mrf.mxu1  ;;  %v13343_v7 = vpop.f32.mrf.mxu0 }
 0x8f1   :  { %14517 = vst [vmem:[#allocation34_spill] sm:$0xff] %v13343_v7 }
 0x8f2   :  { %v10190_v39 = vpop.f32.mrf.mxu1  ;;  %v10195_v3 = vpop.f32.mrf.mxu0 }
 0x8f4   :  { %v13345_v34 = vpop.f32.mrf.mxu0  ;;  %v13347_v8 = vpop.f32.mrf.mxu1 }
 0x8f5   :  { %14518 = vst [vmem:[#allocation37_spill] sm:$0xff] %v13347_v8 }
 0x8f6   :  { %v10196_v16 = vpop.f32.mrf.mxu0  ;;  %v10201_v29 = vpop.f32.mrf.mxu1 }
 0x8f8   :  { %v13349_v17 = vpop.f32.mrf.mxu1  ;;  %v13351_v48 = vpop.f32.mrf.mxu0 }
 0x8f9   :  { %14519 = vst [vmem:[#allocation36_spill] sm:$0xff] %v13349_v17  ;;  %14520 = vst [vmem:[#allocation39_spill] sm:$0xff] %v13351_v48 }
 0x8fa   :  { %v10202_v22 = vpop.f32.mrf.mxu1  ;;  %v10207_v50 = vpop.f32.mrf.mxu0 }
 0x8fc   :  { %v13353_v11 = vpop.f32.mrf.mxu0  ;;  %v13355_v63 = vpop.f32.mrf.mxu1 }
 0x8fd   :  { %14521 = vst [vmem:[#allocation38_spill] sm:$0xff] %v13353_v11  ;;  %14522 = vst [vmem:[#allocation41_spill] sm:$0xff] %v13355_v63 }
 0x8fe   :  { %v10208_v32 = vpop.f32.mrf.mxu0  ;;  %v10213_v24 = vpop.f32.mrf.mxu1 }
 0x900   :  { %v13357_v26 = vpop.f32.mrf.mxu1  ;;  %v13359_v20 = vpop.f32.mrf.mxu0 }
 0x901   :  { %14523 = vst [vmem:[#allocation40_spill] sm:$0xff] %v13357_v26  ;;  %14524 = vst [vmem:[#allocation42_spill] sm:$0xff] %v13359_v20 }
 0x902   :  { %v10214_v62 = vpop.f32.mrf.mxu1  ;;  %v10219_v15 = vpop.f32.mrf.mxu0 }
 0x904   :  { %v13361_v23 = vpop.f32.mrf.mxu0  ;;  %v13363_v12 = vpop.f32.mrf.mxu1 }
 0x905   :  { %14525 = vst [vmem:[#allocation43_spill] sm:$0xff] %v13361_v23  ;;  %14526 = vst [vmem:[#allocation44_spill] sm:$0xff] %v13363_v12 }
 0x906   :  { %v10220_v43 = vpop.f32.mrf.mxu0  ;;  %v10225_v60 = vpop.f32.mrf.mxu1 }
 0x908   :  { %v13365_v6 = vpop.f32.mrf.mxu1  ;;  %v13367_v45 = vpop.f32.mrf.mxu0 }
 0x909   :  { %14527 = vst [vmem:[#allocation45_spill] sm:$0xff] %v13365_v6  ;;  %14528 = vst [vmem:[#allocation46_spill] sm:$0xff] %v13367_v45 }
 0x90a   :  { %v10226_v42 = vpop.f32.mrf.mxu1  ;;  %v10231_v1 = vpop.f32.mrf.mxu0 }
 0x90c   :  { %v13369_v52 = vpop.f32.mrf.mxu0  ;;  %v13371_v27 = vpop.f32.mrf.mxu1 }
 0x90d   :  { %14529 = vst [vmem:[#allocation47_spill] sm:$0xff] %v13369_v52  ;;  %14530 = vst [vmem:[#allocation48_spill] sm:$0xff] %v13371_v27 }
 0x90e   :  { %v10232_v14 = vpop.f32.mrf.mxu0  ;;  %v10237_v47 = vpop.f32.mrf.mxu1 }
 0x910   :  { %v13373_v56 = vpop.f32.mrf.mxu1  ;;  %v13375_v0 = vpop.f32.mrf.mxu0 }
 0x911   :  { %14531 = vst [vmem:[#allocation49_spill] sm:$0xff] %v13373_v56  ;;  %14532 = vst [vmem:[#allocation50_spill] sm:$0xff] %v13375_v0 }
 0x912   :  { %v10238_v10 = vpop.f32.mrf.mxu1  ;;  %v10243_v33 = vpop.f32.mrf.mxu0 }
 0x914   :  { %v13377_v54 = vpop.f32.mrf.mxu0  ;;  %v13379_v41 = vpop.f32.mrf.mxu1 }
 0x915   :  { %14533 = vst [vmem:[#allocation51_spill] sm:$0xff] %v13377_v54  ;;  %14534 = vst [vmem:[#allocation52_spill] sm:$0xff] %v13379_v41 }
 0x916   :  { %v10244_v31 = vpop.f32.mrf.mxu0  ;;  %v10249_v44 = vpop.f32.mrf.mxu1 }
 0x918   :  { %v13381_v5 = vpop.f32.mrf.mxu1  ;;  %v13383_v55 = vpop.f32.mrf.mxu0 }
 0x919   :  { %14535 = vst [vmem:[#allocation53_spill] sm:$0xff] %v13381_v5  ;;  %v7597_v49 = vsel %vm1177_vm3, %v13383_v55, -inf }
 0x91a   :  { %v10250_v19 = vpop.f32.mrf.mxu1  ;;  %7598 = vmax.xlane.f32.xlu0 %v7597_v49  ;;  %v10255_v53 = vpop.f32.mrf.mxu0 }
 0x91c   :  { %v13387_v13 = vpop.f32.mrf.mxu0  ;;  %v13389_v21 = vpop.f32.mrf.mxu1 }
 0x91d   :  { %v7603_v51 = vsel %vm1177_vm3, %v13389_v21, -inf  ;;  %v7600_v39 = vsel %vm1177_vm3, %v13387_v13, -inf }
 0x91e   :  { %v10261_v3 = vpop.f32.mrf.mxu1  ;;  %7604 = vmax.xlane.f32.xlu0 %v7603_v51  ;;  %7601 = vmax.xlane.f32.xlu1 %v7600_v39  ;;  %v10256_v16 = vpop.f32.mrf.mxu0 }
 0x920   :  { %v13395_v29 = vpop.f32.mrf.mxu1  ;;  %v13397_v22 = vpop.f32.mrf.mxu0 }
 0x921   :  { %v7606_v50 = vsel %vm1177_vm3, %v13395_v29, -inf  ;;  %v7609_v32 = vsel %vm1177_vm3, %v13397_v22, -inf }
 0x922   :  { %v10262_v24 = vpop.f32.mrf.mxu1  ;;  %7607 = vmax.xlane.f32.xlu0 %v7606_v50  ;;  %7610 = vmax.xlane.f32.xlu1 %v7609_v32  ;;  %v10267_v62 = vpop.f32.mrf.mxu0 }
 0x924   :  { %v13403_v15 = vpop.f32.mrf.mxu0  ;;  %v13405_v43 = vpop.f32.mrf.mxu1 }
 0x925   :  { %v7615_v60 = vsel %vm1177_vm3, %v13405_v43, -inf  ;;  %v7612_v42 = vsel %vm1177_vm3, %v13403_v15, -inf }
 0x926   :  { %v10273_v1 = vpop.f32.mrf.mxu1  ;;  %7616 = vmax.xlane.f32.xlu1 %v7615_v60  ;;  %7613 = vmax.xlane.f32.xlu0 %v7612_v42  ;;  %v10268_v14 = vpop.f32.mrf.mxu0 }
 0x928   :  { %v13411_v47 = vpop.f32.mrf.mxu1  ;;  %v13413_v10 = vpop.f32.mrf.mxu0 }
 0x929   :  { %v7618_v33 = vsel %vm1177_vm3, %v13411_v47, -inf  ;;  %v7621_v31 = vsel %vm1177_vm3, %v13413_v10, -inf }
 0x92a   :  { %v10274_v44 = vpop.f32.mrf.mxu1  ;;  %7619 = vmax.xlane.f32.xlu0 %v7618_v33  ;;  %7622 = vmax.xlane.f32.xlu1 %v7621_v31  ;;  %v10279_v49 = vpop.f32.mrf.mxu0 }
 0x92c   :  { %v13419_v19 = vpop.f32.mrf.mxu0  ;;  %v13421_v53 = vpop.f32.mrf.mxu1 }
 0x92d   :  { %v7627_v51 = vsel %vm1177_vm3, %v13421_v53, -inf  ;;  %v7624_v39 = vsel %vm1177_vm3, %v13419_v19, -inf }
 0x92e   :  { %v10285_v3 = vpop.f32.mrf.mxu1  ;;  %7628 = vmax.xlane.f32.xlu1 %v7627_v51  ;;  %7625 = vmax.xlane.f32.xlu0 %v7624_v39  ;;  %v10280_v16 = vpop.f32.mrf.mxu0 }
 0x930   :  { %v13427_v50 = vpop.f32.mrf.mxu1  ;;  %v13429_v32 = vpop.f32.mrf.mxu0 }
 0x931   :  { %v7630_v24 = vsel %vm1177_vm3, %v13427_v50, -inf  ;;  %v7633_v62 = vsel %vm1177_vm3, %v13429_v32, -inf }
 0x932   :  { %v10286_v60 = vpop.f32.mrf.mxu1  ;;  %7631 = vmax.xlane.f32.xlu0 %v7630_v24  ;;  %7634 = vmax.xlane.f32.xlu1 %v7633_v62  ;;  %v10291_v42 = vpop.f32.mrf.mxu0 }
 0x934   :  { %v13435_v1 = vpop.f32.mrf.mxu0  ;;  %v13437_v14 = vpop.f32.mrf.mxu1 }
 0x935   :  { %v7639_v33 = vsel %vm1177_vm3, %v13437_v14, -inf  ;;  %v7636_v31 = vsel %vm1177_vm3, %v13435_v1, -inf }
 0x936   :  { %v10297_v44 = vpop.f32.mrf.mxu1  ;;  %7640 = vmax.xlane.f32.xlu1 %v7639_v33  ;;  %7637 = vmax.xlane.f32.xlu0 %v7636_v31  ;;  %v10292_v49 = vpop.f32.mrf.mxu0 }
 0x938   :  { %v13443_v51 = vpop.f32.mrf.mxu1  ;;  %v13445_v39 = vpop.f32.mrf.mxu0 }
 0x939   :  { %v7642_v3 = vsel %vm1177_vm3, %v13443_v51, -inf  ;;  %v7645_v16 = vsel %vm1177_vm3, %v13445_v39, -inf }
 0x93a   :  { %v10298_v24 = vpop.f32.mrf.mxu1  ;;  %7643 = vmax.xlane.f32.xlu0 %v7642_v3  ;;  %7646 = vmax.xlane.f32.xlu1 %v7645_v16  ;;  %v10303_v62 = vpop.f32.mrf.mxu0 }
 0x93c   :  { %v13451_v60 = vpop.f32.mrf.mxu0  ;;  %v13453_v42 = vpop.f32.mrf.mxu1 }
 0x93d   :  { %v7651_v33 = vsel %vm1177_vm3, %v13453_v42, -inf  ;;  %v7648_v31 = vsel %vm1177_vm3, %v13451_v60, -inf }
 0x93e   :  { %v10309_v44 = vpop.f32.mrf.mxu1  ;;  %7652 = vmax.xlane.f32.xlu1 %v7651_v33  ;;  %7649 = vmax.xlane.f32.xlu0 %v7648_v31  ;;  %v10304_v49 = vpop.f32.mrf.mxu0 }
 0x940   :  { %v13459_v41 = vpop.f32.mrf.mxu1  ;;  %v13461_v24 = vpop.f32.mrf.mxu0 }
 0x941   :  { %v7654_v3 = vsel %vm1177_vm3, %v13459_v41, -inf  ;;  %v7657_v16 = vsel %vm1177_vm3, %v13461_v24, -inf }
 0x942   :  { %v10310_v62 = vpop.f32.mrf.mxu1  ;;  %7655 = vmax.xlane.f32.xlu0 %v7654_v3  ;;  %7658 = vmax.xlane.f32.xlu1 %v7657_v16  ;;  %v10315_v0 = vpop.f32.mrf.mxu0 }
 0x944   :  { %v13467_v27 = vpop.f32.mrf.mxu0  ;;  %v13469_v44 = vpop.f32.mrf.mxu1 }
 0x945   :  { %v7663_v33 = vsel %vm1177_vm3, %v13469_v44, -inf  ;;  %v7660_v31 = vsel %vm1177_vm3, %v13467_v27, -inf }
 0x946   :  { %v10321_v49 = vpop.f32.mrf.mxu1  ;;  %7664 = vmax.xlane.f32.xlu1 %v7663_v33  ;;  %7661 = vmax.xlane.f32.xlu0 %v7660_v31  ;;  %v10316_v5 = vpop.f32.mrf.mxu0 }
 0x948   :  { %v13475_v45 = vpop.f32.mrf.mxu1  ;;  %v13477_v62 = vpop.f32.mrf.mxu0 }
 0x949   :  { %v7666_v0 = vsel %vm1177_vm3, %v13475_v45, -inf  ;;  %v7669_v3 = vsel %vm1177_vm3, %v13477_v62, -inf }
 0x94a   :  { %v10322_v16 = vpop.f32.mrf.mxu1  ;;  %7667 = vmax.xlane.f32.xlu0 %v7666_v0  ;;  %7670 = vmax.xlane.f32.xlu1 %v7669_v3  ;;  %v10327_v54 = vpop.f32.mrf.mxu0 }
 0x94c   :  { %v13483_v12 = vpop.f32.mrf.mxu0  ;;  %v13485_v49 = vpop.f32.mrf.mxu1 }
 0x94d   :  { %v7675_v5 = vsel %vm1177_vm3, %v13485_v49, -inf  ;;  %v7672_v33 = vsel %vm1177_vm3, %v13483_v12, -inf }
 0x94e   :  { %v10333_v31 = vpop.f32.mrf.mxu1  ;;  %7676 = vmax.xlane.f32.xlu1 %v7675_v5  ;;  %7673 = vmax.xlane.f32.xlu0 %v7672_v33  ;;  %v10328_v56 = vpop.f32.mrf.mxu0 }
 0x950   :  { %v13491_v20 = vpop.f32.mrf.mxu1  ;;  %v13493_v16 = vpop.f32.mrf.mxu0 }
 0x951   :  { %v7678_v54 = vsel %vm1177_vm3, %v13491_v20, -inf  ;;  %v7681_v0 = vsel %vm1177_vm3, %v13493_v16, -inf }
 0x952   :  { %v10334_v3 = vpop.f32.mrf.mxu1  ;;  %7679 = vmax.xlane.f32.xlu0 %v7678_v54  ;;  %7682 = vmax.xlane.f32.xlu1 %v7681_v0  ;;  %v10339_v52 = vpop.f32.mrf.mxu0 }
 0x953   :  { %v13515_v0 = vpop.permute.xlu1 %8059 }
 0x954   :  { %v13499_v63 = vpop.f32.mrf.mxu0  ;;  %v13501_v31 = vpop.f32.mrf.mxu1 }
 0x955   :  { %v7687_v56 = vsel %vm1177_vm3, %v13501_v31, -inf  ;;  %v7684_v5 = vsel %vm1177_vm3, %v13499_v63, -inf }
 0x956   :  { %v10345_v33 = vpop.f32.mrf.mxu1  ;;  %7688 = vmax.xlane.f32.xlu1 %v7687_v56  ;;  %7685 = vmax.xlane.f32.xlu0 %v7684_v5  ;;  %v10340_v6 = vpop.f32.mrf.mxu0 }
 0x957   :  { %v13517_v3 = vpop.permute.xlu1 %8153  ;;  %v13519_v56 = vpop.permute.xlu0 %8106 }
 0x958   :  { %v13507_v48 = vpop.f32.mrf.mxu1 }
 0x959   :  { %v7690_v54 = vsel %vm1177_vm3, %v13507_v48, -inf }
 0x95a   :  { %v10346_v52 = vpop.f32.mrf.mxu1  ;;  %7691 = vmax.xlane.f32.xlu0 %v7690_v54 }
 0x95b   :  { %v13521_v6 = vpop.permute.xlu1 %8247  ;;  %v13523_v5 = vpop.permute.xlu0 %8200 }
 0x95c   :  { %14536 = vst [vmem:[#allocation54_spill] sm:$0xff] %v13521_v6  ;;  %14537 = vst [vmem:[#allocation55_spill] sm:$0xff] %v13523_v5 }
 0x95f   :  { %v13525_v33 = vpop.permute.xlu1 %8341  ;;  %v13527_v52 = vpop.permute.xlu0 %8294 }
 0x960   :  { %14538 = vst [vmem:[#allocation56_spill] sm:$0xff] %v13525_v33  ;;  %14539 = vst [vmem:[#allocation57_spill] sm:$0xff] %v13527_v52 }
 0x963   :  { %v13529_v54 = vpop.permute.xlu1 %8435 }
 0x964   :  { %14540 = vst [vmem:[#allocation58_spill] sm:$0xff] %v13529_v54 }
 0x967   :  { %8576 = vrot.lane.b32.xlu1 %v11181_v25, %s11001_s7  ;;  %v13531_v25 = vpop.permute.xlu0 %8388  ;;  %v13533_v23 = vpop.permute.xlu1 %8482 }
 0x968   :  { %14541 = vst [vmem:[#allocation59_spill] sm:$0xff] %v13531_v25  ;;  %14542 = vst [vmem:[#allocation60_spill] sm:$0xff] %v13533_v23 }
 0x970   :  { %8529 = vrot.lane.b32.xlu0 %v14433_v2, %s11001_s7 }
 0x9a3   :  { %v7599_v2 = vpop.xlane.xlu0 %7598 }
 0x9a4   :  { %v7693_v8 = vsub.f32 %v13383_v55, %v7599_v2 }
 0x9a6   :  { %v7725_v26 = vmul.f32 1.442695, %v7693_v8 }
 0x9a7   :  { %v7602_v7 = vpop.xlane.xlu1 %7601  ;;  %v7605_v11 = vpop.xlane.xlu0 %7604 }
 0x9a8   :  { %10861 = vpow2.f32 %v7725_v26  ;;  %v7694_v6 = vsub.f32 %v13387_v13, %v7602_v7  ;;  %v7695_v5 = vsub.f32 %v13389_v21, %v7605_v11 }
 0x9aa   :  { %v7727_v33 = vmul.f32 1.442695, %v7694_v6  ;;  %v7729_v30 = vmul.f32 1.442695, %v7695_v5 }
 0x9ab   :  { %v7611_v52 = vpop.xlane.xlu1 %7610  ;;  %v7608_v17 = vpop.xlane.xlu0 %7607 }
 0x9ac   :  { %10863 = vpow2.f32 %v7727_v33  ;;  %v7697_v54 = vsub.f32 %v13397_v22, %v7611_v52  ;;  %v7696_v23 = vsub.f32 %v13395_v29, %v7608_v17 }
 0x9ad   :  { %10865 = vpow2.f32 %v7729_v30 }
 0x9ae   :  { %v7733_v25 = vmul.f32 1.442695, %v7697_v54  ;;  %v7731_v55 = vmul.f32 1.442695, %v7696_v23 }
 0x9af   :  { %v7617_v8 = vpop.xlane.xlu1 %7616  ;;  %v7614_v2 = vpop.xlane.xlu0 %7613 }
 0x9b0   :  { %10867 = vpow2.f32 %v7733_v25  ;;  %v7699_v26 = vsub.f32 %v13405_v43, %v7617_v8  ;;  %v7698_v7 = vsub.f32 %v13403_v15, %v7614_v2 }
 0x9b1   :  { %10869 = vpow2.f32 %v7731_v55 }
 0x9b2   :  { %v7737_v11 = vmul.f32 1.442695, %v7699_v26  ;;  %v7735_v13 = vmul.f32 1.442695, %v7698_v7 }
 0x9b3   :  { %v7623_v21 = vpop.xlane.xlu1 %7622  ;;  %v7620_v6 = vpop.xlane.xlu0 %7619 }
 0x9b4   :  { %10871 = vpow2.f32 %v7737_v11  ;;  %v7701_v22 = vsub.f32 %v13413_v10, %v7623_v21  ;;  %v7700_v17 = vsub.f32 %v13411_v47, %v7620_v6 }
 0x9b5   :  { %v13544_v30 = vpop.eup %10861  ;;  %10873 = vpow2.f32 %v7735_v13 }
 0x9b6   :  { %v7741_v23 = vmul.f32 1.442695, %v7701_v22  ;;  %v7739_v29 = vmul.f32 1.442695, %v7700_v17  ;;  %v7789_v43 = vsel %vm1177_vm3, %v13544_v30, 0.0 }
 0x9b7   :  { %v7629_v5 = vpop.xlane.xlu1 %7628  ;;  %7790 = vadd.xlane.f32.xlu1 %v7789_v43  ;;  %v7626_v15 = vpop.xlane.xlu0 %7625 }
 0x9b8   :  { %10875 = vpow2.f32 %v7741_v23  ;;  %v7703_v33 = vsub.f32 %v13421_v53, %v7629_v5  ;;  %v7702_v52 = vsub.f32 %v13419_v19, %v7626_v15 }
 0x9b9   :  { %v13550_v54 = vpop.eup %10863  ;;  %10877 = vpow2.f32 %v7739_v29 }
 0x9ba   :  { %v13552_v47 = vpop.eup %10865  ;;  %v7745_v10 = vmul.f32 1.442695, %v7703_v33  ;;  %v7743_v25 = vmul.f32 1.442695, %v7702_v52  ;;  %v7792_v55 = vsel %vm1177_vm3, %v13550_v54, 0.0 }
 0x9bb   :  { %v7635_v8 = vpop.xlane.xlu1 %7634  ;;  %7793 = vadd.xlane.f32.xlu0 %v7792_v55  ;;  %v7795_v2 = vsel %vm1177_vm3, %v13552_v47, 0.0  ;;  %v7632_v26 = vpop.xlane.xlu0 %7631 }
 0x9bc   :  { %10879 = vpow2.f32 %v7745_v10  ;;  %v7705_v53 = vsub.f32 %v13429_v32, %v7635_v8  ;;  %7796 = vadd.xlane.f32.xlu1 %v7795_v2  ;;  %v7704_v19 = vsub.f32 %v13427_v50, %v7632_v26 }
 0x9bd   :  { %v13560_v7 = vpop.eup %10867  ;;  %10881 = vpow2.f32 %v7743_v25 }
 0x9be   :  { %v13562_v11 = vpop.eup %10869  ;;  %v7749_v13 = vmul.f32 1.442695, %v7705_v53  ;;  %v7747_v21 = vmul.f32 1.442695, %v7704_v19  ;;  %v7801_v6 = vsel %vm1177_vm3, %v13560_v7, 0.0 }
 0x9bf   :  { %v7641_v22 = vpop.xlane.xlu1 %7640  ;;  %v7798_v17 = vsel %vm1177_vm3, %v13562_v11, 0.0  ;;  %v7638_v23 = vpop.xlane.xlu0 %7637 }
 0x9c0   :  { %10883 = vpow2.f32 %v7749_v13  ;;  %v7707_v32 = vsub.f32 %v13437_v14, %v7641_v22  ;;  %7802 = vadd.xlane.f32.xlu1 %v7801_v6  ;;  %7799 = vadd.xlane.f32.xlu0 %v7798_v17  ;;  %v7706_v50 = vsub.f32 %v13435_v1, %v7638_v23 }
 0x9c1   :  { %v13570_v29 = vpop.eup %10871  ;;  %10885 = vpow2.f32 %v7747_v21 }
 0x9c2   :  { %v13572_v43 = vpop.eup %10873  ;;  %v7753_v5 = vmul.f32 1.442695, %v7707_v32  ;;  %v7751_v15 = vmul.f32 1.442695, %v7706_v50  ;;  %v7807_v33 = vsel %vm1177_vm3, %v13570_v29, 0.0 }
 0x9c3   :  { %v7647_v52 = vpop.xlane.xlu1 %7646  ;;  %v7804_v10 = vsel %vm1177_vm3, %v13572_v43, 0.0  ;;  %v7644_v25 = vpop.xlane.xlu0 %7643 }
 0x9c4   :  { %10887 = vpow2.f32 %v7753_v5  ;;  %v7709_v14 = vsub.f32 %v13445_v39, %v7647_v52  ;;  %7808 = vadd.xlane.f32.xlu1 %v7807_v33  ;;  %7805 = vadd.xlane.f32.xlu0 %v7804_v10  ;;  %v7708_v1 = vsub.f32 %v13443_v51, %v7644_v25 }
 0x9c5   :  { %v13580_v55 = vpop.eup %10875  ;;  %10889 = vpow2.f32 %v7751_v15 }
 0x9c6   :  { %v13582_v8 = vpop.eup %10877  ;;  %v7757_v2 = vmul.f32 1.442695, %v7709_v14  ;;  %v7755_v26 = vmul.f32 1.442695, %v7708_v1  ;;  %v7813_v53 = vsel %vm1177_vm3, %v13580_v55, 0.0 }
 0x9c7   :  { %v7653_v19 = vpop.xlane.xlu1 %7652  ;;  %v7810_v13 = vsel %vm1177_vm3, %v13582_v8, 0.0  ;;  %v7650_v21 = vpop.xlane.xlu0 %7649 }
 0x9c8   :  { %10891 = vpow2.f32 %v7757_v2  ;;  %v7711_v39 = vsub.f32 %v13453_v42, %v7653_v19  ;;  %7814 = vadd.xlane.f32.xlu1 %v7813_v53  ;;  %7811 = vadd.xlane.f32.xlu0 %v7810_v13  ;;  %v7710_v51 = vsub.f32 %v13451_v60, %v7650_v21 }
 0x9c9   :  { %v13590_v6 = vpop.eup %10879  ;;  %10893 = vpow2.f32 %v7755_v26 }
 0x9ca   :  { %v13592_v22 = vpop.eup %10881  ;;  %v7761_v17 = vmul.f32 1.442695, %v7711_v39  ;;  %v7759_v23 = vmul.f32 1.442695, %v7710_v51  ;;  %v7819_v32 = vsel %vm1177_vm3, %v13590_v6, 0.0 }
 0x9cb   :  { %v7659_v50 = vpop.xlane.xlu1 %7658  ;;  %v7816_v5 = vsel %vm1177_vm3, %v13592_v22, 0.0  ;;  %v7656_v15 = vpop.xlane.xlu0 %7655 }
 0x9cc   :  { %10895 = vpow2.f32 %v7761_v17  ;;  %v7713_v42 = vsub.f32 %v13461_v24, %v7659_v50  ;;  %7820 = vadd.xlane.f32.xlu1 %v7819_v32  ;;  %7817 = vadd.xlane.f32.xlu0 %v7816_v5  ;;  %v7712_v60 = vsub.f32 %v13459_v41, %v7656_v15 }
 0x9cd   :  { %v13600_v33 = vpop.eup %10883  ;;  %10897 = vpow2.f32 %v7759_v23 }
 0x9ce   :  { %v13602_v52 = vpop.eup %10885  ;;  %v7765_v10 = vmul.f32 1.442695, %v7713_v42  ;;  %v7763_v25 = vmul.f32 1.442695, %v7712_v60  ;;  %v7825_v14 = vsel %vm1177_vm3, %v13600_v33, 0.0 }
 0x9cf   :  { %v7665_v1 = vpop.xlane.xlu1 %7664  ;;  %v7822_v2 = vsel %vm1177_vm3, %v13602_v52, 0.0  ;;  %v7662_v26 = vpop.xlane.xlu0 %7661 }
 0x9d0   :  { %10899 = vpow2.f32 %v7765_v10  ;;  %v7715_v24 = vsub.f32 %v13469_v44, %v7665_v1  ;;  %7826 = vadd.xlane.f32.xlu1 %v7825_v14  ;;  %7823 = vadd.xlane.f32.xlu0 %v7822_v2  ;;  %v7714_v41 = vsub.f32 %v13467_v27, %v7662_v26 }
 0x9d1   :  { %v13610_v53 = vpop.eup %10887  ;;  %10901 = vpow2.f32 %v7763_v25 }
 0x9d2   :  { %v13612_v19 = vpop.eup %10889  ;;  %v7769_v13 = vmul.f32 1.442695, %v7715_v24  ;;  %v7767_v21 = vmul.f32 1.442695, %v7714_v41  ;;  %v7831_v39 = vsel %vm1177_vm3, %v13610_v53, 0.0 }
 0x9d3   :  { %v7671_v51 = vpop.xlane.xlu1 %7670  ;;  %v7828_v17 = vsel %vm1177_vm3, %v13612_v19, 0.0  ;;  %v7668_v23 = vpop.xlane.xlu0 %7667 }
 0x9d4   :  { %10903 = vpow2.f32 %v7769_v13  ;;  %v7717_v44 = vsub.f32 %v13477_v62, %v7671_v51  ;;  %7832 = vadd.xlane.f32.xlu1 %v7831_v39  ;;  %7829 = vadd.xlane.f32.xlu0 %v7828_v17  ;;  %v7716_v27 = vsub.f32 %v13475_v45, %v7668_v23 }
 0x9d5   :  { %v13620_v32 = vpop.eup %10891  ;;  %10905 = vpow2.f32 %v7767_v21 }
 0x9d6   :  { %v13622_v50 = vpop.eup %10893  ;;  %v7773_v5 = vmul.f32 1.442695, %v7717_v44  ;;  %v7771_v15 = vmul.f32 1.442695, %v7716_v27  ;;  %v7837_v42 = vsel %vm1177_vm3, %v13620_v32, 0.0 }
 0x9d7   :  { %v7677_v60 = vpop.xlane.xlu1 %7676  ;;  %v7834_v10 = vsel %vm1177_vm3, %v13622_v50, 0.0  ;;  %v7674_v25 = vpop.xlane.xlu0 %7673 }
 0x9d8   :  { %10907 = vpow2.f32 %v7773_v5  ;;  %v7719_v62 = vsub.f32 %v13485_v49, %v7677_v60  ;;  %7838 = vadd.xlane.f32.xlu1 %v7837_v42  ;;  %7835 = vadd.xlane.f32.xlu0 %v7834_v10  ;;  %v7718_v45 = vsub.f32 %v13483_v12, %v7674_v25 }
 0x9d9   :  { %v13630_v14 = vpop.eup %10895  ;;  %10909 = vpow2.f32 %v7771_v15 }
 0x9da   :  { %v13632_v1 = vpop.eup %10897  ;;  %v7777_v2 = vmul.f32 1.442695, %v7719_v62  ;;  %v7775_v26 = vmul.f32 1.442695, %v7718_v45  ;;  %v7843_v24 = vsel %vm1177_vm3, %v13630_v14, 0.0 }
 0x9db   :  { %v7683_v41 = vpop.xlane.xlu1 %7682  ;;  %v7840_v13 = vsel %vm1177_vm3, %v13632_v1, 0.0  ;;  %v7680_v21 = vpop.xlane.xlu0 %7679 }
 0x9dc   :  { %10911 = vpow2.f32 %v7777_v2  ;;  %v7721_v49 = vsub.f32 %v13493_v16, %v7683_v41  ;;  %7844 = vadd.xlane.f32.xlu1 %v7843_v24  ;;  %7841 = vadd.xlane.f32.xlu0 %v7840_v13  ;;  %v7720_v12 = vsub.f32 %v13491_v20, %v7680_v21 }
 0x9dd   :  { %v13640_v39 = vpop.eup %10899  ;;  %10913 = vpow2.f32 %v7775_v26 }
 0x9de   :  { %v13642_v51 = vpop.eup %10901  ;;  %v7781_v17 = vmul.f32 1.442695, %v7721_v49  ;;  %v7779_v23 = vmul.f32 1.442695, %v7720_v12  ;;  %v7849_v44 = vsel %vm1177_vm3, %v13640_v39, 0.0 }
 0x9df   :  { %v7689_v27 = vpop.xlane.xlu1 %7688  ;;  %v7846_v5 = vsel %vm1177_vm3, %v13642_v51, 0.0  ;;  %v7686_v15 = vpop.xlane.xlu0 %7685 }
 0x9e0   :  { %10915 = vpow2.f32 %v7781_v17  ;;  %v7723_v16 = vsub.f32 %v13501_v31, %v7689_v27  ;;  %7850 = vadd.xlane.f32.xlu1 %v7849_v44  ;;  %7847 = vadd.xlane.f32.xlu0 %v7846_v5  ;;  %v7722_v20 = vsub.f32 %v13499_v63, %v7686_v15 }
 0x9e1   :  { %v13650_v42 = vpop.eup %10903  ;;  %10917 = vpow2.f32 %v7779_v23 }
 0x9e2   :  { %v13652_v60 = vpop.eup %10905  ;;  %v7785_v10 = vmul.f32 1.442695, %v7723_v16  ;;  %v7783_v25 = vmul.f32 1.442695, %v7722_v20  ;;  %v7855_v62 = vsel %vm1177_vm3, %v13650_v42, 0.0 }
 0x9e3   :  { %v7852_v45 = vsel %vm1177_vm3, %v13652_v60, 0.0  ;;  %v7692_v2 = vpop.xlane.xlu0 %7691 }
 0x9e4   :  { %10919 = vpow2.f32 %v7785_v10  ;;  %7856 = vadd.xlane.f32.xlu1 %v7855_v62  ;;  %7853 = vadd.xlane.f32.xlu0 %v7852_v45  ;;  %v7724_v31 = vsub.f32 %v13507_v48, %v7692_v2  ;;  %v14543_v62 = vld [vmem:[#allocation2_spill] sm:$0xff]  ;;  %v14544_v2 = vld [vmem:[#allocation3_spill] sm:$0xff] }
 0x9e5   :  { %v13659_v63 = vpop.eup %10907  ;;  %10921 = vpow2.f32 %v7783_v25  ;;  %v9270_v45 = vpack.c.bf16 %v14543_v62, %v14543_v62  ;;  %v14551_v62 = vld [vmem:[#allocation13_spill] sm:$0xff] }
 0x9e6   :  { %v13661_v26 = vpop.eup %10909  ;;  %v7787_v24 = vmul.f32 1.442695, %v7724_v31  ;;  %v7861_v41 = vsel %vm1177_vm3, %v13659_v63, 0.0  ;;  %v9272_v31 = vpack.c.bf16 %v14544_v2, %v14544_v2  ;;  %v14552_v2 = vld [vmem:[#allocation9_spill] sm:$0xff] }
 0x9e7   :  { %v7858_v13 = vsel %vm1177_vm3, %v13661_v26, 0.0 }
 0x9e8   :  { %10923 = vpow2.f32 %v7787_v24  ;;  %7862 = vadd.xlane.f32.xlu1 %v7861_v41  ;;  %7859 = vadd.xlane.f32.xlu0 %v7858_v13  ;;  %v14545_v24 = vld [vmem:[#allocation7_spill] sm:$0xff]  ;;  %v14546_v13 = vld [vmem:[#allocation5_spill] sm:$0xff] }
 0x9e9   :  { %v13667_v21 = vpop.eup %10911  ;;  %v9274_v41 = vpack.c.bf16 %v14545_v24, %v14545_v24  ;;  %v14553_v24 = vld [vmem:[#allocation15_spill] sm:$0xff] }
 0x9ea   :  { %v13669_v49 = vpop.eup %10913  ;;  %v7867_v48 = vsel %vm1177_vm3, %v13667_v21, 0.0 }
 0x9eb   :  { %v7864_v12 = vsel %vm1177_vm3, %v13669_v49, 0.0 }
 0x9ec   :  { %7868 = vadd.xlane.f32.xlu1 %v7867_v48  ;;  %7865 = vadd.xlane.f32.xlu0 %v7864_v12  ;;  %v14547_v48 = vld [vmem:[#allocation8_spill] sm:$0xff] }
 0x9ed   :  { %v13675_v17 = vpop.eup %10915  ;;  %v9276_v12 = vpack.c.bf16 %v14547_v48, %v14547_v48  ;;  %v14555_v48 = vld [vmem:[#allocation17_spill] sm:$0xff] }
 0x9ee   :  { %v13677_v23 = vpop.eup %10917  ;;  %v7873_v44 = vsel %vm1177_vm3, %v13675_v17, 0.0 }
 0x9ef   :  { %v7870_v27 = vsel %vm1177_vm3, %v13677_v23, 0.0 }
 0x9f0   :  { %7874 = vadd.xlane.f32.xlu1 %v7873_v44  ;;  %7871 = vadd.xlane.f32.xlu0 %v7870_v27  ;;  %v14548_v44 = vld [vmem:[#allocation4_spill] sm:$0xff] }
 0x9f1   :  { %v13683_v5 = vpop.eup %10919  ;;  %v9271_v27 = vpack.c.bf16 %v14548_v44, %v14548_v44  ;;  %v14556_v44 = vld [vmem:[#allocation12_spill] sm:$0xff] }
 0x9f2   :  { %v13685_v15 = vpop.eup %10921  ;;  %v7879_v16 = vsel %vm1177_vm3, %v13683_v5, 0.0 }
 0x9f3   :  { %v7876_v20 = vsel %vm1177_vm3, %v13685_v15, 0.0 }
 0x9f4   :  { %7880 = vadd.xlane.f32.xlu1 %v7879_v16  ;;  %7877 = vadd.xlane.f32.xlu0 %v7876_v20  ;;  %v14550_v20 = vld [vmem:[#allocation6_spill] sm:$0xff] }
 0x9f5   :  { %v13691_v10 = vpop.eup %10923 }
 0x9f6   :  { %v7882_v25 = vsel %vm1177_vm3, %v13691_v10, 0.0 }
 0x9f8   :  { %7883 = vadd.xlane.f32.xlu0 %v7882_v25  ;;  %v9273_v25 = vpack.c.bf16 %v14550_v20, %v14550_v20  ;;  %v14558_v20 = vld [vmem:[#allocation14_spill] sm:$0xff] }
 0xa05   :  { %8670 = vrot.lane.b32.xlu1 %v11193_v37, %s11001_s7  ;;  %v9269_v37 = vpack.c.bf16 %v14546_v13, %v14546_v13  ;;  %v14554_v13 = vld [vmem:[#allocation10_spill] sm:$0xff] }
 0xa09   :  { %4493 = vrot.lane.b32.xlu1 %v9270_v45, %s11002_s8  ;;  %v9280_v45 = vpack.c.bf16 %v14551_v62, %v14551_v62  ;;  %v14559_v62 = vld [vmem:[#allocation21_spill] sm:$0xff] }
 0xa0d   :  { %4497 = vrot.lane.b32.xlu1 %v9272_v31, %s11002_s8  ;;  %v9275_v31 = vpack.c.bf16 %v14552_v2, %v14552_v2  ;;  %v14560_v2 = vld [vmem:[#allocation16_spill] sm:$0xff] }
 0xa0e   :  { %8623 = vrot.lane.b32.xlu0 %v11196_v40, %s11001_s7  ;;  %v14549_v40 = vld [vmem:[#allocation11_spill] sm:$0xff] }
 0xa0f   :  { %v9278_v16 = vpack.c.bf16 %v14549_v40, %v14549_v40  ;;  %v14557_v40 = vld [vmem:[#allocation19_spill] sm:$0xff] }
 0xa11   :  { %4501 = vrot.lane.b32.xlu1 %v9274_v41, %s11002_s8  ;;  %v9282_v41 = vpack.c.bf16 %v14553_v24, %v14553_v24  ;;  %v14561_v24 = vld [vmem:[#allocation23_spill] sm:$0xff] }
 0xa12   :  { %4491 = vrot.lane.b32.xlu0 %v9269_v37, %s11002_s8  ;;  %v9277_v37 = vpack.c.bf16 %v14554_v13, %v14554_v13  ;;  %v14562_v13 = vld [vmem:[#allocation18_spill] sm:$0xff] }
 0xa15   :  { %4505 = vrot.lane.b32.xlu1 %v9276_v12, %s11002_s8  ;;  %v9284_v12 = vpack.c.bf16 %v14555_v48, %v14555_v48  ;;  %v14563_v48 = vld [vmem:[#allocation25_spill] sm:$0xff] }
 0xa16   :  { %4495 = vrot.lane.b32.xlu0 %v9271_v27, %s11002_s8  ;;  %v9279_v27 = vpack.c.bf16 %v14556_v44, %v14556_v44  ;;  %v14564_v44 = vld [vmem:[#allocation20_spill] sm:$0xff] }
 0xa19   :  { %4509 = vrot.lane.b32.xlu1 %v9278_v16, %s11002_s8  ;;  %v9286_v16 = vpack.c.bf16 %v14557_v40, %v14557_v40  ;;  %v14565_v40 = vld [vmem:[#allocation27_spill] sm:$0xff] }
 0xa1a   :  { %4499 = vrot.lane.b32.xlu0 %v9273_v25, %s11002_s8  ;;  %v9281_v25 = vpack.c.bf16 %v14558_v20, %v14558_v20  ;;  %v14566_v20 = vld [vmem:[#allocation22_spill] sm:$0xff] }
 0xa1d   :  { %4513 = vrot.lane.b32.xlu1 %v9280_v45, %s11002_s8  ;;  %v9288_v45 = vpack.c.bf16 %v14559_v62, %v14559_v62  ;;  %v14567_v62 = vld [vmem:[#allocation29_spill] sm:$0xff] }
 0xa1e   :  { %4503 = vrot.lane.b32.xlu0 %v9275_v31, %s11002_s8  ;;  %v9283_v31 = vpack.c.bf16 %v14560_v2, %v14560_v2  ;;  %v14568_v2 = vld [vmem:[#allocation24_spill] sm:$0xff] }
 0xa21   :  { %4517 = vrot.lane.b32.xlu1 %v9282_v41, %s11002_s8  ;;  %v9290_v41 = vpack.c.bf16 %v14561_v24, %v14561_v24  ;;  %v13775_v24 = vpop.permute.xlu1 %8576 }
 0xa22   :  { %4507 = vrot.lane.b32.xlu0 %v9277_v37, %s11002_s8  ;;  %v9285_v37 = vpack.c.bf16 %v14562_v13, %v14562_v13 }
 0xa25   :  { %4521 = vrot.lane.b32.xlu1 %v9284_v12, %s11002_s8  ;;  %v9292_v12 = vpack.c.bf16 %v14563_v48, %v14563_v48 }
 0xa26   :  { %4511 = vrot.lane.b32.xlu0 %v9279_v27, %s11002_s8  ;;  %v9287_v27 = vpack.c.bf16 %v14564_v44, %v14564_v44 }
 0xa29   :  { %4525 = vrot.lane.b32.xlu1 %v9286_v16, %s11002_s8  ;;  %v9294_v16 = vpack.c.bf16 %v14565_v40, %v14565_v40 }
 0xa2a   :  { %4515 = vrot.lane.b32.xlu0 %v9281_v25, %s11002_s8  ;;  %v9289_v25 = vpack.c.bf16 %v14566_v20, %v14566_v20 }
 0xa2d   :  { %4529 = vrot.lane.b32.xlu1 %v9288_v45, %s11002_s8  ;;  %v9296_v45 = vpack.c.bf16 %v14567_v62, %v14567_v62 }
 0xa2e   :  { %4519 = vrot.lane.b32.xlu0 %v9283_v31, %s11002_s8  ;;  %v9291_v31 = vpack.c.bf16 %v14568_v2, %v14568_v2  ;;  %v14573_v2 = vld [vmem:[#allocation30_spill] sm:$0xff] }
 0xa31   :  { %4533 = vrot.lane.b32.xlu1 %v9290_v41, %s11002_s8  ;;  %v14569_v41 = vld [vmem:[#allocation31_spill] sm:$0xff] }
 0xa32   :  { %4523 = vrot.lane.b32.xlu0 %v9285_v37, %s11002_s8  ;;  %v9298_v13 = vpack.c.bf16 %v14569_v41, %v14569_v41  ;;  %v14570_v37 = vld [vmem:[#allocation26_spill] sm:$0xff] }
 0xa33   :  { %v9293_v48 = vpack.c.bf16 %v14570_v37, %v14570_v37  ;;  %v9304_v37 = vpack.c.bf16 %v13325_v59, %v13325_v59 }
 0xa35   :  { %4537 = vrot.lane.b32.xlu1 %v9292_v12, %s11002_s8  ;;  %v13783_v12 = vpop.permute.xlu0 %8529 }
 0xa36   :  { %4527 = vrot.lane.b32.xlu0 %v9287_v27, %s11002_s8  ;;  %v14571_v27 = vld [vmem:[#allocation33_spill] sm:$0xff] }
 0xa37   :  { %v9300_v40 = vpack.c.bf16 %v14571_v27, %v14571_v27 }
 0xa39   :  { %4541 = vrot.lane.b32.xlu1 %v9294_v16, %s11002_s8  ;;  %v14572_v16 = vld [vmem:[#allocation28_spill] sm:$0xff] }
 0xa3a   :  { %4531 = vrot.lane.b32.xlu0 %v9289_v25, %s11002_s8  ;;  %v9295_v20 = vpack.c.bf16 %v14572_v16, %v14572_v16 }
 0xa3d   :  { %4545 = vrot.lane.b32.xlu1 %v9296_v45, %s11002_s8  ;;  %v9302_v45 = vpack.c.bf16 %v13321_v58, %v13321_v58 }
 0xa3e   :  { %4535 = vrot.lane.b32.xlu0 %v9291_v31, %s11002_s8  ;;  %v9297_v31 = vpack.c.bf16 %v14573_v2, %v14573_v2 }
 0xa40   :  { %v7791_v44 = vpop.xlane.xlu1 %7790 }
 0xa41   :  { %4549 = vrot.lane.b32.xlu1 %v9298_v13, %s11002_s8  ;;  %10925 = vrcp.f32 %v7791_v44 }
 0xa42   :  { %4539 = vrot.lane.b32.xlu0 %v9293_v48, %s11002_s8  ;;  %v14574_v48 = vld [vmem:[#allocation32_spill] sm:$0xff] }
 0xa43   :  { %v9299_v44 = vpack.c.bf16 %v14574_v48, %v14574_v48 }
 0xa44   :  { %v7794_v25 = vpop.xlane.xlu0 %7793 }
 0xa45   :  { %4553 = vrot.lane.b32.xlu1 %v9300_v40, %s11002_s8  ;;  %v7797_v62 = vpop.xlane.xlu1 %7796  ;;  %10927 = vrcp.f32 %v7794_v25  ;;  %v9306_v40 = vpack.c.bf16 %v13329_v61, %v13329_v61 }
 0xa46   :  { %4543 = vrot.lane.b32.xlu0 %v9295_v20, %s11002_s8  ;;  %10929 = vrcp.f32 %v7797_v62  ;;  %v9301_v20 = vpack.c.bf16 %v13319_v9, %v13319_v9 }
 0xa49   :  { %6654 = vrot.lane.b32.xlu1 %v9302_v45, %s11003_s9  ;;  %v7803_v41 = vpop.xlane.xlu1 %7802  ;;  %v7800_v13 = vpop.xlane.xlu0 %7799  ;;  %v9308_v45 = vpack.c.bf16 %v13333_v38, %v13333_v38  ;;  %v9310_v38 = vpack.c.bf16 %v13337_v28, %v13337_v28 }
 0xa4a   :  { %4547 = vrot.lane.b32.xlu0 %v9297_v31, %s11002_s8  ;;  %10931 = vrcp.f32 %v7800_v13  ;;  %v9303_v31 = vpack.c.bf16 %v13323_v35, %v13323_v35 }
 0xa4b   :  { %10933 = vrcp.f32 %v7803_v41 }
 0xa4d   :  { %6658 = vrot.lane.b32.xlu1 %v9304_v37, %s11003_s9  ;;  %v7809_v58 = vpop.xlane.xlu1 %7808  ;;  %v7806_v27 = vpop.xlane.xlu0 %7805 }
 0xa4e   :  { %4551 = vrot.lane.b32.xlu0 %v9299_v44, %s11002_s8  ;;  %10935 = vrcp.f32 %v7806_v27  ;;  %v10926_v16 = vpop.eup %10925 }
 0xa4f   :  { %10937 = vrcp.f32 %v7809_v58  ;;  %v7917_v2 = vmul.f32 %v10926_v16, %v13544_v30 }
 0xa51   :  { %6662 = vrot.lane.b32.xlu1 %v9306_v40, %s11003_s9  ;;  %v7815_v59 = vpop.xlane.xlu1 %7814  ;;  %v7812_v25 = vpop.xlane.xlu0 %7811 }
 0xa52   :  { %v10928_v62 = vpop.eup %10927  ;;  %6652 = vrot.lane.b32.xlu0 %v9301_v20, %s11003_s9  ;;  %10939 = vrcp.f32 %v7812_v25 }
 0xa53   :  { %v7918_v61 = vmul.f32 %v10928_v62, %v13550_v54  ;;  %10941 = vrcp.f32 %v7815_v59  ;;  %v10930_v37 = vpop.eup %10929  ;;  %v9305_v54 = vpack.c.bf16 %v13327_v57, %v13327_v57  ;;  %v9312_v57 = vpack.c.bf16 %v13341_v4, %v13341_v4 }
 0xa54   :  { %v7919_v35 = vmul.f32 %v10930_v37, %v13552_v47  ;;  %v9307_v47 = vpack.c.bf16 %v13331_v36, %v13331_v36  ;;  %v9314_v4 = vpack.c.bf16 %v13345_v34, %v13345_v34 }
 0xa55   :  { %6666 = vrot.lane.b32.xlu1 %v9308_v45, %s11003_s9  ;;  %v7821_v9 = vpop.xlane.xlu1 %7820  ;;  %v7818_v41 = vpop.xlane.xlu0 %7817  ;;  %v7949_v13 = vpack.c.bf16 %v7918_v61, %v7917_v2  ;;  %v14575_v2 = vld [vmem:[#allocation36_spill] sm:$0xff] }
 0xa56   :  { %6656 = vrot.lane.b32.xlu0 %v9303_v31, %s11003_s9  ;;  %10943 = vrcp.f32 %v7818_v41  ;;  %v9316_v61 = vpack.c.bf16 %v14575_v2, %v14575_v2 }
 0xa57   :  { %10350 = vmatmul.mubr.msk.bf16.vlgmr.msra.gmra.mxu0 %vm1177_vm3, %v7949_v13  ;;  %v10932_v30 = vpop.eup %10931  ;;  %10945 = vrcp.f32 %v7821_v9 }
 0xa58   :  { %10360 = vmatpush3.bf16.msra.mxu0 %v13515_v0  ;;  %10361 = vmatprep.mubr.msk.bf16.mxu0 %vm10990_vm1, %v14430_v18  ;;  %v7920_v48 = vmul.f32 %v10932_v30, %v13562_v11  ;;  %v10934_v58 = vpop.eup %10933  ;;  %v14578_v30 = vld [vmem:[#allocation38_spill] sm:$0xff] }
 0xa59   :  { %6670 = vrot.lane.b32.xlu1 %v9310_v38, %s11003_s9  ;;  %v7827_v28 = vpop.xlane.xlu1 %7826  ;;  %v7824_v44 = vpop.xlane.xlu0 %7823  ;;  %10371 = vmatprep.subr.bf16.mxu0 %v14430_v18  ;;  %v7921_v11 = vmul.f32 %v10934_v58, %v13560_v7  ;;  %v14577_v38 = vld [vmem:[#allocation55_spill] sm:$0xff] }
 0xa5a   :  { %6660 = vrot.lane.b32.xlu0 %v9305_v54, %s11003_s9  ;;  %10947 = vrcp.f32 %v7824_v44  ;;  %v7950_v0 = vpack.c.bf16 %v7920_v48, %v7919_v35  ;;  %v9318_v54 = vpack.c.bf16 %v14578_v30, %v14578_v30 }
 0xa5b   :  { %v10936_v27 = vpop.eup %10935  ;;  %10949 = vrcp.f32 %v7827_v28 }
 0xa5c   :  { %v7922_v40 = vmul.f32 %v10936_v27, %v13572_v43  ;;  %10356 = vmatmul.mubr.msk.bf16.vlgmr.msra.gmra.mxu1 %vm1177_vm3, %v7950_v0  ;;  %v10938_v59 = vpop.eup %10937  ;;  %v9309_v43 = vpack.c.bf16 %v13335_v46, %v13335_v46  ;;  %v14580_v27 = vld [vmem:[#allocation54_spill] sm:$0xff] }
 0xa5d   :  { %6674 = vrot.lane.b32.xlu1 %v9312_v57, %s11003_s9  ;;  %v7833_v16 = vpop.xlane.xlu1 %7832  ;;  %v7830_v20 = vpop.xlane.xlu0 %7829  ;;  %10366 = vmatpush3.bf16.msra.mxu1 %v13519_v56  ;;  %v7923_v25 = vmul.f32 %v10938_v59, %v13570_v29 }
 0xa5e   :  { %6664 = vrot.lane.b32.xlu0 %v9307_v47, %s11003_s9  ;;  %10951 = vrcp.f32 %v7830_v20  ;;  %v7951_v36 = vpack.c.bf16 %v7922_v40, %v7921_v11  ;;  %10367 = vmatprep.mubr.msk.bf16.mxu1 %vm10990_vm1, %v14430_v18  ;;  %v14581_v47 = vld [vmem:[#allocation40_spill] sm:$0xff] }
 0xa5f   :  { %10377 = vmatprep.subr.bf16.mxu1 %v14430_v18  ;;  %v10940_v7 = vpop.eup %10939  ;;  %10953 = vrcp.f32 %v7833_v16  ;;  %v9320_v11 = vpack.c.bf16 %v14581_v47, %v14581_v47  ;;  %v14592_v47 = vld [vmem:[#allocation58_spill] sm:$0xff] }
 0xa60   :  { %v7924_v56 = vmul.f32 %v10940_v7, %v13582_v8  ;;  %10362 = vmatmul.mubr.msk.bf16.vlgmr.msra.gmra.mxu0 %vm1177_vm3, %v7951_v36  ;;  %v10942_v45 = vpop.eup %10941  ;;  %v14576_v8 = vld [vmem:[#allocation35_spill] sm:$0xff] }
 0xa61   :  { %6678 = vrot.lane.b32.xlu1 %v9314_v4, %s11003_s9  ;;  %v7839_v34 = vpop.xlane.xlu1 %7838  ;;  %v7836_v62 = vpop.xlane.xlu0 %7835  ;;  %10372 = vmatpush3.bf16.msra.mxu0 %v13517_v3  ;;  %v9311_v31 = vpack.c.bf16 %v14576_v8, %v14576_v8  ;;  %v7925_v9 = vmul.f32 %v10942_v45, %v13580_v55  ;;  %v14586_v8 = vld [vmem:[#allocation56_spill] sm:$0xff] }
 0xa62   :  { %6668 = vrot.lane.b32.xlu0 %v9309_v43, %s11003_s9  ;;  %10955 = vrcp.f32 %v7836_v62  ;;  %v7952_v46 = vpack.c.bf16 %v7924_v56, %v7923_v25  ;;  %10373 = vmatprep.mubr.msk.bf16.mxu0 %vm10990_vm1, %v14430_v18  ;;  %v14583_v43 = vld [vmem:[#allocation57_spill] sm:$0xff]  ;;  %v14584_v25 = vld [vmem:[#allocation43_spill] sm:$0xff] }
 0xa63   :  { %10383 = vmatprep.subr.bf16.mxu0 %v14430_v18  ;;  %v10944_v29 = vpop.eup %10943  ;;  %10957 = vrcp.f32 %v7839_v34  ;;  %v9322_v56 = vpack.c.bf16 %v14584_v25, %v14584_v25 }
 0xa64   :  { %v7926_v3 = vmul.f32 %v10944_v29, %v13592_v22  ;;  %10368 = vmatmul.mubr.msk.bf16.vlgmr.msra.gmra.mxu1 %vm1177_vm3, %v7952_v46  ;;  %v10946_v37 = vpop.eup %10945  ;;  %v14579_v22 = vld [vmem:[#allocation34_spill] sm:$0xff] }
 0xa65   :  { %6682 = vrot.lane.b32.xlu1 %v9316_v61, %s11003_s9  ;;  %v7845_v41 = vpop.xlane.xlu1 %7844  ;;  %v7842_v13 = vpop.xlane.xlu0 %7841  ;;  %10378 = vmatpush3.bf16.msra.mxu1 %v14577_v38  ;;  %v9313_v48 = vpack.c.bf16 %v14579_v22, %v14579_v22  ;;  %v7927_v28 = vmul.f32 %v10946_v37, %v13590_v6 }
 0xa66   :  { %6672 = vrot.lane.b32.xlu0 %v9311_v31, %s11003_s9  ;;  %10959 = vrcp.f32 %v7842_v13  ;;  %v7953_v35 = vpack.c.bf16 %v7926_v3, %v7925_v9  ;;  %10379 = vmatprep.mubr.msk.bf16.mxu1 %vm10990_vm1, %v14430_v18  ;;  %v14587_v31 = vld [vmem:[#allocation45_spill] sm:$0xff] }
 0xa67   :  { %10389 = vmatprep.subr.bf16.mxu1 %v14430_v18  ;;  %v10948_v55 = vpop.eup %10947  ;;  %10961 = vrcp.f32 %v7845_v41  ;;  %v9324_v9 = vpack.c.bf16 %v14587_v31, %v14587_v31 }
 0xa68   :  { %v7928_v44 = vmul.f32 %v10948_v55, %v13602_v52  ;;  %10374 = vmatmul.mubr.msk.bf16.vlgmr.msra.gmra.mxu0 %vm1177_vm3, %v7953_v35  ;;  %v10950_v0 = vpop.eup %10949  ;;  %v14582_v52 = vld [vmem:[#allocation37_spill] sm:$0xff]  ;;  %v14589_v35 = vld [vmem:[#allocation59_spill] sm:$0xff] }
 0xa69   :  { %6686 = vrot.lane.b32.xlu1 %v9318_v54, %s11003_s9  ;;  %v7851_v58 = vpop.xlane.xlu1 %7850  ;;  %v7848_v57 = vpop.xlane.xlu0 %7847  ;;  %10384 = vmatpush3.bf16.msra.mxu0 %v14580_v27  ;;  %v9315_v16 = vpack.c.bf16 %v14582_v52, %v14582_v52  ;;  %v7929_v20 = vmul.f32 %v10950_v0, %v13600_v33  ;;  %v14590_v55 = vld [vmem:[#allocation47_spill] sm:$0xff] }
 0xa6a   :  { %6676 = vrot.lane.b32.xlu0 %v9313_v48, %s11003_s9  ;;  %10963 = vrcp.f32 %v7848_v57  ;;  %v7954_v40 = vpack.c.bf16 %v7928_v44, %v7927_v28  ;;  %10385 = vmatprep.mubr.msk.bf16.mxu0 %vm10990_vm1, %v14430_v18  ;;  %v9326_v22 = vpack.c.bf16 %v14590_v55, %v14590_v55 }
 0xa6b   :  { %10395 = vmatprep.subr.bf16.mxu0 %v14430_v18  ;;  %v10952_v6 = vpop.eup %10951  ;;  %10965 = vrcp.f32 %v7851_v58 }
 0xa6c   :  { %v7930_v59 = vmul.f32 %v10952_v6, %v13612_v19  ;;  %10380 = vmatmul.mubr.msk.bf16.vlgmr.msra.gmra.mxu1 %vm1177_vm3, %v7954_v40  ;;  %v10954_v7 = vpop.eup %10953  ;;  %v14585_v19 = vld [vmem:[#allocation39_spill] sm:$0xff] }
 0xa6d   :  { %6690 = vrot.lane.b32.xlu1 %v9320_v11, %s11003_s9  ;;  %v7857_v4 = vpop.xlane.xlu1 %7856  ;;  %v7854_v36 = vpop.xlane.xlu0 %7853  ;;  %10390 = vmatpush3.bf16.msra.mxu1 %v14583_v43  ;;  %v9317_v62 = vpack.c.bf16 %v14585_v19, %v14585_v19  ;;  %v7931_v45 = vmul.f32 %v10954_v7, %v13610_v53  ;;  %v14593_v11 = vld [vmem:[#allocation49_spill] sm:$0xff]  ;;  %v14595_v7 = vld [vmem:[#allocation60_spill] sm:$0xff]  ;;  %v14596_v43 = vld [vmem:[#allocation51_spill] sm:$0xff] }
 0xa6e   :  { %6680 = vrot.lane.b32.xlu0 %v9315_v16, %s11003_s9  ;;  %10967 = vrcp.f32 %v7854_v36  ;;  %v7955_v34 = vpack.c.bf16 %v7930_v59, %v7929_v20  ;;  %10391 = vmatprep.mubr.msk.bf16.mxu1 %vm10990_vm1, %v14430_v18  ;;  %v9328_v40 = vpack.c.bf16 %v14593_v11, %v14593_v11  ;;  %v9330_v25 = vpack.c.bf16 %v14596_v43, %v14596_v43 }
 0xa6f   :  { %10401 = vmatprep.subr.bf16.mxu1 %v14430_v18  ;;  %v10956_v33 = vpop.eup %10955  ;;  %10969 = vrcp.f32 %v7857_v4 }
 0xa70   :  { %v7932_v2 = vmul.f32 %v10956_v33, %v13622_v50  ;;  %10386 = vmatmul.mubr.msk.bf16.vlgmr.msra.gmra.mxu0 %vm1177_vm3, %v7955_v34  ;;  %v10958_v29 = vpop.eup %10957  ;;  %v14588_v50 = vld [vmem:[#allocation41_spill] sm:$0xff] }
 0xa71   :  { %6694 = vrot.lane.b32.xlu1 %v9322_v56, %s11003_s9  ;;  %v7863_v61 = vpop.xlane.xlu1 %7862  ;;  %v7860_v46 = vpop.xlane.xlu0 %7859  ;;  %10396 = vmatpush3.bf16.msra.mxu0 %v14586_v8  ;;  %v9319_v41 = vpack.c.bf16 %v14588_v50, %v14588_v50  ;;  %v7933_v13 = vmul.f32 %v10958_v29, %v13620_v32 }
 0xa72   :  { %6684 = vrot.lane.b32.xlu0 %v9317_v62, %s11003_s9  ;;  %10971 = vrcp.f32 %v7860_v46  ;;  %v7956_v3 = vpack.c.bf16 %v7932_v2, %v7931_v45  ;;  %10397 = vmatprep.mubr.msk.bf16.mxu0 %vm10990_vm1, %v14430_v18 }
 0xa73   :  { %10407 = vmatprep.subr.bf16.mxu0 %v14430_v18  ;;  %v10960_v53 = vpop.eup %10959  ;;  %10973 = vrcp.f32 %v7863_v61  ;;  %v14598_v61 = vld [vmem:[#allocation53_spill] sm:$0xff] }
 0xa74   :  { %v7934_v37 = vmul.f32 %v10960_v53, %v13632_v1  ;;  %10392 = vmatmul.mubr.msk.bf16.vlgmr.msra.gmra.mxu1 %vm1177_vm3, %v7956_v3  ;;  %v10962_v54 = vpop.eup %10961  ;;  %v14591_v1 = vld [vmem:[#allocation42_spill] sm:$0xff]  ;;  %v9332_v46 = vpack.c.bf16 %v14598_v61, %v14598_v61 }
 0xa75   :  { %6698 = vrot.lane.b32.xlu1 %v9324_v9, %s11003_s9  ;;  %v7869_v38 = vpop.xlane.xlu1 %7868  ;;  %v7866_v30 = vpop.xlane.xlu0 %7865  ;;  %10402 = vmatpush3.bf16.msra.mxu1 %v14589_v35  ;;  %v9321_v28 = vpack.c.bf16 %v14591_v1, %v14591_v1  ;;  %v7935_v44 = vmul.f32 %v10962_v54, %v13630_v14  ;;  %v14601_v54 = vld [vmem:[#allocation52_spill] sm:$0xff] }
 0xa76   :  { %6688 = vrot.lane.b32.xlu0 %v9319_v41, %s11003_s9  ;;  %10975 = vrcp.f32 %v7866_v30  ;;  %v7957_v48 = vpack.c.bf16 %v7934_v37, %v7933_v13  ;;  %10403 = vmatprep.mubr.msk.bf16.mxu1 %vm10990_vm1, %v14430_v18  ;;  %v9331_v35 = vpack.c.bf16 %v14601_v54, %v14601_v54 }
 0xa77   :  { %10413 = vmatprep.subr.bf16.mxu1 %v14430_v18  ;;  %v10964_v32 = vpop.eup %10963  ;;  %10977 = vrcp.f32 %v7869_v38 }
 0xa78   :  { %v7936_v58 = vmul.f32 %v10964_v32, %v13642_v51  ;;  %10398 = vmatmul.mubr.msk.bf16.vlgmr.msra.gmra.mxu0 %vm1177_vm3, %v7957_v48  ;;  %v10966_v27 = vpop.eup %10965  ;;  %v14594_v51 = vld [vmem:[#allocation44_spill] sm:$0xff] }
 0xa79   :  { %6702 = vrot.lane.b32.xlu1 %v9326_v22, %s11003_s9  ;;  %v7875_v57 = vpop.xlane.xlu1 %7874  ;;  %v7872_v0 = vpop.xlane.xlu0 %7871  ;;  %10408 = vmatpush3.bf16.msra.mxu0 %v14592_v47  ;;  %v9323_v52 = vpack.c.bf16 %v14594_v51, %v14594_v51  ;;  %v7937_v16 = vmul.f32 %v10966_v27, %v13640_v39 }
 0xa7a   :  { %6692 = vrot.lane.b32.xlu0 %v9321_v28, %s11003_s9  ;;  %10979 = vrcp.f32 %v7872_v0  ;;  %v7958_v6 = vpack.c.bf16 %v7936_v58, %v7935_v44  ;;  %10409 = vmatprep.mubr.msk.bf16.mxu0 %vm10990_vm1, %v14430_v18 }
 0xa7b   :  { %10419 = vmatprep.subr.bf16.mxu0 %v14430_v18  ;;  %v10968_v14 = vpop.eup %10967  ;;  %10981 = vrcp.f32 %v7875_v57 }
 0xa7c   :  { %v7938_v20 = vmul.f32 %v10968_v14, %v13652_v60  ;;  %10404 = vmatmul.mubr.msk.bf16.vlgmr.msra.gmra.mxu1 %vm1177_vm3, %v7958_v6  ;;  %v10970_v36 = vpop.eup %10969  ;;  %v14597_v60 = vld [vmem:[#allocation46_spill] sm:$0xff] }
 0xa7d   :  { %6706 = vrot.lane.b32.xlu1 %v9328_v40, %s11003_s9  ;;  %v7881_v59 = vpop.xlane.xlu1 %7880  ;;  %v7878_v4 = vpop.xlane.xlu0 %7877  ;;  %10414 = vmatpush3.bf16.msra.mxu1 %v14595_v7  ;;  %v9325_v34 = vpack.c.bf16 %v14597_v60, %v14597_v60  ;;  %v7939_v33 = vmul.f32 %v10970_v36, %v13650_v42 }
 0xa7e   :  { %6696 = vrot.lane.b32.xlu0 %v9323_v52, %s11003_s9  ;;  %10983 = vrcp.f32 %v7878_v4  ;;  %v7959_v56 = vpack.c.bf16 %v7938_v20, %v7937_v16  ;;  %10415 = vmatprep.mubr.msk.bf16.mxu1 %vm10990_vm1, %v14430_v18 }
 0xa7f   :  { %10425 = vmatprep.subr.bf16.mxu1 %v14430_v18  ;;  %v10972_v39 = vpop.eup %10971  ;;  %10985 = vrcp.f32 %v7881_v59 }
 0xa80   :  { %v7940_v19 = vmul.f32 %v10972_v39, %v13661_v26  ;;  %10410 = vmatmul.mubr.msk.bf16.vlgmr.msra.gmra.mxu0 %vm1177_vm3, %v7959_v56  ;;  %v10974_v2 = vpop.eup %10973  ;;  %v14599_v26 = vld [vmem:[#allocation48_spill] sm:$0xff] }
 0xa81   :  { %6710 = vrot.lane.b32.xlu1 %v9330_v25, %s11003_s9  ;;  %v8671_v62 = vpop.permute.xlu1 %8670  ;;  %v7884_v45 = vpop.xlane.xlu0 %7883  ;;  %10420 = vmatpush3.bf16.msra.mxu0 %v13783_v12  ;;  %v9327_v8 = vpack.c.bf16 %v14599_v26, %v14599_v26  ;;  %v7941_v31 = vmul.f32 %v10974_v2, %v13659_v63 }
 0xa82   :  { %10987 = vrcp.f32 %v7884_v45  ;;  %6700 = vrot.lane.b32.xlu0 %v9325_v34, %s11003_s9  ;;  %v7960_v29 = vpack.c.bf16 %v7940_v19, %v7939_v33  ;;  %10421 = vmatprep.mubr.msk.bf16.mxu0 %vm10990_vm1, %v14430_v18 }
 0xa83   :  { %10431 = vmatprep.subr.bf16.mxu0 %v14430_v18  ;;  %v10976_v42 = vpop.eup %10975 }
 0xa84   :  { %v7942_v12 = vmul.f32 %v10976_v42, %v13669_v49  ;;  %10416 = vmatmul.mubr.msk.bf16.vlgmr.msra.gmra.mxu1 %vm1177_vm3, %v7960_v29  ;;  %v10978_v53 = vpop.eup %10977  ;;  %v14600_v49 = vld [vmem:[#allocation50_spill] sm:$0xff] }
 0xa85   :  { %6714 = vrot.lane.b32.xlu1 %v9332_v46, %s11003_s9  ;;  %v4494_v9 = vpop.permute.xlu1 %4493  ;;  %v8624_v3 = vpop.permute.xlu0 %8623  ;;  %10426 = vmatpush3.bf16.msra.mxu1 %v13775_v24  ;;  %v9329_v41 = vpack.c.bf16 %v14600_v49, %v14600_v49  ;;  %v7943_v13 = vmul.f32 %v10978_v53, %v13667_v21 }
 0xa86   :  { %4589 = vst.msk [vmem:[%s14414_s3 + $0x4] sm:$0xf] %vm4587_vm5, %v4494_v9  ;;  %6704 = vrot.lane.b32.xlu0 %v9327_v8, %s11003_s9  ;;  %v7961_v50 = vpack.c.bf16 %v7942_v12, %v7941_v31  ;;  %10427 = vmatprep.mubr.msk.bf16.mxu1 %vm10990_vm1, %v14430_v18 }
 0xa87   :  { %10437 = vmatprep.subr.bf16.mxu1 %v14430_v18  ;;  %v10980_v63 = vpop.eup %10979 }
 0xa88   :  { %v7944_v24 = vmul.f32 %v10980_v63, %v13677_v23  ;;  %10422 = vmatmul.mubr.msk.bf16.vlgmr.msra.gmra.mxu0 %vm1177_vm3, %v7961_v50  ;;  %v10982_v30 = vpop.eup %10981 }
 0xa89   :  { %v4498_v37 = vpop.permute.xlu1 %4497  ;;  %v4492_v38 = vpop.permute.xlu0 %4491  ;;  %10432 = vmatpush3.bf16.msra.mxu0 %v8624_v3  ;;  %10433 = vmatprep.mubr.msk.bf16.mxu0 %vm10990_vm1, %v14430_v18  ;;  %v7945_v22 = vmul.f32 %v10982_v30, %v13675_v17 }
 0xa8a   :  { %4591 = vst.msk [vmem:[%s14414_s3 + $0xc] sm:$0xf] %vm4587_vm5, %v4498_v37  ;;  %4588 = vst.msk [vmem:[%s14414_s3] sm:$0xf] %vm4587_vm5, %v4492_v38  ;;  %6708 = vrot.lane.b32.xlu0 %v9329_v41, %s11003_s9  ;;  %v7962_v21 = vpack.c.bf16 %v7944_v24, %v7943_v13 }
 0xa8b   :  { %v10984_v23 = vpop.eup %10983 }
 0xa8c   :  { %v10986_v55 = vpop.eup %10985  ;;  %v7946_v48 = vmul.f32 %v10984_v23, %v13685_v15  ;;  %10428 = vmatmul.mubr.msk.bf16.vlgmr.msra.gmra.mxu1 %vm1177_vm3, %v7962_v21 }
 0xa8d   :  { %v4502_v32 = vpop.permute.xlu1 %4501  ;;  %v4496_v1 = vpop.permute.xlu0 %4495  ;;  %10438 = vmatpush3.bf16.msra.mxu1 %v8671_v62  ;;  %10439 = vmatprep.mubr.msk.bf16.mxu1 %vm10990_vm1, %v14430_v18  ;;  %v7947_v15 = vmul.f32 %v10986_v55, %v13683_v5 }
 0xa8e   :  { %4593 = vst.msk [vmem:[%s14414_s3 + $0x14] sm:$0xf] %vm4587_vm5, %v4502_v32  ;;  %4590 = vst.msk [vmem:[%s14414_s3 + $0x8] sm:$0xf] %vm4587_vm5, %v4496_v1  ;;  %6712 = vrot.lane.b32.xlu0 %v9331_v35, %s11003_s9  ;;  %v7963_v28 = vpack.c.bf16 %v7946_v48, %v7945_v22 }
 0xa8f   :  { %v10988_v17 = vpop.eup %10987 }
 0xa90   :  { %v7948_v44 = vmul.f32 %v10988_v17, %v13691_v10  ;;  %10434 = vmatmul.mubr.msk.bf16.vlgmr.msra.gmra.mxu0 %vm1177_vm3, %v7963_v28 }
 0xa91   :  { %v4506_v58 = vpop.permute.xlu1 %4505  ;;  %v4500_v57 = vpop.permute.xlu0 %4499 }
 0xa92   :  { %4595 = vst.msk [vmem:[%s14414_s3 + $0x1c] sm:$0xf] %vm4587_vm5, %v4506_v58  ;;  %4592 = vst.msk [vmem:[%s14414_s3 + $0x10] sm:$0xf] %vm4587_vm5, %v4500_v57  ;;  %v7964_v0 = vpack.c.bf16 %v7948_v44, %v7947_v15 }
 0xa94   :  { %10440 = vmatmul.mubr.msk.bf16.vlgmr.msra.gmra.mxu1 %vm1177_vm3, %v7964_v0 }
 0xa95   :  { %v4510_v18 = vpop.permute.xlu1 %4509  ;;  %v4504_v5 = vpop.permute.xlu0 %4503 }
 0xa96   :  { %4597 = vst.msk [vmem:[%s14414_s3 + $0x24] sm:$0xf] %vm4587_vm5, %v4510_v18  ;;  %4594 = vst.msk [vmem:[%s14414_s3 + $0x18] sm:$0xf] %vm4587_vm5, %v4504_v5 }
 0xa99   :  { %v4514_v10 = vpop.permute.xlu1 %4513  ;;  %v4508_v27 = vpop.permute.xlu0 %4507 }
 0xa9a   :  { %4599 = vst.msk [vmem:[%s14414_s3 + $0x2c] sm:$0xf] %vm4587_vm5, %v4514_v10  ;;  %4596 = vst.msk [vmem:[%s14414_s3 + $0x20] sm:$0xf] %vm4587_vm5, %v4508_v27 }
 0xa9d   :  { %v4518_v47 = vpop.permute.xlu1 %4517  ;;  %v4512_v11 = vpop.permute.xlu0 %4511 }
 0xa9e   :  { %4601 = vst.msk [vmem:[%s14414_s3 + $0x34] sm:$0xf] %vm4587_vm5, %v4518_v47  ;;  %4598 = vst.msk [vmem:[%s14414_s3 + $0x28] sm:$0xf] %vm4587_vm5, %v4512_v11 }
 0xaa1   :  { %v4522_v40 = vpop.permute.xlu1 %4521  ;;  %v4516_v6 = vpop.permute.xlu0 %4515 }
 0xaa2   :  { %4603 = vst.msk [vmem:[%s14414_s3 + $0x3c] sm:$0xf] %vm4587_vm5, %v4522_v40  ;;  %4600 = vst.msk [vmem:[%s14414_s3 + $0x30] sm:$0xf] %vm4587_vm5, %v4516_v6 }
 0xaa5   :  { %v4526_v14 = vpop.permute.xlu1 %4525  ;;  %v4520_v51 = vpop.permute.xlu0 %4519 }
 0xaa6   :  { %4605 = vst.msk [vmem:[%s14414_s3 + $0x44] sm:$0xf] %vm4587_vm5, %v4526_v14  ;;  %4602 = vst.msk [vmem:[%s14414_s3 + $0x38] sm:$0xf] %vm4587_vm5, %v4520_v51 }
 0xaa9   :  { %v4530_v52 = vpop.permute.xlu1 %4529  ;;  %v4524_v16 = vpop.permute.xlu0 %4523 }
 0xaaa   :  { %4607 = vst.msk [vmem:[%s14414_s3 + $0x4c] sm:$0xf] %vm4587_vm5, %v4530_v52  ;;  %4604 = vst.msk [vmem:[%s14414_s3 + $0x40] sm:$0xf] %vm4587_vm5, %v4524_v16 }
 0xaad   :  { %v4534_v20 = vpop.permute.xlu1 %4533  ;;  %v4528_v59 = vpop.permute.xlu0 %4527 }
 0xaae   :  { %4609 = vst.msk [vmem:[%s14414_s3 + $0x54] sm:$0xf] %vm4587_vm5, %v4534_v20  ;;  %4606 = vst.msk [vmem:[%s14414_s3 + $0x48] sm:$0xf] %vm4587_vm5, %v4528_v59 }
 0xab1   :  { %v4538_v4 = vpop.permute.xlu1 %4537  ;;  %v4532_v36 = vpop.permute.xlu0 %4531 }
 0xab2   :  { %4611 = vst.msk [vmem:[%s14414_s3 + $0x5c] sm:$0xf] %vm4587_vm5, %v4538_v4  ;;  %4608 = vst.msk [vmem:[%s14414_s3 + $0x50] sm:$0xf] %vm4587_vm5, %v4532_v36 }
 0xab5   :  { %v4542_v7 = vpop.permute.xlu1 %4541  ;;  %v4536_v43 = vpop.permute.xlu0 %4535 }
 0xab6   :  { %4613 = vst.msk [vmem:[%s14414_s3 + $0x64] sm:$0xf] %vm4587_vm5, %v4542_v7  ;;  %4610 = vst.msk [vmem:[%s14414_s3 + $0x58] sm:$0xf] %vm4587_vm5, %v4536_v43 }
 0xab9   :  { %v4546_v25 = vpop.permute.xlu1 %4545  ;;  %v4540_v56 = vpop.permute.xlu0 %4539 }
 0xaba   :  { %4615 = vst.msk [vmem:[%s14414_s3 + $0x6c] sm:$0xf] %vm4587_vm5, %v4546_v25  ;;  %4612 = vst.msk [vmem:[%s14414_s3 + $0x60] sm:$0xf] %vm4587_vm5, %v4540_v56 }
 0xabd   :  { %v4550_v39 = vpop.permute.xlu1 %4549  ;;  %v4544_v60 = vpop.permute.xlu0 %4543 }
 0xabe   :  { %4617 = vst.msk [vmem:[%s14414_s3 + $0x74] sm:$0xf] %vm4587_vm5, %v4550_v39  ;;  %4614 = vst.msk [vmem:[%s14414_s3 + $0x68] sm:$0xf] %vm4587_vm5, %v4544_v60 }
 0xac1   :  { %v4554_v34 = vpop.permute.xlu1 %4553  ;;  %v4548_v33 = vpop.permute.xlu0 %4547 }
 0xac2   :  { %4619 = vst.msk [vmem:[%s14414_s3 + $0x7c] sm:$0xf] %vm4587_vm5, %v4554_v34  ;;  %4616 = vst.msk [vmem:[%s14414_s3 + $0x70] sm:$0xf] %vm4587_vm5, %v4548_v33 }
 0xac5   :  { %v6655_v19 = vpop.permute.xlu1 %6654  ;;  %v4552_v62 = vpop.permute.xlu0 %4551 }
 0xac6   :  { %6750 = vst.msk [vmem:[%s14414_s3 + $0x4] sm:$0xf] %vm6748_vm6, %v6655_v19 }
 0xac7   :  { %4618 = vst.msk [vmem:[%s14414_s3 + $0x78] sm:$0xf] %vm4587_vm5, %v4552_v62 }
 0xac9   :  { %v6659_v45 = vpop.permute.xlu1 %6658  ;;  %v6653_v2 = vpop.permute.xlu0 %6652 }
 0xaca   :  { %6752 = vst.msk [vmem:[%s14414_s3 + $0xc] sm:$0xf] %vm6748_vm6, %v6659_v45  ;;  %6749 = vst.msk [vmem:[%s14414_s3] sm:$0xf] %vm6748_vm6, %v6653_v2 }
 0xacd   :  { %v6663_v61 = vpop.permute.xlu1 %6662  ;;  %v6657_v46 = vpop.permute.xlu0 %6656 }
 0xace   :  { %6754 = vst.msk [vmem:[%s14414_s3 + $0x14] sm:$0xf] %vm6748_vm6, %v6663_v61  ;;  %6751 = vst.msk [vmem:[%s14414_s3 + $0x8] sm:$0xf] %vm6748_vm6, %v6657_v46 }
 0xad1   :  { %v6667_v29 = vpop.permute.xlu1 %6666  ;;  %v6661_v42 = vpop.permute.xlu0 %6660 }
 0xad2   :  { %6756 = vst.msk [vmem:[%s14414_s3 + $0x1c] sm:$0xf] %vm6748_vm6, %v6667_v29  ;;  %6753 = vst.msk [vmem:[%s14414_s3 + $0x10] sm:$0xf] %vm6748_vm6, %v6661_v42 }
 0xad5   :  { %v6671_v26 = vpop.permute.xlu1 %6670  ;;  %v6665_v8 = vpop.permute.xlu0 %6664 }
 0xad6   :  { %6758 = vst.msk [vmem:[%s14414_s3 + $0x24] sm:$0xf] %vm6748_vm6, %v6671_v26  ;;  %6755 = vst.msk [vmem:[%s14414_s3 + $0x18] sm:$0xf] %vm6748_vm6, %v6665_v8 }
 0xad9   :  { %v6675_v31 = vpop.permute.xlu1 %6674  ;;  %v6669_v12 = vpop.permute.xlu0 %6668 }
 0xada   :  { %6760 = vst.msk [vmem:[%s14414_s3 + $0x2c] sm:$0xf] %vm6748_vm6, %v6675_v31  ;;  %6757 = vst.msk [vmem:[%s14414_s3 + $0x20] sm:$0xf] %vm6748_vm6, %v6669_v12 }
 0xadd   :  { %v6679_v9 = vpop.permute.xlu1 %6678  ;;  %v6673_v3 = vpop.permute.xlu0 %6672 }
 0xade   :  { %6762 = vst.msk [vmem:[%s14414_s3 + $0x34] sm:$0xf] %vm6748_vm6, %v6679_v9  ;;  %6759 = vst.msk [vmem:[%s14414_s3 + $0x28] sm:$0xf] %vm6748_vm6, %v6673_v3 }
 0xae1   :  { %v6683_v53 = vpop.permute.xlu1 %6682  ;;  %v6677_v50 = vpop.permute.xlu0 %6676 }
 0xae2   :  { %6764 = vst.msk [vmem:[%s14414_s3 + $0x3c] sm:$0xf] %vm6748_vm6, %v6683_v53  ;;  %6761 = vst.msk [vmem:[%s14414_s3 + $0x30] sm:$0xf] %vm6748_vm6, %v6677_v50 }
 0xae5   :  { %v6687_v63 = vpop.permute.xlu1 %6686  ;;  %v6681_v49 = vpop.permute.xlu0 %6680 }
 0xae6   :  { %6766 = vst.msk [vmem:[%s14414_s3 + $0x44] sm:$0xf] %vm6748_vm6, %v6687_v63  ;;  %6763 = vst.msk [vmem:[%s14414_s3 + $0x38] sm:$0xf] %vm6748_vm6, %v6681_v49 }
 0xae9   :  { %v6691_v41 = vpop.permute.xlu1 %6690  ;;  %v6685_v13 = vpop.permute.xlu0 %6684 }
 0xaea   :  { %6768 = vst.msk [vmem:[%s14414_s3 + $0x4c] sm:$0xf] %vm6748_vm6, %v6691_v41  ;;  %6765 = vst.msk [vmem:[%s14414_s3 + $0x40] sm:$0xf] %vm6748_vm6, %v6685_v13 }
 0xaed   :  { %v6695_v24 = vpop.permute.xlu1 %6694  ;;  %v6689_v37 = vpop.permute.xlu0 %6688 }
 0xaee   :  { %6770 = vst.msk [vmem:[%s14414_s3 + $0x54] sm:$0xf] %vm6748_vm6, %v6695_v24  ;;  %6767 = vst.msk [vmem:[%s14414_s3 + $0x48] sm:$0xf] %vm6748_vm6, %v6689_v37 }
 0xaf1   :  { %v6699_v38 = vpop.permute.xlu1 %6698  ;;  %v6693_v30 = vpop.permute.xlu0 %6692 }
 0xaf2   :  { %6772 = vst.msk [vmem:[%s14414_s3 + $0x5c] sm:$0xf] %vm6748_vm6, %v6699_v38  ;;  %6769 = vst.msk [vmem:[%s14414_s3 + $0x50] sm:$0xf] %vm6748_vm6, %v6693_v30 }
 0xaf5   :  { %v6703_v21 = vpop.permute.xlu1 %6702  ;;  %v6697_v23 = vpop.permute.xlu0 %6696 }
 0xaf6   :  { %6774 = vst.msk [vmem:[%s14414_s3 + $0x64] sm:$0xf] %vm6748_vm6, %v6703_v21  ;;  %6771 = vst.msk [vmem:[%s14414_s3 + $0x58] sm:$0xf] %vm6748_vm6, %v6697_v23 }
 0xaf9   :  { %v6707_v54 = vpop.permute.xlu1 %6706  ;;  %v6701_v35 = vpop.permute.xlu0 %6700 }
 0xafa   :  { %6776 = vst.msk [vmem:[%s14414_s3 + $0x6c] sm:$0xf] %vm6748_vm6, %v6707_v54  ;;  %6773 = vst.msk [vmem:[%s14414_s3 + $0x60] sm:$0xf] %vm6748_vm6, %v6701_v35 }
 0xafd   :  { %v6711_v55 = vpop.permute.xlu1 %6710  ;;  %v6705_v22 = vpop.permute.xlu0 %6704 }
 0xafe   :  { %6778 = vst.msk [vmem:[%s14414_s3 + $0x74] sm:$0xf] %vm6748_vm6, %v6711_v55  ;;  %6775 = vst.msk [vmem:[%s14414_s3 + $0x68] sm:$0xf] %vm6748_vm6, %v6705_v22 }
 0xb01   :  { %v6715_v48 = vpop.permute.xlu1 %6714  ;;  %v6709_v32 = vpop.permute.xlu0 %6708 }
 0xb02   :  { %6780 = vst.msk [vmem:[%s14414_s3 + $0x7c] sm:$0xf] %vm6748_vm6, %v6715_v48  ;;  %6777 = vst.msk [vmem:[%s14414_s3 + $0x70] sm:$0xf] %vm6748_vm6, %v6709_v32 }
 0xb05   :  { %v6713_v1 = vpop.permute.xlu0 %6712 }
 0xb06   :  { %6779 = vst.msk [vmem:[%s14414_s3 + $0x78] sm:$0xf] %vm6748_vm6, %v6713_v1 }
 0xb17   :  { %v8005_v17 = vpop.f32.mrf.mxu0 }
 0xb18   :  { %v9333_v28 = vpack.c.bf16 %v8005_v17, %v8005_v17 }
 0xb19   :  { %v10351_v15 = vpop.f32.mrf.mxu0 }
 0xb1a   :  { %8813 = vrot.lane.b32.xlu0 %v9333_v28, %s11004_s18 }
 0xb1b   :  { %v8008_v44 = vpop.f32.mrf.mxu0 }
 0xb1c   :  { %v9334_v58 = vpack.c.bf16 %v8008_v44, %v8008_v44  ;;  %v8052_v57 = vpop.f32.mrf.mxu1 }
 0xb1d   :  { %v10352_v0 = vpop.f32.mrf.mxu0  ;;  %v9335_v18 = vpack.c.bf16 %v8052_v57, %v8052_v57 }
 0xb1e   :  { %8815 = vrot.lane.b32.xlu1 %v9334_v58, %s11004_s18  ;;  %v10357_v5 = vpop.f32.mrf.mxu1 }
 0xb1f   :  { %8817 = vrot.lane.b32.xlu0 %v9335_v18, %s11004_s18 }
 0xb20   :  { %v8055_v10 = vpop.f32.mrf.mxu1  ;;  %v8099_v27 = vpop.f32.mrf.mxu0 }
 0xb21   :  { %v9336_v47 = vpack.c.bf16 %v8055_v10, %v8055_v10  ;;  %v9337_v11 = vpack.c.bf16 %v8099_v27, %v8099_v27 }
 0xb22   :  { %v10358_v40 = vpop.f32.mrf.mxu1  ;;  %v10363_v6 = vpop.f32.mrf.mxu0 }
 0xb23   :  { %8819 = vrot.lane.b32.xlu1 %v9336_v47, %s11004_s18  ;;  %8821 = vrot.lane.b32.xlu0 %v9337_v11, %s11004_s18 }
 0xb24   :  { %v8102_v14 = vpop.f32.mrf.mxu0  ;;  %v8146_v51 = vpop.f32.mrf.mxu1 }
 0xb25   :  { %v9338_v52 = vpack.c.bf16 %v8102_v14, %v8102_v14  ;;  %v9339_v16 = vpack.c.bf16 %v8146_v51, %v8146_v51 }
 0xb26   :  { %v10364_v20 = vpop.f32.mrf.mxu0  ;;  %v10369_v59 = vpop.f32.mrf.mxu1 }
 0xb27   :  { %8823 = vrot.lane.b32.xlu1 %v9338_v52, %s11004_s18  ;;  %8825 = vrot.lane.b32.xlu0 %v9339_v16, %s11004_s18 }
 0xb28   :  { %v8149_v4 = vpop.f32.mrf.mxu1  ;;  %v8193_v36 = vpop.f32.mrf.mxu0 }
 0xb29   :  { %v9340_v7 = vpack.c.bf16 %v8149_v4, %v8149_v4  ;;  %v9341_v43 = vpack.c.bf16 %v8193_v36, %v8193_v36 }
 0xb2a   :  { %v10370_v25 = vpop.f32.mrf.mxu1  ;;  %v10375_v56 = vpop.f32.mrf.mxu0 }
 0xb2b   :  { %8827 = vrot.lane.b32.xlu1 %v9340_v7, %s11004_s18  ;;  %8829 = vrot.lane.b32.xlu0 %v9341_v43, %s11004_s18 }
 0xb2c   :  { %v8196_v39 = vpop.f32.mrf.mxu0  ;;  %v8240_v60 = vpop.f32.mrf.mxu1 }
 0xb2d   :  { %v9342_v34 = vpack.c.bf16 %v8196_v39, %v8196_v39  ;;  %v9343_v33 = vpack.c.bf16 %v8240_v60, %v8240_v60 }
 0xb2e   :  { %v10376_v19 = vpop.f32.mrf.mxu0  ;;  %v10381_v62 = vpop.f32.mrf.mxu1 }
 0xb2f   :  { %8831 = vrot.lane.b32.xlu1 %v9342_v34, %s11004_s18  ;;  %8833 = vrot.lane.b32.xlu0 %v9343_v33, %s11004_s18 }
 0xb30   :  { %v8243_v45 = vpop.f32.mrf.mxu1  ;;  %v8287_v2 = vpop.f32.mrf.mxu0 }
 0xb31   :  { %v9344_v61 = vpack.c.bf16 %v8243_v45, %v8243_v45  ;;  %v9345_v46 = vpack.c.bf16 %v8287_v2, %v8287_v2 }
 0xb32   :  { %v10382_v29 = vpop.f32.mrf.mxu1  ;;  %v10387_v42 = vpop.f32.mrf.mxu0 }
 0xb33   :  { %8835 = vrot.lane.b32.xlu1 %v9344_v61, %s11004_s18  ;;  %8837 = vrot.lane.b32.xlu0 %v9345_v46, %s11004_s18 }
 0xb34   :  { %v8290_v26 = vpop.f32.mrf.mxu0  ;;  %v8334_v8 = vpop.f32.mrf.mxu1 }
 0xb35   :  { %v9346_v31 = vpack.c.bf16 %v8290_v26, %v8290_v26  ;;  %v9347_v12 = vpack.c.bf16 %v8334_v8, %v8334_v8 }
 0xb36   :  { %v10388_v9 = vpop.f32.mrf.mxu0  ;;  %v10393_v3 = vpop.f32.mrf.mxu1 }
 0xb37   :  { %8839 = vrot.lane.b32.xlu1 %v9346_v31, %s11004_s18  ;;  %8841 = vrot.lane.b32.xlu0 %v9347_v12, %s11004_s18 }
 0xb38   :  { %v8337_v53 = vpop.f32.mrf.mxu1  ;;  %v8381_v50 = vpop.f32.mrf.mxu0 }
 0xb39   :  { %v9348_v63 = vpack.c.bf16 %v8337_v53, %v8337_v53  ;;  %v9349_v49 = vpack.c.bf16 %v8381_v50, %v8381_v50 }
 0xb3a   :  { %v10394_v41 = vpop.f32.mrf.mxu1  ;;  %v10399_v13 = vpop.f32.mrf.mxu0 }
 0xb3b   :  { %8843 = vrot.lane.b32.xlu1 %v9348_v63, %s11004_s18  ;;  %8845 = vrot.lane.b32.xlu0 %v9349_v49, %s11004_s18 }
 0xb3c   :  { %v8384_v24 = vpop.f32.mrf.mxu0  ;;  %v8428_v37 = vpop.f32.mrf.mxu1 }
 0xb3d   :  { %v9350_v38 = vpack.c.bf16 %v8384_v24, %v8384_v24  ;;  %v9351_v30 = vpack.c.bf16 %v8428_v37, %v8428_v37 }
 0xb3e   :  { %v10400_v21 = vpop.f32.mrf.mxu0  ;;  %v10405_v23 = vpop.f32.mrf.mxu1 }
 0xb3f   :  { %8847 = vrot.lane.b32.xlu1 %v9350_v38, %s11004_s18  ;;  %8849 = vrot.lane.b32.xlu0 %v9351_v30, %s11004_s18 }
 0xb40   :  { %v8431_v54 = vpop.f32.mrf.mxu1  ;;  %v8475_v35 = vpop.f32.mrf.mxu0 }
 0xb41   :  { %v9352_v55 = vpack.c.bf16 %v8431_v54, %v8431_v54  ;;  %v9353_v22 = vpack.c.bf16 %v8475_v35, %v8475_v35 }
 0xb42   :  { %v10406_v48 = vpop.f32.mrf.mxu1  ;;  %v10411_v32 = vpop.f32.mrf.mxu0 }
 0xb43   :  { %8851 = vrot.lane.b32.xlu1 %v9352_v55, %s11004_s18  ;;  %8853 = vrot.lane.b32.xlu0 %v9353_v22, %s11004_s18 }
 0xb44   :  { %v8478_v1 = vpop.f32.mrf.mxu0  ;;  %v8522_v17 = vpop.f32.mrf.mxu1 }
 0xb45   :  { %v9354_v28 = vpack.c.bf16 %v8478_v1, %v8478_v1  ;;  %v9355_v15 = vpack.c.bf16 %v8522_v17, %v8522_v17 }
 0xb46   :  { %v10412_v44 = vpop.f32.mrf.mxu0  ;;  %v10417_v58 = vpop.f32.mrf.mxu1 }
 0xb47   :  { %8855 = vrot.lane.b32.xlu1 %v9354_v28, %s11004_s18  ;;  %8857 = vrot.lane.b32.xlu0 %v9355_v15, %s11004_s18 }
 0xb48   :  { %v8525_v57 = vpop.f32.mrf.mxu1  ;;  %v8569_v0 = vpop.f32.mrf.mxu0 }
 0xb49   :  { %v9356_v18 = vpack.c.bf16 %v8525_v57, %v8525_v57  ;;  %v9357_v5 = vpack.c.bf16 %v8569_v0, %v8569_v0 }
 0xb4a   :  { %v10418_v10 = vpop.f32.mrf.mxu1  ;;  %v10423_v27 = vpop.f32.mrf.mxu0 }
 0xb4b   :  { %8859 = vrot.lane.b32.xlu1 %v9356_v18, %s11004_s18  ;;  %8861 = vrot.lane.b32.xlu0 %v9357_v5, %s11004_s18 }
 0xb4c   :  { %v8572_v47 = vpop.f32.mrf.mxu0  ;;  %v8616_v11 = vpop.f32.mrf.mxu1 }
 0xb4d   :  { %v9358_v40 = vpack.c.bf16 %v8572_v47, %v8572_v47  ;;  %v9359_v6 = vpack.c.bf16 %v8616_v11, %v8616_v11 }
 0xb4e   :  { %v10424_v14 = vpop.f32.mrf.mxu0  ;;  %v10429_v51 = vpop.f32.mrf.mxu1 }
 0xb4f   :  { %8863 = vrot.lane.b32.xlu1 %v9358_v40, %s11004_s18  ;;  %8865 = vrot.lane.b32.xlu0 %v9359_v6, %s11004_s18 }
 0xb50   :  { %v8619_v52 = vpop.f32.mrf.mxu1  ;;  %v8663_v16 = vpop.f32.mrf.mxu0 }
 0xb51   :  { %v9360_v20 = vpack.c.bf16 %v8619_v52, %v8619_v52  ;;  %v9361_v59 = vpack.c.bf16 %v8663_v16, %v8663_v16 }
 0xb52   :  { %v10430_v4 = vpop.f32.mrf.mxu1  ;;  %v10435_v36 = vpop.f32.mrf.mxu0 }
 0xb53   :  { %8867 = vrot.lane.b32.xlu1 %v9360_v20, %s11004_s18  ;;  %8869 = vrot.lane.b32.xlu0 %v9361_v59, %s11004_s18 }
 0xb54   :  { %v8666_v7 = vpop.f32.mrf.mxu0  ;;  %v8710_v43 = vpop.f32.mrf.mxu1 }
 0xb55   :  { %v9362_v25 = vpack.c.bf16 %v8666_v7, %v8666_v7  ;;  %v9363_v56 = vpack.c.bf16 %v8710_v43, %v8710_v43 }
 0xb56   :  { %v10436_v39 = vpop.f32.mrf.mxu0  ;;  %v10441_v60 = vpop.f32.mrf.mxu1 }
 0xb57   :  { %8873 = vrot.lane.b32.xlu0 %v9363_v56, %s11004_s18  ;;  %8871 = vrot.lane.b32.xlu1 %v9362_v25, %s11004_s18 }
 0xb58   :  { %v8713_v34 = vpop.f32.mrf.mxu1 }
 0xb59   :  { %v9364_v33 = vpack.c.bf16 %v8713_v34, %v8713_v34 }
 0xb5a   :  { %v10442_v19 = vpop.f32.mrf.mxu1 }
 0xb5b   :  { %8875 = vrot.lane.b32.xlu1 %v9364_v33, %s11004_s18 }
 0xb8c   :  { %v8814_v62 = vpop.permute.xlu0 %8813 }
 0xb8d   :  { %8910 = vst.msk [vmem:[%s14414_s3] sm:$0xf] %vm8909_vm7, %v8814_v62 }
 0xb90   :  { %v8816_v45 = vpop.permute.xlu1 %8815 }
 0xb91   :  { %8911 = vst.msk [vmem:[%s14414_s3 + $0x4] sm:$0xf] %vm8909_vm7, %v8816_v45  ;;  %v8818_v2 = vpop.permute.xlu0 %8817 }
 0xb92   :  { %8912 = vst.msk [vmem:[%s14414_s3 + $0x8] sm:$0xf] %vm8909_vm7, %v8818_v2 }
 0xb95   :  { %v8820_v61 = vpop.permute.xlu1 %8819  ;;  %v8822_v46 = vpop.permute.xlu0 %8821 }
 0xb96   :  { %8913 = vst.msk [vmem:[%s14414_s3 + $0xc] sm:$0xf] %vm8909_vm7, %v8820_v61  ;;  %8914 = vst.msk [vmem:[%s14414_s3 + $0x10] sm:$0xf] %vm8909_vm7, %v8822_v46 }
 0xb99   :  { %v8824_v29 = vpop.permute.xlu1 %8823  ;;  %v8826_v42 = vpop.permute.xlu0 %8825 }
 0xb9a   :  { %8915 = vst.msk [vmem:[%s14414_s3 + $0x14] sm:$0xf] %vm8909_vm7, %v8824_v29  ;;  %8916 = vst.msk [vmem:[%s14414_s3 + $0x18] sm:$0xf] %vm8909_vm7, %v8826_v42 }
 0xb9d   :  { %v8828_v26 = vpop.permute.xlu1 %8827  ;;  %v8830_v8 = vpop.permute.xlu0 %8829 }
 0xb9e   :  { %8917 = vst.msk [vmem:[%s14414_s3 + $0x1c] sm:$0xf] %vm8909_vm7, %v8828_v26  ;;  %8918 = vst.msk [vmem:[%s14414_s3 + $0x20] sm:$0xf] %vm8909_vm7, %v8830_v8 }
 0xba1   :  { %v8832_v31 = vpop.permute.xlu1 %8831  ;;  %v8834_v12 = vpop.permute.xlu0 %8833 }
 0xba2   :  { %8919 = vst.msk [vmem:[%s14414_s3 + $0x24] sm:$0xf] %vm8909_vm7, %v8832_v31  ;;  %8920 = vst.msk [vmem:[%s14414_s3 + $0x28] sm:$0xf] %vm8909_vm7, %v8834_v12 }
 0xba5   :  { %v8836_v9 = vpop.permute.xlu1 %8835  ;;  %v8838_v3 = vpop.permute.xlu0 %8837 }
 0xba6   :  { %8921 = vst.msk [vmem:[%s14414_s3 + $0x2c] sm:$0xf] %vm8909_vm7, %v8836_v9  ;;  %8922 = vst.msk [vmem:[%s14414_s3 + $0x30] sm:$0xf] %vm8909_vm7, %v8838_v3 }
 0xba9   :  { %v8840_v53 = vpop.permute.xlu1 %8839  ;;  %v8842_v50 = vpop.permute.xlu0 %8841 }
 0xbaa   :  { %8923 = vst.msk [vmem:[%s14414_s3 + $0x34] sm:$0xf] %vm8909_vm7, %v8840_v53  ;;  %8924 = vst.msk [vmem:[%s14414_s3 + $0x38] sm:$0xf] %vm8909_vm7, %v8842_v50 }
 0xbad   :  { %v8844_v63 = vpop.permute.xlu1 %8843  ;;  %v8846_v49 = vpop.permute.xlu0 %8845 }
 0xbae   :  { %8925 = vst.msk [vmem:[%s14414_s3 + $0x3c] sm:$0xf] %vm8909_vm7, %v8844_v63  ;;  %8926 = vst.msk [vmem:[%s14414_s3 + $0x40] sm:$0xf] %vm8909_vm7, %v8846_v49 }
 0xbb1   :  { %v8848_v41 = vpop.permute.xlu1 %8847  ;;  %v8850_v13 = vpop.permute.xlu0 %8849 }
 0xbb2   :  { %8927 = vst.msk [vmem:[%s14414_s3 + $0x44] sm:$0xf] %vm8909_vm7, %v8848_v41  ;;  %8928 = vst.msk [vmem:[%s14414_s3 + $0x48] sm:$0xf] %vm8909_vm7, %v8850_v13 }
 0xbb5   :  { %v8852_v24 = vpop.permute.xlu1 %8851  ;;  %v8854_v37 = vpop.permute.xlu0 %8853 }
 0xbb6   :  { %8929 = vst.msk [vmem:[%s14414_s3 + $0x4c] sm:$0xf] %vm8909_vm7, %v8852_v24  ;;  %8930 = vst.msk [vmem:[%s14414_s3 + $0x50] sm:$0xf] %vm8909_vm7, %v8854_v37 }
 0xbb9   :  { %v8856_v38 = vpop.permute.xlu1 %8855  ;;  %v8858_v30 = vpop.permute.xlu0 %8857 }
 0xbba   :  { %8931 = vst.msk [vmem:[%s14414_s3 + $0x54] sm:$0xf] %vm8909_vm7, %v8856_v38  ;;  %8932 = vst.msk [vmem:[%s14414_s3 + $0x58] sm:$0xf] %vm8909_vm7, %v8858_v30 }
 0xbbd   :  { %v8860_v21 = vpop.permute.xlu1 %8859  ;;  %v8862_v23 = vpop.permute.xlu0 %8861 }
 0xbbe   :  { %8933 = vst.msk [vmem:[%s14414_s3 + $0x5c] sm:$0xf] %vm8909_vm7, %v8860_v21  ;;  %8934 = vst.msk [vmem:[%s14414_s3 + $0x60] sm:$0xf] %vm8909_vm7, %v8862_v23 }
 0xbc1   :  { %v8864_v54 = vpop.permute.xlu1 %8863  ;;  %v8866_v35 = vpop.permute.xlu0 %8865 }
 0xbc2   :  { %8935 = vst.msk [vmem:[%s14414_s3 + $0x64] sm:$0xf] %vm8909_vm7, %v8864_v54  ;;  %8936 = vst.msk [vmem:[%s14414_s3 + $0x68] sm:$0xf] %vm8909_vm7, %v8866_v35 }
 0xbc5   :  { %v8868_v55 = vpop.permute.xlu1 %8867  ;;  %v8870_v22 = vpop.permute.xlu0 %8869 }
 0xbc6   :  { %8937 = vst.msk [vmem:[%s14414_s3 + $0x6c] sm:$0xf] %vm8909_vm7, %v8868_v55  ;;  %8938 = vst.msk [vmem:[%s14414_s3 + $0x70] sm:$0xf] %vm8909_vm7, %v8870_v22 }
 0xbc9   :  { %v8872_v48 = vpop.permute.xlu1 %8871  ;;  %v8874_v32 = vpop.permute.xlu0 %8873 }
 0xbca   :  { %8939 = vst.msk [vmem:[%s14414_s3 + $0x74] sm:$0xf] %vm8909_vm7, %v8872_v48  ;;  %8940 = vst.msk [vmem:[%s14414_s3 + $0x78] sm:$0xf] %vm8909_vm7, %v8874_v32 }
 0xbcd   :  { %v8876_v1 = vpop.permute.xlu1 %8875 }
 0xbce   :  { %8941 = vst.msk [vmem:[%s14414_s3 + $0x7c] sm:$0xf] %vm8909_vm7, %v8876_v1 }

</bundles_post_ra>
